<compile_context>
chip_gen: v6e
topology: v6e:2x2x1
jax: 0.10.0
libtpu: 0.0.40
codegen_flags: <defaults>
</compile_context>

<pallas_src>
import functools

import jax
import jax.numpy as jnp
from jax import lax
from jax.experimental import pallas as pl
from jax.experimental.pallas import tpu as pltpu

_VMEM_LIMIT = 48 * 1024 * 1024  # explicit scoped-VMEM budget (< v7x's 64 MiB)


# ---------------------------------------------------------------------------
# Fused BasicBlock kernel (one image per grid step)
# ---------------------------------------------------------------------------
def _make_block_kernel(*, nine_slabs, Wo, Wp2, Ls, proj):
    """conv1+bn1+relu+conv2+bn2+shortcut+relu, all in VMEM.

    Layout: the zero-padded image is kept flattened as (rows*width, channels).
    A 3x3/stride-1 conv then becomes 9 accumulated matmuls on *contiguous*
    row slabs of that flat matrix ("wide" outputs whose 2 wrap-around columns
    land on pad positions and are masked / sliced off).
    """

    def kernel(*refs):
        if proj:
            (x_ref, m_ref, w1_ref, b1_ref, w2_ref, b2_ref,
             wsc_ref, o_ref, y1_ref) = refs
        else:
            (x_ref, m_ref, w1_ref, b1_ref, w2_ref, b2_ref,
             o_ref, y1_ref) = refs

        cp = w2_ref.shape[-1]

        def conv1_slab(k):
            if nine_slabs:                       # stride>1: slabs pre-sliced in wrapper
                return x_ref[0, k]
            dy, dx = divmod(k, 3)                # stride=1: contiguous shifted slab
            off = dy * Wp2 + dx
            return x_ref[0, off:off + Ls, :]

        # ---- conv1 + folded bn1 + relu -> zero-padded y1 scratch (bf16) -----
        acc = jnp.zeros((Ls, cp), jnp.float32)
        for k in range(9):
            acc = acc + jnp.dot(conv1_slab(k), w1_ref[k],
                                preferred_element_type=jnp.float32)
        # mask zeroes the wrap-around garbage columns so the pad ring stays 0
        y1 = jnp.maximum(acc + b1_ref[...], 0.0) * m_ref[...]
        y1_ref[...] = jnp.zeros_like(y1_ref)
        y1_ref[Wp2 + 1:Wp2 + 1 + Ls, :] = y1.astype(y1_ref.dtype)

        # ---- conv2 + folded bn2 ----------------------------------------------
        acc2 = jnp.zeros((Ls, cp), jnp.float32)
        for k in range(9):
            dy, dx = divmod(k, 3)
            off = dy * Wp2 + dx
            acc2 = acc2 + jnp.dot(y1_ref[off:off + Ls, :], w2_ref[k],
                                  preferred_element_type=jnp.float32)
        acc2 = acc2 + b2_ref[...]

        # ---- shortcut + relu (f32 epilogue; bf16 lane-dense store) -----------
        if proj:
            # 1x1 strided conv shortcut == matmul on the already-resident
            # center (dy=1, dx=1) input slab -- no extra HBM input.
            sc = x_ref[0, 4] if nine_slabs else x_ref[0, Wp2 + 1:Wp2 + 1 + Ls, :]
            acc2 = acc2 + jnp.dot(sc, wsc_ref[...],
                                  preferred_element_type=jnp.float32)
        else:
            acc2 = acc2 + x_ref[0, Wp2 + 1:Wp2 + 1 + Ls, :].astype(jnp.float32)
        o_ref[0] = jnp.maximum(acc2, 0.0).astype(o_ref.dtype)

    return kernel


# ---------------------------------------------------------------------------
# Small helpers (wrapper side, plain JAX)
# ---------------------------------------------------------------------------
def _round_up(x, m):
    return (x + m - 1) // m * m


def _fold_bn(gamma, beta, mean, var, eps=1e-5):
    scale = gamma / jnp.sqrt(var + eps)
    return scale, beta - mean * scale


def _conv3x3_weight(w_oihw, scale, cin_p, cout_p):
    """(Cout, Cin, 3, 3) -> (9, cin_p, cout_p) bf16, BN scale folded into columns."""
    cout, cin = w_oihw.shape[:2]
    w = jnp.transpose(w_oihw, (2, 3, 1, 0)).reshape(9, cin, cout) * scale[None, None, :]
    return jnp.pad(w, ((0, 0), (0, cin_p - cin), (0, cout_p - cout))).astype(jnp.bfloat16)


# ---------------------------------------------------------------------------
# NHWC bf16 forward (chaining entry point) and NCHW module-equivalent wrapper
# ---------------------------------------------------------------------------
def basic_block_forward_nhwc(x, params, stride=1, out_dtype=jnp.bfloat16):
    """x: (N, H, W, Cin) -> (N, Ho, Wo, Cout) in out_dtype (eval-mode BN folded)."""
    N, H, W, Cin = x.shape
    Cout = params["w1"].shape[0]
    proj = (stride != 1) or (Cin != Cout)
    cp = _round_up(Cout, 128)                   # lane-dense padded output channels

    Ho = (H + 2 - 3) // stride + 1
    Wo = (W + 2 - 3) // stride + 1
    Wp2 = Wo + 2                                # padded width of the conv2 input
    Ls = Ho * Wp2                               # "wide" flat output length per image

    x = x.astype(jnp.bfloat16)

    # Fold eval-mode BN into weight columns / bias.
    s1, b1 = _fold_bn(params["bn1_g"], params["bn1_b"], params["bn1_m"], params["bn1_v"])
    s2, b2 = _fold_bn(params["bn2_g"], params["bn2_b"], params["bn2_m"], params["bn2_v"])
    if proj:
        ssc, bsc = _fold_bn(params["bnsc_g"], params["bnsc_b"],
                            params["bnsc_m"], params["bnsc_v"])
        b2 = b2 + bsc

    cin_k = Cin if proj else cp                 # identity: pad channels so the add lines up
    w1 = _conv3x3_weight(params["w1"], s1, cin_k, cp)       # (9, cin_k, cp) bf16
    w2 = _conv3x3_weight(params["w2"], s2, cp, cp)          # (9, cp, cp)    bf16
    b1p = jnp.pad(b1, (0, cp - Cout)).reshape(1, cp).astype(jnp.float32)
    b2p = jnp.pad(b2, (0, cp - Cout)).reshape(1, cp).astype(jnp.float32)

    if stride == 1:
        nine = False
        if not proj:                            # identity: zero-pad channels to cp
            x = jnp.pad(x, ((0, 0), (0, 0), (0, 0), (0, cp - Cin)))
        Cx = x.shape[-1]
        xp = jnp.pad(x, ((0, 0), (1, 2), (1, 1), (0, 0)))    # conv pad + 1 spare row
        Lx = (H + 3) * (W + 2)
        x_in = xp.reshape(N, Lx, Cx)
        x_spec = pl.BlockSpec((1, Lx, Cx), lambda n: (n, 0, 0))
    else:
        # Down-sampling block only: pre-slice the 9 strided shifted "wide" slabs
        # (wrapper-side strided gather; ~2.3x of x, not 9x like im2col).
        nine = True
        xe = jnp.pad(x, ((0, 0), (1, 5), (1, 5), (0, 0)))
        slabs = [xe[:, dy:dy + stride * Ho:stride, dx:dx + stride * Wp2:stride, :]
                 for dy in range(3) for dx in range(3)]
        x_in = jnp.stack(slabs, axis=1).reshape(N, 9, Ls, Cin)
        x_spec = pl.BlockSpec((1, 9, Ls, Cin), lambda n: (n, 0, 0, 0))

    # valid-column mask (kills the 2 wrap-around columns of each wide output row)
    mask = (jnp.arange(Ls) % Wp2 < Wo).astype(jnp.float32).reshape(Ls, 1)

    operands = [x_in, mask, w1, b1p, w2, b2p]
    in_specs = [
        x_spec,
        pl.BlockSpec((Ls, 1), lambda n: (0, 0)),
        pl.BlockSpec(w1.shape, lambda n: (0, 0, 0)),     # resident (constant index_map)
        pl.BlockSpec((1, cp), lambda n: (0, 0)),
        pl.BlockSpec(w2.shape, lambda n: (0, 0, 0)),     # resident
        pl.BlockSpec((1, cp), lambda n: (0, 0)),
    ]
    if proj:
        wsc = params["wsc"].reshape(Cout, Cin).T * ssc[None, :]
        wsc = jnp.pad(wsc, ((0, 0), (0, cp - Cout))).astype(jnp.bfloat16)
        operands.append(wsc)
        in_specs.append(pl.BlockSpec((Cin, cp), lambda n: (0, 0)))

    kernel = _make_block_kernel(nine_slabs=nine, Wo=Wo, Wp2=Wp2, Ls=Ls, proj=proj)

    out = pl.pallas_call(
        kernel,
        out_shape=jax.ShapeDtypeStruct((N, Ls, cp), out_dtype),
        grid=(N,),
        in_specs=in_specs,
        out_specs=pl.BlockSpec((1, Ls, cp), lambda n: (n, 0, 0)),
        scratch_shapes=[pltpu.VMEM(((Ho + 3) * Wp2, cp), jnp.bfloat16)],  # padded y1
        compiler_params=pltpu.CompilerParams(
            dimension_semantics=("parallel",),
            vmem_limit_bytes=_VMEM_LIMIT),
    )(*operands)

    # drop the 2 garbage columns and the channel padding
    return out.reshape(N, Ho, Wp2, cp)[:, :, :Wo, :Cout]


def basic_block_forward(x_nchw, params, stride=1):
    """Module-equivalent boundary wrapper: NCHW f32 in -> NCHW f32 out."""
    x = jnp.transpose(x_nchw, (0, 2, 3, 1))
    y = basic_block_forward_nhwc(x, params, stride=stride, out_dtype=jnp.bfloat16)
    return jnp.transpose(y, (0, 3, 1, 2)).astype(jnp.float32)


# ---------------------------------------------------------------------------
# Pure-JAX reference (float32) for correctness checking
# ---------------------------------------------------------------------------
def basic_block_reference(x, params, stride=1):
    def conv(inp, w, s, pad):
        return lax.conv_general_dilated(
            inp, w, window_strides=(s, s), padding=((pad, pad), (pad, pad)),
            dimension_numbers=("NCHW", "OIHW", "NCHW"),
            precision=lax.Precision.HIGHEST)

    def bn(inp, g, b, m, v, eps=1e-5):
        g, b, m, v = (t.reshape(1, -1, 1, 1) for t in (g, b, m, v))
        return (inp - m) / jnp.sqrt(v + eps) * g + b

    y = jax.nn.relu(bn(conv(x, params["w1"], stride, 1),
                       params["bn1_g"], params["bn1_b"], params["bn1_m"], params["bn1_v"]))
    y = bn(conv(y, params["w2"], 1, 1),
           params["bn2_g"], params["bn2_b"], params["bn2_m"], params["bn2_v"])
    in_ch, out_ch = x.shape[1], params["w1"].shape[0]
    if stride != 1 or in_ch != out_ch:
        sc = bn(conv(x, params["wsc"], stride, 0),
                params["bnsc_g"], params["bnsc_b"], params["bnsc_m"], params["bnsc_v"])
    else:
        sc = x
    return jax.nn.relu(y + sc)


def init_params(key, in_ch, out_ch, stride):
    ks = jax.random.split(key, 8)
    params = {
        "w1": 0.1 * jax.random.normal(ks[0], (out_ch, in_ch, 3, 3), jnp.float32),
        "bn1_g": 1.0 + 0.05 * jax.random.normal(ks[1], (out_ch,), jnp.float32),
        "bn1_b": 0.05 * jax.random.normal(ks[2], (out_ch,), jnp.float32),
        "bn1_m": 0.05 * jax.random.normal(ks[3], (out_ch,), jnp.float32),
        "bn1_v": jnp.abs(1.0 + 0.05 * jax.random.normal(ks[4], (out_ch,), jnp.float32)),
        "w2": 0.1 * jax.random.normal(ks[5], (out_ch, out_ch, 3, 3), jnp.float32),
        "bn2_g": jnp.ones((out_ch,), jnp.float32),
        "bn2_b": jnp.zeros((out_ch,), jnp.float32),
        "bn2_m": jnp.zeros((out_ch,), jnp.float32),
        "bn2_v": jnp.ones((out_ch,), jnp.float32),
    }
    if stride != 1 or in_ch != out_ch:
        params.update({
            "wsc": 0.1 * jax.random.normal(ks[6], (out_ch, in_ch, 1, 1), jnp.float32),
            "bnsc_g": jnp.ones((out_ch,), jnp.float32),
            "bnsc_b": jnp.zeros((out_ch,), jnp.float32),
            "bnsc_m": jnp.zeros((out_ch,), jnp.float32),
            "bnsc_v": jnp.ones((out_ch,), jnp.float32),
        })
    return params


if __name__ == "__main__":
    key = jax.random.PRNGKey(0)
    kx1, kx2, kx3, kp1, kp2, kp3 = jax.random.split(key, 6)
    N, H, W = 2, 16, 16

    def run_case(name, x, params, stride):
        fwd = jax.jit(functools.partial(basic_block_forward, stride=stride))
        out = fwd(x, params)
        jax.block_until_ready(out)
        ref = basic_block_reference(x, params, stride)
        assert out.shape == ref.shape, (name, out.shape, ref.shape)
        assert bool(jnp.all(out >= 0.0)), name
        err = float(jnp.max(jnp.abs(out - ref)))
        tol = 0.1 + 0.05 * float(jnp.max(jnp.abs(ref)))
        assert err <= tol, f"{name}: max err {err} > tol {tol}"

    # 1) projection shortcut (channel change), stride 1
    x1 = jax.random.normal(kx1, (N, 4, H, W), jnp.float32)
    run_case("proj_s1", x1, init_params(kp1, 4, 8, 1), 1)

    # 2) identity shortcut (in_ch == out_ch, stride 1)
    x2 = jax.random.normal(kx2, (N, 8, H, W), jnp.float32)
    run_case("identity", x2, init_params(kp2, 8, 8, 1), 1)

    # 3) projection shortcut with stride 2 (down-sampling block)
    x3 = jax.random.normal(kx3, (N, 4, H, W), jnp.float32)
    run_case("proj_s2", x3, init_params(kp3, 4, 8, 2), 2)

    print("KERNEL_OK")
</pallas_src>

<mosaic_0001>
module attributes {stable_mosaic.version = 11 : i64} {
  func.func @kernel(%arg0: i32, %arg1: memref<1x342x4xbf16, #tpu.memory_space<vmem>>, %arg2: memref<288x1xf32, #tpu.memory_space<vmem>>, %arg3: memref<9x4x128xbf16, #tpu.memory_space<vmem>>, %arg4: memref<1x128xf32, #tpu.memory_space<vmem>>, %arg5: memref<9x128x128xbf16, #tpu.memory_space<vmem>>, %arg6: memref<1x128xf32, #tpu.memory_space<vmem>>, %arg7: memref<4x128xbf16, #tpu.memory_space<vmem>>, %arg8: memref<1x288x128xbf16, #tpu.memory_space<vmem>>, %arg9: memref<342x128xbf16, #tpu.memory_space<vmem>>) attributes {dimension_semantics = [#tpu.dimension_semantics<parallel>], iteration_bounds = array<i64: 2>, scalar_prefetch = 0 : i64, scratch_operands = 1 : i64, tpu.core_type = #tpu.core_type<tc>, window_params = [{transform_indices = @transform_0, window_bounds = array<i64: 1, 342, 4>}, {pipeline_mode = #tpu.pipeline_mode<synchronous>, transform_indices = @transform_1, window_bounds = array<i64: 288, 1>}, {pipeline_mode = #tpu.pipeline_mode<synchronous>, transform_indices = @transform_2, window_bounds = array<i64: 9, 4, 128>}, {pipeline_mode = #tpu.pipeline_mode<synchronous>, transform_indices = @transform_3, window_bounds = array<i64: 1, 128>}, {pipeline_mode = #tpu.pipeline_mode<synchronous>, transform_indices = @transform_4, window_bounds = array<i64: 9, 128, 128>}, {pipeline_mode = #tpu.pipeline_mode<synchronous>, transform_indices = @transform_5, window_bounds = array<i64: 1, 128>}, {pipeline_mode = #tpu.pipeline_mode<synchronous>, transform_indices = @transform_6, window_bounds = array<i64: 4, 128>}, {transform_indices = @transform_7, window_bounds = array<i64: 1, 288, 128>}]} {
    %cst = arith.constant 0.000000e+00 : f32
    %0 = vector.broadcast %cst : f32 to vector<288x128xf32>
    %c0 = arith.constant 0 : index
    %c0_0 = arith.constant 0 : index
    %c0_1 = arith.constant 0 : index
    %1 = vector.load %arg1[%c0, %c0_0, %c0_1] : memref<1x342x4xbf16, #tpu.memory_space<vmem>>, vector<1x288x4xbf16>
    %2 = vector.shape_cast %1 : vector<1x288x4xbf16> to vector<288x4xbf16>
    %c0_2 = arith.constant 0 : index
    %c0_3 = arith.constant 0 : index
    %c0_4 = arith.constant 0 : index
    %3 = vector.load %arg3[%c0_2, %c0_3, %c0_4] : memref<9x4x128xbf16, #tpu.memory_space<vmem>>, vector<1x4x128xbf16>
    %4 = vector.shape_cast %3 : vector<1x4x128xbf16> to vector<4x128xbf16>
    %cst_5 = arith.constant dense<0.000000e+00> : vector<288x128xf32>
    %5 = tpu.matmul %2, %4, %cst_5 {dimension_numbers = #tpu.dot_dimension_numbers<[1], [0], [0], [1], [0, 0, 1, 1], [], []>} : vector<288x4xbf16>, vector<4x128xbf16>, vector<288x128xf32> -> vector<288x128xf32>
    %6 = arith.addf %0, %5 : vector<288x128xf32>
    %c0_6 = arith.constant 0 : index
    %c1 = arith.constant 1 : index
    %c0_7 = arith.constant 0 : index
    %7 = vector.load %arg1[%c0_6, %c1, %c0_7] : memref<1x342x4xbf16, #tpu.memory_space<vmem>>, vector<1x288x4xbf16>
    %8 = vector.shape_cast %7 : vector<1x288x4xbf16> to vector<288x4xbf16>
    %c1_8 = arith.constant 1 : index
    %c0_9 = arith.constant 0 : index
    %c0_10 = arith.constant 0 : index
    %9 = vector.load %arg3[%c1_8, %c0_9, %c0_10] : memref<9x4x128xbf16, #tpu.memory_space<vmem>>, vector<1x4x128xbf16>
    %10 = vector.shape_cast %9 : vector<1x4x128xbf16> to vector<4x128xbf16>
    %cst_11 = arith.constant dense<0.000000e+00> : vector<288x128xf32>
    %11 = tpu.matmul %8, %10, %cst_11 {dimension_numbers = #tpu.dot_dimension_numbers<[1], [0], [0], [1], [0, 0, 1, 1], [], []>} : vector<288x4xbf16>, vector<4x128xbf16>, vector<288x128xf32> -> vector<288x128xf32>
    %12 = arith.addf %6, %11 : vector<288x128xf32>
    %c0_12 = arith.constant 0 : index
    %c2 = arith.constant 2 : index
    %c0_13 = arith.constant 0 : index
    %13 = vector.load %arg1[%c0_12, %c2, %c0_13] : memref<1x342x4xbf16, #tpu.memory_space<vmem>>, vector<1x288x4xbf16>
    %14 = vector.shape_cast %13 : vector<1x288x4xbf16> to vector<288x4xbf16>
    %c2_14 = arith.constant 2 : index
    %c0_15 = arith.constant 0 : index
    %c0_16 = arith.constant 0 : index
    %15 = vector.load %arg3[%c2_14, %c0_15, %c0_16] : memref<9x4x128xbf16, #tpu.memory_space<vmem>>, vector<1x4x128xbf16>
    %16 = vector.shape_cast %15 : vector<1x4x128xbf16> to vector<4x128xbf16>
    %cst_17 = arith.constant dense<0.000000e+00> : vector<288x128xf32>
    %17 = tpu.matmul %14, %16, %cst_17 {dimension_numbers = #tpu.dot_dimension_numbers<[1], [0], [0], [1], [0, 0, 1, 1], [], []>} : vector<288x4xbf16>, vector<4x128xbf16>, vector<288x128xf32> -> vector<288x128xf32>
    %18 = arith.addf %12, %17 : vector<288x128xf32>
    %c0_18 = arith.constant 0 : index
    %c18 = arith.constant 18 : index
    %c0_19 = arith.constant 0 : index
    %19 = vector.load %arg1[%c0_18, %c18, %c0_19] : memref<1x342x4xbf16, #tpu.memory_space<vmem>>, vector<1x288x4xbf16>
    %20 = vector.shape_cast %19 : vector<1x288x4xbf16> to vector<288x4xbf16>
    %c3 = arith.constant 3 : index
    %c0_20 = arith.constant 0 : index
    %c0_21 = arith.constant 0 : index
    %21 = vector.load %arg3[%c3, %c0_20, %c0_21] : memref<9x4x128xbf16, #tpu.memory_space<vmem>>, vector<1x4x128xbf16>
    %22 = vector.shape_cast %21 : vector<1x4x128xbf16> to vector<4x128xbf16>
    %cst_22 = arith.constant dense<0.000000e+00> : vector<288x128xf32>
    %23 = tpu.matmul %20, %22, %cst_22 {dimension_numbers = #tpu.dot_dimension_numbers<[1], [0], [0], [1], [0, 0, 1, 1], [], []>} : vector<288x4xbf16>, vector<4x128xbf16>, vector<288x128xf32> -> vector<288x128xf32>
    %24 = arith.addf %18, %23 : vector<288x128xf32>
    %c0_23 = arith.constant 0 : index
    %c19 = arith.constant 19 : index
    %c0_24 = arith.constant 0 : index
    %25 = vector.load %arg1[%c0_23, %c19, %c0_24] : memref<1x342x4xbf16, #tpu.memory_space<vmem>>, vector<1x288x4xbf16>
    %26 = vector.shape_cast %25 : vector<1x288x4xbf16> to vector<288x4xbf16>
    %c4 = arith.constant 4 : index
    %c0_25 = arith.constant 0 : index
    %c0_26 = arith.constant 0 : index
    %27 = vector.load %arg3[%c4, %c0_25, %c0_26] : memref<9x4x128xbf16, #tpu.memory_space<vmem>>, vector<1x4x128xbf16>
    %28 = vector.shape_cast %27 : vector<1x4x128xbf16> to vector<4x128xbf16>
    %cst_27 = arith.constant dense<0.000000e+00> : vector<288x128xf32>
    %29 = tpu.matmul %26, %28, %cst_27 {dimension_numbers = #tpu.dot_dimension_numbers<[1], [0], [0], [1], [0, 0, 1, 1], [], []>} : vector<288x4xbf16>, vector<4x128xbf16>, vector<288x128xf32> -> vector<288x128xf32>
    %30 = arith.addf %24, %29 : vector<288x128xf32>
    %c0_28 = arith.constant 0 : index
    %c20 = arith.constant 20 : index
    %c0_29 = arith.constant 0 : index
    %31 = vector.load %arg1[%c0_28, %c20, %c0_29] : memref<1x342x4xbf16, #tpu.memory_space<vmem>>, vector<1x288x4xbf16>
    %32 = vector.shape_cast %31 : vector<1x288x4xbf16> to vector<288x4xbf16>
    %c5 = arith.constant 5 : index
    %c0_30 = arith.constant 0 : index
    %c0_31 = arith.constant 0 : index
    %33 = vector.load %arg3[%c5, %c0_30, %c0_31] : memref<9x4x128xbf16, #tpu.memory_space<vmem>>, vector<1x4x128xbf16>
    %34 = vector.shape_cast %33 : vector<1x4x128xbf16> to vector<4x128xbf16>
    %cst_32 = arith.constant dense<0.000000e+00> : vector<288x128xf32>
    %35 = tpu.matmul %32, %34, %cst_32 {dimension_numbers = #tpu.dot_dimension_numbers<[1], [0], [0], [1], [0, 0, 1, 1], [], []>} : vector<288x4xbf16>, vector<4x128xbf16>, vector<288x128xf32> -> vector<288x128xf32>
    %36 = arith.addf %30, %35 : vector<288x128xf32>
    %c0_33 = arith.constant 0 : index
    %c36 = arith.constant 36 : index
    %c0_34 = arith.constant 0 : index
    %37 = vector.load %arg1[%c0_33, %c36, %c0_34] : memref<1x342x4xbf16, #tpu.memory_space<vmem>>, vector<1x288x4xbf16>
    %38 = vector.shape_cast %37 : vector<1x288x4xbf16> to vector<288x4xbf16>
    %c6 = arith.constant 6 : index
    %c0_35 = arith.constant 0 : index
    %c0_36 = arith.constant 0 : index
    %39 = vector.load %arg3[%c6, %c0_35, %c0_36] : memref<9x4x128xbf16, #tpu.memory_space<vmem>>, vector<1x4x128xbf16>
    %40 = vector.shape_cast %39 : vector<1x4x128xbf16> to vector<4x128xbf16>
    %cst_37 = arith.constant dense<0.000000e+00> : vector<288x128xf32>
    %41 = tpu.matmul %38, %40, %cst_37 {dimension_numbers = #tpu.dot_dimension_numbers<[1], [0], [0], [1], [0, 0, 1, 1], [], []>} : vector<288x4xbf16>, vector<4x128xbf16>, vector<288x128xf32> -> vector<288x128xf32>
    %42 = arith.addf %36, %41 : vector<288x128xf32>
    %c0_38 = arith.constant 0 : index
    %c37 = arith.constant 37 : index
    %c0_39 = arith.constant 0 : index
    %43 = vector.load %arg1[%c0_38, %c37, %c0_39] : memref<1x342x4xbf16, #tpu.memory_space<vmem>>, vector<1x288x4xbf16>
    %44 = vector.shape_cast %43 : vector<1x288x4xbf16> to vector<288x4xbf16>
    %c7 = arith.constant 7 : index
    %c0_40 = arith.constant 0 : index
    %c0_41 = arith.constant 0 : index
    %45 = vector.load %arg3[%c7, %c0_40, %c0_41] : memref<9x4x128xbf16, #tpu.memory_space<vmem>>, vector<1x4x128xbf16>
    %46 = vector.shape_cast %45 : vector<1x4x128xbf16> to vector<4x128xbf16>
    %cst_42 = arith.constant dense<0.000000e+00> : vector<288x128xf32>
    %47 = tpu.matmul %44, %46, %cst_42 {dimension_numbers = #tpu.dot_dimension_numbers<[1], [0], [0], [1], [0, 0, 1, 1], [], []>} : vector<288x4xbf16>, vector<4x128xbf16>, vector<288x128xf32> -> vector<288x128xf32>
    %48 = arith.addf %42, %47 : vector<288x128xf32>
    %c0_43 = arith.constant 0 : index
    %c38 = arith.constant 38 : index
    %c0_44 = arith.constant 0 : index
    %49 = vector.load %arg1[%c0_43, %c38, %c0_44] : memref<1x342x4xbf16, #tpu.memory_space<vmem>>, vector<1x288x4xbf16>
    %50 = vector.shape_cast %49 : vector<1x288x4xbf16> to vector<288x4xbf16>
    %c8 = arith.constant 8 : index
    %c0_45 = arith.constant 0 : index
    %c0_46 = arith.constant 0 : index
    %51 = vector.load %arg3[%c8, %c0_45, %c0_46] : memref<9x4x128xbf16, #tpu.memory_space<vmem>>, vector<1x4x128xbf16>
    %52 = vector.shape_cast %51 : vector<1x4x128xbf16> to vector<4x128xbf16>
    %cst_47 = arith.constant dense<0.000000e+00> : vector<288x128xf32>
    %53 = tpu.matmul %50, %52, %cst_47 {dimension_numbers = #tpu.dot_dimension_numbers<[1], [0], [0], [1], [0, 0, 1, 1], [], []>} : vector<288x4xbf16>, vector<4x128xbf16>, vector<288x128xf32> -> vector<288x128xf32>
    %54 = arith.addf %48, %53 : vector<288x128xf32>
    %c0_48 = arith.constant 0 : index
    %c0_49 = arith.constant 0 : index
    %55 = vector.load %arg4[%c0_48, %c0_49] : memref<1x128xf32, #tpu.memory_space<vmem>>, vector<1x128xf32>
    %56 = vector.broadcast %55 : vector<1x128xf32> to vector<288x128xf32>
    %57 = arith.addf %54, %56 : vector<288x128xf32>
    %cst_50 = arith.constant 0.000000e+00 : f32
    %58 = vector.broadcast %cst_50 : f32 to vector<288x128xf32>
    %59 = arith.maximumf %57, %58 : vector<288x128xf32>
    %c0_51 = arith.constant 0 : index
    %c0_52 = arith.constant 0 : index
    %60 = vector.load %arg2[%c0_51, %c0_52] : memref<288x1xf32, #tpu.memory_space<vmem>>, vector<288x1xf32>
    %61 = vector.broadcast %60 : vector<288x1xf32> to vector<288x128xf32>
    %62 = arith.mulf %59, %61 : vector<288x128xf32>
    %cst_53 = arith.constant 0.000000e+00 : bf16
    %63 = vector.broadcast %cst_53 : bf16 to vector<342x128xbf16>
    %c0_54 = arith.constant 0 : index
    %c0_55 = arith.constant 0 : index
    %64 = vector.load %arg9[%c0_54, %c0_55] : memref<342x128xbf16, #tpu.memory_space<vmem>>, vector<342x128xbf16>
    tpu.vector_store %arg9[%c0_54, %c0_55], %63 {strides = array<i32>} : memref<342x128xbf16, #tpu.memory_space<vmem>>, vector<342x128xbf16>,
    %65 = arith.truncf %62 : vector<288x128xf32> to vector<288x128xbf16>
    %c19_56 = arith.constant 19 : index
    %c0_57 = arith.constant 0 : index
    %66 = vector.load %arg9[%c19_56, %c0_57] : memref<342x128xbf16, #tpu.memory_space<vmem>>, vector<288x128xbf16>
    tpu.vector_store %arg9[%c19_56, %c0_57], %65 {strides = array<i32>} : memref<342x128xbf16, #tpu.memory_space<vmem>>, vector<288x128xbf16>,
    %cst_58 = arith.constant 0.000000e+00 : f32
    %67 = vector.broadcast %cst_58 : f32 to vector<288x128xf32>
    %c0_59 = arith.constant 0 : index
    %c0_60 = arith.constant 0 : index
    %68 = vector.load %arg9[%c0_59, %c0_60] : memref<342x128xbf16, #tpu.memory_space<vmem>>, vector<288x128xbf16>
    %c0_61 = arith.constant 0 : index
    %c0_62 = arith.constant 0 : index
    %c0_63 = arith.constant 0 : index
    %69 = vector.load %arg5[%c0_61, %c0_62, %c0_63] : memref<9x128x128xbf16, #tpu.memory_space<vmem>>, vector<1x128x128xbf16>
    %70 = vector.shape_cast %69 : vector<1x128x128xbf16> to vector<128x128xbf16>
    %cst_64 = arith.constant dense<0.000000e+00> : vector<288x128xf32>
    %71 = tpu.matmul %68, %70, %cst_64 {dimension_numbers = #tpu.dot_dimension_numbers<[1], [0], [0], [1], [0, 0, 1, 1], [], []>} : vector<288x128xbf16>, vector<128x128xbf16>, vector<288x128xf32> -> vector<288x128xf32>
    %72 = arith.addf %67, %71 : vector<288x128xf32>
    %c1_65 = arith.constant 1 : index
    %c0_66 = arith.constant 0 : index
    %73 = vector.load %arg9[%c1_65, %c0_66] : memref<342x128xbf16, #tpu.memory_space<vmem>>, vector<288x128xbf16>
    %c1_67 = arith.constant 1 : index
    %c0_68 = arith.constant 0 : index
    %c0_69 = arith.constant 0 : index
    %74 = vector.load %arg5[%c1_67, %c0_68, %c0_69] : memref<9x128x128xbf16, #tpu.memory_space<vmem>>, vector<1x128x128xbf16>
    %75 = vector.shape_cast %74 : vector<1x128x128xbf16> to vector<128x128xbf16>
    %cst_70 = arith.constant dense<0.000000e+00> : vector<288x128xf32>
    %76 = tpu.matmul %73, %75, %cst_70 {dimension_numbers = #tpu.dot_dimension_numbers<[1], [0], [0], [1], [0, 0, 1, 1], [], []>} : vector<288x128xbf16>, vector<128x128xbf16>, vector<288x128xf32> -> vector<288x128xf32>
    %77 = arith.addf %72, %76 : vector<288x128xf32>
    %c2_71 = arith.constant 2 : index
    %c0_72 = arith.constant 0 : index
    %78 = vector.load %arg9[%c2_71, %c0_72] : memref<342x128xbf16, #tpu.memory_space<vmem>>, vector<288x128xbf16>
    %c2_73 = arith.constant 2 : index
    %c0_74 = arith.constant 0 : index
    %c0_75 = arith.constant 0 : index
    %79 = vector.load %arg5[%c2_73, %c0_74, %c0_75] : memref<9x128x128xbf16, #tpu.memory_space<vmem>>, vector<1x128x128xbf16>
    %80 = vector.shape_cast %79 : vector<1x128x128xbf16> to vector<128x128xbf16>
    %cst_76 = arith.constant dense<0.000000e+00> : vector<288x128xf32>
    %81 = tpu.matmul %78, %80, %cst_76 {dimension_numbers = #tpu.dot_dimension_numbers<[1], [0], [0], [1], [0, 0, 1, 1], [], []>} : vector<288x128xbf16>, vector<128x128xbf16>, vector<288x128xf32> -> vector<288x128xf32>
    %82 = arith.addf %77, %81 : vector<288x128xf32>
    %c18_77 = arith.constant 18 : index
    %c0_78 = arith.constant 0 : index
    %83 = vector.load %arg9[%c18_77, %c0_78] : memref<342x128xbf16, #tpu.memory_space<vmem>>, vector<288x128xbf16>
    %c3_79 = arith.constant 3 : index
    %c0_80 = arith.constant 0 : index
    %c0_81 = arith.constant 0 : index
    %84 = vector.load %arg5[%c3_79, %c0_80, %c0_81] : memref<9x128x128xbf16, #tpu.memory_space<vmem>>, vector<1x128x128xbf16>
    %85 = vector.shape_cast %84 : vector<1x128x128xbf16> to vector<128x128xbf16>
    %cst_82 = arith.constant dense<0.000000e+00> : vector<288x128xf32>
    %86 = tpu.matmul %83, %85, %cst_82 {dimension_numbers = #tpu.dot_dimension_numbers<[1], [0], [0], [1], [0, 0, 1, 1], [], []>} : vector<288x128xbf16>, vector<128x128xbf16>, vector<288x128xf32> -> vector<288x128xf32>
    %87 = arith.addf %82, %86 : vector<288x128xf32>
    %c19_83 = arith.constant 19 : index
    %c0_84 = arith.constant 0 : index
    %88 = vector.load %arg9[%c19_83, %c0_84] : memref<342x128xbf16, #tpu.memory_space<vmem>>, vector<288x128xbf16>
    %c4_85 = arith.constant 4 : index
    %c0_86 = arith.constant 0 : index
    %c0_87 = arith.constant 0 : index
    %89 = vector.load %arg5[%c4_85, %c0_86, %c0_87] : memref<9x128x128xbf16, #tpu.memory_space<vmem>>, vector<1x128x128xbf16>
    %90 = vector.shape_cast %89 : vector<1x128x128xbf16> to vector<128x128xbf16>
    %cst_88 = arith.constant dense<0.000000e+00> : vector<288x128xf32>
    %91 = tpu.matmul %88, %90, %cst_88 {dimension_numbers = #tpu.dot_dimension_numbers<[1], [0], [0], [1], [0, 0, 1, 1], [], []>} : vector<288x128xbf16>, vector<128x128xbf16>, vector<288x128xf32> -> vector<288x128xf32>
    %92 = arith.addf %87, %91 : vector<288x128xf32>
    %c20_89 = arith.constant 20 : index
    %c0_90 = arith.constant 0 : index
    %93 = vector.load %arg9[%c20_89, %c0_90] : memref<342x128xbf16, #tpu.memory_space<vmem>>, vector<288x128xbf16>
    %c5_91 = arith.constant 5 : index
    %c0_92 = arith.constant 0 : index
    %c0_93 = arith.constant 0 : index
    %94 = vector.load %arg5[%c5_91, %c0_92, %c0_93] : memref<9x128x128xbf16, #tpu.memory_space<vmem>>, vector<1x128x128xbf16>
    %95 = vector.shape_cast %94 : vector<1x128x128xbf16> to vector<128x128xbf16>
    %cst_94 = arith.constant dense<0.000000e+00> : vector<288x128xf32>
    %96 = tpu.matmul %93, %95, %cst_94 {dimension_numbers = #tpu.dot_dimension_numbers<[1], [0], [0], [1], [0, 0, 1, 1], [], []>} : vector<288x128xbf16>, vector<128x128xbf16>, vector<288x128xf32> -> vector<288x128xf32>
    %97 = arith.addf %92, %96 : vector<288x128xf32>
    %c36_95 = arith.constant 36 : index
    %c0_96 = arith.constant 0 : index
    %98 = vector.load %arg9[%c36_95, %c0_96] : memref<342x128xbf16, #tpu.memory_space<vmem>>, vector<288x128xbf16>
    %c6_97 = arith.constant 6 : index
    %c0_98 = arith.constant 0 : index
    %c0_99 = arith.constant 0 : index
    %99 = vector.load %arg5[%c6_97, %c0_98, %c0_99] : memref<9x128x128xbf16, #tpu.memory_space<vmem>>, vector<1x128x128xbf16>
    %100 = vector.shape_cast %99 : vector<1x128x128xbf16> to vector<128x128xbf16>
    %cst_100 = arith.constant dense<0.000000e+00> : vector<288x128xf32>
    %101 = tpu.matmul %98, %100, %cst_100 {dimension_numbers = #tpu.dot_dimension_numbers<[1], [0], [0], [1], [0, 0, 1, 1], [], []>} : vector<288x128xbf16>, vector<128x128xbf16>, vector<288x128xf32> -> vector<288x128xf32>
    %102 = arith.addf %97, %101 : vector<288x128xf32>
    %c37_101 = arith.constant 37 : index
    %c0_102 = arith.constant 0 : index
    %103 = vector.load %arg9[%c37_101, %c0_102] : memref<342x128xbf16, #tpu.memory_space<vmem>>, vector<288x128xbf16>
    %c7_103 = arith.constant 7 : index
    %c0_104 = arith.constant 0 : index
    %c0_105 = arith.constant 0 : index
    %104 = vector.load %arg5[%c7_103, %c0_104, %c0_105] : memref<9x128x128xbf16, #tpu.memory_space<vmem>>, vector<1x128x128xbf16>
    %105 = vector.shape_cast %104 : vector<1x128x128xbf16> to vector<128x128xbf16>
    %cst_106 = arith.constant dense<0.000000e+00> : vector<288x128xf32>
    %106 = tpu.matmul %103, %105, %cst_106 {dimension_numbers = #tpu.dot_dimension_numbers<[1], [0], [0], [1], [0, 0, 1, 1], [], []>} : vector<288x128xbf16>, vector<128x128xbf16>, vector<288x128xf32> -> vector<288x128xf32>
    %107 = arith.addf %102, %106 : vector<288x128xf32>
    %c38_107 = arith.constant 38 : index
    %c0_108 = arith.constant 0 : index
    %108 = vector.load %arg9[%c38_107, %c0_108] : memref<342x128xbf16, #tpu.memory_space<vmem>>, vector<288x128xbf16>
    %c8_109 = arith.constant 8 : index
    %c0_110 = arith.constant 0 : index
    %c0_111 = arith.constant 0 : index
    %109 = vector.load %arg5[%c8_109, %c0_110, %c0_111] : memref<9x128x128xbf16, #tpu.memory_space<vmem>>, vector<1x128x128xbf16>
    %110 = vector.shape_cast %109 : vector<1x128x128xbf16> to vector<128x128xbf16>
    %cst_112 = arith.constant dense<0.000000e+00> : vector<288x128xf32>
    %111 = tpu.matmul %108, %110, %cst_112 {dimension_numbers = #tpu.dot_dimension_numbers<[1], [0], [0], [1], [0, 0, 1, 1], [], []>} : vector<288x128xbf16>, vector<128x128xbf16>, vector<288x128xf32> -> vector<288x128xf32>
    %112 = arith.addf %107, %111 : vector<288x128xf32>
    %c0_113 = arith.constant 0 : index
    %c0_114 = arith.constant 0 : index
    %113 = vector.load %arg6[%c0_113, %c0_114] : memref<1x128xf32, #tpu.memory_space<vmem>>, vector<1x128xf32>
    %114 = vector.broadcast %113 : vector<1x128xf32> to vector<288x128xf32>
    %115 = arith.addf %112, %114 : vector<288x128xf32>
    %c0_115 = arith.constant 0 : index
    %c19_116 = arith.constant 19 : index
    %c0_117 = arith.constant 0 : index
    %116 = vector.load %arg1[%c0_115, %c19_116, %c0_117] : memref<1x342x4xbf16, #tpu.memory_space<vmem>>, vector<1x288x4xbf16>
    %117 = vector.shape_cast %116 : vector<1x288x4xbf16> to vector<288x4xbf16>
    %c0_118 = arith.constant 0 : index
    %c0_119 = arith.constant 0 : index
    %118 = vector.load %arg7[%c0_118, %c0_119] : memref<4x128xbf16, #tpu.memory_space<vmem>>, vector<4x128xbf16>
    %cst_120 = arith.constant dense<0.000000e+00> : vector<288x128xf32>
    %119 = tpu.matmul %117, %118, %cst_120 {dimension_numbers = #tpu.dot_dimension_numbers<[1], [0], [0], [1], [0, 0, 1, 1], [], []>} : vector<288x4xbf16>, vector<4x128xbf16>, vector<288x128xf32> -> vector<288x128xf32>
    %120 = arith.addf %115, %119 : vector<288x128xf32>
    %cst_121 = arith.constant 0.000000e+00 : f32
    %121 = vector.broadcast %cst_121 : f32 to vector<288x128xf32>
    %122 = arith.maximumf %120, %121 : vector<288x128xf32>
    %123 = arith.truncf %122 : vector<288x128xf32> to vector<288x128xbf16>
    %c0_122 = arith.constant 0 : index
    %c0_123 = arith.constant 0 : index
    %c0_124 = arith.constant 0 : index
    %124 = vector.load %arg8[%c0_122, %c0_123, %c0_124] : memref<1x288x128xbf16, #tpu.memory_space<vmem>>, vector<1x288x128xbf16>
    %125 = vector.shape_cast %124 : vector<1x288x128xbf16> to vector<288x128xbf16>
    %126 = vector.shape_cast %123 : vector<288x128xbf16> to vector<1x288x128xbf16>
    tpu.vector_store %arg8[%c0_122, %c0_123, %c0_124], %126 {strides = array<i32>} : memref<1x288x128xbf16, #tpu.memory_space<vmem>>, vector<1x288x128xbf16>,
    return
  }
  func.func @transform_0(%arg0: i32) -> (i32, i32, i32) {
    %c0_i32 = arith.constant 0 : i32
    %c0_i32_0 = arith.constant 0 : i32
    %c0_i32_1 = arith.constant 0 : i32
    return %arg0, %c0_i32, %c0_i32_0 : i32, i32, i32
  }
  func.func @transform_1(%arg0: i32) -> (i32, i32) {
    %c0_i32 = arith.constant 0 : i32
    %c0_i32_0 = arith.constant 0 : i32
    %c0_i32_1 = arith.constant 0 : i32
    return %c0_i32, %c0_i32_0 : i32, i32
  }
  func.func @transform_2(%arg0: i32) -> (i32, i32, i32) {
    %c0_i32 = arith.constant 0 : i32
    %c0_i32_0 = arith.constant 0 : i32
    %c0_i32_1 = arith.constant 0 : i32
    %c0_i32_2 = arith.constant 0 : i32
    return %c0_i32, %c0_i32_0, %c0_i32_1 : i32, i32, i32
  }
  func.func @transform_3(%arg0: i32) -> (i32, i32) {
    %c0_i32 = arith.constant 0 : i32
    %c0_i32_0 = arith.constant 0 : i32
    %c0_i32_1 = arith.constant 0 : i32
    return %c0_i32, %c0_i32_0 : i32, i32
  }
  func.func @transform_4(%arg0: i32) -> (i32, i32, i32) {
    %c0_i32 = arith.constant 0 : i32
    %c0_i32_0 = arith.constant 0 : i32
    %c0_i32_1 = arith.constant 0 : i32
    %c0_i32_2 = arith.constant 0 : i32
    return %c0_i32, %c0_i32_0, %c0_i32_1 : i32, i32, i32
  }
  func.func @transform_5(%arg0: i32) -> (i32, i32) {
    %c0_i32 = arith.constant 0 : i32
    %c0_i32_0 = arith.constant 0 : i32
    %c0_i32_1 = arith.constant 0 : i32
    return %c0_i32, %c0_i32_0 : i32, i32
  }
  func.func @transform_6(%arg0: i32) -> (i32, i32) {
    %c0_i32 = arith.constant 0 : i32
    %c0_i32_0 = arith.constant 0 : i32
    %c0_i32_1 = arith.constant 0 : i32
    return %c0_i32, %c0_i32_0 : i32, i32
  }
  func.func @transform_7(%arg0: i32) -> (i32, i32, i32) {
    %c0_i32 = arith.constant 0 : i32
    %c0_i32_0 = arith.constant 0 : i32
    %c0_i32_1 = arith.constant 0 : i32
    return %arg0, %c0_i32, %c0_i32_0 : i32, i32, i32
  }
}

</mosaic_0001>

<bundles_post_ra>
// kernel: basic_block_forward.1
= control target key start
LH: loop header
LB: loop body
LE: loop exit
PB: predicated region body
PF: predicated region fallthrough
CT: control target
= control target key end

     0   :  { %s11579_s24 = smov 0   ;;  %s15249_s0 = inlined_call_operand.vmem [shape: bf16[2,342,4], index: 0, kind: input, shape index: {}]   ;;  %s15250_s1 = inlined_call_operand.vmem [shape: f32[288,1], index: 1, kind: input, shape index: {}]   ;;  %s15251_s2 = inlined_call_operand.vmem [shape: bf16[9,4,128], index: 2, kind: input, shape index: {}]   ;;  %s15252_s3 = inlined_call_operand.vmem [shape: f32[1,128], index: 3, kind: input, shape index: {}]   ;;  %s15253_s4 = inlined_call_operand.vmem [shape: bf16[9,128,128], index: 4, kind: input, shape index: {}]   ;;  %s15254_s5 = inlined_call_operand.vmem [shape: f32[1,128], index: 5, kind: input, shape index: {}]   ;;  %s15255_s6 = inlined_call_operand.vmem [shape: bf16[4,128], index: 6, kind: input, shape index: {}]   ;;  %s15256_s7 = inlined_call_operand.vmem [shape: bf16[2,288,128], index: 7, kind: output, shape index: {}]  }
   0x1 LB: > { %s9214_s25 = sadd.s32 4294967295, %s11536_s24   ;;  %p9218_p0 = scmp.ge.s32.totalorder %s11536_s24, 1  ;;  %s11536_s24 = sphi %s11579_s24, %s17_s24  }
   0x2   : > { %p237_p1 = scmp.lt.s32.totalorder %s11536_s24, 3 }
   0x4   : > { %p238_p2 = pnand %p9218_p0, %p237_p1 }
   0x6   : > { %241 = sbr.rel (%p238_p2) target bundleno = 1139 (0x473), region = 48 }
   0xb   : > { %v9221_v0 = vld [vmem:[%s15251_s2 + $0x2] sm:$0x3]  ;;  %vm617_vm0 = vcmask 1041408   ;;  %p269_p3 = scmp.lt.s32.totalorder %s9214_s25, 1  ;;  %v9277_v2 = vld [vmem:[%s15251_s2 + $0x4] sm:$0x3] }
   0xc   : > { %11281 = vmatprep.subr.msk.bf16.mxu0 %vm617_vm0, %v9221_v0  ;;  %11282 = vmatprep.subr.msk.bf16.mxu1 %vm617_vm0, %v9221_v0  ;;  %v619_v1 = vsel %vm617_vm0, %v9221_v0, 0  ;;  %v316_v3 = vld [vmem:[%s15251_s2] sm:$0x3]  ;;  %vm413_vm1 = vsmask.f32 7424  ;;  %vm562_vm2 = vcmask 31744  }
   0xd   : > { %10432 = vmatpush3.bf16.msra.mxu0 %v619_v1  ;;  %11280 = vmatpush3.bf16.msra.mxu1 %v619_v1  ;;  %s15434_s25 = smov (!%p269_p3, %s9214_s25), 1  ;;  %v1113_v8 = vsel %vm617_vm0, %v9277_v2, 0  ;;  %v835_v16 = vsel %vm617_vm0, %v316_v3, 0  ;;  %v11652_v33 = vld [vmem:[%s15251_s2 + $0x8] sm:$0x3]  ;;  %vm1020_vm3 = vcmask 1046528  }
   0xe   : > { %11284 = vmatprep.subr.msk.bf16.mxu0 %vm617_vm0, %v9277_v2  ;;  %11283 = vmatprep.subr.msk.bf16.mxu1 %vm617_vm0, %v316_v3  ;;  %s11292_s9 = smul.u32 172, %s15434_s25  ;;  %v11672_v45 = vld [vmem:[%s15251_s2 + $0x6] sm:$0x3]  ;;  %vm2220_vm4 = vcmask 1045504   ;;  %vm1773_vm5 = vsmask.f32 6400 }
   0xf   : > { %vm3420_vm6 = vcmask 1044480   ;;  %vm2973_vm7 = vsmask.f32 5376  ;;  %vm4609_vm8 = vcmask 1043457   ;;  %vm4610_vm9 = vsmask.f32 7942 }
  0x10   : > { %s11607_s12 = scalar_lea.vmem %s15249_s0, %s11292_s9  ;;  %vm4210_vm10 = vsmask.f32 1280  ;;  %vm4211_vm11 = vsmask.f32 5392  ;;  %vm13174_vm12 = vmand %vm4609_vm8, %vm4610_vm9  ;;  %s11293_s11 = smul.u32 144, %s15434_s25 }
  0x11   : > { %v280_v4 = vld [vmem:[%s11607_s12] sm:$0xf]  ;;  %v11611_v5 = vld [vmem:[%s11607_s12 + $0x4] sm:$0xf]  ;;  %v11617_v7 = vld [vmem:[%s11607_s12 + $0x8] sm:$0xff]  }
  0x12   : > { %v11614_v6 = vcombine.low %v280_v4, %v11611_v5  ;;  %v422_v11 = vshll.u32 %v11617_v7, 16  ;;  %v426_v12 = vshrl.u32 %v11617_v7, 16  ;;  %v11625_v13 = vld [vmem:[%s11607_s12 + $0x50] sm:$0xff]   ;;  %v11628_v14 = vld [vmem:[%s11607_s12 + $0x58] sm:$0xff]   ;;  %v11640_v24 = vld [vmem:[%s11607_s12 + $0x60] sm:$0xff]   ;;  %s15121_s25 = scalar_lea.vmem %s15256_s7, %s11293_s11 }
  0x13   : > { %v11631_v15 = vld [vmem:[%s11607_s12 + $0x10] sm:$0xff]   ;;  %v494_v19 = vshll.u32 %v11625_v13, 16  ;;  %v498_v20 = vshrl.u32 %v11625_v13, 16  ;;  %v502_v21 = vshll.u32 %v11628_v14, 16  ;;  %v506_v22 = vshrl.u32 %v11628_v14, 16  ;;  %v11645_v28 = vld [vmem:[%s11607_s12 + $0x18] sm:$0xff]   ;;  %vm13183_vm13 = vmor %vm4210_vm10, %vm4211_vm11 }
  0x14   : > { %v415_v9 = vshrl.u32 %v11614_v6, 16  ;;  %v417_v10 = vshll.u32 %v11614_v6, 16  ;;  %v424_v18 = vrot.slane %v422_v11, 1  ;;  %v430_v23 = vshll.u32 %v11631_v15, 16  ;;  %v11658_v37 = vld [vmem:[%s11607_s12 + $0x68] sm:$0xff]   ;;  %v11662_v39 = vld [vmem:[%s11607_s12 + $0x20] sm:$0xff]   ;;  %vm13605_vm14 = vmand %vm617_vm0, %vm4210_vm10 }
  0x15   : > { %v11642_v27 = vrot.slane %v494_v19, 1  ;;  %v504_v29 = vrot.slane %v502_v21, 1  ;;  %v510_v31 = vshll.u32 %v11640_v24, 16  ;;  %v434_v32 = vshrl.u32 %v11631_v15, 16  ;;  %v11667_v44 = vld [vmem:[%s11607_s12 + $0x70] sm:$0xff]   ;;  %v11679_v50 = vld [vmem:[%s11607_s12 + $0x28] sm:$0xff]  }
  0x16   : > { %v419_v17 = vrot.slane %v417_v10, 1  ;;  %v428_v26 = vor.u32 %v426_v12, %v424_v18  ;;  %v432_v30 = vrot.slane %v430_v23, 1  ;;  %v438_v36 = vshll.u32 %v11645_v28, 16  ;;  %v11694_v62 = vld [vmem:[%s11607_s12 + $0x78] sm:$0xff]   ;;  %v11704_v10 = vld [vmem:[%s11607_s12 + $0x30] sm:$0xff]   ;;  %v11707_v11 = vld [vmem:[%s11607_s12 + $0x80] sm:$0xff]  }
  0x17   : > { %v500_v35 = vor.u32 %v498_v20, %v11642_v27  ;;  %v514_v38 = vshrl.u32 %v11640_v24, 16  ;;  %v508_v40 = vor.u32 %v506_v22, %v504_v29  ;;  %v512_v42 = vrot.slane %v510_v31, 1  ;;  %v11716_v23 = vld [vmem:[%s11607_s12 + $0x38] sm:$0xff]  }
  0x18   : > { %v420_v25 = vor.u32 %v419_v17, %v415_v9  ;;  %v433_v41 = vsel %vm413_vm1, %v428_v26, %v432_v30  ;;  %v436_v43 = vor.u32 %v434_v32, %v432_v30  ;;  %v440_v47 = vrot.slane %v438_v36, 1  ;;  %v11721_v26 = vld [vmem:[%s11607_s12 + $0x88] sm:$0xff]  }
  0x19   : > { %v505_v46 = vsel %vm413_vm1, %v500_v35, %v504_v29  ;;  %v518_v48 = vshll.u32 %v11658_v37, 16  ;;  %v442_v49 = vshrl.u32 %v11645_v28, 16  ;;  %v513_v51 = vsel %vm413_vm1, %v508_v40, %v512_v42  ;;  %v11733_v40 = vld [vmem:[%s11607_s12 + $0x48] sm:$0xff]  }
  0x1a   : > { %v425_v34 = vsel %vm413_vm1, %v420_v25, %v424_v18  ;;  %10453 = vmatprep.mubr.msk.bf16.mxu1 %vm562_vm2, %v505_v46  ;;  %v516_v52 = vor.u32 %v514_v38, %v512_v42  ;;  %v446_v53 = vshll.u32 %v11662_v39, 16  ;;  %v522_v54 = vshrl.u32 %v11658_v37, 16  ;;  %v11730_v38 = vld [vmem:[%s11607_s12 + $0x40] sm:$0xff]  }
  0x1b   : > { %10433 = vmatprep.mubr.msk.bf16.mxu0 %vm562_vm2, %v425_v34  ;;  %10454 = vmatmul.mubr.msk.bf16.vlgmr.msra.gmra.mxu1 %vm562_vm2, %v513_v51  ;;  %v441_v55 = vsel %vm413_vm1, %v436_v43, %v440_v47  ;;  %v520_v56 = vrot.slane %v518_v48, 1  ;;  %v444_v57 = vor.u32 %v442_v49, %v440_v47  ;;  %v526_v58 = vshll.u32 %v11667_v44, 16  ;;  %v11737_v43 = vld [vmem:[%s11607_s12 + $0x90] ss:$0 sps:$4 sm:$0x11]  }
  0x1c   : > { %10434 = vmatmul.mubr.msk.bf16.vlgmr.msra.gmra.mxu0 %vm562_vm2, %v433_v41  ;;  %10470 = vmatpush3.bf16.msra.mxu1 %v835_v16  ;;  %v448_v59 = vrot.slane %v446_v53, 1  ;;  %v450_v60 = vshrl.u32 %v11662_v39, 16  ;;  %v454_v61 = vshll.u32 %v11679_v50, 16  ;;  %v530_v2 = vshrl.u32 %v11667_v44, 16 }
  0x1d   : > { %10508 = vmatpush3.bf16.msra.mxu0 %v1113_v8  ;;  %10437 = vmatprep.mubr.msk.bf16.mxu0 %vm562_vm2, %v441_v55  ;;  %v521_v63 = vsel %vm413_vm1, %v516_v52, %v520_v56  ;;  %v524_v0 = vor.u32 %v522_v54, %v520_v56  ;;  %v528_v1 = vrot.slane %v526_v58, 1  ;;  %v534_v9 = vshll.u32 %v11694_v62, 16 }
  0x1e   : > { %11286 = vmatprep.subr.msk.bf16.mxu0 %vm617_vm0, %v11652_v33  ;;  %11285 = vmatprep.subr.msk.bf16.mxu1 %vm617_vm0, %v11672_v45  ;;  %v449_v3 = vsel %vm413_vm1, %v444_v57, %v448_v59  ;;  %v452_v4 = vor.u32 %v450_v60, %v448_v59  ;;  %v456_v8 = vrot.slane %v454_v61, 1  ;;  %v458_v17 = vshrl.u32 %v11679_v50, 16 }
  0x1f   : > { %10457 = vmatprep.mubr.msk.bf16.mxu1 %vm562_vm2, %v521_v63  ;;  %v529_v12 = vsel %vm413_vm1, %v524_v0, %v528_v1  ;;  %v532_v16 = vor.u32 %v530_v2, %v528_v1  ;;  %v538_v18 = vshrl.u32 %v11694_v62, 16  ;;  %v536_v20 = vrot.slane %v534_v9, 1  ;;  %v1014_v63 = vld [vmem:[%s11607_s12] sm:$0xe] }
  0x20   : > { %v457_v19 = vsel %vm413_vm1, %v452_v4, %v456_v8  ;;  %v462_v21 = vshll.u32 %v11704_v10, 16  ;;  %v542_v22 = vshll.u32 %v11707_v11, 16  ;;  %v466_v25 = vshrl.u32 %v11704_v10, 16 }
  0x21   : > { %v537_v29 = vsel %vm413_vm1, %v532_v16, %v536_v20  ;;  %v460_v30 = vor.u32 %v458_v17, %v456_v8  ;;  %v470_v34 = vshll.u32 %v11716_v23, 16  ;;  %v546_v35 = vshrl.u32 %v11707_v11, 16 }
  0x22   : > { %v464_v31 = vrot.slane %v462_v21, 1  ;;  %v544_v32 = vrot.slane %v542_v22, 1  ;;  %v550_v36 = vshll.u32 %v11721_v26, 16  ;;  %v540_v41 = vor.u32 %v538_v18, %v536_v20 }
  0x23   : > { %10458 = vmatmul.mubr.msk.bf16.gmra.mxu1 %vm562_vm2, %v529_v12  ;;  %v472_v46 = vrot.slane %v470_v34, 1  ;;  %v478_v49 = vshll.u32 %v11730_v38, 16  ;;  %v474_v52 = vshrl.u32 %v11716_v23, 16  ;;  %v482_v54 = vshrl.u32 %v11730_v38, 16 }
  0x24   : > { %10438 = vmatmul.mubr.msk.bf16.gmra.mxu0 %vm562_vm2, %v449_v3  ;;  %10461 = vmatprep.mubr.msk.bf16.mxu1 %vm562_vm2, %v537_v29  ;;  %v468_v42 = vor.u32 %v466_v25, %v464_v31  ;;  %v548_v47 = vor.u32 %v546_v35, %v544_v32  ;;  %v552_v48 = vrot.slane %v550_v36, 1  ;;  %v465_v51 = vsel %vm413_vm1, %v460_v30, %v464_v31  ;;  %v9355_v25 = vld [vmem:[%s15251_s2 + $0xa] sm:$0x3]  ;;  %v9375_v30 = vld [vmem:[%s15251_s2 + $0xc] sm:$0x3] }
  0x25   : > { %10441 = vmatprep.mubr.msk.bf16.mxu0 %vm562_vm2, %v457_v19  ;;  %v486_v55 = vshll.u32 %v11733_v40, 16  ;;  %v545_v56 = vsel %vm413_vm1, %v540_v41, %v544_v32  ;;  %v554_v57 = vshrl.u32 %v11721_v26, 16  ;;  %v558_v58 = vshll.u32 %v11737_v43, 16  ;;  %v1329_v36 = vld [vmem:[%s11607_s12 + $0xc] sm:$0xf] }
  0x26   : > { %v473_v53 = vsel %vm413_vm1, %v468_v42, %v472_v46  ;;  %v553_v59 = vsel %vm413_vm1, %v548_v47, %v552_v48  ;;  %v480_v60 = vrot.slane %v478_v49, 1  ;;  %v476_v61 = vor.u32 %v474_v52, %v472_v46  ;;  %v11824_v42 = vld [vmem:[%s11607_s12 + $0x10] sm:$0xff]   ;;  %v11832_v49 = vld [vmem:[%s11607_s12 + $0x18] sm:$0xff]   ;;  %v11839_v52 = vld [vmem:[%s11607_s12 + $0x28] sm:$0xff]  }
  0x27   : > { %v488_v1 = vrot.slane %v486_v55, 1  ;;  %v556_v2 = vor.u32 %v554_v57, %v552_v48  ;;  %v560_v3 = vrot.slane %v558_v58, 1  ;;  %v490_v8 = vshrl.u32 %v11733_v40, 16  ;;  %v11846_v58 = vld [vmem:[%s11607_s12 + $0x30] sm:$0xff]  }
  0x28   : > { %v484_v0 = vor.u32 %v482_v54, %v480_v60  ;;  %v481_v4 = vsel %vm413_vm1, %v476_v61, %v480_v60  ;;  %v9278_v12 = vcombine.low %v1014_v63, %v11611_v5  ;;  %v1022_v19 = vrot.slane %v11617_v7, 1  ;;  %v11852_v61 = vld [vmem:[%s11607_s12 + $0x38] sm:$0xff]  }
  0x29   : > { %v561_v16 = vsel %vm413_vm1, %v556_v2, %v560_v3  ;;  %v492_v17 = vor.u32 %v490_v8, %v488_v1  ;;  %v1552_v21 = vsel %vm617_vm0, %v11672_v45, 0  ;;  %v1024_v22 = vrot.slane %v11631_v15, 1 }
  0x2a   : > { %v489_v9 = vsel %vm413_vm1, %v484_v0, %v488_v1  ;;  %v1021_v18 = vrot.slane %v9278_v12, 1  ;;  %v1999_v45 = vsel %vm617_vm0, %v11652_v33, 0  ;;  %v1034_v32 = vrot.slane %v11716_v23, 1 }
  0x2b   : > { %10462 = vmatmul.mubr.msk.bf16.gmra.mxu1 %vm562_vm2, %v545_v56  ;;  %v497_v20 = vsel %vm413_vm1, %v492_v17, %v11642_v27  ;;  %v1025_v27 = vsel %vm1020_vm3, %v1022_v19, %v1024_v22  ;;  %v1036_v35 = vrot.slane %v11730_v38, 1  ;;  %v11821_v41 = vsel %vm617_vm0, %v9355_v25, 0 }
  0x2c   : > { %10442 = vmatmul.mubr.msk.bf16.gmra.mxu0 %vm562_vm2, %v465_v51  ;;  %10465 = vmatprep.mubr.msk.bf16.mxu1 %vm562_vm2, %v553_v59  ;;  %v1023_v5 = vsel %vm1020_vm3, %v1021_v18, %v1022_v19  ;;  %v11827_v46 = vsel %vm617_vm0, %v9375_v30, 0  ;;  %v11836_v51 = vld [vmem:[%s11607_s12 + $0x20] sm:$0xff]   ;;  %v2222_v54 = vrot.slane %v11824_v42, 2  ;;  %v1040_v55 = vrot.slane %v11625_v13, 1 }
  0x2d   : > { %10445 = vmatprep.mubr.msk.bf16.mxu0 %vm562_vm2, %v473_v53  ;;  %v1037_v48 = vsel %vm1020_vm3, %v1034_v32, %v1036_v35  ;;  %v1042_v56 = vrot.slane %v11628_v14, 1  ;;  %v1044_v57 = vrot.slane %v11640_v24, 1  ;;  %v2224_v59 = vrot.slane %v11832_v49, 2 }
  0x2e   : > { %v1046_v60 = vrot.slane %v11658_v37, 1  ;;  %v2226_v0 = vrot.slane %v11836_v51, 2  ;;  %v1048_v1 = vrot.slane %v11667_v44, 1  ;;  %v1050_v2 = vrot.slane %v11694_v62, 1 }
  0x2f   : > { %v1052_v8 = vrot.slane %v11707_v11, 1  ;;  %v1054_v17 = vrot.slane %v11721_v26, 1  ;;  %v1461_v18 = vrot.slane %v11824_v42, 1  ;;  %v1056_v19 = vrot.slane %v11737_v43, 1 }
  0x30   : > { %v11873_v12 = vsel %vm2220_vm4, %v2224_v59, %v2226_v0 }
  0x33   : > { %10466 = vmatmul.mubr.msk.bf16.gmra.mxu1 %vm562_vm2, %v561_v16  ;;  %v2228_v16 = vrot.slane %v11839_v52, 2 }
  0x34   : > { %10446 = vmatmul.mubr.msk.bf16.gmra.mxu0 %vm562_vm2, %v481_v4  ;;  %10471 = vmatprep.mubr.msk.bf16.mxu1 %vm562_vm2, %v11614_v6  ;;  %v1026_v6 = vrot.slane %v11645_v28, 1  ;;  %v11864_v4 = vsel %vm2220_vm4, %v2222_v54, %v2224_v59  ;;  %v11951_v59 = vld [vmem:[%s11607_s12 + $0x68] sm:$0xff]  }
  0x35   : > { %10449 = vmatprep.mubr.msk.bf16.mxu0 %vm562_vm2, %v489_v9  ;;  %v11870_v9 = vld [vmem:[%s11607_s12 + $0x40] sm:$0xff]  }
  0x36   : > { %v1027_v29 = vsel %vm1020_vm3, %v1024_v22, %v1026_v6  ;;  %v11888_v22 = vsel %vm2220_vm4, %v2226_v0, %v2228_v16  ;;  %v1049_v0 = vsel %vm1020_vm3, %v1046_v60, %v1048_v1 }
  0x3b   : > { %10472 = vmatmul.mubr.msk.bf16.vlgmr.msra.gmra.mxu1 %vm562_vm2, %v11617_v7  ;;  %v1028_v7 = vrot.slane %v11662_v39, 1 }
  0x3c   : > { %10450 = vmatmul.mubr.msk.bf16.gmra.mxu0 %vm562_vm2, %v497_v20  ;;  %10546 = vmatpush3.bf16.msra.mxu1 %v1552_v21  ;;  %v1463_v20 = vrot.slane %v11832_v49, 1  ;;  %v11885_v21 = vld [vmem:[%s11607_s12 + $0x48] sm:$0xff]  }
  0x3d   : > { %10509 = vmatprep.mubr.msk.bf16.mxu0 %vm562_vm2, %v1023_v5  ;;  %10475 = vmatprep.mubr.msk.bf16.mxu1 %vm562_vm2, %v11631_v15  ;;  %v1030_v15 = vrot.slane %v11679_v50, 1  ;;  %v1029_v33 = vsel %vm1020_vm3, %v1026_v6, %v1028_v7 }
  0x3e   : > { %11287 = vmatprep.subr.msk.bf16.mxu1 %vm617_vm0, %v9355_v25  ;;  %v2232_v25 = vrot.slane %v11852_v61, 2  ;;  %v1464_v43 = vsel %vm1020_vm3, %v1461_v18, %v1463_v20 }
  0x3f   : > { %v1031_v31 = vsel %vm1020_vm3, %v1028_v7, %v1030_v15 }
  0x43   : > { %10476 = vmatmul.mubr.msk.bf16.gmra.mxu1 %vm562_vm2, %v11645_v28  ;;  %v1032_v28 = vrot.slane %v11704_v10, 1 }
  0x44   : > { %10510 = vmatmul.mubr.msk.bf16.vlgmr.msra.gmra.mxu0 %vm562_vm2, %v1025_v27  ;;  %10479 = vmatprep.mubr.msk.bf16.mxu1 %vm562_vm2, %v11662_v39  ;;  %v1465_v27 = vrot.slane %v11836_v51, 1 }
  0x45   : > { %10584 = vmatpush3.bf16.msra.mxu0 %v1999_v45  ;;  %10513 = vmatprep.mubr.msk.bf16.mxu0 %vm562_vm2, %v1027_v29  ;;  %v1033_v39 = vsel %vm1020_vm3, %v1030_v15, %v1032_v28  ;;  %v1035_v34 = vsel %vm1020_vm3, %v1032_v28, %v1034_v32  ;;  %v1043_v29 = vsel %vm1020_vm3, %v1040_v55, %v1042_v56  ;;  %v2234_v15 = vrot.slane %v11870_v9, 2 }
  0x46   : > { %11288 = vmatprep.subr.msk.bf16.mxu0 %vm617_vm0, %v9375_v30  ;;  %v1786_v32 = vshll.u32 %v11824_v42, 16 }
  0x4b   : > { %10480 = vmatmul.mubr.msk.bf16.gmra.mxu1 %vm562_vm2, %v11679_v50  ;;  %v2214_v50 = vld [vmem:[%s11607_s12 + $0x8] sm:$0xc] }
  0x4c   : > { %10514 = vmatmul.mubr.msk.bf16.gmra.mxu0 %vm562_vm2, %v1029_v33  ;;  %10483 = vmatprep.mubr.msk.bf16.mxu1 %vm562_vm2, %v11704_v10  ;;  %v1038_v10 = vrot.slane %v11733_v40, 1  ;;  %v9356_v47 = vcombine.low %v2214_v50, %v1329_v36  ;;  %v1783_v33 = vshrl.u32 %v11824_v42, 16  ;;  %v11924_v50 = vld [vmem:[%s11607_s12 + $0x58] sm:$0xff]  }
  0x4d   : > { %10517 = vmatprep.mubr.msk.bf16.mxu0 %vm562_vm2, %v1031_v31  ;;  %v2236_v31 = vrot.slane %v11885_v21, 2 }
  0x4e   : > { %v2221_v53 = vrot.slane %v9356_v47, 2  ;;  %v1467_v47 = vrot.slane %v11839_v52, 1 }
  0x50   : > { %v11855_v63 = vsel %vm2220_vm4, %v2221_v53, %v2222_v54  ;;  %v2240_v53 = vrot.slane %v11924_v50, 2  ;;  %v1795_v54 = vshll.u32 %v11832_v49, 16 }
  0x53   : > { %10484 = vmatmul.mubr.msk.bf16.gmra.mxu1 %vm562_vm2, %v11716_v23  ;;  %v1328_v23 = vld [vmem:[%s11607_s12 + $0x8] sm:$0xe] }
  0x54   : > { %10518 = vmatmul.mubr.msk.bf16.gmra.mxu0 %vm562_vm2, %v1033_v39  ;;  %10487 = vmatprep.mubr.msk.bf16.mxu1 %vm562_vm2, %v11730_v38  ;;  %v1039_v38 = vsel %vm1020_vm3, %v1036_v35, %v1038_v10  ;;  %v11861_v3 = vcombine.low %v1328_v23, %v1329_v36  ;;  %v11910_v39 = vsel %vm2220_vm4, %v2232_v25, %v2234_v15  ;;  %v11919_v35 = vld [vmem:[%s11607_s12 + $0x50] sm:$0xff]   ;;  %v1785_v23 = vrot.slane %v1783_v33, 1 }
  0x55   : > { %10521 = vmatprep.mubr.msk.bf16.mxu0 %vm562_vm2, %v1035_v34  ;;  %v11914_v34 = vsel %vm2220_vm4, %v2234_v15, %v2236_v31  ;;  %v11976_v15 = vld [vmem:[%s11607_s12 + $0x70] sm:$0xff]   ;;  %v1053_v33 = vsel %vm1020_vm3, %v1050_v2, %v1052_v8 }
  0x56   : > { %v1775_v5 = vshrl.u32 %v11861_v3, 16  ;;  %v1460_v6 = vrot.slane %v11861_v3, 1  ;;  %v1778_v30 = vshll.u32 %v11861_v3, 16  ;;  %v12014_v3 = vld [vmem:[%s11607_s12 + $0x80] sm:$0xff]  }
  0x58   : > { %v11906_v28 = vrot.slane %v1775_v5, 1  ;;  %v1780_v36 = vrot.slane %v1778_v30, 2  ;;  %v1051_v5 = vsel %vm1020_vm3, %v1048_v1, %v1050_v2  ;;  %v1462_v2 = vsel %vm1020_vm3, %v1460_v6, %v1461_v18 }
  0x59   : > { %v1057_v6 = vsel %vm1020_vm3, %v1054_v17, %v1056_v19  ;;  %v1466_v19 = vsel %vm1020_vm3, %v1463_v20, %v1465_v27  ;;  %v12059_v20 = vld [vmem:[%s11607_s12 + $0x98] ss:$0 sps:$4 sm:$0x33]  }
  0x5b   : > { %10488 = vmatmul.mubr.msk.bf16.gmra.mxu1 %vm562_vm2, %v11733_v40  ;;  %v2230_v40 = vrot.slane %v11846_v58, 2 }
  0x5c   : > { %10522 = vmatmul.mubr.msk.bf16.gmra.mxu0 %vm562_vm2, %v1037_v48  ;;  %10491 = vmatprep.mubr.msk.bf16.mxu1 %vm562_vm2, %v11625_v13  ;;  %v1041_v13 = vsel %vm1020_vm3, %v1038_v10, %v1040_v55  ;;  %v1045_v10 = vsel %vm1020_vm3, %v1042_v56, %v1044_v57  ;;  %v1047_v48 = vsel %vm1020_vm3, %v1044_v57, %v1046_v60  ;;  %v11946_v57 = vld [vmem:[%s11607_s12 + $0x60] sm:$0xff]   ;;  %v1810_v60 = vshrl.u32 %v11839_v52, 16 }
  0x5d   : > { %10525 = vmatprep.mubr.msk.bf16.mxu0 %vm562_vm2, %v1039_v38  ;;  %v11895_v45 = vsel %vm2220_vm4, %v2228_v16, %v2230_v40  ;;  %v11900_v7 = vsel %vm2220_vm4, %v2230_v40, %v2232_v25  ;;  %v1788_v38 = vrot.slane %v1786_v32, 2  ;;  %v1469_v16 = vrot.slane %v11846_v58, 1  ;;  %v11986_v32 = vld [vmem:[%s11607_s12 + $0x78] sm:$0xff]  }
  0x5e   : > { %v1801_v40 = vshrl.u32 %v11836_v51, 16 }
  0x63   : > { %10492 = vmatmul.mubr.msk.bf16.gmra.mxu1 %vm562_vm2, %v11628_v14  ;;  %v2238_v14 = vrot.slane %v11919_v35, 2 }
  0x64   : > { %10526 = vmatmul.mubr.msk.bf16.gmra.mxu0 %vm562_vm2, %v1041_v13  ;;  %10495 = vmatprep.mubr.msk.bf16.mxu1 %vm562_vm2, %v11640_v24  ;;  %v1792_v24 = vshrl.u32 %v11832_v49, 16  ;;  %v2242_v13 = vrot.slane %v11946_v57, 2  ;;  %v12054_v49 = vld [vmem:[%s11607_s12 + $0x90] sm:$0xff]  }
  0x65   : > { %10529 = vmatprep.mubr.msk.bf16.mxu0 %vm562_vm2, %v1043_v29  ;;  %v11937_v55 = vsel %vm2220_vm4, %v2236_v31, %v2238_v14  ;;  %v11941_v56 = vsel %vm2220_vm4, %v2238_v14, %v2240_v53  ;;  %v2244_v29 = vrot.slane %v11951_v59, 2  ;;  %v1803_v31 = vrot.slane %v1801_v40, 1 }
  0x66   : > { %v1794_v25 = vrot.slane %v1792_v24, 1  ;;  %v11967_v30 = vsel %vm2220_vm4, %v2240_v53, %v2242_v13  ;;  %v2246_v14 = vrot.slane %v11976_v15, 2  ;;  %v1813_v53 = vshll.u32 %v11839_v52, 16 }
  0x67   : > { %v11971_v1 = vsel %vm2220_vm4, %v2242_v13, %v2244_v29  ;;  %v1819_v24 = vshrl.u32 %v11846_v58, 16  ;;  %v1789_v40 = vor.u32 %v1788_v38, %v1785_v23  ;;  %v12023_v13 = vld [vmem:[%s11607_s12 + $0x88] sm:$0xff]   ;;  %v1471_v52 = vrot.slane %v11852_v61, 1 }
  0x6b   : > { %10496 = vmatmul.mubr.msk.bf16.gmra.mxu1 %vm562_vm2, %v11658_v37  ;;  %v1797_v37 = vrot.slane %v1795_v54, 2 }
  0x6c   : > { %10530 = vmatmul.mubr.msk.bf16.gmra.mxu0 %vm562_vm2, %v1045_v10  ;;  %10499 = vmatprep.mubr.msk.bf16.mxu1 %vm562_vm2, %v11667_v44  ;;  %v1804_v44 = vshll.u32 %v11836_v51, 16  ;;  %v1055_v10 = vsel %vm1020_vm3, %v1052_v8, %v1054_v17  ;;  %v12004_v8 = vsel %vm2220_vm4, %v2244_v29, %v2246_v14  ;;  %v1822_v29 = vshll.u32 %v11846_v58, 16 }
  0x6d   : > { %10533 = vmatprep.mubr.msk.bf16.mxu0 %vm562_vm2, %v1047_v48  ;;  %v2252_v17 = vrot.slane %v12023_v13, 2  ;;  %v1798_v18 = vor.u32 %v1797_v37, %v1794_v25  ;;  %v12067_v25 = vld [vmem:[%s15251_s2 + $0x10] sm:$0x3] }
  0x6e   : > { %v1806_v48 = vrot.slane %v1804_v44, 2 }
  0x70   : > { %v1807_v38 = vor.u32 %v1806_v48, %v1803_v31  ;;  %v2254_v31 = vrot.slane %v12054_v49, 2  ;;  %v1470_v48 = vsel %vm1020_vm3, %v1467_v47, %v1469_v16 }
  0x72   : > { %v1808_v37 = vsel %vm1773_vm5, %v1798_v18, %v1807_v38 }
  0x73   : > { %10500 = vmatmul.mubr.msk.bf16.gmra.mxu1 %vm562_vm2, %v11694_v62  ;;  %v2248_v62 = vrot.slane %v11986_v32, 2 }
  0x74   : > { %10534 = vmatmul.mubr.msk.bf16.gmra.mxu0 %vm562_vm2, %v1049_v0  ;;  %10503 = vmatprep.mubr.msk.bf16.mxu1 %vm562_vm2, %v11707_v11  ;;  %v1812_v11 = vrot.slane %v1810_v60, 1  ;;  %v1781_v0 = vor.u32 %v1780_v36, %v11906_v28  ;;  %v2250_v28 = vrot.slane %v12014_v3, 2  ;;  %v12043_v36 = vld [vmem:[%s15251_s2 + $0xe] sm:$0x3]  ;;  %v1799_v60 = vsel %vm1773_vm5, %v1789_v40, %v1798_v18 }
  0x75   : > { %10537 = vmatprep.mubr.msk.bf16.mxu0 %vm562_vm2, %v1051_v5  ;;  %v12008_v54 = vsel %vm2220_vm4, %v2246_v14, %v2248_v62  ;;  %v1815_v5 = vrot.slane %v1813_v53, 2  ;;  %v1828_v14 = vshrl.u32 %v11852_v61, 16  ;;  %v1831_v53 = vshll.u32 %v11852_v61, 16 }
  0x76   : > { %v1790_v44 = vsel %vm1773_vm5, %v1781_v0, %v1789_v40  ;;  %v12046_v42 = vsel %vm2220_vm4, %v2248_v62, %v2250_v28  ;;  %v12050_v23 = vsel %vm2220_vm4, %v2250_v28, %v2252_v17  ;;  %v12086_v62 = vsel %vm2220_vm4, %v2252_v17, %v2254_v31 }
  0x77   : > { %v1816_v51 = vor.u32 %v1815_v5, %v1812_v11  ;;  %v1849_v11 = vshll.u32 %v11885_v21, 16  ;;  %v1473_v0 = vrot.slane %v11870_v9, 1  ;;  %v1855_v40 = vshrl.u32 %v11919_v35, 16 }
  0x78   : > { %v1858_v61 = vshll.u32 %v11919_v35, 16  ;;  %v1830_v5 = vrot.slane %v1828_v14, 1  ;;  %v1475_v17 = vrot.slane %v11885_v21, 1  ;;  %v1876_v14 = vshll.u32 %v11946_v57, 16 }
  0x79   : > { %v1851_v18 = vrot.slane %v1849_v11, 2  ;;  %v1857_v58 = vrot.slane %v1855_v40, 1 }
  0x7b   : > { %10504 = vmatmul.mubr.msk.bf16.gmra.mxu1 %vm562_vm2, %v11721_v26  ;;  %v1821_v26 = vrot.slane %v1819_v24, 1  ;;  %v1840_v24 = vshll.u32 %v11870_v9, 16 }
  0x7c   : > { %10538 = vmatmul.mubr.msk.bf16.gmra.mxu0 %vm562_vm2, %v1053_v33  ;;  %10547 = vmatprep.mubr.msk.bf16.mxu1 %vm562_vm2, %v1462_v2  ;;  %v1824_v33 = vrot.slane %v1822_v29, 2  ;;  %v1837_v2 = vshrl.u32 %v11870_v9, 16  ;;  %v1472_v29 = vsel %vm1020_vm3, %v1469_v16, %v1471_v52  ;;  %v1477_v9 = vrot.slane %v11919_v35, 1 }
  0x7d   : > { %10541 = vmatprep.mubr.msk.bf16.mxu0 %vm562_vm2, %v1055_v10  ;;  %v2256_v10 = vrot.slane %v12059_v20, 2  ;;  %v1860_v16 = vrot.slane %v1858_v61, 2  ;;  %v1867_v35 = vshll.u32 %v11924_v50, 16 }
  0x7e   : > { %v1478_v11 = vsel %vm1020_vm3, %v1475_v17, %v1477_v9 }
  0x83   : > { %10548 = vmatmul.mubr.msk.bf16.vlgmr.msra.gmra.mxu1 %vm562_vm2, %v1464_v43  ;;  %v1839_v43 = vrot.slane %v1837_v2, 1  ;;  %v1476_v2 = vsel %vm1020_vm3, %v1473_v0, %v1475_v17  ;;  %v1878_v17 = vrot.slane %v1876_v14, 2 }
  0x84   : > { %10542 = vmatmul.mubr.msk.bf16.gmra.mxu0 %vm562_vm2, %v1057_v6  ;;  %10622 = vmatpush3.bf16.msra.mxu1 %v11821_v41  ;;  %v1468_v41 = vsel %vm1020_vm3, %v1465_v27, %v1467_v47  ;;  %v12091_v27 = vsel %vm2220_vm4, %v2254_v31, %v2256_v10  ;;  %v1825_v47 = vor.u32 %v1824_v33, %v1821_v26  ;;  %v1842_v26 = vrot.slane %v1840_v24, 2  ;;  %v12120_v33 = vld [vmem:[%s11607_s12 + $0x14] sm:$0xf]  ;;  %v3414_v10 = vld [vmem:[%s11607_s12 + $0x10] sm:$0x8] }
  0x85   : > { %10585 = vmatprep.mubr.msk.bf16.mxu0 %vm562_vm2, %v1790_v44  ;;  %10551 = vmatprep.mubr.msk.bf16.mxu1 %vm562_vm2, %v1466_v19  ;;  %v1817_v6 = vsel %vm1773_vm5, %v1807_v38, %v1816_v51  ;;  %v1833_v44 = vrot.slane %v1831_v53, 2  ;;  %v1474_v38 = vsel %vm1020_vm3, %v1471_v52, %v1473_v0  ;;  %v1873_v31 = vshrl.u32 %v11946_v57, 16  ;;  %v12130_v53 = vld [vmem:[%s11607_s12 + $0x20] sm:$0xff]  }
  0x86   : > { %11289 = vmatprep.subr.msk.bf16.mxu1 %vm617_vm0, %v12043_v36  ;;  %v1826_v28 = vsel %vm1773_vm5, %v1816_v51, %v1825_v47  ;;  %v9434_v51 = vcombine.low %v3414_v10, %v12120_v33  ;;  %v1485_v10 = vrot.slane %v11976_v15, 1 }
  0x88   : > { %v3421_v24 = vrot.slane %v9434_v51, 3 }
  0x8b   : > { %10552 = vmatmul.mubr.msk.bf16.gmra.mxu1 %vm562_vm2, %v1468_v41  ;;  %v12124_v41 = vld [vmem:[%s11607_s12 + $0x18] sm:$0xff]  }
  0x8c   : > { %10586 = vmatmul.mubr.msk.bf16.vlgmr.msra.gmra.mxu0 %vm562_vm2, %v1799_v60  ;;  %10555 = vmatprep.mubr.msk.bf16.mxu1 %vm562_vm2, %v1470_v48  ;;  %v1834_v60 = vor.u32 %v1833_v44, %v1830_v5  ;;  %v1479_v5 = vrot.slane %v11924_v50, 1  ;;  %v1481_v44 = vrot.slane %v11946_v57, 1 }
  0x8d   : > { %10660 = vmatpush3.bf16.msra.mxu0 %v11827_v46  ;;  %10589 = vmatprep.mubr.msk.bf16.mxu0 %vm562_vm2, %v1808_v37  ;;  %v1846_v46 = vshrl.u32 %v11885_v21, 16  ;;  %v1843_v37 = vor.u32 %v1842_v26, %v1839_v43  ;;  %v1864_v21 = vshrl.u32 %v11924_v50, 16  ;;  %v1875_v26 = vrot.slane %v1873_v31, 1  ;;  %v3807_v31 = vld [vmem:[%s15250_s1] sm:$0xff] }
  0x8e   : > { %11290 = vmatprep.subr.msk.bf16.mxu0 %vm617_vm0, %v12067_v25  ;;  %v1835_v48 = vsel %vm1773_vm5, %v1825_v47, %v1834_v60  ;;  %v15257_v47 = vrot.slane %v12130_v53, 3  ;;  %v1482_v50 = vsel %vm1020_vm3, %v1479_v5, %v1481_v44 }
  0x8f   : > { %v1848_v19 = vrot.slane %v1846_v46, 1  ;;  %v1844_v52 = vsel %vm1773_vm5, %v1834_v60, %v1843_v37  ;;  %v3422_v46 = vrot.slane %v12124_v41, 3 }
  0x91   : > { %v1852_v40 = vor.u32 %v1851_v18, %v1848_v19  ;;  %v12141_v61 = vsel %vm3420_vm6, %v3421_v24, %v3422_v46  ;;  %v12149_v0 = vsel %vm3420_vm6, %v3422_v46, %v15257_v47  ;;  %v1480_v18 = vsel %vm1020_vm3, %v1477_v9, %v1479_v5  ;;  %v3809_v24 = vld [vmem:[%s15250_s1 + $0x10] sm:$0xff] }
  0x92   : > { %v12168_v9 = vor.u32 %v1878_v17, %v1875_v26  ;;  %v1900_v46 = vshrl.u32 %v11986_v32, 16  ;;  %v1909_v5 = vshrl.u32 %v12014_v3, 16  ;;  %v3811_v26 = vld [vmem:[%s15250_s1 + $0x20] sm:$0xff]  ;;  %v1489_v17 = vrot.slane %v12014_v3, 1 }
  0x93   : > { %10556 = vmatmul.mubr.msk.bf16.gmra.mxu1 %vm562_vm2, %v1472_v29  ;;  %v1866_v29 = vrot.slane %v1864_v21, 1  ;;  %v1853_v43 = vsel %vm1773_vm5, %v1843_v37, %v1852_v40  ;;  %v1894_v37 = vshll.u32 %v11976_v15, 16  ;;  %v11538_v21 = vmov 0  }
  0x94   : > { %10590 = vmatmul.mubr.msk.bf16.gmra.mxu0 %vm562_vm2, %v1817_v6  ;;  %10559 = vmatprep.mubr.msk.bf16.mxu1 %vm562_vm2, %v1474_v38  ;;  %v12144_v6 = vor.u32 %v1860_v16, %v1857_v58  ;;  %v1882_v38 = vshrl.u32 %v11951_v59, 16  ;;  %v1885_v58 = vshll.u32 %v11951_v59, 16  ;;  %v1891_v16 = vshrl.u32 %v11976_v15, 16  ;;  %4059 = vst [vmem:[#allocation2] sm:$0xf] %v11538_v21 }
  0x95   : > { %10593 = vmatprep.mubr.msk.bf16.mxu0 %vm562_vm2, %v1826_v28  ;;  %v1869_v28 = vrot.slane %v1867_v35, 2  ;;  %11303 = vset.pattern.permute.xlu0 %v11538_v21  ;;  %4060 = vst [vmem:[#allocation2 + $0x4] sm:$0xf] %v11538_v21  ;;  %4061 = vst [vmem:[#allocation2 + $0x8] sm:$0xf] %v11538_v21  ;;  %v1483_v35 = vrot.slane %v11951_v59, 1 }
  0x96   : > { %v1862_v19 = vsel %vm1773_vm5, %v1852_v40, %v12144_v6  ;;  %4062 = vst [vmem:[#allocation2 + $0xc] sm:$0xf] %v11538_v21  ;;  %4063 = vst [vmem:[#allocation2 + $0x10] sm:$0xf] %v11538_v21  ;;  %11304 = vset.pattern.permute.xlu1 %v11538_v21  ;;  %3845 = vperm.xlu0 %11303, %v3807_v31   ;;  %v1887_v51 = vrot.slane %v1885_v58, 2  ;;  %v3814_v31 = vld [vmem:[%s15250_s1 + $0x38] sm:$0xff] }
  0x97   : > { %v1870_v60 = vor.u32 %v1869_v28, %v1866_v29  ;;  %4064 = vst [vmem:[#allocation2 + $0x14] sm:$0xf] %v11538_v21  ;;  %4065 = vst [vmem:[#allocation2 + $0x18] sm:$0xf] %v11538_v21  ;;  %3855 = vperm.xlu1 %11304, %v3809_v24   ;;  %v1484_v15 = vsel %vm1020_vm3, %v1481_v44, %v1483_v35  ;;  %v1486_v40 = vsel %vm1020_vm3, %v1483_v35, %v1485_v10  ;;  %v3810_v29 = vld [vmem:[%s15250_s1 + $0x18] sm:$0xff] }
  0x98   : > { %4066 = vst [vmem:[#allocation2 + $0x1c] sm:$0xf] %v11538_v21  ;;  %4067 = vst [vmem:[#allocation2 + $0x20] sm:$0xf] %v11538_v21  ;;  %v1912_v44 = vshll.u32 %v12014_v3, 16  ;;  %v3813_v3 = vld [vmem:[%s15250_s1 + $0x30] sm:$0xff] }
  0x99   : > { %4068 = vst [vmem:[#allocation2 + $0x24] sm:$0xf] %v11538_v21  ;;  %4069 = vst [vmem:[#allocation2 + $0x28] sm:$0xf] %v11538_v21  ;;  %v1871_v14 = vsel %vm1773_vm5, %v12144_v6, %v1870_v60  ;;  %v1880_v59 = vsel %vm1773_vm5, %v1870_v60, %v12168_v9  ;;  %v1903_v6 = vshll.u32 %v11986_v32, 16  ;;  %v1921_v35 = vshll.u32 %v12023_v13, 16 }
  0x9a   : > { %4070 = vst [vmem:[#allocation2 + $0x2c] sm:$0xf] %v11538_v21  ;;  %4071 = vst [vmem:[#allocation2 + $0x30] sm:$0xf] %v11538_v21  ;;  %v1914_v58 = vrot.slane %v1912_v44, 2 }
  0x9b   : > { %10560 = vmatmul.mubr.msk.bf16.gmra.mxu1 %vm562_vm2, %v1476_v2  ;;  %4072 = vst [vmem:[#allocation2 + $0x34] sm:$0xf] %v11538_v21  ;;  %4073 = vst [vmem:[#allocation2 + $0x38] sm:$0xf] %v11538_v21  ;;  %v1896_v2 = vrot.slane %v1894_v37, 2  ;;  %3860 = vperm.xlu1 %11304, %v3810_v29   ;;  %v1936_v29 = vshrl.u32 %v12059_v20, 16 }
  0x9c   : > { %10594 = vmatmul.mubr.msk.bf16.gmra.mxu0 %vm562_vm2, %v1835_v48  ;;  %10563 = vmatprep.mubr.msk.bf16.mxu1 %vm562_vm2, %v1478_v11  ;;  %4074 = vst [vmem:[#allocation2 + $0x3c] sm:$0xf] %v11538_v21  ;;  %4075 = vst [vmem:[#allocation2 + $0x40] sm:$0xf] %v11538_v21  ;;  %v1884_v48 = vrot.slane %v1882_v38, 1  ;;  %v3808_v11 = vld [vmem:[%s15250_s1 + $0x8] sm:$0xff] }
  0x9d   : > { %10597 = vmatprep.mubr.msk.bf16.mxu0 %vm562_vm2, %v1844_v52  ;;  %4076 = vst [vmem:[#allocation2 + $0x44] sm:$0xf] %v11538_v21  ;;  %4077 = vst [vmem:[#allocation2 + $0x48] sm:$0xf] %v11538_v21  ;;  %v1893_v52 = vrot.slane %v1891_v16, 1  ;;  %3850 = vperm.xlu0 %11303, %v3808_v11   ;;  %v1905_v38 = vrot.slane %v1903_v6, 2 }
  0x9e   : > { %4078 = vst [vmem:[#allocation2 + $0x4c] sm:$0xf] %v11538_v21  ;;  %4079 = vst [vmem:[#allocation2 + $0x50] sm:$0xf] %v11538_v21  ;;  %v1888_v57 = vor.u32 %v1887_v51, %v1884_v48  ;;  %v3812_v16 = vld [vmem:[%s15250_s1 + $0x28] sm:$0xff]  ;;  %v1927_v48 = vshrl.u32 %v12054_v49, 16 }
  0x9f   : > { %4080 = vst [vmem:[#allocation2 + $0x54] sm:$0xf] %v11538_v21  ;;  %4081 = vst [vmem:[#allocation2 + $0x58] sm:$0xf] %v11538_v21  ;;  %v1897_v28 = vor.u32 %v1896_v2, %v1893_v52  ;;  %3870 = vperm.xlu1 %11304, %v3812_v16   ;;  %v1491_v51 = vrot.slane %v12023_v13, 1  ;;  %v3815_v52 = vld [vmem:[%s15250_s1 + $0x40] sm:$0xff] }
  0xa0   : > { %4082 = vst [vmem:[#allocation2 + $0x5c] sm:$0xf] %v11538_v21  ;;  %4083 = vst [vmem:[#allocation2 + $0x60] sm:$0xf] %v11538_v21  ;;  %v1493_v2 = vrot.slane %v12054_v49, 1 }
  0xa1   : > { %4084 = vst [vmem:[#allocation2 + $0x64] sm:$0xf] %v11538_v21  ;;  %4085 = vst [vmem:[#allocation2 + $0x68] sm:$0xf] %v11538_v21  ;;  %3865 = vperm.xlu0 %11303, %v3811_v26  }
  0xa2   : > { %4086 = vst [vmem:[#allocation2 + $0x6c] sm:$0xf] %v11538_v21  ;;  %4087 = vst [vmem:[#allocation2 + $0x70] sm:$0xf] %v11538_v21 }
  0xa3   : > { %10564 = vmatmul.mubr.msk.bf16.gmra.mxu1 %vm562_vm2, %v1480_v18  ;;  %4088 = vst [vmem:[#allocation2 + $0x74] sm:$0xf] %v11538_v21  ;;  %4089 = vst [vmem:[#allocation2 + $0x78] sm:$0xf] %v11538_v21  ;;  %v1889_v18 = vsel %vm1773_vm5, %v12168_v9, %v1888_v57  ;;  %3880 = vperm.xlu1 %11304, %v3814_v31  }
  0xa4   : > { %10598 = vmatmul.mubr.msk.bf16.gmra.mxu0 %vm562_vm2, %v1853_v43  ;;  %4090 = vst [vmem:[#allocation2 + $0x7c] sm:$0xf] %v11538_v21  ;;  %4091 = vst [vmem:[#allocation2 + $0x80] sm:$0xf] %v11538_v21  ;;  %10567 = vmatprep.mubr.msk.bf16.mxu1 %vm562_vm2, %v1482_v50  ;;  %v1487_v43 = vrot.slane %v11986_v32, 1  ;;  %v1911_v50 = vrot.slane %v1909_v5, 1  ;;  %v1898_v32 = vsel %vm1773_vm5, %v1888_v57, %v1897_v28 }
  0xa5   : > { %10601 = vmatprep.mubr.msk.bf16.mxu0 %vm562_vm2, %v1862_v19  ;;  %4092 = vst [vmem:[#allocation2 + $0x84] sm:$0xf] %v11538_v21  ;;  %4093 = vst [vmem:[#allocation2 + $0x88] sm:$0xf] %v11538_v21  ;;  %v1902_v19 = vrot.slane %v1900_v46, 1  ;;  %3875 = vperm.xlu0 %11303, %v3813_v3   ;;  %v3816_v46 = vld [vmem:[%s15250_s1 + $0x48] sm:$0xff]  ;;  %v1494_v57 = vsel %vm1020_vm3, %v1491_v51, %v1493_v2 }
  0xa6   : > { %4094 = vst [vmem:[#allocation2 + $0x8c] sm:$0xf] %v11538_v21  ;;  %4095 = vst [vmem:[#allocation2 + $0x90] sm:$0xf] %v11538_v21  ;;  %v1488_v60 = vsel %vm1020_vm3, %v1485_v10, %v1487_v43  ;;  %v1490_v37 = vsel %vm1020_vm3, %v1487_v43, %v1489_v17  ;;  %v1915_v10 = vor.u32 %v1914_v58, %v1911_v50  ;;  %v3818_v43 = vld [vmem:[%s15250_s1 + $0x58] sm:$0xff]  ;;  %v3820_v58 = vld [vmem:[%s15250_s1 + $0x68] sm:$0xff] }
  0xa7   : > { %4096 = vst [vmem:[#allocation2 + $0x94] sm:$0xf] %v11538_v21  ;;  %4097 = vst [vmem:[#allocation2 + $0x98] sm:$0xf] %v11538_v21  ;;  %v1906_v9 = vor.u32 %v1905_v38, %v1902_v19  ;;  %3890 = vperm.xlu1 %11304, %v3816_v46   ;;  %v2528_v19 = vld [vmem:[%s11607_s12 + $0x10] sm:$0xc] }
  0xa8   : > { %4098 = vst [vmem:[#allocation2 + $0x9c] sm:$0xf] %v11538_v21  ;;  %4099 = vst [vmem:[#allocation2 + $0xa0] sm:$0xf] %v11538_v21  ;;  %v1918_v21 = vshrl.u32 %v12023_v13, 16  ;;  %v1492_v13 = vsel %vm1020_vm3, %v1489_v17, %v1491_v51  ;;  %v3821_v3 = vld [vmem:[%s15250_s1 + $0x70] sm:$0xff] }
  0xa9   : > { %3885 = vperm.xlu0 %11303, %v3815_v52   ;;  %v1907_v24 = vsel %vm1773_vm5, %v1897_v28, %v1906_v9  ;;  %v1916_v11 = vsel %vm1773_vm5, %v1906_v9, %v1915_v10  ;;  %v11343_v5 = vld [vmem:[%s11607_s12 + $0x98] ss:$0 sps:$4 sm:$0x11]   ;;  %v1939_v28 = vshll.u32 %v12059_v20, 16  ;;  %v1938_v20 = vrot.slane %v1936_v29, 1  ;;  %v12348_v29 = vld [vmem:[%s11607_s12 + $0x48] sm:$0xff]  }
  0xaa   : > { %v1495_v17 = vrot.slane %v11343_v5, 1  ;;  %v3822_v9 = vld [vmem:[%s15250_s1 + $0x78] sm:$0xff]  ;;  %v3199_v51 = vsel %vm617_vm0, %v12043_v36, 0  ;;  %v2663_v52 = vrot.slane %v12130_v53, 2  ;;  %v3827_v36 = vld [vmem:[%s15250_s1 + $0xa0] sm:$0xff]  ;;  %v3513_v46 = vsel %vm617_vm0, %v12067_v25, 0 }
  0xab   : > { %10568 = vmatmul.mubr.msk.bf16.gmra.mxu1 %vm562_vm2, %v1484_v15  ;;  %v1923_v15 = vrot.slane %v1921_v35, 2  ;;  %3900 = vperm.xlu1 %11304, %v3818_v43   ;;  %v1941_v50 = vrot.slane %v1939_v28, 2  ;;  %v3823_v35 = vld [vmem:[%s15250_s1 + $0x80] sm:$0xff]  ;;  %v3830_v25 = vld [vmem:[%s15250_s1 + $0xb8] sm:$0xff] }
  0xac   : > { %10602 = vmatmul.mubr.msk.bf16.gmra.mxu0 %vm562_vm2, %v1871_v14  ;;  %10571 = vmatprep.mubr.msk.bf16.mxu1 %vm562_vm2, %v1486_v40  ;;  %v1930_v14 = vshll.u32 %v12054_v49, 16  ;;  %v1929_v40 = vrot.slane %v1927_v48, 1  ;;  %v3817_v49 = vld [vmem:[%s15250_s1 + $0x50] sm:$0xff]  ;;  %v3831_v5 = vld [vmem:[%s15250_s1 + $0xc0] sm:$0xff] }
  0xad   : > { %10605 = vmatprep.mubr.msk.bf16.mxu0 %vm562_vm2, %v1880_v59  ;;  %v1920_v59 = vrot.slane %v1918_v21, 1  ;;  %3895 = vperm.xlu0 %11303, %v3817_v49   ;;  %v2661_v21 = vrot.slane %v12124_v41, 2 }
  0xae   : > { %v1932_v6 = vrot.slane %v1930_v14, 2  ;;  %v12288_v14 = vld [vmem:[%s11607_s12 + $0x28] sm:$0xff]  }
  0xaf   : > { %v1924_v44 = vor.u32 %v1923_v15, %v1920_v59  ;;  %3910 = vperm.xlu1 %11304, %v3820_v58   ;;  %v2664_v59 = vsel %vm2220_vm4, %v2661_v21, %v2663_v52  ;;  %v12311_v15 = vld [vmem:[%s11607_s12 + $0x30] sm:$0xff]  }
  0xb0   : > { %v1933_v26 = vor.u32 %v1932_v6, %v1929_v40  ;;  %v12320_v40 = vld [vmem:[%s11607_s12 + $0x38] sm:$0xff]   ;;  %v2667_v6 = vrot.slane %v12311_v15, 2 }
  0xb1   : > { %v1925_v38 = vsel %vm1773_vm5, %v1915_v10, %v1924_v44  ;;  %v3824_v10 = vld [vmem:[%s15250_s1 + $0x88] sm:$0xff] }
  0xb2   : > { %v1934_v16 = vsel %vm1773_vm5, %v1924_v44, %v1933_v26  ;;  %v3832_v44 = vld [vmem:[%s15250_s1 + $0xc8] sm:$0xff] }
  0xb3   : > { %10572 = vmatmul.mubr.msk.bf16.gmra.mxu1 %vm562_vm2, %v1488_v60  ;;  %v1496_v60 = vsel %vm1020_vm3, %v1493_v2, %v1495_v17  ;;  %3920 = vperm.xlu1 %11304, %v3822_v9   ;;  %v3826_v2 = vld [vmem:[%s15250_s1 + $0x98] sm:$0xff]  ;;  %v3837_v9 = vld [vmem:[%s15250_s1 + $0xf0] sm:$0xff] }
  0xb4   : > { %10606 = vmatmul.mubr.msk.bf16.gmra.mxu0 %vm562_vm2, %v1889_v18  ;;  %10575 = vmatprep.mubr.msk.bf16.mxu1 %vm562_vm2, %v1490_v37  ;;  %v3819_v18 = vld [vmem:[%s15250_s1 + $0x60] sm:$0xff]  ;;  %v1942_v37 = vor.u32 %v1941_v50, %v1938_v20 }
  0xb5   : > { %10609 = vmatprep.mubr.msk.bf16.mxu0 %vm562_vm2, %v1898_v32  ;;  %3905 = vperm.xlu0 %11303, %v3819_v18   ;;  %v12263_v32 = vcombine.low %v2528_v19, %v12120_v33  ;;  %v2673_v18 = vrot.slane %v12348_v29, 2 }
  0xb6   : > { %v1943_v31 = vsel %vm1773_vm5, %v1933_v26, %v1942_v37  ;;  %v3834_v26 = vld [vmem:[%s15250_s1 + $0xd8] sm:$0xff] }
  0xb7   : > { %v2660_v33 = vrot.slane %v12263_v32, 2  ;;  %3930 = vperm.xlu1 %11304, %v3824_v10   ;;  %v12390_v37 = vld [vmem:[%s11607_s12 + $0x58] sm:$0xff]  }
  0xb9   : > { %3915 = vperm.xlu0 %11303, %v3821_v3   ;;  %v2662_v48 = vsel %vm2220_vm4, %v2660_v33, %v2661_v21 }
  0xbb   : > { %10576 = vmatmul.mubr.msk.bf16.gmra.mxu1 %vm562_vm2, %v1492_v13  ;;  %3940 = vperm.xlu1 %11304, %v3826_v2   ;;  %v2669_v13 = vrot.slane %v12320_v40, 2 }
  0xbc   : > { %10610 = vmatmul.mubr.msk.bf16.gmra.mxu0 %vm562_vm2, %v1907_v24  ;;  %10579 = vmatprep.mubr.msk.bf16.mxu1 %vm562_vm2, %v1494_v57  ;;  %v2665_v24 = vrot.slane %v12288_v14, 2  ;;  %v12341_v57 = vld [vmem:[%s11607_s12 + $0x40] sm:$0xff]  }
  0xbd   : > { %10613 = vmatprep.mubr.msk.bf16.mxu0 %vm562_vm2, %v1916_v11  ;;  %3925 = vperm.xlu0 %11303, %v3823_v35   ;;  %v2671_v43 = vrot.slane %v12341_v57, 2 }
  0xbe   : > { %v2666_v11 = vsel %vm2220_vm4, %v2663_v52, %v2665_v24  ;;  %v2668_v49 = vsel %vm2220_vm4, %v2665_v24, %v2667_v6 }
  0xbf   : > { %v2672_v58 = vsel %vm2220_vm4, %v2669_v13, %v2671_v43  ;;  %v2674_v3 = vsel %vm2220_vm4, %v2671_v43, %v2673_v18 }
  0xc3   : > { %10580 = vmatmul.mubr.msk.bf16.gmra.mxu1 %vm562_vm2, %v1496_v60 }
  0xc4   : > { %10614 = vmatmul.mubr.msk.bf16.gmra.mxu0 %vm562_vm2, %v1925_v38  ;;  %10623 = vmatprep.mubr.msk.bf16.mxu1 %vm562_vm2, %v11855_v63  ;;  %v3825_v63 = vld [vmem:[%s15250_s1 + $0x90] sm:$0xff]  ;;  %v3835_v38 = vld [vmem:[%s15250_s1 + $0xe0] sm:$0xff] }
  0xc5   : > { %10617 = vmatprep.mubr.msk.bf16.mxu0 %vm562_vm2, %v1934_v16  ;;  %3935 = vperm.xlu0 %11303, %v3825_v63   ;;  %v3836_v16 = vld [vmem:[%s15250_s1 + $0xe8] sm:$0xff]  ;;  %v2677_v63 = vrot.slane %v12390_v37, 2 }
  0xc9   : > { %3945 = vperm.xlu0 %11303, %v3827_v36   ;;  %v3840_v36 = vld [vmem:[%s15250_s1 + $0x108] sm:$0xff] }
  0xcb   : > { %10624 = vmatmul.mubr.msk.bf16.vlgmr.msra.gmra.mxu1 %vm562_vm2, %v11864_v4  ;;  %v3828_v4 = vld [vmem:[%s15250_s1 + $0xa8] sm:$0xff] }
  0xcc   : > { %10618 = vmatmul.mubr.msk.bf16.gmra.mxu0 %vm562_vm2, %v1943_v31  ;;  %10698 = vmatpush3.bf16.msra.mxu1 %v3199_v51  ;;  %v3838_v31 = vld [vmem:[%s15250_s1 + $0xf8] sm:$0xff]  ;;  %v3839_v51 = vld [vmem:[%s15250_s1 + $0x100] sm:$0xff] }
  0xcd   : > { %10661 = vmatprep.mubr.msk.bf16.mxu0 %vm562_vm2, %v2662_v48  ;;  %10627 = vmatprep.mubr.msk.bf16.mxu1 %vm562_vm2, %v11873_v12  ;;  %v3829_v12 = vld [vmem:[%s15250_s1 + $0xb0] sm:$0xff] }
  0xce   : > { %3950 = vperm.xlu1 %11304, %v3828_v4   ;;  %3955 = vperm.xlu0 %11303, %v3829_v12  }
  0xd2   : > { %3960 = vperm.xlu1 %11304, %v3830_v25   ;;  %3965 = vperm.xlu0 %11303, %v3831_v5  }
  0xd3   : > { %10628 = vmatmul.mubr.msk.bf16.gmra.mxu1 %vm562_vm2, %v11888_v22  ;;  %v2670_v22 = vsel %vm2220_vm4, %v2667_v6, %v2669_v13  ;;  %v3842_v13 = vld [vmem:[%s15250_s1 + $0x118] sm:$0xff] }
  0xd4   : > { %10662 = vmatmul.mubr.msk.bf16.vlgmr.msra.gmra.mxu0 %vm562_vm2, %v2664_v59  ;;  %10631 = vmatprep.mubr.msk.bf16.mxu1 %vm562_vm2, %v11895_v45  ;;  %v3833_v45 = vld [vmem:[%s15250_s1 + $0xd0] sm:$0xff] }
  0xd5   : > { %10736 = vmatpush3.bf16.msra.mxu0 %v3513_v46  ;;  %10665 = vmatprep.mubr.msk.bf16.mxu0 %vm562_vm2, %v2666_v11  ;;  %v12434_v46 = vld [vmem:[%s11607_s12 + $0x68] sm:$0xff]   ;;  %v3841_v11 = vld [vmem:[%s15250_s1 + $0x110] sm:$0xff] }
  0xd6   : > { %3970 = vperm.xlu1 %11304, %v3832_v44   ;;  %3975 = vperm.xlu0 %11303, %v3833_v45   ;;  %v2681_v44 = vrot.slane %v12434_v46, 2 }
  0xda   : > { %3980 = vperm.xlu1 %11304, %v3834_v26   ;;  %3985 = vperm.xlu0 %11303, %v3835_v38   ;;  %v12464_v26 = vld [vmem:[%s11607_s12 + $0x70] sm:$0xff]  }
  0xdb   : > { %v12361_v17 = vpop.f32.mrf.mxu1  ;;  %10632 = vmatmul.mubr.msk.bf16.gmra.mxu1 %vm562_vm2, %v11900_v7  ;;  %v12379_v7 = vld [vmem:[%s11607_s12 + $0x50] sm:$0xff]  }
  0xdc   : > { %v12353_v28 = vpop.f32.mrf.mxu0  ;;  %10666 = vmatmul.mubr.msk.bf16.gmra.mxu0 %vm562_vm2, %v2668_v49  ;;  %10635 = vmatprep.mubr.msk.bf16.mxu1 %vm562_vm2, %v11910_v39  ;;  %v2675_v35 = vrot.slane %v12379_v7, 2 }
  0xdd   : > { %10669 = vmatprep.mubr.msk.bf16.mxu0 %vm562_vm2, %v2670_v22  ;;  %v12373_v20 = vpop.f32.mrf.mxu1 }
  0xde   : > { %v12365_v19 = vpop.f32.mrf.mxu0  ;;  %3990 = vperm.xlu1 %11304, %v3836_v16   ;;  %3995 = vperm.xlu0 %11303, %v3837_v9   ;;  %v2676_v24 = vsel %vm2220_vm4, %v2673_v18, %v2675_v35  ;;  %v2678_v4 = vsel %vm2220_vm4, %v2675_v35, %v2677_v63 }
  0xdf   : > { %v12384_v60 = vpop.f32.mrf.mxu1 }
  0xe0   : > { %v12375_v50 = vpop.f32.mrf.mxu0 }
  0xe1   : > { %v12395_v33 = vpop.f32.mrf.mxu1 }
  0xe2   : > { %v12386_v39 = vpop.f32.mrf.mxu0  ;;  %4000 = vperm.xlu1 %11304, %v3838_v31   ;;  %4005 = vperm.xlu0 %11303, %v3839_v51  }
  0xe3   : > { %v12405_v10 = vpop.f32.mrf.mxu1  ;;  %10636 = vmatmul.mubr.msk.bf16.gmra.mxu1 %vm562_vm2, %v11914_v34  ;;  %v12423_v34 = vld [vmem:[%s11607_s12 + $0x60] sm:$0xff]  }
  0xe4   : > { %v12397_v21 = vpop.f32.mrf.mxu0  ;;  %10670 = vmatmul.mubr.msk.bf16.gmra.mxu0 %vm562_vm2, %v2672_v58  ;;  %10639 = vmatprep.mubr.msk.bf16.mxu1 %vm562_vm2, %v11937_v55  ;;  %v2679_v25 = vrot.slane %v12423_v34, 2  ;;  %v12472_v58 = vld [vmem:[%s11607_s12 + $0x78] sm:$0xff]  }
  0xe5   : > { %10673 = vmatprep.mubr.msk.bf16.mxu0 %vm562_vm2, %v2674_v3  ;;  %v12417_v52 = vpop.f32.mrf.mxu1  ;;  %v2683_v3 = vrot.slane %v12464_v26, 2  ;;  %v2685_v31 = vrot.slane %v12472_v58, 2 }
  0xe6   : > { %v12409_v48 = vpop.f32.mrf.mxu0  ;;  %4010 = vperm.xlu1 %11304, %v3840_v36   ;;  %4015 = vperm.xlu0 %11303, %v3841_v11   ;;  %v2680_v43 = vsel %vm2220_vm4, %v2677_v63, %v2679_v25  ;;  %v12496_v36 = vld [vmem:[%s11607_s12 + $0x80] sm:$0xff]  }
  0xe7   : > { %v12428_v59 = vpop.f32.mrf.mxu1  ;;  %15282 = vst [vmem:[#allocation11_spill] sm:$0xff] %v12496_v36 }
  0xe8   : > { %v12419_v2 = vpop.f32.mrf.mxu0  ;;  %15274 = vst [vmem:[#allocation3_spill] sm:$0xff] %v12428_v59 }
  0xe9   : > { %v12439_v12 = vpop.f32.mrf.mxu1 }
  0xea   : > { %v12430_v55 = vpop.f32.mrf.mxu0  ;;  %15275 = vst [vmem:[#allocation4_spill] sm:$0xff] %v12439_v12  ;;  %4020 = vperm.xlu1 %11304, %v3842_v13  }
  0xeb   : > { %v12449_v5 = vpop.f32.mrf.mxu1  ;;  %10640 = vmatmul.mubr.msk.bf16.gmra.mxu1 %vm562_vm2, %v11941_v56  ;;  %v2682_v56 = vsel %vm2220_vm4, %v2679_v25, %v2681_v44  ;;  %v12504_v25 = vld [vmem:[%s11607_s12 + $0x88] sm:$0xff]  }
  0xec   : > { %v12441_v6 = vpop.f32.mrf.mxu0  ;;  %10674 = vmatmul.mubr.msk.bf16.gmra.mxu0 %vm562_vm2, %v2676_v24  ;;  %15276 = vst [vmem:[#allocation5_spill] sm:$0xff] %v12449_v5  ;;  %10643 = vmatprep.mubr.msk.bf16.mxu1 %vm562_vm2, %v11967_v30  ;;  %v2684_v24 = vsel %vm2220_vm4, %v2681_v44, %v2683_v3  ;;  %15284 = vst [vmem:[#allocation13_spill] sm:$0xff] %v12504_v25 }
  0xed   : > { %10677 = vmatprep.mubr.msk.bf16.mxu0 %vm562_vm2, %v2678_v4  ;;  %v12458_v22 = vpop.f32.mrf.mxu1 }
  0xee   : > { %v12453_v49 = vpop.f32.mrf.mxu0  ;;  %15277 = vst [vmem:[#allocation6_spill] sm:$0xff] %v12458_v22  ;;  %v12536_v22 = vld [vmem:[%s11607_s12 + $0x98] sm:$0xff]  }
  0xef   : > { %v12466_v18 = vpop.f32.mrf.mxu1  ;;  %15286 = vst [vmem:[#allocation15_spill] sm:$0xff] %v12536_v22 }
  0xf0   : > { %v12460_v45 = vpop.f32.mrf.mxu0  ;;  %15278 = vst [vmem:[#allocation7_spill] sm:$0xff] %v12466_v18  ;;  %v12530_v18 = vld [vmem:[%s11607_s12 + $0x90] sm:$0xff]  }
  0xf1   : > { %v12474_v16 = vpop.f32.mrf.mxu1 }
  0xf2   : > { %v12468_v38 = vpop.f32.mrf.mxu0  ;;  %15279 = vst [vmem:[#allocation8_spill] sm:$0xff] %v12474_v16 }
  0xf3   : > { %v12481_v9 = vpop.f32.mrf.mxu1  ;;  %10644 = vmatmul.mubr.msk.bf16.gmra.mxu1 %vm562_vm2, %v11971_v1  ;;  %v2686_v1 = vsel %vm2220_vm4, %v2683_v3, %v2685_v31  ;;  %v2689_v3 = vrot.slane %v12504_v25, 2 }
  0xf4   : > { %v12476_v30 = vpop.f32.mrf.mxu0  ;;  %10678 = vmatmul.mubr.msk.bf16.gmra.mxu0 %vm562_vm2, %v2680_v43  ;;  %15280 = vst [vmem:[#allocation9_spill] sm:$0xff] %v12481_v9  ;;  %10647 = vmatprep.mubr.msk.bf16.mxu1 %vm562_vm2, %v12004_v8  ;;  %v2687_v8 = vrot.slane %v12496_v36, 2 }
  0xf5   : > { %10681 = vmatprep.mubr.msk.bf16.mxu0 %vm562_vm2, %v2682_v56  ;;  %v12490_v63 = vpop.f32.mrf.mxu1 }
  0xf6   : > { %v12485_v35 = vpop.f32.mrf.mxu0  ;;  %15281 = vst [vmem:[#allocation10_spill] sm:$0xff] %v12490_v63  ;;  %v2983_v63 = vshrl.u32 %v12124_v41, 16  ;;  %v2688_v16 = vsel %vm2220_vm4, %v2685_v31, %v2687_v8 }
  0xf7   : > { %v12498_v4 = vpop.f32.mrf.mxu1 }
  0xf8   : > { %v12492_v51 = vpop.f32.mrf.mxu0  ;;  %15283 = vst [vmem:[#allocation12_spill] sm:$0xff] %v12498_v4  ;;  %v2978_v4 = vshll.u32 %v12263_v32, 16 }
  0xf9   : > { %v12506_v13 = vpop.f32.mrf.mxu1 }
  0xfa   : > { %v12500_v11 = vpop.f32.mrf.mxu0  ;;  %15285 = vst [vmem:[#allocation14_spill] sm:$0xff] %v12506_v13  ;;  %v2980_v25 = vrot.slane %v2978_v4, 3 }
  0xfb   : > { %v10473_v44 = vpop.f32.mrf.mxu1  ;;  %10648 = vmatmul.mubr.msk.bf16.gmra.mxu1 %vm562_vm2, %v12008_v54  ;;  %v2986_v54 = vshll.u32 %v12124_v41, 16 }
  0xfc   : > { %v12508_v43 = vpop.f32.mrf.mxu0  ;;  %10682 = vmatmul.mubr.msk.bf16.gmra.mxu0 %vm562_vm2, %v2684_v24  ;;  %v880_v47 = vadd.f32 %v10473_v44, %v12353_v28  ;;  %10651 = vmatprep.mubr.msk.bf16.mxu1 %vm562_vm2, %v12046_v42  ;;  %v2690_v42 = vsel %vm2220_vm4, %v2687_v8, %v2689_v3  ;;  %v2691_v8 = vrot.slane %v12530_v18, 2 }
  0xfd   : > { %10685 = vmatprep.mubr.msk.bf16.mxu0 %vm562_vm2, %v2686_v1  ;;  %v871_v24 = vpop.f32.mrf.mxu1  ;;  %v2975_v1 = vshrl.u32 %v12263_v32, 16 }
  0xfe   : > { %v12515_v56 = vpop.f32.mrf.mxu0  ;;  %v872_v9 = vadd.f32 %v871_v24, %v12365_v19  ;;  %v2985_v19 = vrot.slane %v2983_v63, 2  ;;  %v2988_v24 = vrot.slane %v2986_v54, 3 }
  0xff   : > { %v10474_v28 = vpop.f32.mrf.mxu1  ;;  %v2977_v41 = vrot.slane %v2975_v1, 2 }
 0x100   : > { %v12521_v13 = vpop.f32.mrf.mxu0  ;;  %v883_v5 = vadd.f32 %v10474_v28, %v12375_v50  ;;  %v2693_v28 = vrot.slane %v12536_v22, 2  ;;  %v2989_v54 = vor.u32 %v2988_v24, %v2985_v19 }
 0x101   : > { %v874_v32 = vpop.f32.mrf.mxu1  ;;  %v2981_v1 = vor.u32 %v2980_v25, %v2977_v41 }
 0x102   : > { %v12532_v44 = vpop.f32.mrf.mxu0  ;;  %v875_v31 = vadd.f32 %v874_v32, %v12386_v39  ;;  %v2995_v39 = vshll.u32 %v12130_v53, 16 }
 0x103   : > { %v10477_v59 = vpop.f32.mrf.mxu1  ;;  %10652 = vmatmul.mubr.msk.bf16.gmra.mxu1 %vm562_vm2, %v12050_v23  ;;  %v3001_v23 = vshrl.u32 %v12288_v14, 16 }
 0x104   : > { %v10511_v12 = vpop.f32.mrf.mxu0  ;;  %10686 = vmatmul.mubr.msk.bf16.gmra.mxu0 %vm562_vm2, %v2688_v16  ;;  %v896_v16 = vadd.f32 %v10477_v59, %v12397_v21  ;;  %10655 = vmatprep.mubr.msk.bf16.mxu1 %vm562_vm2, %v12086_v62  ;;  %v2692_v59 = vsel %vm2220_vm4, %v2689_v3, %v2691_v8  ;;  %v11364_v62 = vld [vmem:[%s11607_s12 + $0xa0] ss:$0 sps:$4 sm:$0x33]   ;;  %v2997_v19 = vrot.slane %v2995_v39, 3  ;;  %v3013_v39 = vshll.u32 %v12311_v15, 16 }
 0x105   : > { %v12541_v36 = vadd.f32 %v10511_v12, %v880_v47  ;;  %10689 = vmatprep.mubr.msk.bf16.mxu0 %vm562_vm2, %v2690_v42  ;;  %v2992_v47 = vshrl.u32 %v12130_v53, 16  ;;  %v887_v12 = vpop.f32.mrf.mxu1  ;;  %v3004_v42 = vshll.u32 %v12288_v14, 16 }
 0x106   : > { %v1149_v50 = vpop.f32.mrf.mxu0  ;;  %v888_v32 = vadd.f32 %v887_v12, %v12409_v48  ;;  %v2990_v48 = vsel %vm2973_vm7, %v2981_v1, %v2989_v54 }
 0x107   : > { %15287 = vst [vmem:[#allocation16_spill] sm:$0xff] %v12541_v36  ;;  %v12549_v63 = vadd.f32 %v1149_v50, %v872_v9  ;;  %v10478_v9 = vpop.f32.mrf.mxu1  ;;  %v2994_v41 = vrot.slane %v2992_v47, 2  ;;  %v3006_v3 = vrot.slane %v3004_v42, 3  ;;  %v3010_v47 = vshrl.u32 %v12311_v15, 16 }
 0x108   : > { %v10512_v4 = vpop.f32.mrf.mxu0  ;;  %v899_v36 = vadd.f32 %v10478_v9, %v12419_v2  ;;  %v3019_v42 = vshrl.u32 %v12320_v40, 16 }
 0x109   : > { %15288 = vst [vmem:[#allocation17_spill] sm:$0xff] %v12549_v63  ;;  %v12558_v21 = vadd.f32 %v10512_v4, %v883_v5  ;;  %v2694_v63 = vsel %vm2220_vm4, %v2691_v8, %v2693_v28  ;;  %v890_v24 = vpop.f32.mrf.mxu1  ;;  %v3003_v5 = vrot.slane %v3001_v23, 2  ;;  %v2695_v8 = vrot.slane %v11364_v62, 2 }
 0x10a   : > { %v1152_v50 = vpop.f32.mrf.mxu0  ;;  %v891_v12 = vadd.f32 %v890_v24, %v12430_v55  ;;  %v2998_v55 = vor.u32 %v2997_v19, %v2994_v41  ;;  %v3015_v24 = vrot.slane %v3013_v39, 3 }
 0x10b   : > { %v12564_v25 = vadd.f32 %v1152_v50, %v875_v31  ;;  %v10481_v2 = vpop.f32.mrf.mxu1  ;;  %10656 = vmatmul.mubr.msk.bf16.gmra.mxu1 %vm562_vm2, %v12091_v27  ;;  %v2696_v9 = vsel %vm2220_vm4, %v2693_v28, %v2695_v8 }
 0x10c   : > { %v10515_v22 = vpop.f32.mrf.mxu0  ;;  %10690 = vmatmul.mubr.msk.bf16.gmra.mxu0 %vm562_vm2, %v2692_v59  ;;  %v912_v1 = vadd.f32 %v10481_v2, %v12441_v6  ;;  %10699 = vmatprep.mubr.msk.bf16.mxu1 %vm562_vm2, %v2990_v48  ;;  %v3022_v59 = vshll.u32 %v12320_v40, 16  ;;  %v2999_v19 = vsel %vm2973_vm7, %v2989_v54, %v2998_v55 }
 0x10d   : > { %v12569_v4 = vadd.f32 %v10515_v22, %v896_v16  ;;  %10693 = vmatprep.mubr.msk.bf16.mxu0 %vm562_vm2, %v2694_v63  ;;  %v903_v22 = vpop.f32.mrf.mxu1  ;;  %v3007_v63 = vor.u32 %v3006_v3, %v3003_v5 }
 0x10e   : > { %v1165_v31 = vpop.f32.mrf.mxu0  ;;  %v904_v27 = vadd.f32 %v903_v22, %v12453_v49  ;;  %v3024_v2 = vrot.slane %v3022_v59, 3 }
 0x10f   : > { %v12577_v23 = vadd.f32 %v1165_v31, %v888_v32  ;;  %v10482_v50 = vpop.f32.mrf.mxu1  ;;  %v3012_v32 = vrot.slane %v3010_v47, 2  ;;  %v3008_v49 = vsel %vm2973_vm7, %v2998_v55, %v3007_v63  ;;  %v3426_v31 = vrot.slane %v12288_v14, 3 }
 0x110   : > { %v10516_v16 = vpop.f32.mrf.mxu0  ;;  %v915_v48 = vadd.f32 %v10482_v50, %v12460_v45  ;;  %v15289_v50 = vrot.slane %v12130_v53, 3 }
 0x111   : > { %v12583_v62 = vadd.f32 %v10516_v16, %v899_v36  ;;  %v906_v5 = vpop.f32.mrf.mxu1  ;;  %v3021_v36 = vrot.slane %v3019_v42, 2  ;;  %v3016_v54 = vor.u32 %v3015_v24, %v3012_v32  ;;  %v3037_v16 = vshrl.u32 %v12348_v29, 16 }
 0x112   : > { %v1168_v6 = vpop.f32.mrf.mxu0  ;;  %v907_v28 = vadd.f32 %v906_v5, %v12468_v38  ;;  %v3028_v38 = vshrl.u32 %v12341_v57, 16  ;;  %v3040_v42 = vshll.u32 %v12348_v29, 16 }
 0x113   : > { %v12587_v41 = vadd.f32 %v1168_v6, %v891_v12  ;;  %v10485_v45 = vpop.f32.mrf.mxu1  ;;  %10700 = vmatmul.mubr.msk.bf16.vlgmr.msra.gmra.mxu1 %vm562_vm2, %v2999_v19  ;;  %v3427_v6 = vsel %vm3420_vm6, %v15289_v50, %v3426_v31 }
 0x114   : > { %v10519_v3 = vpop.f32.mrf.mxu0  ;;  %10694 = vmatmul.mubr.msk.bf16.gmra.mxu0 %vm562_vm2, %v2696_v9  ;;  %v928_v47 = vadd.f32 %v10485_v45, %v12476_v30  ;;  %10703 = vmatprep.mubr.msk.bf16.mxu1 %vm562_vm2, %v3008_v49  ;;  %v3017_v9 = vsel %vm2973_vm7, %v3007_v63, %v3016_v54  ;;  %v3030_v19 = vrot.slane %v3028_v38, 2  ;;  %v3430_v45 = vrot.slane %v12320_v40, 3 }
 0x115   : > { %v12593_v8 = vadd.f32 %v10519_v3, %v912_v1  ;;  %10737 = vmatprep.mubr.msk.bf16.mxu0 %vm562_vm2, %v12141_v61  ;;  %v3031_v1 = vshll.u32 %v12341_v57, 16  ;;  %v919_v55 = vpop.f32.mrf.mxu1  ;;  %v3025_v61 = vor.u32 %v3024_v2, %v3021_v36  ;;  %v3042_v36 = vrot.slane %v3040_v42, 3 }
 0x116   : > { %v1181_v12 = vpop.f32.mrf.mxu0  ;;  %v920_v59 = vadd.f32 %v919_v55, %v12485_v35  ;;  %v3055_v55 = vshrl.u32 %v12390_v37, 16 }
 0x117   : > { %v12600_v39 = vadd.f32 %v1181_v12, %v904_v27  ;;  %v10486_v30 = vpop.f32.mrf.mxu1  ;;  %v3033_v5 = vrot.slane %v3031_v1, 3  ;;  %v3026_v35 = vsel %vm2973_vm7, %v3016_v54, %v3025_v61  ;;  %v3049_v12 = vshll.u32 %v12379_v7, 16 }
 0x118   : > { %v10520_v22 = vpop.f32.mrf.mxu0  ;;  %v931_v32 = vadd.f32 %v10486_v30, %v12492_v51  ;;  %v3428_v51 = vrot.slane %v12311_v15, 3 }
 0x119   : > { %v12608_v14 = vadd.f32 %v10520_v22, %v915_v48  ;;  %v922_v3 = vpop.f32.mrf.mxu1  ;;  %v3039_v48 = vrot.slane %v3037_v16, 2  ;;  %v3058_v22 = vshll.u32 %v12390_v37, 16 }
 0x11a   : > { %v1184_v27 = vpop.f32.mrf.mxu0  ;;  %v923_v63 = vadd.f32 %v922_v3, %v12500_v11  ;;  %v3034_v11 = vor.u32 %v3033_v5, %v3030_v19  ;;  %v3429_v42 = vsel %vm3420_vm6, %v3426_v31, %v3428_v51 }
 0x11b   : > { %v12615_v24 = vadd.f32 %v1184_v27, %v907_v28  ;;  %v10489_v2 = vpop.f32.mrf.mxu1  ;;  %10704 = vmatmul.mubr.msk.bf16.gmra.mxu1 %vm562_vm2, %v3017_v9  ;;  %v3043_v15 = vor.u32 %v3042_v36, %v3039_v48  ;;  %v3051_v9 = vrot.slane %v3049_v12, 3  ;;  %v3060_v31 = vrot.slane %v3058_v22, 3 }
 0x11c   : > { %v10523_v49 = vpop.f32.mrf.mxu0  ;;  %10738 = vmatmul.mubr.msk.bf16.vlgmr.msra.gmra.mxu0 %vm562_vm2, %v12149_v0  ;;  %v3046_v0 = vshrl.u32 %v12379_v7, 16  ;;  %v944_v54 = vadd.f32 %v10489_v2, %v12508_v43  ;;  %10707 = vmatprep.mubr.msk.bf16.mxu1 %vm562_vm2, %v3026_v35  ;;  %v3035_v19 = vsel %vm2973_vm7, %v3025_v61, %v3034_v11  ;;  %v3064_v2 = vshrl.u32 %v12423_v34, 16 }
 0x11d   : > { %v12621_v53 = vadd.f32 %v10523_v49, %v928_v47  ;;  %10741 = vmatprep.mubr.msk.bf16.mxu0 %vm562_vm2, %v3427_v6  ;;  %v935_v47 = vpop.f32.mrf.mxu1 }
 0x11e   : > { %v1197_v28 = vpop.f32.mrf.mxu0  ;;  %v936_v40 = vadd.f32 %v935_v47, %v12515_v56  ;;  %v3048_v27 = vrot.slane %v3046_v0, 2  ;;  %v3044_v56 = vsel %vm2973_vm7, %v3034_v11, %v3043_v15 }
 0x11f   : > { %v12630_v38 = vadd.f32 %v1197_v28, %v920_v59  ;;  %v10490_v30 = vpop.f32.mrf.mxu1  ;;  %v3431_v59 = vsel %vm3420_vm6, %v3428_v51, %v3430_v45 }
 0x120   : > { %v10524_v1 = vpop.f32.mrf.mxu0  ;;  %v947_v50 = vadd.f32 %v10490_v30, %v12521_v13  ;;  %v3432_v13 = vrot.slane %v12341_v57, 3  ;;  %v3052_v36 = vor.u32 %v3051_v9, %v3048_v27  ;;  %v3073_v57 = vshrl.u32 %v12434_v46, 16 }
 0x121   : > { %v12636_v16 = vadd.f32 %v10524_v1, %v931_v32  ;;  %v938_v5 = vpop.f32.mrf.mxu1  ;;  %v3057_v32 = vrot.slane %v3055_v55, 2  ;;  %v3066_v30 = vrot.slane %v3064_v2, 2  ;;  %v3094_v2 = vshll.u32 %v12472_v58, 16 }
 0x122   : > { %v1200_v43 = vpop.f32.mrf.mxu0  ;;  %v939_v49 = vadd.f32 %v938_v5, %v12532_v44  ;;  %v3067_v44 = vshll.u32 %v12423_v34, 16  ;;  %v3433_v47 = vsel %vm3420_vm6, %v3430_v45, %v3432_v13  ;;  %v3053_v55 = vsel %vm2973_vm7, %v3043_v15, %v3052_v36 }
 0x123   : > { %v12641_v6 = vadd.f32 %v1200_v43, %v923_v63  ;;  %v10493_v48 = vpop.f32.mrf.mxu1  ;;  %10708 = vmatmul.mubr.msk.bf16.gmra.mxu1 %vm562_vm2, %v3035_v19  ;;  %v3434_v63 = vrot.slane %v12348_v29, 3  ;;  %v3061_v12 = vor.u32 %v3060_v31, %v3057_v32  ;;  %v3082_v32 = vshrl.u32 %v12464_v26, 16 }
 0x124   : > { %v10527_v3 = vpop.f32.mrf.mxu0  ;;  %10742 = vmatmul.mubr.msk.bf16.gmra.mxu0 %vm562_vm2, %v3429_v42  ;;  %10711 = vmatprep.mubr.msk.bf16.mxu1 %vm562_vm2, %v3044_v56  ;;  %v3069_v43 = vrot.slane %v3067_v44, 3  ;;  %v3438_v56 = vrot.slane %v12390_v37, 3  ;;  %v3085_v31 = vshll.u32 %v12464_v26, 16 }
 0x125   : > { %v12647_v35 = vadd.f32 %v10527_v3, %v944_v54  ;;  %10745 = vmatprep.mubr.msk.bf16.mxu0 %vm562_vm2, %v3431_v59  ;;  %v951_v28 = vpop.f32.mrf.mxu1  ;;  %v3076_v54 = vshll.u32 %v12434_v46, 16  ;;  %v3435_v22 = vsel %vm3420_vm6, %v3432_v13, %v3434_v63  ;;  %v3062_v9 = vsel %vm2973_vm7, %v3052_v36, %v3061_v12 }
 0x126   : > { %v1213_v61 = vpop.f32.mrf.mxu0  ;;  %v952_v19 = vadd.f32 %v951_v28, %v12373_v20  ;;  %v3070_v20 = vor.u32 %v3069_v43, %v3066_v30  ;;  %v3091_v36 = vshrl.u32 %v12472_v58, 16 }
 0x127   : > { %v12653_v51 = vadd.f32 %v1213_v61, %v936_v40  ;;  %v10494_v29 = vpop.f32.mrf.mxu1  ;;  %v960_v40 = vadd.f32 %v10493_v48, %v12361_v17  ;;  %v3078_v45 = vrot.slane %v3076_v54, 3  ;;  %v3436_v17 = vrot.slane %v12379_v7, 3 }
 0x128   : > { %v10528_v0 = vpop.f32.mrf.mxu0  ;;  %v3084_v54 = vrot.slane %v3082_v32, 2  ;;  %v3093_v30 = vrot.slane %v3091_v36, 2 }
 0x129   : > { %v12660_v11 = vadd.f32 %v10528_v0, %v947_v50  ;;  %v954_v59 = vpop.f32.mrf.mxu1  ;;  %v3075_v50 = vrot.slane %v3073_v57, 2  ;;  %v3437_v28 = vsel %vm3420_vm6, %v3434_v63, %v3436_v17  ;;  %v3439_v57 = vsel %vm3420_vm6, %v3436_v17, %v3438_v56 }
 0x12a   : > { %v1216_v1 = vpop.f32.mrf.mxu0  ;;  %v955_v37 = vadd.f32 %v954_v59, %v12395_v33  ;;  %v3096_v63 = vrot.slane %v3094_v2, 3 }
 0x12b   : > { %v12666_v42 = vadd.f32 %v1216_v1, %v939_v49  ;;  %v10497_v15 = vpop.f32.mrf.mxu1  ;;  %10712 = vmatmul.mubr.msk.bf16.gmra.mxu1 %vm562_vm2, %v3053_v55  ;;  %v963_v49 = vadd.f32 %v10494_v29, %v12384_v60  ;;  %v3079_v7 = vor.u32 %v3078_v45, %v3075_v50  ;;  %v3071_v55 = vsel %vm2973_vm7, %v3061_v12, %v3070_v20  ;;  %v15290_v45 = vld [vmem:[#allocation3_spill] sm:$0xff] }
 0x12c   : > { %v10531_v27 = vpop.f32.mrf.mxu0  ;;  %10746 = vmatmul.mubr.msk.bf16.gmra.mxu0 %vm562_vm2, %v3433_v47  ;;  %10715 = vmatprep.mubr.msk.bf16.mxu1 %vm562_vm2, %v3062_v9  ;;  %v3087_v47 = vrot.slane %v3085_v31, 3  ;;  %v976_v29 = vadd.f32 %v10497_v15, %v12405_v10  ;;  %v3440_v10 = vrot.slane %v12423_v34, 3  ;;  %v3442_v50 = vrot.slane %v12434_v46, 3 }
 0x12d   : > { %v12671_v5 = vadd.f32 %v10531_v27, %v960_v40  ;;  %10749 = vmatprep.mubr.msk.bf16.mxu0 %vm562_vm2, %v3435_v22  ;;  %v967_v48 = vpop.f32.mrf.mxu1  ;;  %v3080_v33 = vsel %vm2973_vm7, %v3070_v20, %v3079_v7  ;;  %v3097_v34 = vor.u32 %v3096_v63, %v3093_v30  ;;  %v15295_v63 = vld [vmem:[#allocation6_spill] sm:$0xff] }
 0x12e   : > { %v1229_v3 = vpop.f32.mrf.mxu0  ;;  %v968_v43 = vadd.f32 %v967_v48, %v12417_v52  ;;  %v3088_v9 = vor.u32 %v3087_v47, %v3084_v54  ;;  %v15291_v52 = vld [vmem:[#allocation11_spill] sm:$0xff]  ;;  %v3441_v2 = vsel %vm3420_vm6, %v3438_v56, %v3440_v10 }
 0x12f   : > { %v12680_v13 = vadd.f32 %v1229_v3, %v952_v19  ;;  %v10498_v0 = vpop.f32.mrf.mxu1  ;;  %v3100_v15 = vshrl.u32 %v15291_v52, 16  ;;  %v3103_v3 = vshll.u32 %v15291_v52, 16 }
 0x130   : > { %v10532_v61 = vpop.f32.mrf.mxu0  ;;  %v979_v19 = vadd.f32 %v10498_v0, %v15290_v45  ;;  %v3089_v0 = vsel %vm2973_vm7, %v3079_v7, %v3088_v9  ;;  %v3444_v7 = vrot.slane %v12464_v26, 3  ;;  %v3446_v45 = vrot.slane %v12472_v58, 3  ;;  %v11367_v26 = vld [vmem:[%s15253_s4 + $0x78] sm:$0xff]   ;;  %v15297_v58 = vld [vmem:[#allocation15_spill] sm:$0xff] }
 0x131   : > { %v12686_v44 = vadd.f32 %v10532_v61, %v963_v49  ;;  %v970_v22 = vpop.f32.mrf.mxu1  ;;  %v15292_v49 = vld [vmem:[#allocation13_spill] sm:$0xff]  ;;  %v15293_v61 = vld [vmem:[#allocation4_spill] sm:$0xff]  ;;  %10773 = vmatprep.subr.bf16.mxu1 %v11367_v26 }
 0x132   : > { %v1232_v60 = vpop.f32.mrf.mxu0  ;;  %v3109_v20 = vshrl.u32 %v15292_v49, 16  ;;  %v3112_v48 = vshll.u32 %v15292_v49, 16  ;;  %v971_v36 = vadd.f32 %v970_v22, %v15293_v61  ;;  %v3098_v22 = vsel %vm2973_vm7, %v3088_v9, %v3097_v34  ;;  %10774 = vmatpush3.bf16.msra.mxu1 %v11367_v26 }
 0x133   : > { %v12691_v1 = vadd.f32 %v1232_v60, %v955_v37  ;;  %v10501_v27 = vpop.f32.mrf.mxu1  ;;  %10716 = vmatmul.mubr.msk.bf16.gmra.mxu1 %vm562_vm2, %v3071_v55  ;;  %v3443_v60 = vsel %vm3420_vm6, %v3440_v10, %v3442_v50  ;;  %v3105_v55 = vrot.slane %v3103_v3, 3  ;;  %v3121_v9 = vshll.u32 %v12530_v18, 16 }
 0x134   : > { %v10535_v40 = vpop.f32.mrf.mxu0  ;;  %10750 = vmatmul.mubr.msk.bf16.gmra.mxu0 %vm562_vm2, %v3437_v28  ;;  %10719 = vmatprep.mubr.msk.bf16.mxu1 %vm562_vm2, %v3080_v33  ;;  %v3111_v30 = vrot.slane %v3109_v20, 2  ;;  %v3114_v56 = vrot.slane %v3112_v48, 3 }
 0x135   : > { %v12697_v59 = vadd.f32 %v10535_v40, %v976_v29  ;;  %10753 = vmatprep.mubr.msk.bf16.mxu0 %vm562_vm2, %v3439_v57  ;;  %v983_v32 = vpop.f32.mrf.mxu1  ;;  %v15294_v57 = vld [vmem:[#allocation5_spill] sm:$0xff]  ;;  %v3102_v29 = vrot.slane %v3100_v15, 2  ;;  %v15296_v15 = vld [vmem:[#allocation7_spill] sm:$0xff] }
 0x136   : > { %v1245_v12 = vpop.f32.mrf.mxu0  ;;  %v992_v54 = vadd.f32 %v10501_v27, %v15294_v57  ;;  %v3115_v61 = vor.u32 %v3114_v56, %v3111_v30  ;;  %v15299_v30 = vld [vmem:[#allocation9_spill] sm:$0xff] }
 0x137   : > { %v12704_v17 = vadd.f32 %v1245_v12, %v968_v43  ;;  %v10502_v37 = vpop.f32.mrf.mxu1  ;;  %v984_v43 = vadd.f32 %v983_v32, %v15295_v63  ;;  %v3106_v32 = vor.u32 %v3105_v55, %v3102_v29  ;;  %v3447_v29 = vsel %vm3420_vm6, %v3444_v7, %v3446_v45 }
 0x138   : > { %v10536_v31 = vpop.f32.mrf.mxu0  ;;  %v995_v3 = vadd.f32 %v10502_v37, %v15296_v15  ;;  %v15300_v15 = vld [vmem:[#allocation10_spill] sm:$0xff] }
 0x139   : > { %v12712_v46 = vadd.f32 %v10536_v31, %v979_v19  ;;  %v986_v40 = vpop.f32.mrf.mxu1  ;;  %v3118_v19 = vshrl.u32 %v12530_v18, 16 }
 0x13a   : > { %v1248_v28 = vpop.f32.mrf.mxu0 }
 0x13b   : > { %v12718_v47 = vadd.f32 %v1248_v28, %v971_v36  ;;  %v10505_v10 = vpop.f32.mrf.mxu1  ;;  %10720 = vmatmul.mubr.msk.bf16.gmra.mxu1 %vm562_vm2, %v3089_v0  ;;  %v3127_v36 = vshrl.u32 %v15297_v58, 16  ;;  %v15298_v28 = vld [vmem:[#allocation8_spill] sm:$0xff]  ;;  %v3120_v55 = vrot.slane %v3118_v19, 2 }
 0x13c   : > { %v10539_v33 = vpop.f32.mrf.mxu0  ;;  %10754 = vmatmul.mubr.msk.bf16.gmra.mxu0 %vm562_vm2, %v3441_v2  ;;  %10723 = vmatprep.mubr.msk.bf16.mxu1 %vm562_vm2, %v3098_v22  ;;  %v3130_v2 = vshll.u32 %v15297_v58, 16  ;;  %v987_v0 = vadd.f32 %v986_v40, %v15298_v28  ;;  %v12746_v22 = vld [vmem:[%s11607_s12 + $0xa0] ss:$0 sps:$4 sm:$0x77]   ;;  %v1008_v56 = vadd.f32 %v10505_v10, %v15299_v30  ;;  %v3107_v40 = vsel %vm2973_vm7, %v3097_v34, %v3106_v32 }
 0x13d   : > { %v12723_v12 = vadd.f32 %v10539_v33, %v992_v54  ;;  %10757 = vmatprep.mubr.msk.bf16.mxu0 %vm562_vm2, %v3443_v60  ;;  %v999_v20 = vpop.f32.mrf.mxu1  ;;  %v3445_v60 = vsel %vm3420_vm6, %v3442_v50, %v3444_v7  ;;  %v3123_v33 = vrot.slane %v3121_v9, 3  ;;  %v11368_v50 = vld [vmem:[%s15253_s4 + $0x38] sm:$0xff]   ;;  %v3116_v7 = vsel %vm2973_vm7, %v3106_v32, %v3115_v61 }
 0x13e   : > { %v1261_v27 = vpop.f32.mrf.mxu0  ;;  %v3129_v19 = vrot.slane %v3127_v36, 2  ;;  %v3132_v9 = vrot.slane %v3130_v2, 3  ;;  %v3448_v34 = vrot.slane %v15291_v52, 3  ;;  %10825 = vmatprep.subr.bf16.mxu0 %v11368_v50  ;;  %v3136_v32 = vshrl.u32 %v12746_v22, 16  ;;  %v15301_v36 = vld [vmem:[#allocation12_spill] sm:$0xff]  ;;  %v15303_v30 = vld [vmem:[#allocation17_spill] sm:$0xff] }
 0x13f   : > { %v12732_v31 = vadd.f32 %v1261_v27, %v984_v43  ;;  %v10506_v57 = vpop.f32.mrf.mxu1  ;;  %v3124_v28 = vor.u32 %v3123_v33, %v3120_v55  ;;  %10826 = vmatpush3.bf16.msra.mxu0 %v11368_v50  ;;  %v3139_v52 = vshll.u32 %v12746_v22, 16 }
 0x140   : > { %v10540_v48 = vpop.f32.mrf.mxu0  ;;  %v1011_v2 = vadd.f32 %v10506_v57, %v15301_v36  ;;  %v3449_v57 = vsel %vm3420_vm6, %v3446_v45, %v3448_v34 }
 0x141   : > { %v12741_v37 = vadd.f32 %v10540_v48, %v995_v3  ;;  %v12755_v43 = vpop.f32.mrf.mxu1  ;;  %v1000_v3 = vadd.f32 %v999_v20, %v15300_v15  ;;  %v15302_v20 = vld [vmem:[#allocation16_spill] sm:$0xff] }
 0x142   : > { %v1264_v54 = vpop.f32.mrf.mxu0 }
 0x143   : > { %v12749_v63 = vadd.f32 %v1264_v54, %v987_v0  ;;  %v10549_v26 = vpop.f32.mrf.mxu1  ;;  %10724 = vmatmul.mubr.msk.bf16.gmra.mxu1 %vm562_vm2, %v3107_v40  ;;  %v3450_v0 = vrot.slane %v15292_v49, 3  ;;  %v3133_v49 = vor.u32 %v3132_v9, %v3129_v19  ;;  %v11370_v19 = vld [vmem:[%s15253_s4 + $0x30] sm:$0xff]  }
 0x144   : > { %v10543_v27 = vpop.f32.mrf.mxu0  ;;  %10758 = vmatmul.mubr.msk.bf16.gmra.mxu0 %vm562_vm2, %v3445_v60  ;;  %v1733_v60 = vadd.f32 %v10549_v26, %v15302_v20  ;;  %10727 = vmatprep.mubr.msk.bf16.mxu1 %vm562_vm2, %v3116_v7  ;;  %v3138_v26 = vrot.slane %v3136_v32, 2  ;;  %v3454_v32 = vrot.slane %v15297_v58, 3  ;;  %v11371_v58 = vld [vmem:[%s15253_s4 + $0x68] sm:$0xff]  }
 0x145   : > { %v12760_v10 = vadd.f32 %v10543_v27, %v1008_v56  ;;  %10761 = vmatprep.mubr.msk.bf16.mxu0 %vm562_vm2, %v3447_v29  ;;  %v11369_v29 = vld [vmem:[%s15253_s4 + $0x70] sm:$0xff]   ;;  %v1588_v55 = vpop.f32.mrf.mxu1  ;;  %v3451_v7 = vsel %vm3420_vm6, %v3448_v34, %v3450_v0  ;;  %v3134_v36 = vsel %vm2973_vm7, %v3124_v28, %v3133_v49  ;;  %10827 = vmatprep.subr.bf16.mxu0 %v11370_v19 }
 0x146   : > { %v1277_v48 = vpop.f32.mrf.mxu0  ;;  %v1731_v56 = vadd.f32 %v1588_v55, %v15303_v30  ;;  %10775 = vmatprep.subr.bf16.mxu1 %v11369_v29  ;;  %10828 = vmatpush3.bf16.msra.mxu0 %v11370_v19 }
 0x147   : > { %v12769_v54 = vadd.f32 %v1277_v48, %v1000_v3  ;;  %v10550_v50 = vpop.f32.mrf.mxu1  ;;  %10776 = vmatpush3.bf16.msra.mxu1 %v11369_v29  ;;  %v3125_v3 = vsel %vm2973_vm7, %v3115_v61, %v3124_v28  ;;  %v3141_v48 = vrot.slane %v3139_v52, 3 }
 0x148   : > { %v10544_v33 = vpop.f32.mrf.mxu0  ;;  %v1734_v15 = vadd.f32 %v10550_v50, %v12558_v21  ;;  %v3452_v21 = vrot.slane %v12530_v18, 3  ;;  %10777 = vmatprep.subr.bf16.mxu1 %v11371_v58 }
 0x149   : > { %v12777_v40 = vadd.f32 %v10544_v33, %v1011_v2  ;;  %v12788_v9 = vpop.f32.mrf.mxu1  ;;  %v3142_v28 = vor.u32 %v3141_v48, %v3138_v26 }
 0x14a   : > { %v12780_v27 = vpop.f32.mrf.mxu0  ;;  %v3453_v33 = vsel %vm3420_vm6, %v3450_v0, %v3452_v21 }
 0x14b   : > { %v10553_v61 = vpop.f32.mrf.mxu1  ;;  %10728 = vmatmul.mubr.msk.bf16.gmra.mxu1 %vm562_vm2, %v3125_v3  ;;  %v3143_v50 = vsel %vm2973_vm7, %v3133_v49, %v3142_v28  ;;  %v11372_v3 = vld [vmem:[%s15253_s4 + $0x28] sm:$0xff]  }
 0x14c   : > { %v10587_v45 = vpop.f32.mrf.mxu0  ;;  %10762 = vmatmul.mubr.msk.bf16.gmra.mxu0 %vm562_vm2, %v3449_v57  ;;  %v1737_v20 = vadd.f32 %v10553_v61, %v12569_v4  ;;  %10731 = vmatprep.mubr.msk.bf16.mxu1 %vm562_vm2, %v3134_v36  ;;  %v3455_v4 = vsel %vm3420_vm6, %v3452_v21, %v3454_v32  ;;  %v11373_v61 = vld [vmem:[%s15253_s4 + $0x60] sm:$0xff]  }
 0x14d   : > { %v12792_v2 = vadd.f32 %v10587_v45, %v1733_v60  ;;  %10765 = vmatprep.mubr.msk.bf16.mxu0 %vm562_vm2, %v3451_v7  ;;  %v1604_v60 = vpop.f32.mrf.mxu1  ;;  %10778 = vmatpush3.bf16.msra.mxu1 %v11371_v58 }
 0x14e   : > { %v2035_v34 = vpop.f32.mrf.mxu0  ;;  %v1735_v55 = vadd.f32 %v1604_v60, %v12577_v23  ;;  %10829 = vmatprep.subr.bf16.mxu0 %v11372_v3  ;;  %10779 = vmatprep.subr.bf16.mxu1 %v11373_v61 }
 0x14f   : > { %v12799_v52 = vadd.f32 %v2035_v34, %v1731_v56  ;;  %v10554_v30 = vpop.f32.mrf.mxu1  ;;  %10830 = vmatpush3.bf16.msra.mxu0 %v11372_v3 }
 0x150   : > { %v10588_v29 = vpop.f32.mrf.mxu0  ;;  %v1738_v56 = vadd.f32 %v10554_v30, %v12583_v62 }
 0x151   : > { %v12803_v18 = vadd.f32 %v10588_v29, %v1734_v15  ;;  %v12814_v7 = vpop.f32.mrf.mxu1  ;;  %v3456_v15 = vrot.slane %v12746_v22, 3  ;;  %10780 = vmatpush3.bf16.msra.mxu1 %v11373_v61 }
 0x152   : > { %v12809_v57 = vpop.f32.mrf.mxu0 }
 0x153   : > { %v10557_v62 = vpop.f32.mrf.mxu1  ;;  %10732 = vmatmul.mubr.msk.bf16.gmra.mxu1 %vm562_vm2, %v3143_v50  ;;  %v3457_v22 = vsel %vm3420_vm6, %v3454_v32, %v3456_v15  ;;  %v11374_v32 = vld [vmem:[%s15253_s4 + $0x20] sm:$0xff]  }
 0x154   : > { %v10591_v23 = vpop.f32.mrf.mxu0  ;;  %10766 = vmatmul.mubr.msk.bf16.gmra.mxu0 %vm562_vm2, %v3453_v33  ;;  %v1741_v26 = vadd.f32 %v10557_v62, %v12593_v8  ;;  %10831 = vmatprep.subr.bf16.mxu0 %v11374_v32 }
 0x155   : > { %v12817_v0 = vadd.f32 %v10591_v23, %v1737_v20  ;;  %10769 = vmatprep.mubr.msk.bf16.mxu0 %vm562_vm2, %v3455_v4  ;;  %v1620_v19 = vpop.f32.mrf.mxu1  ;;  %10832 = vmatpush3.bf16.msra.mxu0 %v11374_v32 }
 0x156   : > { %v2051_v49 = vpop.f32.mrf.mxu0  ;;  %v1739_v36 = vadd.f32 %v1620_v19, %v12600_v39 }
 0x157   : > { %v12826_v48 = vadd.f32 %v2051_v49, %v1735_v55  ;;  %v10558_v34 = vpop.f32.mrf.mxu1 }
 0x158   : > { %v10592_v45 = vpop.f32.mrf.mxu0  ;;  %v1742_v8 = vadd.f32 %v10558_v34, %v12608_v14 }
 0x159   : > { %v12829_v21 = vadd.f32 %v10592_v45, %v1738_v56  ;;  %v12838_v28 = vpop.f32.mrf.mxu1 }
 0x15a   : > { %v12835_v20 = vpop.f32.mrf.mxu0 }
 0x15b   : > { %v10561_v29 = vpop.f32.mrf.mxu1 }
 0x15c   : > { %v10595_v60 = vpop.f32.mrf.mxu0  ;;  %10770 = vmatmul.mubr.msk.bf16.gmra.mxu0 %vm562_vm2, %v3457_v22  ;;  %v1745_v33 = vadd.f32 %v10561_v29, %v12621_v53 }
 0x15d   : > { %v12841_v39 = vadd.f32 %v10595_v60, %v1741_v26  ;;  %v1636_v14 = vpop.f32.mrf.mxu1 }
 0x15e   : > { %v2067_v55 = vpop.f32.mrf.mxu0  ;;  %v1743_v4 = vadd.f32 %v1636_v14, %v12630_v38 }
 0x15f   : > { %v12847_v58 = vadd.f32 %v2067_v55, %v1739_v36  ;;  %v10562_v50 = vpop.f32.mrf.mxu1 }
 0x160   : > { %v10596_v30 = vpop.f32.mrf.mxu0  ;;  %v1746_v15 = vadd.f32 %v10562_v50, %v12636_v16 }
 0x161   : > { %v12850_v56 = vadd.f32 %v10596_v30, %v1742_v8  ;;  %v12855_v3 = vpop.f32.mrf.mxu1 }
 0x162   : > { %v12852_v23 = vpop.f32.mrf.mxu0 }
 0x163   : > { %v10565_v53 = vpop.f32.mrf.mxu1 }
 0x164   : > { %v10599_v62 = vpop.f32.mrf.mxu0  ;;  %v1749_v19 = vadd.f32 %v10565_v53, %v12647_v35 }
 0x165   : > { %v12857_v49 = vadd.f32 %v10599_v62, %v1745_v33  ;;  %v1652_v36 = vpop.f32.mrf.mxu1 }
 0x166   : > { %v2083_v26 = vpop.f32.mrf.mxu0  ;;  %v1747_v22 = vadd.f32 %v1652_v36, %v12653_v51  ;;  %v11376_v51 = vld [vmem:[%s15253_s4 + $0x18] sm:$0xff]  }
 0x167   : > { %v12860_v45 = vadd.f32 %v2083_v26, %v1743_v4  ;;  %v10566_v34 = vpop.f32.mrf.mxu1  ;;  %10833 = vmatprep.subr.bf16.mxu0 %v11376_v51 }
 0x168   : > { %v10600_v38 = vpop.f32.mrf.mxu0  ;;  %v1750_v16 = vadd.f32 %v10566_v34, %v12660_v11  ;;  %10834 = vmatpush3.bf16.msra.mxu0 %v11376_v51 }
 0x169   : > { %v12863_v61 = vadd.f32 %v10600_v38, %v1746_v15  ;;  %v12868_v60 = vpop.f32.mrf.mxu1 }
 0x16a   : > { %v12865_v8 = vpop.f32.mrf.mxu0 }
 0x16b   : > { %15304 = vst [vmem:[#allocation3_spill] sm:$0xff] %v12865_v8  ;;  %v10569_v55 = vpop.f32.mrf.mxu1 }
 0x16c   : > { %v10603_v32 = vpop.f32.mrf.mxu0  ;;  %v1753_v33 = vadd.f32 %v10569_v55, %v12671_v5  ;;  %v11375_v5 = vld [vmem:[%s15253_s4 + $0x58] sm:$0xff]  }
 0x16d   : > { %v12870_v29 = vadd.f32 %v10603_v32, %v1749_v19  ;;  %v1668_v30 = vpop.f32.mrf.mxu1  ;;  %10781 = vmatprep.subr.bf16.mxu1 %v11375_v5 }
 0x16e   : > { %v2099_v35 = vpop.f32.mrf.mxu0  ;;  %v1751_v50 = vadd.f32 %v1668_v30, %v12680_v13  ;;  %10782 = vmatpush3.bf16.msra.mxu1 %v11375_v5 }
 0x16f   : > { %v12873_v14 = vadd.f32 %v2099_v35, %v1747_v22  ;;  %v10570_v15 = vpop.f32.mrf.mxu1  ;;  %v11378_v35 = vld [vmem:[%s15253_s4 + $0x10] sm:$0xff]  }
 0x170   : > { %v10604_v4 = vpop.f32.mrf.mxu0  ;;  %v1754_v53 = vadd.f32 %v10570_v15, %v12686_v44  ;;  %10835 = vmatprep.subr.bf16.mxu0 %v11378_v35 }
 0x171   : > { %v12879_v11 = vadd.f32 %v10604_v4, %v1750_v16  ;;  %v12887_v26 = vpop.f32.mrf.mxu1  ;;  %10836 = vmatpush3.bf16.msra.mxu0 %v11378_v35 }
 0x172   : > { %v12881_v62 = vpop.f32.mrf.mxu0 }
 0x173   : > { %15305 = vst [vmem:[#allocation11_spill] sm:$0xff] %v12881_v62  ;;  %v10573_v13 = vpop.f32.mrf.mxu1 }
 0x174   : > { %v10607_v19 = vpop.f32.mrf.mxu0  ;;  %v1757_v22 = vadd.f32 %v10573_v13, %v12697_v59 }
 0x175   : > { %v12889_v36 = vadd.f32 %v10607_v19, %v1753_v33  ;;  %v1684_v16 = vpop.f32.mrf.mxu1 }
 0x176   : > { %v2115_v38 = vpop.f32.mrf.mxu0  ;;  %v1755_v44 = vadd.f32 %v1684_v16, %v12704_v17  ;;  %v11377_v17 = vld [vmem:[%s15253_s4 + $0x50] sm:$0xff]  }
 0x177   : > { %v12892_v34 = vadd.f32 %v2115_v38, %v1751_v50  ;;  %v10574_v33 = vpop.f32.mrf.mxu1  ;;  %10783 = vmatprep.subr.bf16.mxu1 %v11377_v17 }
 0x178   : > { %v10608_v32 = vpop.f32.mrf.mxu0  ;;  %v1758_v30 = vadd.f32 %v10574_v33, %v12712_v46  ;;  %10784 = vmatpush3.bf16.msra.mxu1 %v11377_v17 }
 0x179   : > { %v12895_v55 = vadd.f32 %v10608_v32, %v1754_v53  ;;  %v12903_v4 = vpop.f32.mrf.mxu1 }
 0x17a   : > { %v12900_v51 = vpop.f32.mrf.mxu0 }
 0x17b   : > { %15306 = vst [vmem:[#allocation13_spill] sm:$0xff] %v12900_v51  ;;  %v10577_v15 = vpop.f32.mrf.mxu1 }
 0x17c   : > { %v10611_v59 = vpop.f32.mrf.mxu0  ;;  %v1761_v5 = vadd.f32 %v10577_v15, %v12723_v12  ;;  %v11379_v12 = vld [vmem:[%s15253_s4 + $0x48] sm:$0xff]  }
 0x17d   : > { %v12905_v50 = vadd.f32 %v10611_v59, %v1757_v22  ;;  %v1700_v13 = vpop.f32.mrf.mxu1  ;;  %10785 = vmatprep.subr.bf16.mxu1 %v11379_v12 }
 0x17e   : > { %v2131_v53 = vpop.f32.mrf.mxu0  ;;  %v1759_v38 = vadd.f32 %v1700_v13, %v12732_v31  ;;  %v11380_v31 = vld [vmem:[%s15253_s4 + $0x8] sm:$0xff]   ;;  %10786 = vmatpush3.bf16.msra.mxu1 %v11379_v12 }
 0x17f   : > { %v12911_v19 = vadd.f32 %v2131_v53, %v1755_v44  ;;  %v10578_v22 = vpop.f32.mrf.mxu1  ;;  %10837 = vmatprep.subr.bf16.mxu0 %v11380_v31 }
 0x180   : > { %v10612_v46 = vpop.f32.mrf.mxu0  ;;  %v1762_v35 = vadd.f32 %v10578_v22, %v12741_v37  ;;  %10838 = vmatpush3.bf16.msra.mxu0 %v11380_v31 }
 0x181   : > { %v12914_v16 = vadd.f32 %v10612_v46, %v1758_v30  ;;  %v12919_v33 = vpop.f32.mrf.mxu1  ;;  %v11381_v46 = vld [vmem:[%s15253_s4] sm:$0xff]  }
 0x182   : > { %v12916_v32 = vpop.f32.mrf.mxu0  ;;  %10839 = vmatprep.subr.bf16.mxu0 %v11381_v46 }
 0x183   : > { %15307 = vst [vmem:[#allocation4_spill] sm:$0xff] %v12916_v32  ;;  %v10581_v44 = vpop.f32.mrf.mxu1 }
 0x184   : > { %v10615_v59 = vpop.f32.mrf.mxu0  ;;  %v1765_v17 = vadd.f32 %v10581_v44, %v12760_v10  ;;  %v4655_v10 = vld [vmem:[#allocation2] sm:$0xf]  ;;  %10840 = vmatpush3.bf16.msra.mxu0 %v11381_v46 }
 0x185   : > { %v12921_v51 = vadd.f32 %v10615_v59, %v1761_v5  ;;  %v1716_v37 = vpop.f32.mrf.mxu1 }
 0x186   : > { %v2147_v30 = vpop.f32.mrf.mxu0  ;;  %v1763_v5 = vadd.f32 %v1716_v37, %v12769_v54 }
 0x187   : > { %v12930_v15 = vadd.f32 %v2147_v30, %v1759_v38  ;;  %v10582_v22 = vpop.f32.mrf.mxu1  ;;  %v4656_v38 = vld [vmem:[#allocation2 + $0x4] sm:$0xf] }
 0x188   : > { %v10616_v53 = vpop.f32.mrf.mxu0  ;;  %v1766_v44 = vadd.f32 %v10582_v22, %v12777_v40  ;;  %v12941_v30 = vcombine.low %v4655_v10, %v4656_v38  ;;  %v11382_v40 = vld [vmem:[%s15253_s4 + $0x40] sm:$0xff]  }
 0x189   : > { %v12933_v13 = vadd.f32 %v10616_v53, %v1762_v35  ;;  %v12943_v12 = vpop.f32.mrf.mxu1  ;;  %10787 = vmatprep.subr.bf16.mxu1 %v11382_v40 }
 0x18a   : > { %v12938_v59 = vpop.f32.mrf.mxu0  ;;  %15309 = vst [vmem:[#allocation6_spill] sm:$0xff] %v12943_v12  ;;  %10841 = vmatprep.mubr.bf16.mxu0 %v12941_v30  ;;  %10788 = vmatpush3.bf16.msra.mxu1 %v11382_v40 }
 0x18b   : > { %15308 = vst [vmem:[#allocation5_spill] sm:$0xff] %v12938_v59  ;;  %v10625_v35 = vpop.f32.mrf.mxu1 }
 0x18c   : > { %v10619_v31 = vpop.f32.mrf.mxu0  ;;  %v2494_v53 = vadd.f32 %v10625_v35, %v12792_v2 }
 0x18d   : > { %v12945_v54 = vadd.f32 %v10619_v31, %v1765_v17  ;;  %v2349_v32 = vpop.f32.mrf.mxu1 }
 0x18e   : > { %v2163_v37 = vpop.f32.mrf.mxu0  ;;  %v2492_v22 = vadd.f32 %v2349_v32, %v12799_v52 }
 0x18f   : > { %v12949_v59 = vadd.f32 %v2163_v37, %v1763_v5  ;;  %v10626_v17 = vpop.f32.mrf.mxu1 }
 0x190   : > { %v10620_v62 = vpop.f32.mrf.mxu0  ;;  %v2495_v38 = vadd.f32 %v10626_v17, %v12803_v18 }
 0x191   : > { %v12955_v10 = vadd.f32 %v10620_v62, %v1766_v44  ;;  %v12960_v2 = vpop.f32.mrf.mxu1 }
 0x192   : > { %v12957_v46 = vpop.f32.mrf.mxu0  ;;  %15311 = vst [vmem:[#allocation15_spill] sm:$0xff] %v12960_v2 }
 0x193   : > { %15310 = vst [vmem:[#allocation7_spill] sm:$0xff] %v12957_v46  ;;  %v10629_v35 = vpop.f32.mrf.mxu1 }
 0x194   : > { %v10663_v5 = vpop.f32.mrf.mxu0  ;;  %v2498_v12 = vadd.f32 %v10629_v35, %v12817_v0 }
 0x195   : > { %v12962_v31 = vadd.f32 %v10663_v5, %v2494_v53  ;;  %v2365_v52 = vpop.f32.mrf.mxu1 }
 0x196   : > { %v2788_v37 = vpop.f32.mrf.mxu0  ;;  %v2496_v32 = vadd.f32 %v2365_v52, %v12826_v48 }
 0x197   : > { %v12965_v8 = vadd.f32 %v2788_v37, %v2492_v22  ;;  %v10630_v46 = vpop.f32.mrf.mxu1 }
 0x198   : > { %v10664_v62 = vpop.f32.mrf.mxu0  ;;  %v2499_v40 = vadd.f32 %v10630_v46, %v12829_v21 }
 0x199   : > { %v12968_v44 = vadd.f32 %v10664_v62, %v2495_v38  ;;  %v12973_v17 = vpop.f32.mrf.mxu1 }
 0x19a   : > { %v12970_v18 = vpop.f32.mrf.mxu0 }
 0x19b   : > { %15312 = vst [vmem:[#allocation8_spill] sm:$0xff] %v12968_v44  ;;  %v10633_v2 = vpop.f32.mrf.mxu1 }
 0x19c   : > { %v10667_v53 = vpop.f32.mrf.mxu0  ;;  %v2502_v22 = vadd.f32 %v10633_v2, %v12841_v39 }
 0x19d   : > { %v12975_v5 = vadd.f32 %v10667_v53, %v2498_v12  ;;  %v2381_v37 = vpop.f32.mrf.mxu1 }
 0x19e   : > { %v2804_v0 = vpop.f32.mrf.mxu0  ;;  %v2500_v38 = vadd.f32 %v2381_v37, %v12847_v58 }
 0x19f   : > { %15313 = vst [vmem:[#allocation9_spill] sm:$0xff] %v12975_v5  ;;  %v12978_v35 = vadd.f32 %v2804_v0, %v2496_v32  ;;  %v10634_v62 = vpop.f32.mrf.mxu1 }
 0x1a0   : > { %v10668_v48 = vpop.f32.mrf.mxu0  ;;  %v2503_v21 = vadd.f32 %v10634_v62, %v12850_v56 }
 0x1a1   : > { %v12981_v52 = vadd.f32 %v10668_v48, %v2499_v40  ;;  %v12986_v46 = vpop.f32.mrf.mxu1 }
 0x1a2   : > { %v12983_v44 = vpop.f32.mrf.mxu0 }
 0x1a3   : > { %15314 = vst [vmem:[#allocation10_spill] sm:$0xff] %v12981_v52  ;;  %v10637_v5 = vpop.f32.mrf.mxu1 }
 0x1a4   : > { %v10671_v12 = vpop.f32.mrf.mxu0  ;;  %v2506_v2 = vadd.f32 %v10637_v5, %v12857_v49 }
 0x1a5   : > { %v12988_v53 = vadd.f32 %v10671_v12, %v2502_v22  ;;  %v2397_v0 = vpop.f32.mrf.mxu1 }
 0x1a6   : > { %v2820_v39 = vpop.f32.mrf.mxu0  ;;  %v2504_v40 = vadd.f32 %v2397_v0, %v12860_v45 }
 0x1a7   : > { %15315 = vst [vmem:[#allocation12_spill] sm:$0xff] %v12988_v53  ;;  %v12991_v32 = vadd.f32 %v2820_v39, %v2500_v38  ;;  %v10638_v48 = vpop.f32.mrf.mxu1 }
 0x1a8   : > { %v10672_v58 = vpop.f32.mrf.mxu0  ;;  %v2507_v56 = vadd.f32 %v10638_v48, %v12863_v61 }
 0x1a9   : > { %v12994_v37 = vadd.f32 %v10672_v58, %v2503_v21  ;;  %v12999_v62 = vpop.f32.mrf.mxu1  ;;  %v11387_v21 = vld [vmem:[%s15253_s4 + $0xb8] sm:$0xff]  }
 0x1aa   : > { %v12996_v52 = vpop.f32.mrf.mxu0  ;;  %10877 = vmatprep.subr.bf16.mxu1 %v11387_v21 }
 0x1ab   : > { %v10641_v53 = vpop.f32.mrf.mxu1 }
 0x1ac   : > { %v10675_v22 = vpop.f32.mrf.mxu0  ;;  %v2510_v5 = vadd.f32 %v10641_v53, %v12870_v29 }
 0x1ad   : > { %v13001_v12 = vadd.f32 %v10675_v22, %v2506_v2  ;;  %v2413_v39 = vpop.f32.mrf.mxu1 }
 0x1ae   : > { %v2836_v49 = vpop.f32.mrf.mxu0  ;;  %v2508_v0 = vadd.f32 %v2413_v39, %v12873_v14  ;;  %v13025_v39 = vld [vmem:[%s15253_s4 + $0xf8] sm:$0xff]  }
 0x1af   : > { %15316 = vst [vmem:[#allocation16_spill] sm:$0xff] %v13001_v12  ;;  %v13004_v38 = vadd.f32 %v2836_v49, %v2504_v40  ;;  %v10642_v58 = vpop.f32.mrf.mxu1  ;;  %15320 = vst [vmem:[#allocation20_spill] sm:$0xff] %v13025_v39  ;;  %10929 = vmatprep.subr.bf16.mxu0 %v13025_v39 }
 0x1b0   : > { %v10676_v45 = vpop.f32.mrf.mxu0  ;;  %v2511_v2 = vadd.f32 %v10642_v58, %v12879_v11 }
 0x1b1   : > { %15317 = vst [vmem:[#allocation17_spill] sm:$0xff] %v13004_v38  ;;  %v13010_v61 = vadd.f32 %v10676_v45, %v2507_v56  ;;  %v13015_v22 = vpop.f32.mrf.mxu1 }
 0x1b2   : > { %v13012_v48 = vpop.f32.mrf.mxu0 }
 0x1b3   : > { %v10645_v40 = vpop.f32.mrf.mxu1 }
 0x1b4   : > { %v10679_v29 = vpop.f32.mrf.mxu0  ;;  %v2514_v38 = vadd.f32 %v10645_v40, %v12889_v36 }
 0x1b5   : > { %v13017_v53 = vadd.f32 %v10679_v29, %v2510_v5  ;;  %v2429_v14 = vpop.f32.mrf.mxu1 }
 0x1b6   : > { %v2852_v49 = vpop.f32.mrf.mxu0  ;;  %v2512_v11 = vadd.f32 %v2429_v14, %v12892_v34 }
 0x1b7   : > { %15318 = vst [vmem:[#allocation18_spill] sm:$0xff] %v13017_v53  ;;  %v13020_v12 = vadd.f32 %v2852_v49, %v2508_v0  ;;  %v10646_v21 = vpop.f32.mrf.mxu1 }
 0x1b8   : > { %v10680_v56 = vpop.f32.mrf.mxu0  ;;  %v2515_v36 = vadd.f32 %v10646_v21, %v12895_v55 }
 0x1b9   : > { %15319 = vst [vmem:[#allocation19_spill] sm:$0xff] %v13020_v12  ;;  %v13028_v45 = vadd.f32 %v10680_v56, %v2511_v2  ;;  %v13034_v0 = vpop.f32.mrf.mxu1 }
 0x1ba   : > { %v13030_v5 = vpop.f32.mrf.mxu0 }
 0x1bb   : > { %15321 = vst [vmem:[#allocation21_spill] sm:$0xff] %v13028_v45  ;;  %v10649_v40 = vpop.f32.mrf.mxu1 }
 0x1bc   : > { %v10683_v58 = vpop.f32.mrf.mxu0  ;;  %v2518_v12 = vadd.f32 %v10649_v40, %v12905_v50 }
 0x1bd   : > { %v13036_v29 = vadd.f32 %v10683_v58, %v2514_v38  ;;  %v2445_v34 = vpop.f32.mrf.mxu1 }
 0x1be   : > { %v2868_v49 = vpop.f32.mrf.mxu0  ;;  %v2516_v14 = vadd.f32 %v2445_v34, %v12911_v19 }
 0x1bf   : > { %15322 = vst [vmem:[#allocation22_spill] sm:$0xff] %v13036_v29  ;;  %v13039_v53 = vadd.f32 %v2868_v49, %v2512_v11  ;;  %v10650_v45 = vpop.f32.mrf.mxu1 }
 0x1c0   : > { %v10684_v2 = vpop.f32.mrf.mxu0  ;;  %v2519_v55 = vadd.f32 %v10650_v45, %v12914_v16 }
 0x1c1   : > { %v13042_v56 = vadd.f32 %v10684_v2, %v2515_v36  ;;  %v13047_v21 = vpop.f32.mrf.mxu1 }
 0x1c2   : > { %v13044_v39 = vpop.f32.mrf.mxu0 }
 0x1c3   : > { %15323 = vst [vmem:[#allocation23_spill] sm:$0xff] %v13042_v56  ;;  %v10653_v29 = vpop.f32.mrf.mxu1 }
 0x1c4   : > { %v10687_v38 = vpop.f32.mrf.mxu0  ;;  %v2522_v11 = vadd.f32 %v10653_v29, %v12921_v51 }
 0x1c5   : > { %v13049_v58 = vadd.f32 %v10687_v38, %v2518_v12  ;;  %v2461_v49 = vpop.f32.mrf.mxu1 }
 0x1c6   : > { %v2884_v50 = vpop.f32.mrf.mxu0  ;;  %v2520_v36 = vadd.f32 %v2461_v49, %v12930_v15 }
 0x1c7   : > { %15324 = vst [vmem:[#allocation24_spill] sm:$0xff] %v13049_v58  ;;  %v13052_v40 = vadd.f32 %v2884_v50, %v2516_v14  ;;  %v10654_v2 = vpop.f32.mrf.mxu1 }
 0x1c8   : > { %v10688_v19 = vpop.f32.mrf.mxu0  ;;  %v2523_v16 = vadd.f32 %v10654_v2, %v12933_v13 }
 0x1c9   : > { %v13055_v34 = vadd.f32 %v10688_v19, %v2519_v55  ;;  %v13060_v45 = vpop.f32.mrf.mxu1 }
 0x1ca   : > { %v13057_v56 = vpop.f32.mrf.mxu0 }
 0x1cb   : > { %15325 = vst [vmem:[#allocation25_spill] sm:$0xff] %v13055_v34  ;;  %v10657_v58 = vpop.f32.mrf.mxu1 }
 0x1cc   : > { %v10691_v12 = vpop.f32.mrf.mxu0  ;;  %v2526_v29 = vadd.f32 %v10657_v58, %v12945_v54  ;;  %v4821_v58 = vshll.u32 %v12941_v30, 16 }
 0x1cd   : > { %v13062_v38 = vadd.f32 %v10691_v12, %v2522_v11  ;;  %v2477_v50 = vpop.f32.mrf.mxu1  ;;  %v15327_v12 = vld [vmem:[#allocation14_spill] sm:$0xff] }
 0x1ce   : > { %v2900_v51 = vpop.f32.mrf.mxu0  ;;  %v2524_v55 = vadd.f32 %v2477_v50, %v12949_v59  ;;  %v1732_v59 = vadd.f32 %v12788_v9, %v12564_v25 }
 0x1cf   : > { %15326 = vst [vmem:[#allocation26_spill] sm:$0xff] %v13062_v38  ;;  %v13065_v14 = vadd.f32 %v2900_v51, %v2520_v36  ;;  %v10658_v19 = vpop.f32.mrf.mxu1  ;;  %v1003_v38 = vadd.f32 %v12755_v43, %v15327_v12  ;;  %v1736_v36 = vadd.f32 %v12814_v7, %v12587_v41  ;;  %v1740_v43 = vadd.f32 %v12838_v28, %v12615_v24  ;;  %v13095_v7 = vpop.permute.xlu0 %3845  ;;  %v15330_v12 = vld [vmem:[#allocation6_spill] sm:$0xff] }
 0x1d0   : > { %v10692_v15 = vpop.f32.mrf.mxu0  ;;  %v2527_v13 = vadd.f32 %v10658_v19, %v12955_v10  ;;  %v1744_v19 = vadd.f32 %v12855_v3, %v12641_v6  ;;  %v1748_v41 = vadd.f32 %v12868_v60, %v12666_v42  ;;  %v1752_v24 = vadd.f32 %v12887_v26, %v12691_v1  ;;  %v15328_v3 = vld [vmem:[#allocation3_spill] sm:$0xff]  ;;  %v15333_v26 = vld [vmem:[#allocation5_spill] sm:$0xff] }
 0x1d1   : > { %v13068_v49 = vadd.f32 %v10692_v15, %v2523_v16  ;;  %v13073_v2 = vpop.f32.mrf.mxu1  ;;  %v1325_v10 = vadd.f32 %v12780_v27, %v1003_v38  ;;  %v2179_v15 = vadd.f32 %v12809_v57, %v1732_v59  ;;  %v4819_v38 = vshrl.u32 %v12941_v30, 16 }
 0x1d2   : > { %v13070_v34 = vpop.f32.mrf.mxu0  ;;  %v4823_v57 = vrot.slane %v4821_v58, 1  ;;  %v1756_v6 = vadd.f32 %v12903_v4, %v12718_v47  ;;  %v2191_v60 = vadd.f32 %v15328_v3, %v1744_v19  ;;  %v15334_v47 = vld [vmem:[#allocation15_spill] sm:$0xff] }
 0x1d3   : > { %v10701_v16 = vpop.f32.mrf.mxu1  ;;  %v1764_v30 = vadd.f32 %v15330_v12, %v1325_v10  ;;  %v2493_v4 = vadd.f32 %v15334_v47, %v2179_v15  ;;  %v15335_v19 = vld [vmem:[#allocation7_spill] sm:$0xff]  ;;  %v3851_v12 = vpop.permute.xlu0 %3850 }
 0x1d4   : > { %v10695_v11 = vpop.f32.mrf.mxu0  ;;  %v3380_v58 = vadd.f32 %v10701_v16, %v12962_v31  ;;  %v13122_v16 = vor.u32 %v4823_v57, %v4819_v38 }
 0x1d5   : > { %v13077_v54 = vadd.f32 %v10695_v11, %v2526_v29  ;;  %v2183_v29 = vadd.f32 %v12835_v20, %v1736_v36  ;;  %v3235_v25 = vpop.f32.mrf.mxu1  ;;  %v1760_v20 = vadd.f32 %v12919_v33, %v12749_v63  ;;  %v15332_v36 = vld [vmem:[#allocation4_spill] sm:$0xff]  ;;  %v13118_v33 = vld [vmem:[%s15252_s3] ss:$0 sm:$0xff] }
 0x1d6   : > { %v2916_v51 = vpop.f32.mrf.mxu0  ;;  %v2203_v1 = vadd.f32 %v15332_v36, %v1756_v6  ;;  %v3378_v10 = vadd.f32 %v3235_v25, %v12965_v8  ;;  %v2505_v6 = vadd.f32 %v12999_v62, %v2191_v60 }
 0x1d7   : > { %v13085_v50 = vadd.f32 %v2916_v51, %v2524_v55  ;;  %v2187_v55 = vadd.f32 %v12852_v23, %v1740_v43  ;;  %v10702_v28 = vpop.f32.mrf.mxu1  ;;  %v15331_v23 = vld [vmem:[#allocation13_spill] sm:$0xff]  ;;  %v2207_v51 = vadd.f32 %v15333_v26, %v1760_v20 }
 0x1d8   : > { %v10696_v9 = vpop.f32.mrf.mxu0  ;;  %v2199_v59 = vadd.f32 %v15331_v23, %v1752_v24  ;;  %v2932_v24 = vadd.f32 %v12970_v18, %v2493_v4  ;;  %v13136_v18 = vadd.f32 %v13012_v48, %v2505_v6 }
 0x1d9   : > { %v13097_v27 = vadd.f32 %v10696_v9, %v2527_v13  ;;  %v15329_v13 = vld [vmem:[#allocation11_spill] sm:$0xff]  ;;  %v3238_v43 = vpop.f32.mrf.mxu1  ;;  %v2211_v9 = vadd.f32 %v15335_v19, %v1764_v30  ;;  %v2501_v15 = vadd.f32 %v12986_v46, %v2187_v55  ;;  %v15336_v30 = vld [vmem:[#allocation8_spill] sm:$0xff]  ;;  %v2521_v48 = vadd.f32 %v13060_v45, %v2207_v51 }
 0x1da   : > { %v2919_v42 = vpop.f32.mrf.mxu0  ;;  %v2195_v11 = vadd.f32 %v15329_v13, %v1748_v41  ;;  %v2497_v41 = vadd.f32 %v12973_v17, %v2183_v29  ;;  %v3856_v13 = vpop.permute.xlu1 %3855  ;;  %v3381_v36 = vadd.f32 %v10702_v28, %v15336_v30  ;;  %v2513_v46 = vadd.f32 %v13034_v0, %v2199_v59 }
 0x1db   : > { %v10705_v20 = vpop.f32.mrf.mxu1  ;;  %v13133_v17 = vadd.f32 %v12996_v52, %v2501_v15  ;;  %v3379_v60 = vadd.f32 %v3238_v43, %v2932_v24  ;;  %v13154_v4 = vadd.f32 %v13070_v34, %v2521_v48 }
 0x1dc   : > { %v10739_v63 = vpop.f32.mrf.mxu0  ;;  %v2509_v23 = vadd.f32 %v13015_v22, %v2195_v11  ;;  %v2936_v38 = vadd.f32 %v12983_v44, %v2497_v41  ;;  %v2517_v44 = vadd.f32 %v13047_v21, %v2203_v1  ;;  %v13145_v52 = vadd.f32 %v13044_v39, %v2513_v46  ;;  %v15337_v21 = vld [vmem:[#allocation9_spill] sm:$0xff] }
 0x1dd   : > { %v3694_v31 = vadd.f32 %v10739_v63, %v3380_v58  ;;  %v3251_v62 = vpop.f32.mrf.mxu1  ;;  %v2525_v58 = vadd.f32 %v13073_v2, %v2211_v9  ;;  %v3384_v39 = vadd.f32 %v10705_v20, %v15337_v21  ;;  %v3866_v63 = vpop.permute.xlu0 %3865 }
 0x1de   : > { %v3549_v3 = vpop.f32.mrf.mxu0  ;;  %v13140_v57 = vadd.f32 %v13030_v5, %v2509_v23  ;;  %v13151_v47 = vadd.f32 %v13057_v56, %v2517_v44  ;;  %v3861_v43 = vpop.permute.xlu1 %3860  ;;  %v3382_v56 = vadd.f32 %v3251_v62, %v12978_v35 }
 0x1df   : > { %v3737_v8 = vadd.f32 %v13118_v33, %v3694_v31  ;;  %v3692_v25 = vadd.f32 %v3549_v3, %v3378_v10  ;;  %v10706_v0 = vpop.f32.mrf.mxu1  ;;  %v13157_v2 = vadd.f32 %v2919_v42, %v2525_v58  ;;  %v15338_v31 = vld [vmem:[#allocation10_spill] sm:$0xff] }
 0x1e0   : > { %v10740_v29 = vpop.f32.mrf.mxu0  ;;  %v3385_v34 = vadd.f32 %v10706_v0, %v15338_v31 }
 0x1e1   : > { %v3773_v22 = vmax.f32 %v3737_v8, 0.0  ;;  %v3735_v55 = vadd.f32 %v13118_v33, %v3692_v25  ;;  %v3695_v28 = vadd.f32 %v10740_v29, %v3381_v36  ;;  %v3254_v45 = vpop.f32.mrf.mxu1 }
 0x1e2   : > { %v3552_v11 = vpop.f32.mrf.mxu0  ;;  %v13163_v30 = vadd.f32 %v3254_v45, %v2936_v38  ;;  %v13169_v38 = vpop.permute.xlu1 %3870 }
 0x1e3   : > { %v4025_v5 = vmul.f32 %v3856_v13, %v3773_v22  ;;  %v3771_v59 = vmax.f32 %v3735_v55, 0.0  ;;  %v3738_v26 = vadd.f32 %v13118_v33, %v3695_v28  ;;  %v3693_v1 = vadd.f32 %v3552_v11, %v3379_v60  ;;  %v10709_v24 = vpop.f32.mrf.mxu1  ;;  %v15339_v28 = vld [vmem:[#allocation12_spill] sm:$0xff]  ;;  %v3876_v11 = vpop.permute.xlu0 %3875 }
 0x1e4   : > { %v10743_v51 = vpop.f32.mrf.mxu0  ;;  %v13167_v44 = vadd.f32 %v10709_v24, %v15339_v28 }
 0x1e5   : > { %v9830_v19 = vpack.c.bf16 %v4025_v5, %v4025_v5  ;;  %v4023_v9 = vmul.f32 %v13095_v7, %v3771_v59  ;;  %v3774_v10 = vmax.f32 %v3738_v26, 0.0  ;;  %v3736_v41 = vadd.f32 %v13118_v33, %v3693_v1  ;;  %v3267_v7 = vpop.f32.mrf.mxu1 }
 0x1e6   : > { %v3698_v15 = vadd.f32 %v10743_v51, %v3384_v39  ;;  %v3565_v6 = vpop.f32.mrf.mxu0 }
 0x1e7   : > { %v4233_v20 = vshrl.u32 %v9830_v19, 16  ;;  %v4236_v3 = vshll.u32 %v9830_v19, 16  ;;  %v9828_v13 = vpack.c.bf16 %v4023_v9, %v4023_v9  ;;  %v4026_v23 = vmul.f32 %v3861_v43, %v3774_v10  ;;  %v10710_v60 = vpop.f32.mrf.mxu1 }
 0x1e8   : > { %v3772_v42 = vmax.f32 %v3736_v41, 0.0  ;;  %v3741_v36 = vadd.f32 %v13118_v33, %v3698_v15  ;;  %v3696_v8 = vadd.f32 %v3565_v6, %v3382_v56  ;;  %v10744_v25 = vpop.f32.mrf.mxu0  ;;  %v3386_v56 = vadd.f32 %v3267_v7, %v12991_v32 }
 0x1e9   : > { %v4235_v35 = vrot.slane %v4233_v20, 6  ;;  %v4238_v46 = vrot.slane %v4236_v3, 7  ;;  %v4214_v62 = vshrl.u32 %v9828_v13, 16  ;;  %v4217_v29 = vshll.u32 %v9828_v13, 16  ;;  %v3270_v43 = vpop.f32.mrf.mxu1 }
 0x1ea   : > { %v9831_v22 = vpack.c.bf16 %v4026_v23, %v4026_v23  ;;  %v4024_v55 = vmul.f32 %v3851_v12, %v3772_v42  ;;  %v3777_v48 = vmax.f32 %v3741_v36, 0.0  ;;  %v3568_v0 = vpop.f32.mrf.mxu0  ;;  %v3739_v26 = vadd.f32 %v13118_v33, %v3696_v8  ;;  %v4612_v12 = vld [vmem:[#allocation2 + $0x8] sm:$0xe] }
 0x1eb   : > { %v4239_v58 = vor.u32 %v4238_v46, %v4235_v35  ;;  %v4216_v5 = vrot.slane %v4214_v62, 6  ;;  %v4219_v59 = vrot.slane %v4217_v29, 7  ;;  %v10713_v20 = vpop.f32.mrf.mxu1  ;;  %v3389_v32 = vadd.f32 %v10710_v60, %v12994_v37 }
 0x1ec   : > { %v4243_v39 = vshrl.u32 %v9831_v22, 16  ;;  %v4246_v45 = vshll.u32 %v9831_v22, 16  ;;  %v9829_v1 = vpack.c.bf16 %v4024_v55, %v4024_v55  ;;  %v4029_v51 = vmul.f32 %v3876_v11, %v3777_v48  ;;  %v10747_v19 = vpop.f32.mrf.mxu0  ;;  %v3881_v22 = vpop.permute.xlu1 %3880 }
 0x1ed   : > { %v4241_v9 = vrot.slane %v4239_v58, 4  ;;  %v4220_v10 = vor.u32 %v4219_v59, %v4216_v5  ;;  %v3775_v31 = vmax.f32 %v3739_v26, 0.0  ;;  %v3699_v46 = vadd.f32 %v10744_v25, %v3385_v34  ;;  %v3283_v62 = vpop.f32.mrf.mxu1 }
 0x1ee   : > { %v4245_v41 = vrot.slane %v4243_v39, 6  ;;  %v4248_v24 = vrot.slane %v4246_v45, 7  ;;  %v4223_v15 = vshrl.u32 %v9829_v1, 16  ;;  %v4226_v6 = vshll.u32 %v9829_v1, 16  ;;  %v3581_v3 = vpop.f32.mrf.mxu0 }
 0x1ef   : > { %v4613_v13 = vsel %vm13174_vm12, %v4220_v10, %v4612_v12  ;;  %v9834_v42 = vpack.c.bf16 %v4029_v51, %v4029_v51  ;;  %v4027_v36 = vmul.f32 %v3866_v63, %v3775_v31  ;;  %v4221_v55 = vrot.slane %v4220_v10, 4  ;;  %v10714_v60 = vpop.f32.mrf.mxu1  ;;  %v3886_v10 = vpop.permute.xlu0 %3885 }
 0x1f0   : > { %4614 = vst [vmem:[#allocation2 + $0x8] sm:$0xe] %v4613_v13  ;;  %v4249_v7 = vor.u32 %v4248_v24, %v4245_v41  ;;  %v4225_v8 = vrot.slane %v4223_v15, 6  ;;  %v4228_v35 = vrot.slane %v4226_v6, 7  ;;  %v10748_v29 = vpop.f32.mrf.mxu0  ;;  %v3742_v63 = vadd.f32 %v13118_v33, %v3699_v46  ;;  %v3891_v46 = vpop.permute.xlu1 %3890 }
 0x1f1   : > { %v4273_v28 = vshrl.u32 %v9834_v42, 16  ;;  %v4276_v48 = vshll.u32 %v9834_v42, 16  ;;  %v9832_v11 = vpack.c.bf16 %v4027_v36, %v4027_v36  ;;  %v3387_v37 = vadd.f32 %v3270_v43, %v13133_v17  ;;  %v15344_v36 = vld [vmem:[#allocation16_spill] sm:$0xff] }
 0x1f2   : > { %v4250_v5 = vsel %vm13183_vm13, %v4241_v9, %v4249_v7  ;;  %v4229_v59 = vor.u32 %v4228_v35, %v4225_v8  ;;  %v3584_v26 = vpop.f32.mrf.mxu0  ;;  %v3778_v1 = vmax.f32 %v3742_v63, 0.0  ;;  %v3697_v51 = vadd.f32 %v3568_v0, %v13163_v30  ;;  %v3286_v9 = vpop.f32.mrf.mxu1 }
 0x1f3   : > { %4617 = vst [vmem:[#allocation2 + $0x14] sm:$0xf] %v4250_v5  ;;  %v4275_v21 = vrot.slane %v4273_v28, 6  ;;  %v4278_v34 = vrot.slane %v4276_v48, 7  ;;  %v4253_v25 = vshrl.u32 %v9832_v11, 16  ;;  %v4256_v12 = vshll.u32 %v9832_v11, 16 }
 0x1f4   : > { %v4230_v39 = vsel %vm13183_vm13, %v4221_v55, %v4229_v59  ;;  %v4231_v45 = vrot.slane %v4229_v59, 4  ;;  %v4251_v31 = vrot.slane %v4249_v7, 4  ;;  %v4030_v15 = vmul.f32 %v3881_v22, %v3778_v1  ;;  %v10751_v42 = vpop.f32.mrf.mxu0  ;;  %v13205_v35 = vpop.f32.mrf.mxu1  ;;  %v15345_v22 = vld [vmem:[#allocation17_spill] sm:$0xff] }
 0x1f5   : > { %4615 = vst [vmem:[#allocation2 + $0xc] sm:$0xf] %v4230_v39  ;;  %v13195_v41 = vor.u32 %v4278_v34, %v4275_v21  ;;  %v4255_v17 = vrot.slane %v4253_v25, 6  ;;  %v4258_v43 = vrot.slane %v4256_v12, 7  ;;  %v3740_v6 = vadd.f32 %v13118_v33, %v3697_v51 }
 0x1f6   : > { %v4240_v24 = vsel %vm13183_vm13, %v4231_v45, %v4239_v58  ;;  %v3702_v13 = vadd.f32 %v10747_v19, %v13167_v44  ;;  %v3392_v7 = vadd.f32 %v10713_v20, %v15344_v36  ;;  %v3700_v8 = vadd.f32 %v3581_v3, %v3386_v56  ;;  %v13219_v63 = vpop.f32.mrf.mxu0  ;;  %v13223_v39 = vpop.f32.mrf.mxu1 }
 0x1f7   : > { %4616 = vst [vmem:[#allocation2 + $0x10] sm:$0xf] %v4240_v24  ;;  %v4281_v30 = vrot.slane %v13195_v41, 4  ;;  %v13202_v0 = vor.u32 %v4258_v43, %v4255_v17  ;;  %v9835_v55 = vpack.c.bf16 %v4030_v15, %v4030_v15  ;;  %v3776_v28 = vmax.f32 %v3740_v6, 0.0 }
 0x1f8   : > { %v3745_v58 = vadd.f32 %v13118_v33, %v3702_v13  ;;  %v13209_v48 = vadd.f32 %v3283_v62, %v15345_v22  ;;  %v3743_v19 = vadd.f32 %v13118_v33, %v3700_v8  ;;  %v13216_v11 = vadd.f32 %v10714_v60, %v13010_v61  ;;  %v3896_v62 = vpop.permute.xlu0 %3895  ;;  %v13234_v6 = vpop.f32.mrf.mxu0 }
 0x1f9   : > { %v4260_v44 = vsel %vm13183_vm13, %v4251_v31, %v13202_v0  ;;  %v3703_v56 = vadd.f32 %v10748_v29, %v3389_v32  ;;  %v4283_v20 = vshrl.u32 %v9835_v55, 16  ;;  %v4286_v3 = vshll.u32 %v9835_v55, 16  ;;  %v10718_v55 = vpop.f32.mrf.mxu1 }
 0x1fa   : > { %4618 = vst [vmem:[#allocation2 + $0x18] sm:$0xf] %v4260_v44  ;;  %v4028_v5 = vmul.f32 %v13169_v38, %v3776_v28  ;;  %v3781_v59 = vmax.f32 %v3745_v58, 0.0  ;;  %v4261_v21 = vrot.slane %v13202_v0, 4  ;;  %v3779_v34 = vmax.f32 %v3743_v19, 0.0  ;;  %v11394_v38 = vld [vmem:[%s15253_s4 + $0xf0] sm:$0xff]  }
 0x1fb   : > { %v3746_v25 = vadd.f32 %v13118_v33, %v3703_v56  ;;  %v3701_v12 = vadd.f32 %v3584_v26, %v3387_v37  ;;  %v4285_v61 = vrot.slane %v4283_v20, 6  ;;  %v4288_v60 = vrot.slane %v4286_v3, 7  ;;  %v3901_v37 = vpop.permute.xlu1 %3900  ;;  %v11398_v44 = vld [vmem:[%s15253_s4 + $0xe8] sm:$0xff]  }
 0x1fc   : > { %v9833_v32 = vpack.c.bf16 %v4028_v5, %v4028_v5  ;;  %v4033_v29 = vmul.f32 %v3896_v62, %v3781_v59  ;;  %v13225_v45 = vld [vmem:[#allocation2 + $0x8] sm:$0xff]   ;;  %v4031_v1 = vmul.f32 %v3886_v10, %v3779_v34  ;;  %v13231_v31 = vadd.f32 %v3286_v9, %v13136_v18  ;;  %v15346_v18 = vld [vmem:[#allocation20_spill] sm:$0xff]  ;;  %v13246_v19 = vpop.permute.xlu0 %3905  ;;  %v3600_v62 = vpop.f32.mrf.mxu0 }
 0x1fd   : > { %v3782_v51 = vmax.f32 %v3746_v25, 0.0  ;;  %v3744_v17 = vadd.f32 %v13118_v33, %v3701_v12  ;;  %v4289_v26 = vor.u32 %v4288_v60, %v4285_v61  ;;  %10842 = vmatmul.mubr.bf16.vlgmr.msra.gmra.mxu0 %v13225_v45  ;;  %v3706_v8 = vadd.f32 %v10751_v42, %v3392_v7  ;;  %v3302_v60 = vpop.f32.mrf.mxu1 }
 0x1fe   : > { %v4263_v43 = vshrl.u32 %v9833_v32, 16  ;;  %v4266_v24 = vshll.u32 %v9833_v32, 16  ;;  %v9838_v15 = vpack.c.bf16 %v4033_v29, %v4033_v29  ;;  %v13237_v13 = vld [vmem:[#allocation2 + $0x10] sm:$0xff]   ;;  %v9836_v0 = vpack.c.bf16 %v4031_v1, %v4031_v1  ;;  %10930 = vmatpush3.bf16.msra.mxu0 %v15346_v18 }
 0x1ff   : > { %v4034_v36 = vmul.f32 %v3901_v37, %v3782_v51  ;;  %v3780_v10 = vmax.f32 %v3744_v17, 0.0  ;;  %v4290_v9 = vsel %vm13183_vm13, %v4281_v30, %v4289_v26  ;;  %v4291_v28 = vrot.slane %v4289_v26, 4  ;;  %10845 = vmatprep.mubr.bf16.mxu0 %v13237_v13  ;;  %10931 = vmatprep.subr.bf16.mxu0 %v11394_v38 }
 0x200   : > { %v4265_v58 = vrot.slane %v4263_v43, 6  ;;  %v4268_v22 = vrot.slane %v4266_v24, 7  ;;  %4621 = vst [vmem:[#allocation2 + $0x24] sm:$0xf] %v4290_v9  ;;  %v4313_v42 = vshrl.u32 %v9838_v15, 16  ;;  %v4316_v7 = vshll.u32 %v9838_v15, 16 }
 0x201   : > { %v4293_v56 = vshrl.u32 %v9836_v0, 16  ;;  %v4296_v20 = vshll.u32 %v9836_v0, 16  ;;  %v9839_v5 = vpack.c.bf16 %v4034_v36, %v4034_v36  ;;  %v4032_v30 = vmul.f32 %v3891_v46, %v3780_v10  ;;  %v11402_v46 = vld [vmem:[%s15253_s4 + $0xe0] sm:$0xff]   ;;  %v10755_v36 = vpop.f32.mrf.mxu0  ;;  %v3916_v10 = vpop.permute.xlu0 %3915 }
 0x202   : > { %v4269_v3 = vor.u32 %v4268_v22, %v4265_v58  ;;  %v3749_v59 = vadd.f32 %v13118_v33, %v3706_v8  ;;  %v4315_v34 = vrot.slane %v4313_v42, 6  ;;  %v4318_v25 = vrot.slane %v4316_v7, 7  ;;  %10932 = vmatpush3.bf16.msra.mxu0 %v11394_v38  ;;  %v15347_v15 = vld [vmem:[#allocation18_spill] sm:$0xff]  ;;  %v15348_v58 = vld [vmem:[#allocation19_spill] sm:$0xff]  ;;  %v10721_v42 = vpop.f32.mrf.mxu1 }
 0x203   : > { %v4295_v12 = vrot.slane %v4293_v56, 6  ;;  %v4298_v61 = vrot.slane %v4296_v20, 7  ;;  %v4323_v1 = vshrl.u32 %v9839_v5, 16  ;;  %v4326_v51 = vshll.u32 %v9839_v5, 16  ;;  %10933 = vmatprep.subr.bf16.mxu0 %v11398_v44 }
 0x204   : > { %v4270_v32 = vsel %vm13183_vm13, %v4261_v21, %v4269_v3  ;;  %v4271_v29 = vrot.slane %v4269_v3, 4  ;;  %v13254_v17 = vor.u32 %v4318_v25, %v4315_v34  ;;  %v9837_v26 = vpack.c.bf16 %v4032_v30, %v4032_v30  ;;  %v15349_v30 = vld [vmem:[#allocation21_spill] sm:$0xff] }
 0x205   : > { %4619 = vst [vmem:[#allocation2 + $0x1c] sm:$0xf] %v4270_v32  ;;  %v4299_v37 = vor.u32 %v4298_v61, %v4295_v12  ;;  %v3785_v43 = vmax.f32 %v3749_v59, 0.0  ;;  %v4325_v24 = vrot.slane %v4323_v1, 6  ;;  %v4328_v21 = vrot.slane %v4326_v51, 7 }
 0x206   : > { %v4280_v38 = vsel %vm13183_vm13, %v4271_v29, %v13195_v41  ;;  %v3396_v0 = vadd.f32 %v13205_v35, %v15347_v15  ;;  %v4321_v8 = vrot.slane %v13254_v17, 4  ;;  %v4303_v9 = vshrl.u32 %v9837_v26, 16  ;;  %10934 = vmatpush3.bf16.msra.mxu0 %v11398_v44  ;;  %v3911_v41 = vpop.permute.xlu1 %3910 }
 0x207   : > { %4620 = vst [vmem:[#allocation2 + $0x20] sm:$0xf] %v4280_v38  ;;  %v4300_v18 = vsel %vm13183_vm13, %v4291_v28, %v4299_v37  ;;  %v3394_v22 = vadd.f32 %v13223_v39, %v15348_v58  ;;  %v13266_v7 = vor.u32 %v4328_v21, %v4325_v24  ;;  %v4306_v56 = vshll.u32 %v9837_v26, 16  ;;  %10935 = vmatprep.subr.bf16.mxu0 %v11402_v46  ;;  %v11406_v28 = vld [vmem:[%s15253_s4 + $0xd8] sm:$0xff]   ;;  %v15350_v24 = vld [vmem:[#allocation22_spill] sm:$0xff] }
 0x208   : > { %4622 = vst [vmem:[#allocation2 + $0x28] sm:$0xf] %v4300_v18  ;;  %v4037_v35 = vmul.f32 %v3916_v10, %v3785_v43  ;;  %v3704_v20 = vadd.f32 %v13219_v63, %v13209_v48  ;;  %v4301_v3 = vrot.slane %v4299_v37, 4  ;;  %v4305_v5 = vrot.slane %v4303_v9, 6  ;;  %v3613_v63 = vpop.f32.mrf.mxu0 }
 0x209   : > { %v3397_v39 = vadd.f32 %v10718_v55, %v15349_v30  ;;  %v3707_v44 = vadd.f32 %v13234_v6, %v13216_v11  ;;  %v4330_v59 = vsel %vm13183_vm13, %v4321_v8, %v13266_v7  ;;  %v4308_v34 = vrot.slane %v4306_v56, 7  ;;  %v3315_v11 = vpop.f32.mrf.mxu1  ;;  %v11415_v56 = vld [vmem:[%s15253_s4 + $0xc8] sm:$0xff]  }
 0x20a   : > { %v9842_v25 = vpack.c.bf16 %v4037_v35, %v4037_v35  ;;  %v13280_v48 = vadd.f32 %v3302_v60, %v13140_v57  ;;  %v4331_v12 = vrot.slane %v13266_v7, 4  ;;  %4625 = vst [vmem:[#allocation2 + $0x34] sm:$0xf] %v4330_v59  ;;  %v3747_v61 = vadd.f32 %v13118_v33, %v3704_v20  ;;  %10936 = vmatpush3.bf16.msra.mxu0 %v11402_v46  ;;  %v11410_v57 = vld [vmem:[%s15253_s4 + $0xd0] sm:$0xff]   ;;  %v3926_v60 = vpop.permute.xlu0 %3925 }
 0x20b   : > { %v3750_v55 = vadd.f32 %v13118_v33, %v3707_v44  ;;  %v3705_v32 = vadd.f32 %v3600_v62, %v13231_v31  ;;  %v4309_v6 = vor.u32 %v4308_v34, %v4305_v5  ;;  %v3710_v51 = vadd.f32 %v10755_v36, %v3396_v0  ;;  %10937 = vmatprep.subr.bf16.mxu0 %v11406_v28  ;;  %v3921_v62 = vpop.permute.xlu1 %3920  ;;  %v10756_v36 = vpop.f32.mrf.mxu0 }
 0x20c   : > { %v4353_v29 = vshrl.u32 %v9842_v25, 16  ;;  %v4356_v1 = vshll.u32 %v9842_v25, 16  ;;  %v13286_v37 = vld [vmem:[#allocation2 + $0x18] sm:$0xff]   ;;  %v3783_v26 = vmax.f32 %v3747_v61, 0.0  ;;  %v13293_v31 = vadd.f32 %v10721_v42, %v15350_v24  ;;  %v10722_v42 = vpop.f32.mrf.mxu1  ;;  %v15351_v25 = vld [vmem:[#allocation23_spill] sm:$0xff] }
 0x20d   : > { %v3786_v43 = vmax.f32 %v3750_v55, 0.0  ;;  %v3748_v38 = vadd.f32 %v13118_v33, %v3705_v32  ;;  %v4310_v46 = vsel %vm13183_vm13, %v4301_v3, %v4309_v6  ;;  %v4311_v21 = vrot.slane %v4309_v6, 4  ;;  %10846 = vmatmul.mubr.bf16.gmra.mxu0 %v13286_v37  ;;  %v3616_v55 = vpop.f32.mrf.mxu0 }
 0x20e   : > { %v4355_v15 = vrot.slane %v4353_v29, 6  ;;  %v4358_v0 = vrot.slane %v4356_v1, 7  ;;  %v13298_v10 = vld [vmem:[#allocation2 + $0x20] sm:$0xff]   ;;  %4623 = vst [vmem:[#allocation2 + $0x2c] sm:$0xf] %v4310_v46  ;;  %v4035_v8 = vmul.f32 %v13246_v19, %v3783_v26  ;;  %v3753_v58 = vadd.f32 %v13118_v33, %v3710_v51  ;;  %10938 = vmatpush3.bf16.msra.mxu0 %v11406_v28  ;;  %v3318_v26 = vpop.f32.mrf.mxu1 }
 0x20f   : > { %v4038_v18 = vmul.f32 %v3921_v62, %v3786_v43  ;;  %v3784_v9 = vmax.f32 %v3748_v38, 0.0  ;;  %v4320_v35 = vsel %vm13183_vm13, %v4311_v21, %v13254_v17  ;;  %v13311_v3 = vadd.f32 %v3315_v11, %v13039_v53  ;;  %10849 = vmatprep.mubr.bf16.mxu0 %v13298_v10  ;;  %10939 = vmatprep.subr.bf16.mxu0 %v11410_v57  ;;  %v3936_v53 = vpop.permute.xlu0 %3935  ;;  %v13319_v6 = vpop.permute.xlu1 %3930 }
 0x210   : > { %v13308_v20 = vor.u32 %v4358_v0, %v4355_v15  ;;  %v3708_v19 = vadd.f32 %v3613_v63, %v3394_v22  ;;  %4624 = vst [vmem:[#allocation2 + $0x30] sm:$0xf] %v4320_v35  ;;  %v9840_v5 = vpack.c.bf16 %v4035_v8, %v4035_v8  ;;  %v3789_v44 = vmax.f32 %v3753_v58, 0.0  ;;  %v10759_v0 = vpop.f32.mrf.mxu0 }
 0x211   : > { %v9843_v30 = vpack.c.bf16 %v4038_v18, %v4038_v18  ;;  %v4036_v28 = vmul.f32 %v3911_v41, %v3784_v9  ;;  %v13317_v17 = vadd.f32 %v10722_v42, %v15351_v25  ;;  %v3711_v61 = vadd.f32 %v10756_v36, %v3397_v39  ;;  %v11418_v39 = vld [vmem:[%s15253_s4 + $0xc0] sm:$0xff]   ;;  %v11426_v42 = vld [vmem:[%s15253_s4 + $0x178] sm:$0xff]  }
 0x212   : > { %v4361_v59 = vrot.slane %v13308_v20, 4  ;;  %v3751_v34 = vadd.f32 %v13118_v33, %v3708_v19  ;;  %v4333_v32 = vshrl.u32 %v9840_v5, 16  ;;  %v4336_v22 = vshll.u32 %v9840_v5, 16  ;;  %10940 = vmatpush3.bf16.msra.mxu0 %v11410_v57 }
 0x213   : > { %v4363_v63 = vshrl.u32 %v9843_v30, 16  ;;  %v4366_v11 = vshll.u32 %v9843_v30, 16  ;;  %v9841_v41 = vpack.c.bf16 %v4036_v28, %v4036_v28  ;;  %v4041_v29 = vmul.f32 %v3936_v53, %v3789_v44  ;;  %10941 = vmatprep.subr.bf16.mxu0 %v11415_v56  ;;  %v10725_v28 = vpop.f32.mrf.mxu1  ;;  %v3941_v25 = vpop.permute.xlu1 %3940 }
 0x214   : > { %v3787_v1 = vmax.f32 %v3751_v34, 0.0  ;;  %v3754_v51 = vadd.f32 %v13118_v33, %v3711_v61  ;;  %v4335_v43 = vrot.slane %v4333_v32, 6  ;;  %v4338_v38 = vrot.slane %v4336_v22, 7  ;;  %v3629_v32 = vpop.f32.mrf.mxu0 }
 0x215   : > { %v4365_v24 = vrot.slane %v4363_v63, 6  ;;  %v4368_v62 = vrot.slane %v4366_v11, 7  ;;  %v4343_v46 = vshrl.u32 %v9841_v41, 16  ;;  %v4346_v21 = vshll.u32 %v9841_v41, 16  ;;  %v13325_v36 = vld [vmem:[#allocation2 + $0x28] sm:$0xff]  }
 0x216   : > { %v9846_v57 = vpack.c.bf16 %v4041_v29, %v4041_v29  ;;  %v4039_v15 = vmul.f32 %v3926_v60, %v3787_v1  ;;  %v4339_v8 = vor.u32 %v4338_v38, %v4335_v43  ;;  %v3790_v9 = vmax.f32 %v3754_v51, 0.0  ;;  %10942 = vmatpush3.bf16.msra.mxu0 %v11415_v56  ;;  %v3331_v1 = vpop.f32.mrf.mxu1 }
 0x217   : > { %v13327_v18 = vor.u32 %v4368_v62, %v4365_v24  ;;  %v3709_v58 = vadd.f32 %v3616_v55, %v13280_v48  ;;  %v4345_v35 = vrot.slane %v4343_v46, 6  ;;  %v4348_v19 = vrot.slane %v4346_v21, 7  ;;  %10850 = vmatmul.mubr.bf16.gmra.mxu0 %v13325_v36  ;;  %10943 = vmatprep.subr.bf16.mxu0 %v11418_v39  ;;  %v13344_v34 = vld [vmem:[#allocation2 + $0x30] sm:$0xff]   ;;  %v10760_v21 = vpop.f32.mrf.mxu0 }
 0x218   : > { %v4393_v5 = vshrl.u32 %v9846_v57, 16  ;;  %v4396_v30 = vshll.u32 %v9846_v57, 16  ;;  %v4340_v60 = vsel %vm13183_vm13, %v4331_v12, %v4339_v8  ;;  %v4341_v44 = vrot.slane %v4339_v8, 4  ;;  %10853 = vmatprep.mubr.bf16.mxu0 %v13344_v34  ;;  %v3946_v57 = vpop.permute.xlu0 %3945 }
 0x219   : > { %v4370_v48 = vsel %vm13183_vm13, %v4361_v59, %v13327_v18  ;;  %v13342_v56 = vadd.f32 %v3318_v26, %v13145_v52  ;;  %4626 = vst [vmem:[#allocation2 + $0x38] sm:$0xf] %v4340_v60  ;;  %v4349_v61 = vor.u32 %v4348_v19, %v4345_v35  ;;  %v9844_v7 = vpack.c.bf16 %v4039_v15, %v4039_v15  ;;  %v10726_v19 = vpop.f32.mrf.mxu1 }
 0x21a   : > { %4629 = vst [vmem:[#allocation2 + $0x44] sm:$0xf] %v4370_v48  ;;  %v4395_v55 = vrot.slane %v4393_v5, 6  ;;  %v4398_v53 = vrot.slane %v4396_v30, 7  ;;  %v4371_v12 = vrot.slane %v13327_v18, 4  ;;  %v4042_v22 = vmul.f32 %v3941_v25, %v3790_v9  ;;  %10944 = vmatpush3.bf16.msra.mxu0 %v11418_v39 }
 0x21b   : > { %v3752_v63 = vadd.f32 %v13118_v33, %v3709_v58  ;;  %v4826_v59 = vshll.u32 %v13225_v45, 16  ;;  %v4350_v52 = vsel %vm13183_vm13, %v4341_v44, %v4349_v61  ;;  %v4351_v11 = vrot.slane %v4349_v61, 4  ;;  %11033 = vmatprep.subr.bf16.mxu0 %v11426_v42  ;;  %v15352_v44 = vld [vmem:[#allocation24_spill] sm:$0xff] }
 0x21c   : > { %v13352_v41 = vor.u32 %v4398_v53, %v4395_v55  ;;  %v4373_v29 = vshrl.u32 %v9844_v7, 16  ;;  %4627 = vst [vmem:[#allocation2 + $0x3c] sm:$0xf] %v4350_v52  ;;  %v4376_v51 = vshll.u32 %v9844_v7, 16  ;;  %v9847_v26 = vpack.c.bf16 %v4042_v22, %v4042_v22  ;;  %v11391_v7 = vld [vmem:[%s15253_s4 + $0xb0] sm:$0xff]   ;;  %v3956_v52 = vpop.permute.xlu0 %3955 }
 0x21d   : > { %v3788_v43 = vmax.f32 %v3752_v63, 0.0  ;;  %v4828_v38 = vrot.slane %v4826_v59, 1  ;;  %v4360_v24 = vsel %vm13183_vm13, %v4351_v11, %v13308_v20  ;;  %v4830_v46 = vshrl.u32 %v13225_v45, 16 }
 0x21e   : > { %v4401_v39 = vrot.slane %v13352_v41, 4  ;;  %v4375_v62 = vrot.slane %v4373_v29, 6  ;;  %4628 = vst [vmem:[#allocation2 + $0x40] sm:$0xf] %v4360_v24  ;;  %v4378_v15 = vrot.slane %v4376_v51, 7  ;;  %v4403_v8 = vshrl.u32 %v9847_v26, 16 }
 0x21f   : > { %v4406_v18 = vshll.u32 %v9847_v26, 16  ;;  %v4040_v9 = vmul.f32 %v13319_v6, %v3788_v43  ;;  %v4829_v58 = vsel %vm413_vm1, %v13122_v16, %v4828_v38  ;;  %v4832_v42 = vor.u32 %v4830_v46, %v4828_v38  ;;  %v3632_v16 = vpop.f32.mrf.mxu0  ;;  %v3951_v26 = vpop.permute.xlu1 %3950  ;;  %v11520_v24 = vld [vmem:[%s15253_s4 + $0xb8] sm:$0xff]  }
 0x220   : > { %v3714_v35 = vadd.f32 %v10759_v0, %v13293_v31  ;;  %v4834_v20 = vshll.u32 %v13237_v13, 16  ;;  %v4379_v5 = vor.u32 %v4378_v15, %v4375_v62  ;;  %v4405_v30 = vrot.slane %v4403_v8, 6  ;;  %10789 = vmatprep.mubr.bf16.mxu1 %v4829_v58  ;;  %v15353_v8 = vld [vmem:[#allocation25_spill] sm:$0xff]  ;;  %v11396_v58 = vld [vmem:[%s15253_s4 + $0xa8] sm:$0xff]  }
 0x221   : > { %v4408_v45 = vrot.slane %v4406_v18, 7  ;;  %v9845_v60 = vpack.c.bf16 %v4040_v9, %v4040_v9  ;;  %v13365_v48 = vadd.f32 %v10725_v28, %v15352_v44  ;;  %v3712_v61 = vadd.f32 %v3629_v32, %v13311_v3  ;;  %v3334_v3 = vpop.f32.mrf.mxu1 }
 0x222   : > { %v3757_v25 = vadd.f32 %v13118_v33, %v3714_v35  ;;  %v4836_v6 = vrot.slane %v4834_v20, 1  ;;  %v4380_v31 = vsel %vm13183_vm13, %v4371_v12, %v4379_v5  ;;  %v4381_v0 = vrot.slane %v4379_v5, 4 }
 0x223   : > { %v13371_v55 = vor.u32 %v4408_v45, %v4405_v30  ;;  %v4383_v53 = vshrl.u32 %v9845_v60, 16  ;;  %4630 = vst [vmem:[#allocation2 + $0x48] sm:$0xf] %v4380_v31  ;;  %v4386_v28 = vshll.u32 %v9845_v60, 16  ;;  %v3755_v59 = vadd.f32 %v13118_v33, %v3712_v61  ;;  %v13378_v32 = vld [vmem:[#allocation2 + $0x38] sm:$0xff]   ;;  %v10729_v20 = vpop.f32.mrf.mxu1  ;;  %v13416_v61 = vpop.permute.xlu0 %3965 }
 0x224   : > { %v3793_v22 = vmax.f32 %v3757_v25, 0.0  ;;  %v4837_v63 = vsel %vm413_vm1, %v4832_v42, %v4836_v6  ;;  %v13385_v51 = vadd.f32 %v3331_v1, %v13052_v40  ;;  %v3715_v46 = vadd.f32 %v10760_v21, %v13317_v17  ;;  %10854 = vmatmul.mubr.bf16.gmra.mxu0 %v13378_v32  ;;  %v3961_v31 = vpop.permute.xlu1 %3960 }
 0x225   : > { %v4410_v12 = vsel %vm13183_vm13, %v4401_v39, %v13371_v55  ;;  %v4411_v11 = vrot.slane %v13371_v55, 4  ;;  %v4385_v29 = vrot.slane %v4383_v53, 6  ;;  %10790 = vmatmul.mubr.bf16.vlgmr.msra.gmra.mxu1 %v4837_v63  ;;  %v4388_v43 = vrot.slane %v4386_v28, 7  ;;  %v10763_v39 = vpop.f32.mrf.mxu0  ;;  %v13392_v15 = vld [vmem:[#allocation2 + $0x40] sm:$0xff]  }
 0x226   : > { %4633 = vst [vmem:[#allocation2 + $0x54] sm:$0xf] %v4410_v12  ;;  %v4045_v38 = vmul.f32 %v3956_v52, %v3793_v22  ;;  %10878 = vmatpush3.bf16.msra.mxu1 %v11520_v24  ;;  %v3791_v62 = vmax.f32 %v3755_v59, 0.0  ;;  %v13395_v40 = vadd.f32 %v10726_v19, %v15353_v8  ;;  %v3713_v1 = vadd.f32 %v3632_v16, %v13342_v56  ;;  %v3347_v22 = vpop.f32.mrf.mxu1 }
 0x227   : > { %v4838_v18 = vshrl.u32 %v13237_v13, 16  ;;  %v4842_v9 = vshll.u32 %v13286_v37, 16  ;;  %10879 = vmatprep.subr.bf16.mxu1 %v11391_v7  ;;  %v4389_v17 = vor.u32 %v4388_v43, %v4385_v29  ;;  %v3758_v35 = vadd.f32 %v13118_v33, %v3715_v46  ;;  %10857 = vmatprep.mubr.bf16.mxu0 %v13392_v15  ;;  %v13411_v25 = vpop.f32.mrf.mxu0  ;;  %v13428_v29 = vld [vmem:[%s15252_s3] ss:$0 sm:$0xff] }
 0x228   : > { %v9850_v21 = vpack.c.bf16 %v4045_v38, %v4045_v38  ;;  %v4043_v42 = vmul.f32 %v3946_v57, %v3791_v62  ;;  %v13406_v19 = vadd.f32 %v3334_v3, %v13151_v47  ;;  %v3756_v13 = vadd.f32 %v13118_v33, %v3713_v1  ;;  %v11400_v57 = vld [vmem:[%s15253_s4 + $0xa0] sm:$0xff]  }
 0x229   : > { %v4840_v56 = vor.u32 %v4838_v18, %v4836_v6  ;;  %v4844_v5 = vrot.slane %v4842_v9, 1  ;;  %v4390_v30 = vsel %vm13183_vm13, %v4381_v0, %v4389_v17  ;;  %v4391_v45 = vrot.slane %v4389_v17, 4  ;;  %v3976_v17 = vpop.permute.xlu0 %3975 }
 0x22a   : > { %v4433_v60 = vshrl.u32 %v9850_v21, 16  ;;  %v4436_v44 = vshll.u32 %v9850_v21, 16  ;;  %10880 = vmatpush3.bf16.msra.mxu1 %v11391_v7  ;;  %4631 = vst [vmem:[#allocation2 + $0x4c] sm:$0xf] %v4390_v30  ;;  %v9848_v47 = vpack.c.bf16 %v4043_v42, %v4043_v42  ;;  %v3794_v33 = vmax.f32 %v3758_v35, 0.0 }
 0x22b   : > { %v3792_v6 = vmax.f32 %v3756_v13, 0.0  ;;  %v4845_v16 = vsel %vm413_vm1, %v4840_v56, %v4844_v5  ;;  %10881 = vmatprep.subr.bf16.mxu1 %v11396_v58  ;;  %v4400_v0 = vsel %vm13183_vm13, %v4391_v45, %v13352_v41  ;;  %v3718_v28 = vadd.f32 %v10763_v39, %v13365_v48  ;;  %v10764_v48 = vpop.f32.mrf.mxu0  ;;  %v15354_v56 = vld [vmem:[#allocation26_spill] sm:$0xff] }
 0x22c   : > { %v4435_v53 = vrot.slane %v4433_v60, 6  ;;  %v4438_v7 = vrot.slane %v4436_v44, 7  ;;  %10793 = vmatprep.mubr.bf16.mxu1 %v4845_v16  ;;  %4632 = vst [vmem:[#allocation2 + $0x50] sm:$0xf] %v4400_v0  ;;  %v4413_v63 = vshrl.u32 %v9848_v47, 16  ;;  %v4416_v59 = vshll.u32 %v9848_v47, 16 }
 0x22d   : > { %v4046_v3 = vmul.f32 %v3961_v31, %v3794_v33  ;;  %v4044_v52 = vmul.f32 %v3951_v26, %v3792_v6  ;;  %v3761_v41 = vadd.f32 %v13428_v29, %v3718_v28  ;;  %v4846_v43 = vshrl.u32 %v13286_v37, 16  ;;  %v11405_v26 = vld [vmem:[%s15253_s4 + $0x98] sm:$0xff]   ;;  %v10730_v37 = vpop.f32.mrf.mxu1  ;;  %v3648_v44 = vpop.f32.mrf.mxu0 }
 0x22e   : > { %v13423_v12 = vor.u32 %v4438_v7, %v4435_v53  ;;  %v4850_v38 = vshll.u32 %v13298_v10, 16  ;;  %10882 = vmatpush3.bf16.msra.mxu1 %v11396_v58  ;;  %v4415_v24 = vrot.slane %v4413_v63, 6  ;;  %v4418_v62 = vrot.slane %v4416_v59, 7  ;;  %v3971_v31 = vpop.permute.xlu1 %3970 }
 0x22f   : > { %v9851_v46 = vpack.c.bf16 %v4046_v3, %v4046_v3  ;;  %v9849_v39 = vpack.c.bf16 %v4044_v52, %v4044_v52  ;;  %10883 = vmatprep.subr.bf16.mxu1 %v11400_v57  ;;  %v3797_v1 = vmax.f32 %v3761_v41, 0.0  ;;  %v4848_v18 = vor.u32 %v4846_v43, %v4844_v5 }
 0x230   : > { %v4441_v8 = vrot.slane %v13423_v12, 4  ;;  %v13437_v9 = vrot.slane %v4850_v38, 1  ;;  %v4419_v21 = vor.u32 %v4418_v62, %v4415_v24  ;;  %v13440_v30 = vadd.f32 %v10729_v20, %v15354_v56  ;;  %v11409_v20 = vld [vmem:[%s15253_s4 + $0x90] sm:$0xff]  }
 0x231   : > { %v4443_v42 = vshrl.u32 %v9851_v46, 16  ;;  %v4446_v58 = vshll.u32 %v9851_v46, 16  ;;  %v4423_v35 = vshrl.u32 %v9849_v39, 16  ;;  %v4426_v13 = vshll.u32 %v9849_v39, 16  ;;  %v13444_v47 = vld [vmem:[#allocation2 + $0x48] sm:$0xff]  }
 0x232   : > { %v4049_v45 = vmul.f32 %v3976_v17, %v3797_v1  ;;  %v4853_v60 = vsel %vm413_vm1, %v4848_v18, %v13437_v9  ;;  %10884 = vmatpush3.bf16.msra.mxu1 %v11400_v57  ;;  %v4420_v5 = vsel %vm13183_vm13, %v4411_v11, %v4419_v21  ;;  %v4421_v33 = vrot.slane %v4419_v21, 4  ;;  %v3350_v57 = vpop.f32.mrf.mxu1  ;;  %10858 = vmatmul.mubr.bf16.gmra.mxu0 %v13444_v47  ;;  %v3981_v1 = vpop.permute.xlu1 %3980 }
 0x233   : > { %v4445_v6 = vrot.slane %v4443_v42, 6  ;;  %v4448_v16 = vrot.slane %v4446_v58, 7  ;;  %10794 = vmatmul.mubr.bf16.gmra.mxu1 %v4853_v60  ;;  %10885 = vmatprep.subr.bf16.mxu1 %v11405_v26  ;;  %4634 = vst [vmem:[#allocation2 + $0x58] sm:$0xf] %v4420_v5  ;;  %v4425_v0 = vrot.slane %v4423_v35, 6  ;;  %v4428_v53 = vrot.slane %v4426_v13, 7  ;;  %v13491_v58 = vpop.permute.xlu0 %3985 }
 0x234   : > { %v9854_v7 = vpack.c.bf16 %v4049_v45, %v4049_v45  ;;  %v3716_v55 = vadd.f32 %v13411_v25, %v13385_v51  ;;  %v13456_v11 = vld [vmem:[#allocation2 + $0x50] sm:$0xff]   ;;  %v13461_v63 = vadd.f32 %v3347_v22, %v13065_v14  ;;  %v13464_v59 = vadd.f32 %v10730_v37, %v13068_v49  ;;  %v10767_v25 = vpop.f32.mrf.mxu0  ;;  %v11413_v22 = vld [vmem:[%s15253_s4 + $0x88] sm:$0xff]   ;;  %v10733_v39 = vpop.f32.mrf.mxu1 }
 0x235   : > { %v13458_v28 = vor.u32 %v4448_v16, %v4445_v6  ;;  %v3719_v3 = vadd.f32 %v10764_v48, %v13395_v40  ;;  %v4429_v52 = vor.u32 %v4428_v53, %v4425_v0  ;;  %10861 = vmatprep.mubr.bf16.mxu0 %v13456_v11  ;;  %v13474_v49 = vadd.f32 %v3350_v57, %v13154_v4 }
 0x236   : > { %v4473_v41 = vshrl.u32 %v9854_v7, 16  ;;  %v4476_v43 = vshll.u32 %v9854_v7, 16  ;;  %v3759_v51 = vadd.f32 %v13428_v29, %v3716_v55  ;;  %10886 = vmatpush3.bf16.msra.mxu1 %v11405_v26  ;;  %v3717_v40 = vadd.f32 %v3648_v44, %v13406_v19  ;;  %v3661_v42 = vpop.f32.mrf.mxu0  ;;  %v3363_v7 = vpop.f32.mrf.mxu1 }
 0x237   : > { %v4450_v38 = vsel %vm13183_vm13, %v4441_v8, %v13458_v28  ;;  %v3762_v14 = vadd.f32 %v13428_v29, %v3719_v3  ;;  %10887 = vmatprep.subr.bf16.mxu1 %v11409_v20  ;;  %v4430_v48 = vsel %vm13183_vm13, %v4421_v33, %v4429_v52  ;;  %v4431_v24 = vrot.slane %v4429_v52, 4 }
 0x238   : > { %4637 = vst [vmem:[#allocation2 + $0x64] sm:$0xf] %v4450_v38  ;;  %v4475_v62 = vrot.slane %v4473_v41, 6  ;;  %v4478_v46 = vrot.slane %v4476_v43, 7  ;;  %v4451_v26 = vrot.slane %v13458_v28, 4  ;;  %v3795_v4 = vmax.f32 %v3759_v51, 0.0  ;;  %v10768_v55 = vpop.f32.mrf.mxu0 }
 0x239   : > { %4635 = vst [vmem:[#allocation2 + $0x5c] sm:$0xf] %v4430_v48  ;;  %v3798_v8 = vmax.f32 %v3762_v14, 0.0  ;;  %v3760_v19 = vadd.f32 %v13428_v29, %v3717_v40  ;;  %v4440_v18 = vsel %vm13183_vm13, %v4431_v24, %v13423_v12  ;;  %v4854_v17 = vshrl.u32 %v13298_v10, 16  ;;  %v11419_v12 = vld [vmem:[%s15253_s4 + $0x80] sm:$0xff]   ;;  %v13513_v51 = vld [vmem:[%s15253_s4 + $0x138] sm:$0xff]  }
 0x23a   : > { %v13487_v37 = vor.u32 %v4478_v46, %v4475_v62  ;;  %v4858_v21 = vshll.u32 %v13325_v36, 16  ;;  %10888 = vmatpush3.bf16.msra.mxu1 %v11409_v20  ;;  %4636 = vst [vmem:[#allocation2 + $0x60] sm:$0xf] %v4440_v18  ;;  %v4047_v35 = vmul.f32 %v13416_v61, %v3795_v4  ;;  %v13495_v45 = vadd.f32 %v10733_v39, %v13077_v54  ;;  %v10734_v39 = vpop.f32.mrf.mxu1  ;;  %v3664_v4 = vpop.f32.mrf.mxu0 }
 0x23b   : > { %v4050_v13 = vmul.f32 %v3981_v1, %v3798_v8  ;;  %v3796_v56 = vmax.f32 %v3760_v19, 0.0  ;;  %10889 = vmatprep.subr.bf16.mxu1 %v11413_v22  ;;  %v4856_v10 = vor.u32 %v4854_v17, %v13437_v9  ;;  %v3722_v44 = vadd.f32 %v10767_v25, %v13440_v30  ;;  %v3996_v25 = vpop.permute.xlu0 %3995  ;;  %v3991_v17 = vpop.permute.xlu1 %3990 }
 0x23c   : > { %v4860_v60 = vrot.slane %v4858_v21, 1  ;;  %v4862_v5 = vshrl.u32 %v13325_v36, 16  ;;  %v9852_v33 = vpack.c.bf16 %v4047_v35, %v4047_v35  ;;  %v4866_v16 = vshll.u32 %v13344_v34, 16 }
 0x23d   : > { %v9855_v6 = vpack.c.bf16 %v4050_v13, %v4050_v13  ;;  %v4048_v61 = vmul.f32 %v3971_v31, %v3796_v56  ;;  %v4481_v54 = vrot.slane %v13487_v37, 4  ;;  %v3765_v0 = vadd.f32 %v13428_v29, %v3722_v44 }
 0x23e   : > { %v4861_v20 = vsel %vm413_vm1, %v4856_v10, %v4860_v60  ;;  %v4864_v53 = vor.u32 %v4862_v5, %v4860_v60  ;;  %10890 = vmatpush3.bf16.msra.mxu1 %v11413_v22  ;;  %v4453_v9 = vshrl.u32 %v9852_v33, 16  ;;  %v4456_v57 = vshll.u32 %v9852_v33, 16  ;;  %v3366_v33 = vpop.f32.mrf.mxu1 }
 0x23f   : > { %v4483_v30 = vshrl.u32 %v9855_v6, 16  ;;  %v4486_v3 = vshll.u32 %v9855_v6, 16  ;;  %10797 = vmatprep.mubr.bf16.mxu1 %v4861_v20  ;;  %10891 = vmatprep.subr.bf16.mxu1 %v11419_v12  ;;  %v9853_v36 = vpack.c.bf16 %v4048_v61, %v4048_v61  ;;  %v3801_v31 = vmax.f32 %v3765_v0, 0.0  ;;  %v10771_v6 = vpop.f32.mrf.mxu0 }
 0x240   : > { %v4868_v52 = vrot.slane %v4866_v16, 1  ;;  %v3720_v41 = vadd.f32 %v3661_v42, %v13461_v63  ;;  %v13508_v43 = vld [vmem:[#allocation2 + $0x58] sm:$0xff]   ;;  %v4455_v38 = vrot.slane %v4453_v9, 6  ;;  %v4458_v14 = vrot.slane %v4456_v57, 7 }
 0x241   : > { %v4485_v40 = vrot.slane %v4483_v30, 6  ;;  %v4488_v22 = vrot.slane %v4486_v3, 7  ;;  %v4463_v48 = vshrl.u32 %v9853_v36, 16  ;;  %v4466_v24 = vshll.u32 %v9853_v36, 16  ;;  %10862 = vmatmul.mubr.bf16.gmra.mxu0 %v13508_v43  ;;  %v13517_v63 = vld [vmem:[#allocation2 + $0x60] sm:$0xff]  }
 0x242   : > { %v4053_v62 = vmul.f32 %v3996_v25, %v3801_v31  ;;  %v4869_v46 = vsel %vm413_vm1, %v4864_v53, %v4868_v52  ;;  %10892 = vmatpush3.bf16.msra.mxu1 %v11419_v12  ;;  %v4459_v8 = vor.u32 %v4458_v14, %v4455_v38  ;;  %v13522_v1 = vadd.f32 %v3363_v7, %v13085_v50  ;;  %v13544_v53 = vpop.permute.xlu0 %4005  ;;  %v3677_v31 = vpop.f32.mrf.mxu0 }
 0x243   : > { %v13519_v19 = vor.u32 %v4488_v22, %v4485_v40  ;;  %10798 = vmatmul.mubr.bf16.gmra.mxu1 %v4869_v46  ;;  %v3763_v18 = vadd.f32 %v13428_v29, %v3720_v41  ;;  %v4465_v21 = vrot.slane %v4463_v48, 6  ;;  %v4468_v42 = vrot.slane %v4466_v24, 7  ;;  %10865 = vmatprep.mubr.bf16.mxu0 %v13517_v63 }
 0x244   : > { %v9858_v35 = vpack.c.bf16 %v4053_v62, %v4053_v62  ;;  %v3723_v13 = vadd.f32 %v10768_v55, %v13464_v59  ;;  %10981 = vmatprep.subr.bf16.mxu1 %v13513_v51  ;;  %v4460_v56 = vsel %vm13183_vm13, %v4451_v26, %v4459_v8  ;;  %v4461_v12 = vrot.slane %v4459_v8, 4 }
 0x245   : > { %v4490_v50 = vsel %vm13183_vm13, %v4481_v54, %v13519_v19  ;;  %v13536_v10 = vadd.f32 %v10734_v39, %v13097_v27  ;;  %4638 = vst [vmem:[#allocation2 + $0x68] sm:$0xf] %v4460_v56  ;;  %v4469_v59 = vor.u32 %v4468_v42, %v4465_v21  ;;  %v3799_v5 = vmax.f32 %v3763_v18, 0.0 }
 0x246   : > { %4641 = vst [vmem:[#allocation2 + $0x74] sm:$0xf] %v4490_v50  ;;  %v4513_v60 = vshrl.u32 %v9858_v35, 16  ;;  %v4516_v44 = vshll.u32 %v9858_v35, 16  ;;  %v4491_v28 = vrot.slane %v13519_v19, 4  ;;  %v3766_v26 = vadd.f32 %v13428_v29, %v3723_v13  ;;  %v4016_v8 = vpop.permute.xlu0 %4015 }
 0x247   : > { %v3721_v61 = vadd.f32 %v3664_v4, %v13474_v49  ;;  %v4870_v16 = vshrl.u32 %v13344_v34, 16  ;;  %v4470_v27 = vsel %vm13183_vm13, %v4461_v12, %v4469_v59  ;;  %v4471_v54 = vrot.slane %v4469_v59, 4  ;;  %v4001_v49 = vpop.permute.xlu1 %4000  ;;  %v10772_v4 = vpop.f32.mrf.mxu0 }
 0x248   : > { %v4515_v20 = vrot.slane %v4513_v60, 6  ;;  %v4518_v0 = vrot.slane %v4516_v44, 7  ;;  %4639 = vst [vmem:[#allocation2 + $0x6c] sm:$0xf] %v4470_v27  ;;  %v4051_v7 = vmul.f32 %v13491_v58, %v3799_v5  ;;  %v3802_v55 = vmax.f32 %v3766_v26, 0.0 }
 0x249   : > { %v13548_v9 = vadd.f32 %v3366_v33, %v13157_v2  ;;  %v3764_v57 = vadd.f32 %v13428_v29, %v3721_v61  ;;  %v4480_v34 = vsel %vm13183_vm13, %v4471_v54, %v13487_v37  ;;  %v4872_v30 = vor.u32 %v4870_v16, %v4868_v52 }
 0x24a   : > { %v4874_v3 = vshll.u32 %v13378_v32, 16  ;;  %v3726_v36 = vadd.f32 %v10771_v6, %v13495_v45  ;;  %4640 = vst [vmem:[#allocation2 + $0x70] sm:$0xf] %v4480_v34  ;;  %v13556_v41 = vor.u32 %v4518_v0, %v4515_v20  ;;  %v9856_v58 = vpack.c.bf16 %v4051_v7, %v4051_v7  ;;  %v3680_v0 = vpop.f32.mrf.mxu0 }
 0x24b   : > { %v4054_v25 = vmul.f32 %v4001_v49, %v3802_v55  ;;  %v3800_v2 = vmax.f32 %v3764_v57, 0.0  ;;  %v4878_v40 = vshrl.u32 %v13378_v32, 16  ;;  %v4882_v22 = vshll.u32 %v13392_v15, 16  ;;  %v4011_v13 = vpop.permute.xlu1 %4010 }
 0x24c   : > { %v4876_v38 = vrot.slane %v4874_v3, 1  ;;  %v3769_v14 = vadd.f32 %v13428_v29, %v3726_v36  ;;  %v4493_v37 = vshrl.u32 %v9856_v58, 16  ;;  %v4496_v52 = vshll.u32 %v9856_v58, 16 }
 0x24d   : > { %v9859_v48 = vpack.c.bf16 %v4054_v25, %v4054_v25  ;;  %v4052_v24 = vmul.f32 %v3991_v17, %v3800_v2  ;;  %v4884_v39 = vrot.slane %v4882_v22, 1  ;;  %v3724_v59 = vadd.f32 %v3677_v31, %v13522_v1 }
 0x24e   : > { %v4877_v45 = vsel %vm413_vm1, %v4872_v30, %v4876_v38  ;;  %v3805_v62 = vmax.f32 %v3769_v14, 0.0  ;;  %v4880_v46 = vor.u32 %v4878_v40, %v4876_v38  ;;  %v4495_v18 = vrot.slane %v4493_v37, 6 }
 0x24f   : > { %v4498_v21 = vrot.slane %v4496_v52, 7  ;;  %v4523_v42 = vshrl.u32 %v9859_v48, 16  ;;  %v4526_v35 = vshll.u32 %v9859_v48, 16  ;;  %10801 = vmatprep.mubr.bf16.mxu1 %v4877_v45  ;;  %v9857_v56 = vpack.c.bf16 %v4052_v24, %v4052_v24  ;;  %v13564_v17 = vld [vmem:[#allocation2 + $0x68] sm:$0xff]  }
 0x250   : > { %v4057_v12 = vmul.f32 %v4016_v8, %v3805_v62  ;;  %v4885_v50 = vsel %vm413_vm1, %v4880_v46, %v4884_v39  ;;  %v3727_v33 = vadd.f32 %v10772_v4, %v13536_v10  ;;  %v3767_v16 = vadd.f32 %v13428_v29, %v3724_v59  ;;  %10866 = vmatmul.mubr.bf16.gmra.mxu0 %v13564_v17 }
 0x251   : > { %v4499_v60 = vor.u32 %v4498_v21, %v4495_v18  ;;  %v4525_v44 = vrot.slane %v4523_v42, 6  ;;  %v4528_v5 = vrot.slane %v4526_v35, 7  ;;  %10802 = vmatmul.mubr.bf16.gmra.mxu1 %v4885_v50  ;;  %v4503_v6 = vshrl.u32 %v9857_v56, 16  ;;  %v13569_v27 = vld [vmem:[#allocation2 + $0x70] sm:$0xff]  }
 0x252   : > { %v4506_v26 = vshll.u32 %v9857_v56, 16  ;;  %v9862_v61 = vpack.c.bf16 %v4057_v12, %v4057_v12  ;;  %v4521_v54 = vrot.slane %v13556_v41, 4  ;;  %v3770_v10 = vadd.f32 %v13428_v29, %v3727_v33  ;;  %10869 = vmatprep.mubr.bf16.mxu0 %v13569_v27 }
 0x253   : > { %v4500_v1 = vsel %vm13183_vm13, %v4491_v28, %v4499_v60  ;;  %v13576_v20 = vor.u32 %v4528_v5, %v4525_v44  ;;  %v4505_v7 = vrot.slane %v4503_v6, 6  ;;  %v4501_v34 = vrot.slane %v4499_v60, 4  ;;  %v4021_v28 = vpop.permute.xlu1 %4020 }
 0x254   : > { %4642 = vst [vmem:[#allocation2 + $0x78] sm:$0xf] %v4500_v1  ;;  %v4508_v55 = vrot.slane %v4506_v26, 7  ;;  %v4553_v57 = vshrl.u32 %v9862_v61, 16  ;;  %v4556_v49 = vshll.u32 %v9862_v61, 16  ;;  %v3803_v30 = vmax.f32 %v3767_v16, 0.0 }
 0x255   : > { %v4530_v19 = vsel %vm13183_vm13, %v4521_v54, %v13576_v20  ;;  %v3806_v3 = vmax.f32 %v3770_v10, 0.0  ;;  %v3725_v25 = vadd.f32 %v3680_v0, %v13548_v9  ;;  %v4531_v2 = vrot.slane %v13576_v20, 4  ;;  %v4652_v16 = vld [vmem:[#allocation2 + $0x98] sm:$0x3] }
 0x256   : > { %4645 = vst [vmem:[#allocation2 + $0x84] sm:$0xf] %v4530_v19  ;;  %v4509_v36 = vor.u32 %v4508_v55, %v4505_v7  ;;  %v4555_v31 = vrot.slane %v4553_v57, 6  ;;  %v4558_v58 = vrot.slane %v4556_v49, 7  ;;  %v4055_v38 = vmul.f32 %v13544_v53, %v3803_v30  ;;  %v13657_v1 = vld [vmem:[#allocation2 + $0x38] sm:$0xff]  }
 0x257   : > { %v4058_v14 = vmul.f32 %v4021_v28, %v3806_v3  ;;  %v4890_v40 = vshll.u32 %v13444_v47, 16  ;;  %v3768_v52 = vadd.f32 %v13428_v29, %v3725_v25  ;;  %v4886_v48 = vshrl.u32 %v13392_v15, 16 }
 0x258   : > { %v4510_v22 = vsel %vm13183_vm13, %v4501_v34, %v4509_v36  ;;  %v4511_v37 = vrot.slane %v4509_v36, 4  ;;  %v13591_v24 = vor.u32 %v4558_v58, %v4555_v31  ;;  %v9860_v45 = vpack.c.bf16 %v4055_v38, %v4055_v38 }
 0x259   : > { %4643 = vst [vmem:[#allocation2 + $0x7c] sm:$0xf] %v4510_v22  ;;  %v9863_v9 = vpack.c.bf16 %v4058_v14, %v4058_v14  ;;  %v4892_v62 = vrot.slane %v4890_v40, 1  ;;  %v3804_v46 = vmax.f32 %v3768_v52, 0.0  ;;  %v4888_v4 = vor.u32 %v4886_v48, %v4884_v39  ;;  %v13626_v52 = vld [vmem:[#allocation2 + $0xc] sm:$0xf] }
 0x25a   : > { %v4520_v53 = vsel %vm13183_vm13, %v4511_v37, %v13556_v41  ;;  %v4894_v8 = vshrl.u32 %v13444_v47, 16  ;;  %v4533_v18 = vshrl.u32 %v9860_v45, 16  ;;  %v4536_v21 = vshll.u32 %v9860_v45, 16 }
 0x25b   : > { %4644 = vst [vmem:[#allocation2 + $0x80] sm:$0xf] %v4520_v53  ;;  %v4563_v29 = vshrl.u32 %v9863_v9, 16  ;;  %v4566_v42 = vshll.u32 %v9863_v9, 16  ;;  %v4056_v35 = vmul.f32 %v4011_v13, %v3804_v46  ;;  %v4893_v56 = vsel %vm413_vm1, %v4888_v4, %v4892_v62  ;;  %v5452_v53 = vld [vmem:[#allocation2] sm:$0xe] }
 0x25c   : > { %v4896_v12 = vor.u32 %v4894_v8, %v4892_v62  ;;  %v4898_v50 = vshll.u32 %v13456_v11, 16  ;;  %v4535_v59 = vrot.slane %v4533_v18, 6  ;;  %v4538_v60 = vrot.slane %v4536_v21, 7  ;;  %10805 = vmatprep.mubr.bf16.mxu1 %v4893_v56 }
 0x25d   : > { %v4565_v44 = vrot.slane %v4563_v29, 6  ;;  %v4568_v5 = vrot.slane %v4566_v42, 7  ;;  %v4561_v41 = vrot.slane %v13591_v24, 4  ;;  %v9861_v39 = vpack.c.bf16 %v4056_v35, %v4056_v35  ;;  %v5789_v42 = vld [vmem:[#allocation2 + $0x8] sm:$0xe] }
 0x25e   : > { %v4900_v33 = vrot.slane %v4898_v50, 1  ;;  %v4906_v6 = vshll.u32 %v13508_v43, 16  ;;  %v4539_v26 = vor.u32 %v4538_v60, %v4535_v59  ;;  %v4902_v13 = vshrl.u32 %v13456_v11, 16  ;;  %v13642_v59 = vld [vmem:[#allocation2 + $0x10] sm:$0xff]   ;;  %v11522_v60 = vld [vmem:[#allocation2 + $0x4] sm:$0xf] }
 0x25f   : > { %v4569_v61 = vor.u32 %v4568_v5, %v4565_v44  ;;  %v4914_v54 = vshll.u32 %v13517_v63, 16  ;;  %v4543_v20 = vshrl.u32 %v9861_v39, 16  ;;  %v4546_v10 = vshll.u32 %v9861_v39, 16 }
 0x260   : > { %v4901_v0 = vsel %vm413_vm1, %v4896_v12, %v4900_v33  ;;  %v4910_v7 = vshrl.u32 %v13508_v43, 16  ;;  %v13611_v55 = vld [vmem:[#allocation2 + $0x78] sm:$0xff]   ;;  %v4540_v57 = vsel %vm13183_vm13, %v4531_v2, %v4539_v26  ;;  %v4904_v19 = vor.u32 %v4902_v13, %v4900_v33 }
 0x261   : > { %v4570_v49 = vsel %vm13183_vm13, %v4561_v41, %v4569_v61  ;;  %v4571_v34 = vrot.slane %v4569_v61, 4  ;;  %10806 = vmatmul.mubr.bf16.gmra.mxu1 %v4901_v0  ;;  %4646 = vst [vmem:[#allocation2 + $0x88] sm:$0xf] %v4540_v57  ;;  %v4545_v30 = vrot.slane %v4543_v20, 6  ;;  %v4548_v3 = vrot.slane %v4546_v10, 7  ;;  %10870 = vmatmul.mubr.bf16.gmra.mxu0 %v13611_v55  ;;  %v13645_v41 = vld [vmem:[#allocation2 + $0x18] sm:$0xff]  }
 0x262   : > { %4649 = vst [vmem:[#allocation2 + $0x94] sm:$0xf] %v4570_v49  ;;  %v4908_v28 = vrot.slane %v4906_v6, 1  ;;  %v4916_v36 = vrot.slane %v4914_v54, 1  ;;  %v4541_v31 = vrot.slane %v4539_v26, 4  ;;  %v4918_v25 = vshrl.u32 %v13517_v63, 16 }
 0x263   : > { %v4653_v58 = vsel %vm13605_vm14, %v4571_v34, %v4652_v16  ;;  %v4922_v2 = vshll.u32 %v13564_v17, 16  ;;  %v13622_v38 = vld [vmem:[#allocation2 + $0x80] sm:$0xff]   ;;  %v4549_v14 = vor.u32 %v4548_v3, %v4545_v30  ;;  %v4930_v37 = vshll.u32 %v13569_v27, 16  ;;  %v13651_v6 = vld [vmem:[#allocation2 + $0x28] sm:$0xff]   ;;  %v13653_v26 = vld [vmem:[#allocation2 + $0x30] sm:$0xff]  }
 0x264   : > { %4654 = vst [vmem:[#allocation2 + $0x98] sm:$0x3] %v4653_v58  ;;  %v4909_v40 = vsel %vm413_vm1, %v4904_v19, %v4908_v28  ;;  %v4912_v22 = vor.u32 %v4910_v7, %v4908_v28  ;;  %v4920_v48 = vor.u32 %v4918_v25, %v4916_v36  ;;  %v4926_v9 = vshrl.u32 %v13564_v17, 16  ;;  %10873 = vmatprep.mubr.bf16.mxu0 %v13622_v38  ;;  %v13659_v20 = vld [vmem:[#allocation2 + $0x40] sm:$0xff]   ;;  %v11523_v7 = vld [vmem:[#allocation2 + $0x8] sm:$0xff]   ;;  %v11524_v3 = vld [vmem:[#allocation2 + $0x10] sm:$0xff]  }
 0x265   : > { %10809 = vmatprep.mubr.bf16.mxu1 %v4909_v40  ;;  %v4924_v45 = vrot.slane %v4922_v2, 1  ;;  %v4938_v62 = vshll.u32 %v13611_v55, 16  ;;  %v4550_v46 = vsel %vm13183_vm13, %v4541_v31, %v4549_v14  ;;  %v4551_v4 = vrot.slane %v4549_v14, 4  ;;  %v11526_v2 = vld [vmem:[#allocation2 + $0x20] sm:$0xff]   ;;  %v11527_v40 = vld [vmem:[#allocation2 + $0x28] sm:$0xff]  }
 0x266   : > { %v4917_v8 = vsel %vm413_vm1, %v4912_v22, %v4916_v36  ;;  %4647 = vst [vmem:[#allocation2 + $0x8c] sm:$0xf] %v4550_v46  ;;  %v4932_v29 = vrot.slane %v4930_v37, 1  ;;  %v4946_v12 = vshll.u32 %v13622_v38, 16  ;;  %v13640_v50 = vcombine.low %v5789_v42, %v13626_v52  ;;  %v11525_v36 = vld [vmem:[#allocation2 + $0x18] sm:$0xff]  }
 0x267   : > { %v4925_v18 = vsel %vm413_vm1, %v4920_v48, %v4924_v45  ;;  %v4928_v21 = vor.u32 %v4926_v9, %v4924_v45  ;;  %v4560_v35 = vsel %vm13183_vm13, %v4551_v4, %v13591_v24  ;;  %v4940_v56 = vrot.slane %v4938_v62, 1  ;;  %v13648_v24 = vld [vmem:[#allocation2 + $0x20] sm:$0xff]   ;;  %v11528_v4 = vld [vmem:[#allocation2 + $0x30] sm:$0xff]  }
 0x268   : > { %v9557_v44 = vcombine.low %v5452_v53, %v11522_v60  ;;  %4648 = vst [vmem:[#allocation2 + $0x90] sm:$0xf] %v4560_v35  ;;  %v4934_v5 = vshrl.u32 %v13569_v27, 16  ;;  %v4942_v23 = vshrl.u32 %v13611_v55, 16  ;;  %v4948_v16 = vrot.slane %v4946_v12, 1  ;;  %v13685_v35 = vld [vmem:[#allocation2 + $0x48] sm:$0xff]  }
 0x269   : > { %10810 = vmatmul.mubr.bf16.gmra.mxu1 %v4917_v8  ;;  %v4933_v39 = vsel %vm413_vm1, %v4928_v21, %v4932_v29  ;;  %v5936_v13 = vrot.slane %v13640_v50, 1  ;;  %v5937_v54 = vrot.slane %v13642_v59, 1  ;;  %v4950_v10 = vshrl.u32 %v13622_v38, 16 }
 0x26a   : > { %10813 = vmatprep.mubr.bf16.mxu1 %v4925_v18  ;;  %v4936_v33 = vor.u32 %v4934_v5, %v4932_v29  ;;  %v4944_v61 = vor.u32 %v4942_v23, %v4940_v56  ;;  %v5473_v0 = vrot.slane %v9557_v44, 1  ;;  %v5474_v57 = vrot.slane %v11523_v7, 1  ;;  %v13698_v23 = vld [vmem:[#allocation2 + $0x58] sm:$0xff]   ;;  %v13718_v7 = vld [vmem:[#allocation2 + $0x60] sm:$0xff]  }
 0x26b   : > { %v5939_v49 = vrot.slane %v13645_v41, 1  ;;  %v5941_v30 = vrot.slane %v13648_v24, 1  ;;  %v5476_v28 = vrot.slane %v11524_v3, 1  ;;  %v5478_v31 = vrot.slane %v11525_v36, 1 }
 0x26c   : > { %v4941_v34 = vsel %vm413_vm1, %v4936_v33, %v4940_v56  ;;  %v5943_v58 = vrot.slane %v13651_v6, 1  ;;  %v5945_v25 = vrot.slane %v13653_v26, 1  ;;  %v5480_v14 = vrot.slane %v11526_v2, 1  ;;  %v13687_v56 = vld [vmem:[#allocation2 + $0x50] sm:$0xff]  }
 0x26d   : > { %v13664_v19 = vld [vmem:[#allocation2 + $0x88] sm:$0xff]   ;;  %v5482_v22 = vrot.slane %v11527_v40, 1  ;;  %v4949_v37 = vsel %vm413_vm1, %v4944_v61, %v4948_v16  ;;  %v5938_v48 = vsel %vm1020_vm3, %v5936_v13, %v5937_v54  ;;  %v4952_v62 = vor.u32 %v4950_v10, %v4948_v16 }
 0x26e   : > { %10874 = vmatmul.mubr.bf16.gmra.mxu0 %v13664_v19  ;;  %v4954_v45 = vshll.u32 %v13664_v19, 16  ;;  %v5947_v53 = vrot.slane %v13657_v1, 1  ;;  %v5949_v46 = vrot.slane %v13659_v20, 1  ;;  %v5484_v8 = vrot.slane %v11528_v4, 1 }
 0x26f   : > { %v13673_v9 = vld [vmem:[#allocation2 + $0x90] ss:$0 sps:$4 sm:$0x11]   ;;  %10945 = vmatprep.mubr.bf16.mxu0 %v5938_v48  ;;  %v13678_v18 = vsel %vm1020_vm3, %v5473_v0, %v5474_v57  ;;  %v5940_v21 = vsel %vm1020_vm3, %v5937_v54, %v5939_v49  ;;  %v5942_v29 = vsel %vm1020_vm3, %v5939_v49, %v5941_v30  ;;  %v13683_v42 = vsel %vm1020_vm3, %v5474_v57, %v5476_v28 }
 0x270   : > { %v4956_v12 = vrot.slane %v4954_v45, 1  ;;  %v13690_v60 = vsel %vm1020_vm3, %v5476_v28, %v5478_v31  ;;  %v13693_v44 = vsel %vm1020_vm3, %v5941_v30, %v5943_v58  ;;  %v13696_v5 = vsel %vm1020_vm3, %v5943_v58, %v5945_v25  ;;  %v11430_v28 = vld [vmem:[%s15253_s4 + $0x170] sm:$0xff]   ;;  %v11529_v45 = vld [vmem:[%s15253_s4 + $0x178] sm:$0xff]  }
 0x271   : > { %10814 = vmatmul.mubr.bf16.gmra.mxu1 %v4933_v39  ;;  %v4958_v39 = vshrl.u32 %v13664_v19, 16  ;;  %v4962_v33 = vshll.u32 %v13673_v9, 16  ;;  %v13703_v61 = vsel %vm1020_vm3, %v5478_v31, %v5480_v14  ;;  %v13706_v16 = vsel %vm1020_vm3, %v5480_v14, %v5482_v22  ;;  %v13730_v31 = vld [vmem:[#allocation2 + $0x68] sm:$0xff]   ;;  %v13747_v48 = vld [vmem:[#allocation2 + $0x70] sm:$0xff]  }
 0x272   : > { %10817 = vmatprep.mubr.bf16.mxu1 %v4941_v34  ;;  %v13709_v13 = vsel %vm1020_vm3, %v5945_v25, %v5947_v53  ;;  %v13712_v54 = vsel %vm1020_vm3, %v5947_v53, %v5949_v46  ;;  %v13715_v10 = vsel %vm1020_vm3, %v5482_v22, %v5484_v8  ;;  %v5486_v0 = vrot.slane %v13378_v32, 1 }
 0x273   : > { %v5951_v57 = vrot.slane %v13685_v35, 1  ;;  %v5953_v49 = vrot.slane %v13687_v56, 1  ;;  %v15266_v34 = vrot.slane %v13444_v47, 1  ;;  %v5492_v30 = vrot.slane %v13456_v11, 1 }
 0x274   : > { %v4957_v3 = vsel %vm413_vm1, %v4952_v62, %v4956_v12  ;;  %v15265_v36 = vrot.slane %v13392_v15, 1  ;;  %v5494_v32 = vrot.slane %v13508_v43, 1  ;;  %v5496_v58 = vrot.slane %v13517_v63, 1 }
 0x275   : > { %v4960_v25 = vor.u32 %v4958_v39, %v4956_v12  ;;  %v4964_v2 = vrot.slane %v4962_v33, 1  ;;  %v13736_v11 = vsel %vm1020_vm3, %v15266_v34, %v5492_v30  ;;  %v5498_v14 = vrot.slane %v13564_v17, 1 }
 0x276   : > { %10946 = vmatmul.mubr.bf16.vlgmr.msra.gmra.mxu0 %v5940_v21  ;;  %v13740_v40 = vsel %vm1020_vm3, %v5484_v8, %v5486_v0  ;;  %v5955_v43 = vrot.slane %v13698_v23, 1  ;;  %v5957_v22 = vrot.slane %v13718_v7, 1  ;;  %v13745_v63 = vsel %vm1020_vm3, %v5492_v30, %v5494_v32  ;;  %v11434_v8 = vld [vmem:[%s15253_s4 + $0x168] sm:$0xff]  }
 0x277   : > { %10949 = vmatprep.mubr.bf16.mxu0 %v5942_v29  ;;  %11034 = vmatpush3.bf16.msra.mxu0 %v11529_v45  ;;  %v13753_v17 = vsel %vm1020_vm3, %v5949_v46, %v5951_v57  ;;  %v13759_v62 = vsel %vm1020_vm3, %v5496_v58, %v5498_v14  ;;  %v5500_v53 = vrot.slane %v13569_v27, 1  ;;  %v13763_v4 = vsel %vm1020_vm3, %v5951_v57, %v5953_v49 }
 0x278   : > { %11035 = vmatprep.subr.bf16.mxu0 %v11430_v28  ;;  %v13771_v46 = vsel %vm1020_vm3, %v5486_v0, %v15265_v36  ;;  %v15267_v21 = vrot.slane %v13730_v31, 1  ;;  %v5502_v29 = vrot.slane %v13611_v55, 1  ;;  %v4965_v12 = vsel %vm413_vm1, %v4960_v25, %v4964_v2  ;;  %v6722_v55 = vld [vmem:[#allocation2 + $0x8] sm:$0xc] }
 0x279   : > { %10818 = vmatmul.mubr.bf16.gmra.mxu1 %v4949_v37  ;;  %v13756_v37 = vsel %vm1020_vm3, %v5494_v32, %v5496_v58  ;;  %v13777_v27 = vsel %vm1020_vm3, %v5498_v14, %v5500_v53  ;;  %v5504_v39 = vrot.slane %v13622_v38, 1  ;;  %v5506_v33 = vrot.slane %v13664_v19, 1  ;;  %v11438_v58 = vld [vmem:[%s15253_s4 + $0x160] sm:$0xff]  }
 0x27a   : > { %10821 = vmatprep.mubr.bf16.mxu1 %v4957_v3  ;;  %v13782_v57 = vsel %vm1020_vm3, %v5953_v49, %v5955_v43  ;;  %v13785_v30 = vsel %vm1020_vm3, %v5955_v43, %v5957_v22  ;;  %v13789_v3 = vsel %vm1020_vm3, %v5500_v53, %v5502_v29  ;;  %v9650_v19 = vcombine.low %v6722_v55, %v13626_v52 }
 0x27b   : > { %11036 = vmatpush3.bf16.msra.mxu0 %v11430_v28  ;;  %v13792_v32 = vsel %vm1020_vm3, %v5502_v29, %v5504_v39  ;;  %v13795_v38 = vsel %vm1020_vm3, %v5504_v39, %v5506_v33  ;;  %v6744_v49 = vrot.slane %v13642_v59, 2  ;;  %v13805_v25 = vsel %vm1020_vm3, %v5957_v22, %v15267_v21 }
 0x27c   : > { %11037 = vmatprep.subr.bf16.mxu0 %v11434_v8  ;;  %v5508_v28 = vrot.slane %v13673_v9, 1  ;;  %v6274_v2 = vshrl.u32 %v13640_v50, 16  ;;  %v6277_v14 = vshll.u32 %v13640_v50, 16  ;;  %v6743_v52 = vrot.slane %v9650_v19, 2 }
 0x27d   : > { %v6282_v43 = vshrl.u32 %v13642_v59, 16  ;;  %v6285_v45 = vshll.u32 %v13642_v59, 16  ;;  %v6746_v53 = vrot.slane %v13645_v41, 2  ;;  %v6748_v39 = vrot.slane %v13648_v24, 2 }
 0x27e   : > { %10950 = vmatmul.mubr.bf16.gmra.mxu0 %v13693_v44  ;;  %v13816_v22 = vsel %vm1020_vm3, %v5506_v33, %v5508_v28  ;;  %v6276_v9 = vrot.slane %v6274_v2, 1  ;;  %v6279_v29 = vrot.slane %v6277_v14, 2  ;;  %v13821_v50 = vsel %vm2220_vm4, %v6743_v52, %v6744_v49 }
 0x27f   : > { %10953 = vmatprep.mubr.bf16.mxu0 %v13696_v5  ;;  %11038 = vmatpush3.bf16.msra.mxu0 %v11434_v8  ;;  %v6284_v44 = vrot.slane %v6282_v43, 1  ;;  %v6287_v59 = vrot.slane %v6285_v45, 2  ;;  %v13824_v55 = vsel %vm2220_vm4, %v6744_v49, %v6746_v53  ;;  %v11442_v5 = vld [vmem:[%s15253_s4 + $0x158] sm:$0xff]   ;;  %v13830_v33 = vsel %vm2220_vm4, %v6746_v53, %v6748_v39 }
 0x280   : > { %11039 = vmatprep.subr.bf16.mxu0 %v11438_v58  ;;  %v6294_v8 = vshll.u32 %v13645_v41, 16  ;;  %v6300_v28 = vshrl.u32 %v13648_v24, 16  ;;  %v6303_v2 = vshll.u32 %v13648_v24, 16  ;;  %v6750_v49 = vrot.slane %v13651_v6, 2  ;;  %v11427_v24 = vld [vmem:[%s15253_s4 + $0x130] sm:$0xff]  }
 0x281   : > { %10822 = vmatmul.mubr.bf16.gmra.mxu1 %v4965_v12  ;;  %v6280_v12 = vor.u32 %v6279_v29, %v6276_v9  ;;  %v6288_v19 = vor.u32 %v6287_v59, %v6284_v44  ;;  %v6752_v43 = vrot.slane %v13653_v26, 2  ;;  %v6309_v45 = vshrl.u32 %v13651_v6, 16 }
 0x282   : > { %10893 = vmatprep.mubr.bf16.mxu1 %v13678_v18  ;;  %v6291_v18 = vshrl.u32 %v13645_v41, 16  ;;  %v6296_v52 = vrot.slane %v6294_v8, 2  ;;  %v6302_v9 = vrot.slane %v6300_v28, 1  ;;  %v6305_v29 = vrot.slane %v6303_v2, 2 }
 0x283   : > { %11040 = vmatpush3.bf16.msra.mxu0 %v11438_v58  ;;  %v13840_v53 = vsel %vm1773_vm5, %v6280_v12, %v6288_v19  ;;  %v13843_v41 = vsel %vm2220_vm4, %v6748_v39, %v6750_v49  ;;  %v13849_v59 = vsel %vm2220_vm4, %v6750_v49, %v6752_v43  ;;  %v6312_v58 = vshll.u32 %v13651_v6, 16  ;;  %v11446_v12 = vld [vmem:[%s15253_s4 + $0x150] sm:$0xff]  }
 0x284   : > { %v6293_v14 = vrot.slane %v6291_v18, 1  ;;  %11041 = vmatprep.subr.bf16.mxu0 %v11442_v5  ;;  %v6311_v18 = vrot.slane %v6309_v45, 1  ;;  %v6306_v39 = vor.u32 %v6305_v29, %v6302_v9  ;;  %v6318_v8 = vshrl.u32 %v13653_v26, 16  ;;  %v11451_v29 = vld [vmem:[%s15253_s4 + $0x148] sm:$0xff]  }
 0x285   : > { %v6321_v28 = vshll.u32 %v13653_v26, 16  ;;  %v6754_v2 = vrot.slane %v13657_v1, 2  ;;  %v6314_v6 = vrot.slane %v6312_v58, 2  ;;  %v6339_v58 = vshll.u32 %v13659_v20, 16 }
 0x286   : > { %v6297_v44 = vor.u32 %v6296_v52, %v6293_v14  ;;  %10954 = vmatmul.mubr.bf16.gmra.mxu0 %v13709_v13  ;;  %v6756_v13 = vrot.slane %v13659_v20, 2  ;;  %v6327_v14 = vshrl.u32 %v13657_v1, 16  ;;  %v6320_v52 = vrot.slane %v6318_v8, 1 }
 0x287   : > { %10957 = vmatprep.mubr.bf16.mxu0 %v13712_v54  ;;  %v6323_v45 = vrot.slane %v6321_v28, 2  ;;  %v11432_v54 = vld [vmem:[%s15253_s4 + $0x128] sm:$0xff]   ;;  %11042 = vmatpush3.bf16.msra.mxu0 %v11442_v5  ;;  %v6758_v8 = vrot.slane %v13685_v35, 2  ;;  %v6760_v28 = vrot.slane %v13687_v56, 2 }
 0x288   : > { %v13862_v49 = vsel %vm1773_vm5, %v6288_v19, %v6297_v44  ;;  %v13869_v26 = vsel %vm1773_vm5, %v6297_v44, %v6306_v39  ;;  %v6315_v19 = vor.u32 %v6314_v6, %v6311_v18  ;;  %v13878_v9 = vsel %vm2220_vm4, %v6754_v2, %v6756_v13  ;;  %11043 = vmatprep.subr.bf16.mxu0 %v11446_v12 }
 0x289   : > { %10894 = vmatmul.mubr.bf16.vlgmr.msra.gmra.mxu1 %v13683_v42  ;;  %v13872_v42 = vsel %vm2220_vm4, %v6752_v43, %v6754_v2  ;;  %v6324_v43 = vor.u32 %v6323_v45, %v6320_v52  ;;  %v6336_v44 = vshrl.u32 %v13659_v20, 16  ;;  %v13896_v52 = vsel %vm2220_vm4, %v6756_v13, %v6758_v8  ;;  %v11437_v20 = vld [vmem:[%s15253_s4 + $0x120] sm:$0xff]  }
 0x28a   : > { %10982 = vmatpush3.bf16.msra.mxu1 %v13513_v51  ;;  %10897 = vmatprep.mubr.bf16.mxu1 %v13690_v60  ;;  %v6329_v51 = vrot.slane %v6327_v14, 1  ;;  %v6330_v60 = vshll.u32 %v13657_v1, 16  ;;  %v13888_v5 = vsel %vm1773_vm5, %v6306_v39, %v6315_v19  ;;  %v6345_v1 = vshrl.u32 %v13685_v35, 16  ;;  %v11453_v13 = vld [vmem:[%s15253_s4 + $0x140] sm:$0xff]  }
 0x28b   : > { %10983 = vmatprep.subr.bf16.mxu1 %v11427_v24  ;;  %v13893_v2 = vsel %vm1773_vm5, %v6315_v19, %v6324_v43  ;;  %v6338_v6 = vrot.slane %v6336_v44, 1  ;;  %v6341_v14 = vrot.slane %v6339_v58, 2  ;;  %11044 = vmatpush3.bf16.msra.mxu0 %v11446_v12  ;;  %v13902_v45 = vsel %vm2220_vm4, %v6758_v8, %v6760_v28 }
 0x28c   : > { %v6332_v18 = vrot.slane %v6330_v60, 2  ;;  %v6347_v60 = vrot.slane %v6345_v1, 1  ;;  %11045 = vmatprep.subr.bf16.mxu0 %v11451_v29  ;;  %v6354_v44 = vshrl.u32 %v13687_v56, 16  ;;  %v6357_v58 = vshll.u32 %v13687_v56, 16 }
 0x28d   : > { %v6342_v19 = vor.u32 %v6341_v14, %v6338_v6  ;;  %v6762_v12 = vrot.slane %v13698_v23, 2  ;;  %v6363_v8 = vshrl.u32 %v13698_v23, 16  ;;  %v13933_v14 = vld [vmem:[#allocation2 + $0x78] sm:$0xff]  }
 0x28e   : > { %10984 = vmatpush3.bf16.msra.mxu1 %v11427_v24  ;;  %v6333_v39 = vor.u32 %v6332_v18, %v6329_v51  ;;  %v6348_v24 = vshll.u32 %v13685_v35, 16  ;;  %10958 = vmatmul.mubr.bf16.gmra.mxu0 %v13753_v17  ;;  %v6764_v51 = vrot.slane %v13718_v7, 2  ;;  %v6356_v56 = vrot.slane %v6354_v44, 1  ;;  %v13943_v44 = vld [vmem:[#allocation2 + $0x80] sm:$0xff]  }
 0x28f   : > { %10985 = vmatprep.subr.bf16.mxu1 %v11432_v54  ;;  %10961 = vmatprep.mubr.bf16.mxu0 %v13763_v4  ;;  %v6359_v1 = vrot.slane %v6357_v58, 2  ;;  %v11441_v4 = vld [vmem:[%s15253_s4 + $0x118] sm:$0xff]  }
 0x290   : > { %v13915_v35 = vsel %vm1773_vm5, %v6324_v43, %v6333_v39  ;;  %v6350_v17 = vrot.slane %v6348_v24, 2  ;;  %v13921_v18 = vsel %vm1773_vm5, %v6333_v39, %v6342_v19  ;;  %11046 = vmatpush3.bf16.msra.mxu0 %v11451_v29  ;;  %v13930_v6 = vsel %vm2220_vm4, %v6762_v12, %v6764_v51 }
 0x291   : > { %10898 = vmatmul.mubr.bf16.gmra.mxu1 %v13703_v61  ;;  %v13924_v61 = vsel %vm2220_vm4, %v6760_v28, %v6762_v12  ;;  %11047 = vmatprep.subr.bf16.mxu0 %v11453_v13  ;;  %v13938_v28 = vld [vmem:[%s15253_s4 + $0x1f8] sm:$0xff]   ;;  %v6360_v39 = vor.u32 %v6359_v1, %v6356_v56  ;;  %v6372_v24 = vshrl.u32 %v13718_v7, 16  ;;  %v6375_v29 = vshll.u32 %v13718_v7, 16 }
 0x292   : > { %10901 = vmatprep.mubr.bf16.mxu1 %v13706_v16  ;;  %10986 = vmatpush3.bf16.msra.mxu1 %v11432_v54  ;;  %v6351_v43 = vor.u32 %v6350_v17, %v6347_v60  ;;  %v6365_v16 = vrot.slane %v6363_v8, 1  ;;  %v6366_v54 = vshll.u32 %v13698_v23, 16  ;;  %v6766_v60 = vrot.slane %v13730_v31, 2 }
 0x293   : > { %10987 = vmatprep.subr.bf16.mxu1 %v11437_v20  ;;  %v6768_v12 = vrot.slane %v13747_v48, 2  ;;  %v6381_v17 = vshrl.u32 %v13730_v31, 16  ;;  %v6374_v56 = vrot.slane %v6372_v24, 1  ;;  %v6377_v1 = vrot.slane %v6375_v29, 2 }
 0x294   : > { %v13946_v58 = vsel %vm1773_vm5, %v6342_v19, %v6351_v43  ;;  %v6368_v23 = vrot.slane %v6366_v54, 2  ;;  %v13951_v8 = vsel %vm1773_vm5, %v6351_v43, %v6360_v39  ;;  %v13954_v7 = vsel %vm2220_vm4, %v6764_v51, %v6766_v60  ;;  %v11445_v19 = vld [vmem:[%s15253_s4 + $0x110] sm:$0xff]   ;;  %11048 = vmatpush3.bf16.msra.mxu0 %v11453_v13  ;;  %v13964_v43 = vld [vmem:[#allocation2 + $0x88] sm:$0xff]  }
 0x295   : > { %v13960_v36 = vsel %vm2220_vm4, %v6766_v60, %v6768_v12  ;;  %v6383_v34 = vrot.slane %v6381_v17, 1  ;;  %11137 = vmatprep.subr.bf16.mxu0 %v13938_v28  ;;  %v6378_v51 = vor.u32 %v6377_v1, %v6374_v56  ;;  %v6390_v24 = vshrl.u32 %v13747_v48, 16 }
 0x296   : > { %10988 = vmatpush3.bf16.msra.mxu1 %v11437_v20  ;;  %v6369_v54 = vor.u32 %v6368_v23, %v6365_v16  ;;  %v6384_v20 = vshll.u32 %v13730_v31, 16  ;;  %10962 = vmatmul.mubr.bf16.gmra.mxu0 %v13782_v57  ;;  %v6393_v29 = vshll.u32 %v13747_v48, 16  ;;  %v6770_v13 = vrot.slane %v13933_v14, 2  ;;  %v13972_v16 = vld [vmem:[#allocation2 + $0x90] sm:$0xff]  }
 0x297   : > { %10989 = vmatprep.subr.bf16.mxu1 %v11441_v4  ;;  %10965 = vmatprep.mubr.bf16.mxu0 %v13785_v30  ;;  %v6772_v23 = vrot.slane %v13943_v44, 2  ;;  %v6399_v17 = vshrl.u32 %v13933_v14, 16  ;;  %v6392_v1 = vrot.slane %v6390_v24, 1  ;;  %v6411_v24 = vshll.u32 %v13943_v44, 16 }
 0x298   : > { %v13975_v60 = vsel %vm1773_vm5, %v6360_v39, %v6369_v54  ;;  %v6386_v57 = vrot.slane %v6384_v20, 2  ;;  %v13981_v56 = vsel %vm1773_vm5, %v6369_v54, %v6378_v51  ;;  %v13984_v30 = vsel %vm2220_vm4, %v6768_v12, %v6770_v13  ;;  %v11449_v39 = vld [vmem:[%s15253_s4 + $0x108] sm:$0xff]  }
 0x299   : > { %10902 = vmatmul.mubr.bf16.gmra.mxu1 %v13715_v10  ;;  %15357 = vst [vmem:[#allocation14_spill] sm:$0xff] %v13975_v60  ;;  %15358 = vst [vmem:[#allocation3_spill] sm:$0xff] %v13981_v56  ;;  %v6395_v10 = vrot.slane %v6393_v29, 2  ;;  %v13990_v21 = vsel %vm2220_vm4, %v6770_v13, %v6772_v23  ;;  %v6401_v0 = vrot.slane %v6399_v17, 1  ;;  %v6408_v54 = vshrl.u32 %v13943_v44, 16 }
 0x29a   : > { %10905 = vmatprep.mubr.bf16.mxu1 %v13740_v40  ;;  %10990 = vmatpush3.bf16.msra.mxu1 %v11441_v4  ;;  %v6387_v20 = vor.u32 %v6386_v57, %v6383_v34  ;;  %v6402_v40 = vshll.u32 %v13933_v14, 16  ;;  %v6774_v12 = vrot.slane %v13964_v43, 2  ;;  %v15268_v60 = vrot.slane %v13972_v16, 2 }
 0x29b   : > { %10991 = vmatprep.subr.bf16.mxu1 %v11445_v19  ;;  %v6396_v4 = vor.u32 %v6395_v10, %v6392_v1  ;;  %v6417_v34 = vshrl.u32 %v13964_v43, 16  ;;  %v6410_v57 = vrot.slane %v6408_v54, 1  ;;  %v6413_v17 = vrot.slane %v6411_v24, 2 }
 0x29c   : > { %v13997_v29 = vsel %vm1773_vm5, %v6378_v51, %v6387_v20  ;;  %v6404_v56 = vrot.slane %v6402_v40, 2  ;;  %v14005_v1 = vsel %vm2220_vm4, %v6772_v23, %v6774_v12  ;;  %v11454_v51 = vld [vmem:[%s15253_s4 + $0x100] sm:$0xff]   ;;  %v14013_v40 = vsel %vm2220_vm4, %v6774_v12, %v15268_v60 }
 0x29d   : > { %15359 = vst [vmem:[#allocation11_spill] sm:$0xff] %v13997_v29  ;;  %v14002_v13 = vsel %vm1773_vm5, %v6387_v20, %v6396_v4  ;;  %v6420_v20 = vshll.u32 %v13964_v43, 16  ;;  %v15361_v54 = vrot.slane %v13747_v48, 1  ;;  %v15362_v23 = vrot.slane %v13730_v31, 1 }
 0x29e   : > { %10992 = vmatpush3.bf16.msra.mxu1 %v11445_v19  ;;  %15360 = vst [vmem:[#allocation6_spill] sm:$0xff] %v14002_v13  ;;  %v6405_v10 = vor.u32 %v6404_v56, %v6401_v0  ;;  %v6419_v19 = vrot.slane %v6417_v34, 1  ;;  %10966 = vmatmul.mubr.bf16.gmra.mxu0 %v13805_v25  ;;  %v6414_v13 = vor.u32 %v6413_v17, %v6410_v57  ;;  %v6426_v29 = vshrl.u32 %v13972_v16, 16  ;;  %v14153_v60 = vld [vmem:[#allocation2 + $0xa0] ss:$0 sps:$4 sm:$0x77]  }
 0x29f   : > { %10993 = vmatprep.subr.bf16.mxu1 %v11449_v39  ;;  %v5962_v24 = vsel %vm1020_vm3, %v15362_v23, %v15361_v54  ;;  %v6429_v0 = vshll.u32 %v13972_v16, 16  ;;  %v15363_v56 = vrot.slane %v13444_v47, 1  ;;  %v15364_v12 = vrot.slane %v13392_v15, 1  ;;  %v14040_v15 = vld [vmem:[%s15253_s4 + $0x1b8] sm:$0xff]  }
 0x2a0   : > { %10969 = vmatprep.mubr.bf16.mxu0 %v5962_v24  ;;  %v14031_v25 = vsel %vm1773_vm5, %v6396_v4, %v6405_v10  ;;  %v6422_v31 = vrot.slane %v6420_v20, 2  ;;  %v14034_v57 = vsel %vm1773_vm5, %v6405_v10, %v6414_v13  ;;  %v6428_v17 = vrot.slane %v6426_v29, 1  ;;  %v11450_v20 = vld [vmem:[#allocation2 + $0x98] ss:$0 sps:$4 sm:$0x11]  }
 0x2a1   : > { %10906 = vmatmul.mubr.bf16.gmra.mxu1 %v13771_v46  ;;  %v5491_v34 = vsel %vm1020_vm3, %v15364_v12, %v15363_v56  ;;  %v6431_v54 = vrot.slane %v6429_v0, 2  ;;  %v5963_v46 = vrot.slane %v13933_v14, 1  ;;  %v5965_v4 = vrot.slane %v13943_v44, 1  ;;  %v14100_v0 = vld [vmem:[#allocation2 + $0x38] sm:$0xff]   ;;  %v14102_v56 = vld [vmem:[#allocation2 + $0x40] sm:$0xff]   ;;  %v14104_v12 = vld [vmem:[#allocation2 + $0x48] sm:$0xff]  }
 0x2a2   : > { %10909 = vmatprep.mubr.bf16.mxu1 %v5491_v34  ;;  %10994 = vmatpush3.bf16.msra.mxu1 %v11449_v39  ;;  %v6423_v47 = vor.u32 %v6422_v31, %v6419_v19  ;;  %v15366_v14 = vrot.slane %v13747_v48, 1  ;;  %v5967_v44 = vrot.slane %v13964_v43, 1  ;;  %v5971_v24 = vrot.slane %v11450_v20, 1  ;;  %v14097_v43 = vld [vmem:[#allocation2 + $0x30] sm:$0xff]  }
 0x2a3   : > { %10995 = vmatprep.subr.bf16.mxu1 %v11454_v51  ;;  %v14043_v23 = vor.u32 %v6431_v54, %v6428_v17  ;;  %v5966_v19 = vsel %vm1020_vm3, %v5963_v46, %v5965_v4  ;;  %v14109_v31 = vld [vmem:[#allocation2 + $0x50] sm:$0xff]   ;;  %v14111_v17 = vld [vmem:[#allocation2 + $0x58] sm:$0xff]   ;;  %v14116_v54 = vld [vmem:[#allocation2 + $0x60] sm:$0xff]   ;;  %v8026_v20 = vrot.slane %v14104_v12, 3 }
 0x2a4   : > { %v14046_v39 = vsel %vm1773_vm5, %v6414_v13, %v6423_v47  ;;  %v5964_v10 = vsel %vm1020_vm3, %v15366_v14, %v5963_v46  ;;  %v5969_v13 = vrot.slane %v13972_v16, 1  ;;  %v14118_v46 = vld [vmem:[#allocation2 + $0x68] sm:$0xff]  }
 0x2a5   : > { %15365 = vst [vmem:[#allocation13_spill] sm:$0xff] %v14043_v23  ;;  %v14050_v29 = vsel %vm1773_vm5, %v6423_v47, %v14043_v23  ;;  %v14120_v47 = vld [vmem:[#allocation2 + $0x70] sm:$0xff]  }
 0x2a6   : > { %10996 = vmatpush3.bf16.msra.mxu1 %v11454_v51  ;;  %10970 = vmatmul.mubr.bf16.gmra.mxu0 %v5964_v10  ;;  %v5968_v51 = vsel %vm1020_vm3, %v5965_v4, %v5967_v44  ;;  %v5970_v48 = vsel %vm1020_vm3, %v5967_v44, %v5969_v13  ;;  %15368 = vst [vmem:[#allocation5_spill] sm:$0xff] %v14120_v47  ;;  %v14132_v44 = vld [vmem:[#allocation2 + $0x88] sm:$0xff]  }
 0x2a7   : > { %11085 = vmatprep.subr.bf16.mxu1 %v14040_v15  ;;  %10973 = vmatprep.mubr.bf16.mxu0 %v5966_v19  ;;  %v14130_v19 = vld [vmem:[#allocation2 + $0x80] sm:$0xff]   ;;  %15369 = vst [vmem:[#allocation15_spill] sm:$0xff] %v14132_v44 }
 0x2a9   : > { %10910 = vmatmul.mubr.bf16.gmra.mxu1 %v13736_v11  ;;  %v5972_v11 = vsel %vm1020_vm3, %v5969_v13, %v5971_v24  ;;  %v8020_v13 = vrot.slane %v14097_v43, 3  ;;  %v14138_v24 = vld [vmem:[#allocation2 + $0x90] sm:$0xff]  }
 0x2aa   : > { %10913 = vmatprep.mubr.bf16.mxu1 %v13745_v63 }
 0x2ae   : > { %10974 = vmatmul.mubr.bf16.gmra.mxu0 %v5968_v51  ;;  %v8022_v51 = vrot.slane %v14100_v0, 3 }
 0x2af   : > { %10977 = vmatprep.mubr.bf16.mxu0 %v5970_v48  ;;  %v8024_v48 = vrot.slane %v14102_v56, 3 }
 0x2b0   : > { %v14159_v23 = vsel %vm3420_vm6, %v8020_v13, %v8022_v51 }
 0x2b1   : > { %10914 = vmatmul.mubr.bf16.gmra.mxu1 %v13756_v37  ;;  %v11458_v37 = vld [vmem:[%s15253_s4 + $0x1f0] sm:$0xff]   ;;  %15374 = vst [vmem:[#allocation12_spill] sm:$0xff] %v14159_v23  ;;  %v8040_v23 = vrot.slane %v14130_v19, 3 }
 0x2b2   : > { %10917 = vmatprep.mubr.bf16.mxu1 %v13759_v62 }
 0x2b6   : > { %10978 = vmatmul.mubr.bf16.gmra.mxu0 %v5972_v11 }
 0x2b7   : > { %11049 = vmatprep.mubr.bf16.mxu0 %v13821_v50 }
 0x2b9   : > { %10918 = vmatmul.mubr.bf16.gmra.mxu1 %v13777_v27  ;;  %v11460_v27 = vld [vmem:[%s15253_s4 + $0x1e8] sm:$0xff]  }
 0x2ba   : > { %10921 = vmatprep.mubr.bf16.mxu1 %v13789_v3  ;;  %v7992_v3 = vld [vmem:[#allocation2 + $0x10] sm:$0x8] }
 0x2bd   : > { %v14069_v63 = vpop.f32.mrf.mxu0 }
 0x2be   : > { %11050 = vmatmul.mubr.bf16.vlgmr.msra.gmra.mxu0 %v13824_v55  ;;  %v14086_v55 = vld [vmem:[#allocation2 + $0x14] sm:$0xf] }
 0x2bf   : > { %11053 = vmatprep.mubr.bf16.mxu0 %v13830_v33  ;;  %11138 = vmatpush3.bf16.msra.mxu0 %v13938_v28  ;;  %v14079_v62 = vpop.f32.mrf.mxu0  ;;  %v14090_v33 = vld [vmem:[#allocation2 + $0x20] sm:$0xff]   ;;  %v14095_v28 = vld [vmem:[#allocation2 + $0x28] sm:$0xff]   ;;  %v9743_v34 = vcombine.low %v7992_v3, %v14086_v55 }
 0x2c0   : > { %11139 = vmatprep.subr.bf16.mxu0 %v11458_v37  ;;  %v8018_v10 = vrot.slane %v14095_v28, 3 }
 0x2c1   : > { %10922 = vmatmul.mubr.bf16.gmra.mxu1 %v13792_v32  ;;  %v14084_v50 = vpop.f32.mrf.mxu0  ;;  %v14088_v32 = vld [vmem:[#allocation2 + $0x18] sm:$0xff]   ;;  %v8013_v4 = vrot.slane %v9743_v34, 3 }
 0x2c2   : > { %10925 = vmatprep.mubr.bf16.mxu1 %v13795_v38  ;;  %v11462_v38 = vld [vmem:[%s15253_s4 + $0x1e0] sm:$0xff]   ;;  %v8014_v14 = vrot.slane %v14088_v32, 3  ;;  %v14151_v34 = vld [vmem:[#allocation2 + $0x98] sm:$0xff]  }
 0x2c3   : > { %11140 = vmatpush3.bf16.msra.mxu0 %v11458_v37 }
 0x2c4   : > { %11141 = vmatprep.subr.bf16.mxu0 %v11460_v27  ;;  %v14141_v11 = vsel %vm3420_vm6, %v8013_v4, %v8014_v14  ;;  %v14162_v4 = vsel %vm3420_vm6, %v8022_v51, %v8024_v48  ;;  %v11466_v51 = vld [vmem:[%s15253_s4 + $0x1d0] sm:$0xff]  }
 0x2c5   : > { %15370 = vst [vmem:[#allocation7_spill] sm:$0xff] %v14141_v11  ;;  %15375 = vst [vmem:[#allocation16_spill] sm:$0xff] %v14162_v4 }
 0x2c6   : > { %11054 = vmatmul.mubr.bf16.gmra.mxu0 %v13843_v41  ;;  %v14114_v41 = vpop.f32.mrf.mxu0 }
 0x2c7   : > { %11057 = vmatprep.mubr.bf16.mxu0 %v13849_v59  ;;  %11142 = vmatpush3.bf16.msra.mxu0 %v11460_v27  ;;  %15367 = vst [vmem:[#allocation4_spill] sm:$0xff] %v14114_v41  ;;  %v14125_v59 = vld [vmem:[#allocation2 + $0x78] sm:$0xff]   ;;  %v14156_v41 = vsel %vm3420_vm6, %v8018_v10, %v8020_v13  ;;  %v8034_v13 = vrot.slane %v14118_v46, 3 }
 0x2c8   : > { %11143 = vmatprep.subr.bf16.mxu0 %v11462_v38  ;;  %15373 = vst [vmem:[#allocation10_spill] sm:$0xff] %v14156_v41  ;;  %v8038_v4 = vrot.slane %v14125_v59, 3  ;;  %v8042_v41 = vrot.slane %v14132_v44, 3 }
 0x2c9   : > { %10926 = vmatmul.mubr.bf16.gmra.mxu1 %v13816_v22  ;;  %v11464_v22 = vld [vmem:[%s15253_s4 + $0x1d8] sm:$0xff]  }
 0x2ca   : > { %10997 = vmatprep.mubr.bf16.mxu1 %v13840_v53  ;;  %v8016_v53 = vrot.slane %v14090_v33, 3 }
 0x2cb   : > { %11144 = vmatpush3.bf16.msra.mxu0 %v11462_v38  ;;  %v11457_v38 = vld [vmem:[%s15253_s4 + $0x1b0] sm:$0xff]  }
 0x2cc   : > { %v14144_v37 = vsel %vm3420_vm6, %v8014_v14, %v8016_v53  ;;  %v14147_v27 = vsel %vm3420_vm6, %v8016_v53, %v8018_v10  ;;  %v14165_v14 = vsel %vm3420_vm6, %v8024_v48, %v8026_v20  ;;  %11145 = vmatprep.subr.bf16.mxu0 %v11464_v22  ;;  %v8028_v53 = vrot.slane %v14109_v31, 3 }
 0x2cd   : > { %15371 = vst [vmem:[#allocation8_spill] sm:$0xff] %v14144_v37  ;;  %15372 = vst [vmem:[#allocation9_spill] sm:$0xff] %v14147_v27  ;;  %v14149_v3 = vpop.f32.mrf.mxu0  ;;  %v8030_v27 = vrot.slane %v14111_v17, 3  ;;  %v8032_v10 = vrot.slane %v14116_v54, 3 }
 0x2ce   : > { %15376 = vst [vmem:[#allocation17_spill] sm:$0xff] %v14165_v14  ;;  %11058 = vmatmul.mubr.bf16.gmra.mxu0 %v13872_v42  ;;  %v8036_v14 = vrot.slane %v14120_v47, 3  ;;  %v14187_v42 = vsel %vm3420_vm6, %v8026_v20, %v8028_v53  ;;  %v8044_v47 = vrot.slane %v14138_v24, 3 }
 0x2cf   : > { %v14178_v48 = vpop.f32.mrf.mxu0  ;;  %11061 = vmatprep.mubr.bf16.mxu0 %v13878_v9  ;;  %15377 = vst [vmem:[#allocation20_spill] sm:$0xff] %v14187_v42  ;;  %v14190_v37 = vsel %vm3420_vm6, %v8028_v53, %v8030_v27  ;;  %v14193_v11 = vsel %vm3420_vm6, %v8030_v27, %v8032_v10  ;;  %v8046_v27 = vrot.slane %v14151_v34, 3  ;;  %11146 = vmatpush3.bf16.msra.mxu0 %v11464_v22 }
 0x2d0   : > { %15378 = vst [vmem:[#allocation18_spill] sm:$0xff] %v14190_v37  ;;  %15379 = vst [vmem:[#allocation19_spill] sm:$0xff] %v14193_v11  ;;  %v14204_v9 = vsel %vm3420_vm6, %v8034_v13, %v8036_v14  ;;  %v14207_v20 = vsel %vm3420_vm6, %v8036_v14, %v8038_v4  ;;  %v14217_v53 = vsel %vm3420_vm6, %v8040_v23, %v8042_v41  ;;  %v8048_v14 = vrot.slane %v14153_v60, 3 }
 0x2d1   : > { %10998 = vmatmul.mubr.bf16.vlgmr.msra.gmra.mxu1 %v13862_v49  ;;  %v14198_v44 = vpop.f32.mrf.mxu0  ;;  %v14201_v49 = vsel %vm3420_vm6, %v8032_v10, %v8034_v13  ;;  %15381 = vst [vmem:[#allocation22_spill] sm:$0xff] %v14204_v9  ;;  %15382 = vst [vmem:[#allocation23_spill] sm:$0xff] %v14207_v20  ;;  %v14220_v10 = vsel %vm3420_vm6, %v8042_v41, %v8044_v47  ;;  %11147 = vmatprep.subr.bf16.mxu0 %v11466_v51  ;;  %v11469_v20 = vld [vmem:[%s15253_s4 + $0x1c8] sm:$0xff]  }
 0x2d2   : > { %11086 = vmatpush3.bf16.msra.mxu1 %v14040_v15  ;;  %11001 = vmatprep.mubr.bf16.mxu1 %v13869_v26  ;;  %15380 = vst [vmem:[#allocation21_spill] sm:$0xff] %v14201_v49  ;;  %v11459_v15 = vld [vmem:[%s15253_s4 + $0x1a8] sm:$0xff]   ;;  %v14214_v26 = vsel %vm3420_vm6, %v8038_v4, %v8040_v23  ;;  %15384 = vst [vmem:[#allocation25_spill] sm:$0xff] %v14217_v53  ;;  %v14229_v22 = vsel %vm3420_vm6, %v8044_v47, %v8046_v27  ;;  %v11461_v23 = vld [vmem:[%s15253_s4 + $0x1a0] sm:$0xff]  }
 0x2d3   : > { %11087 = vmatprep.subr.bf16.mxu1 %v11457_v38  ;;  %15383 = vst [vmem:[#allocation24_spill] sm:$0xff] %v14214_v26  ;;  %15385 = vst [vmem:[#allocation26_spill] sm:$0xff] %v14220_v10  ;;  %v14223_v13 = vpop.f32.mrf.mxu0  ;;  %v14232_v4 = vsel %vm3420_vm6, %v8046_v27, %v8048_v14  ;;  %11148 = vmatpush3.bf16.msra.mxu0 %v11466_v51  ;;  %v11472_v47 = vld [vmem:[%s15253_s4 + $0x1c0] sm:$0xff]  }
 0x2d4   : > { %15386 = vst [vmem:[#allocation27_spill] sm:$0xff] %v14229_v22  ;;  %15387 = vst [vmem:[#allocation28_spill] sm:$0xff] %v14232_v4  ;;  %11149 = vmatprep.subr.bf16.mxu0 %v11469_v20  ;;  %v14254_v51 = vld [vmem:[%s15255_s6] sm:$0x3]  ;;  %v15390_v4 = vld [vmem:[#allocation11_spill] sm:$0xff] }
 0x2d5   : > { %v15391_v22 = vld [vmem:[#allocation6_spill] sm:$0xff] }
 0x2d6   : > { %11088 = vmatpush3.bf16.msra.mxu1 %v11457_v38  ;;  %11062 = vmatmul.mubr.bf16.gmra.mxu0 %v13896_v52  ;;  %v11463_v52 = vld [vmem:[%s15253_s4 + $0x198] sm:$0xff]  }
 0x2d7   : > { %11089 = vmatprep.subr.bf16.mxu1 %v11459_v15  ;;  %v14238_v41 = vpop.f32.mrf.mxu0  ;;  %11065 = vmatprep.mubr.bf16.mxu0 %v13902_v45 }
 0x2d8   : > { %11150 = vmatpush3.bf16.msra.mxu0 %v11469_v20  ;;  %v11467_v20 = vld [vmem:[%s15253_s4 + $0x188] sm:$0xff]  }
 0x2d9   : > { %11002 = vmatmul.mubr.bf16.gmra.mxu1 %v13888_v5  ;;  %v14246_v38 = vpop.f32.mrf.mxu0  ;;  %11151 = vmatprep.subr.bf16.mxu0 %v11472_v47 }
 0x2da   : > { %11005 = vmatprep.mubr.bf16.mxu1 %v13893_v2  ;;  %11090 = vmatpush3.bf16.msra.mxu1 %v11459_v15  ;;  %v11465_v2 = vld [vmem:[%s15253_s4 + $0x190] sm:$0xff]  }
 0x2db   : > { %11091 = vmatprep.subr.bf16.mxu1 %v11461_v23  ;;  %v14256_v5 = vpop.f32.mrf.mxu0 }
 0x2dc   : > { %11152 = vmatpush3.bf16.msra.mxu0 %v11472_v47 }
 0x2dd   : > { %11291 = vmatprep.subr.msk.bf16.mxu0 %vm617_vm0, %v14254_v51  ;;  %v14267_v45 = vpop.f32.mrf.mxu0 }
 0x2de   : > { %11092 = vmatpush3.bf16.msra.mxu1 %v11461_v23  ;;  %11066 = vmatmul.mubr.bf16.gmra.mxu0 %v13924_v61 }
 0x2df   : > { %11093 = vmatprep.subr.bf16.mxu1 %v11463_v52  ;;  %11069 = vmatprep.mubr.bf16.mxu0 %v13930_v6 }
 0x2e1   : > { %11006 = vmatmul.mubr.bf16.gmra.mxu1 %v13915_v35 }
 0x2e2   : > { %11009 = vmatprep.mubr.bf16.mxu1 %v13921_v18  ;;  %11094 = vmatpush3.bf16.msra.mxu1 %v11463_v52  ;;  %v11473_v18 = vld [vmem:[%s15253_s4 + $0x180] sm:$0xff]  }
 0x2e3   : > { %11095 = vmatprep.subr.bf16.mxu1 %v11465_v2 }
 0x2e4   : > { %v14275_v15 = vpop.f32.mrf.mxu0 }
 0x2e5   : > { %v10791_v27 = vpop.f32.mrf.mxu1 }
 0x2e6   : > { %11096 = vmatpush3.bf16.msra.mxu1 %v11465_v2  ;;  %v14273_v61 = vadd.f32 %v14069_v63, %v10791_v27  ;;  %11070 = vmatmul.mubr.bf16.gmra.mxu0 %v13954_v7  ;;  %v14284_v14 = vpop.f32.mrf.mxu0  ;;  %v14295_v7 = vld [vmem:[%s15253_s4 + $0x238] sm:$0xff]   ;;  %v7552_v27 = vshrl.u32 %v14088_v32, 16 }
 0x2e7   : > { %v5066_v35 = vpop.f32.mrf.mxu1  ;;  %11097 = vmatprep.subr.bf16.mxu1 %v11467_v20  ;;  %11073 = vmatprep.mubr.bf16.mxu0 %v13960_v36 }
 0x2e8   : > { %v14282_v6 = vadd.f32 %v14079_v62, %v5066_v35  ;;  %v14297_v62 = vpop.f32.mrf.mxu0  ;;  %v7555_v35 = vshll.u32 %v14088_v32, 16 }
 0x2e9   : > { %11010 = vmatmul.mubr.bf16.gmra.mxu1 %v13946_v58  ;;  %v10792_v63 = vpop.f32.mrf.mxu1  ;;  %v7059_v58 = vld [vmem:[#allocation2 + $0x10] sm:$0xc] }
 0x2ea   : > { %11013 = vmatprep.mubr.bf16.mxu1 %v13951_v8  ;;  %v14290_v23 = vadd.f32 %v14084_v50, %v10792_v63  ;;  %11098 = vmatpush3.bf16.msra.mxu1 %v11467_v20  ;;  %v14303_v36 = vpop.f32.mrf.mxu0  ;;  %v15388_v8 = vld [vmem:[#allocation14_spill] sm:$0xff]  ;;  %v15389_v50 = vld [vmem:[#allocation3_spill] sm:$0xff]  ;;  %v14309_v52 = vcombine.low %v7059_v58, %v14086_v55 }
 0x2eb   : > { %11099 = vmatprep.subr.bf16.mxu1 %v11473_v18  ;;  %v14299_v47 = vpop.f32.mrf.mxu1 }
 0x2ee   : > { %11100 = vmatpush3.bf16.msra.mxu1 %v11473_v18  ;;  %11074 = vmatmul.mubr.bf16.gmra.mxu0 %v13984_v30 }
 0x2ef   : > { %11189 = vmatprep.subr.bf16.mxu1 %v14295_v7  ;;  %11077 = vmatprep.mubr.bf16.mxu0 %v13990_v21  ;;  %v7544_v21 = vshrl.u32 %v14309_v52, 16 }
 0x2f1   : > { %11014 = vmatmul.mubr.bf16.gmra.mxu1 %v15388_v8  ;;  %v7547_v8 = vshll.u32 %v14309_v52, 16  ;;  %v7546_v10 = vrot.slane %v7544_v21, 2 }
 0x2f2   : > { %11017 = vmatprep.mubr.bf16.mxu1 %v15389_v50  ;;  %v14316_v30 = vpop.f32.mrf.mxu0  ;;  %v7557_v50 = vrot.slane %v7555_v35, 3 }
 0x2f3   : > { %v10795_v2 = vpop.f32.mrf.mxu1  ;;  %v7549_v53 = vrot.slane %v7547_v8, 3 }
 0x2f4   : > { %v14312_v20 = vadd.f32 %v14149_v3, %v10795_v2  ;;  %v14323_v55 = vpop.f32.mrf.mxu0  ;;  %v7554_v3 = vrot.slane %v7552_v27, 2 }
 0x2f5   : > { %v5082_v18 = vpop.f32.mrf.mxu1 }
 0x2f6   : > { %v14319_v63 = vadd.f32 %v14178_v48, %v5082_v18  ;;  %11078 = vmatmul.mubr.bf16.gmra.mxu0 %v14005_v1  ;;  %v11468_v48 = vld [vmem:[#allocation2 + $0x98] ss:$0 sps:$4 sm:$0x33]   ;;  %v14335_v9 = vpop.f32.mrf.mxu0  ;;  %v7561_v1 = vshrl.u32 %v14090_v33, 16  ;;  %v7558_v27 = vor.u32 %v7557_v50, %v7554_v3  ;;  %v7582_v50 = vshll.u32 %v14097_v43, 16 }
 0x2f7   : > { %v10796_v58 = vpop.f32.mrf.mxu1  ;;  %11081 = vmatprep.mubr.bf16.mxu0 %v14013_v40  ;;  %v7573_v40 = vshll.u32 %v14095_v28, 16  ;;  %v6778_v35 = vrot.slane %v11468_v48, 2 }
 0x2f8   : > { %v14327_v2 = vadd.f32 %v14198_v44, %v10796_v58  ;;  %v7564_v44 = vshll.u32 %v14090_v33, 16  ;;  %v7550_v58 = vor.u32 %v7549_v53, %v7546_v10  ;;  %v14341_v49 = vpop.f32.mrf.mxu0  ;;  %v7563_v21 = vrot.slane %v7561_v1, 2 }
 0x2f9   : > { %11018 = vmatmul.mubr.bf16.gmra.mxu1 %v15390_v4  ;;  %v5085_v18 = vpop.f32.mrf.mxu1  ;;  %v7570_v4 = vshrl.u32 %v14095_v28, 16  ;;  %v7575_v37 = vrot.slane %v7573_v40, 3  ;;  %v7591_v40 = vshll.u32 %v14100_v0, 16 }
 0x2fa   : > { %11021 = vmatprep.mubr.bf16.mxu1 %v15391_v22  ;;  %v14333_v26 = vadd.f32 %v14223_v13, %v5085_v18  ;;  %v15392_v22 = vrot.slane %v13972_v16, 2  ;;  %v7566_v8 = vrot.slane %v7564_v44, 3  ;;  %v7559_v18 = vsel %vm2973_vm7, %v7550_v58, %v7558_v27 }
 0x2fb   : > { %v7572_v11 = vrot.slane %v7570_v4, 2  ;;  %v7579_v16 = vshrl.u32 %v14097_v43, 16  ;;  %v7588_v4 = vshrl.u32 %v14100_v0, 16  ;;  %v6438_v58 = vshll.u32 %v11468_v48, 16 }
 0x2fc   : > { %v6779_v13 = vsel %vm2220_vm4, %v15392_v22, %v6778_v35  ;;  %v7567_v10 = vor.u32 %v7566_v8, %v7563_v21  ;;  %v6435_v35 = vshrl.u32 %v11468_v48, 16 }
 0x2fd   : > { %v7576_v44 = vor.u32 %v7575_v37, %v7572_v11  ;;  %v7581_v8 = vrot.slane %v7579_v16, 2  ;;  %v8728_v11 = vsel %vm617_vm0, %v14254_v51, 0  ;;  %v7590_v48 = vrot.slane %v7588_v4, 2 }
 0x2fe   : > { %11082 = vmatmul.mubr.bf16.gmra.mxu0 %v6779_v13  ;;  %v7568_v13 = vsel %vm2973_vm7, %v7558_v27, %v7567_v10  ;;  %v6437_v27 = vrot.slane %v6435_v35, 1  ;;  %v6440_v16 = vrot.slane %v6438_v58, 2  ;;  %v7600_v4 = vshll.u32 %v14102_v56, 16 }
 0x2ff   : > { %11153 = vmatprep.mubr.bf16.mxu0 %v7559_v18  ;;  %v7584_v18 = vrot.slane %v7582_v50, 3  ;;  %v7577_v37 = vsel %vm2973_vm7, %v7567_v10, %v7576_v44 }
 0x300   : > { %v6441_v35 = vor.u32 %v6440_v16, %v6437_v27  ;;  %v7209_v27 = vrot.slane %v14090_v33, 2 }
 0x301   : > { %11022 = vmatmul.mubr.bf16.gmra.mxu1 %v14031_v25  ;;  %v14349_v3 = vpop.f32.mrf.mxu0  ;;  %v7585_v10 = vor.u32 %v7584_v18, %v7581_v8  ;;  %v7602_v8 = vrot.slane %v7600_v4, 3  ;;  %v15393_v18 = vld [vmem:[#allocation13_spill] sm:$0xff]  ;;  %v7615_v4 = vshrl.u32 %v14109_v31, 16 }
 0x302   : > { %11025 = vmatprep.mubr.bf16.mxu1 %v14034_v57 }
 0x303   : > { %v10799_v53 = vpop.f32.mrf.mxu1  ;;  %v14361_v22 = vpop.f32.mrf.mxu0 }
 0x304   : > { %v14354_v1 = vadd.f32 %v14238_v41, %v10799_v53  ;;  %v7593_v53 = vrot.slane %v7591_v40, 3 }
 0x305   : > { %v5098_v25 = vpop.f32.mrf.mxu1  ;;  %v14375_v51 = vpop.f32.mrf.mxu0 }
 0x306   : > { %v14359_v57 = vadd.f32 %v14246_v38, %v5098_v25  ;;  %11154 = vmatmul.mubr.bf16.vlgmr.msra.gmra.mxu0 %v7568_v13  ;;  %v7594_v40 = vor.u32 %v7593_v53, %v7590_v48  ;;  %v7609_v25 = vshll.u32 %v14104_v12, 16  ;;  %v7586_v13 = vsel %vm2973_vm7, %v7576_v44, %v7585_v10 }
 0x307   : > { %v10800_v21 = vpop.f32.mrf.mxu1  ;;  %11157 = vmatprep.mubr.bf16.mxu0 %v7577_v37  ;;  %11242 = vmatpush3.bf16.msra.mxu0 %v8728_v11  ;;  %v14382_v58 = vpop.f32.mrf.mxu0  ;;  %v6442_v11 = vsel %vm1773_vm5, %v15393_v18, %v6441_v35  ;;  %v7624_v35 = vshrl.u32 %v14111_v17, 16 }
 0x308   : > { %v14368_v41 = vadd.f32 %v14256_v5, %v10800_v21  ;;  %v7597_v5 = vshrl.u32 %v14102_v56, 16  ;;  %v7595_v37 = vsel %vm2973_vm7, %v7585_v10, %v7594_v40  ;;  %v7611_v53 = vrot.slane %v7609_v25, 3 }
 0x309   : > { %11026 = vmatmul.mubr.bf16.gmra.mxu1 %v14046_v39  ;;  %v5101_v38 = vpop.f32.mrf.mxu1  ;;  %v7606_v39 = vshrl.u32 %v14104_v12, 16  ;;  %v7618_v10 = vshll.u32 %v14109_v31, 16 }
 0x30a   : > { %11029 = vmatprep.mubr.bf16.mxu1 %v14050_v29  ;;  %v14373_v50 = vadd.f32 %v14267_v45, %v5101_v38  ;;  %v7207_v29 = vrot.slane %v14088_v32, 2  ;;  %v7206_v45 = vrot.slane %v14309_v52, 2  ;;  %v7599_v21 = vrot.slane %v7597_v5, 2 }
 0x30b   : > { %v7608_v48 = vrot.slane %v7606_v39, 2 }
 0x30c   : > { %v7208_v32 = vsel %vm2220_vm4, %v7206_v45, %v7207_v29  ;;  %v7603_v5 = vor.u32 %v7602_v8, %v7599_v21  ;;  %v7627_v45 = vshll.u32 %v14111_v17, 16  ;;  %v7210_v21 = vsel %vm2220_vm4, %v7207_v29, %v7209_v27 }
 0x30d   : > { %v7612_v25 = vor.u32 %v7611_v53, %v7608_v48  ;;  %v7620_v48 = vrot.slane %v7618_v10, 3 }
 0x30e   : > { %11158 = vmatmul.mubr.bf16.gmra.mxu0 %v7586_v13 }
 0x30f   : > { %11161 = vmatprep.mubr.bf16.mxu0 %v7595_v37  ;;  %v7617_v37 = vrot.slane %v7615_v4, 2  ;;  %v7213_v4 = vrot.slane %v14097_v43, 2 }
 0x310   : > { %v14393_v44 = vpop.f32.mrf.mxu0 }
 0x311   : > { %11030 = vmatmul.mubr.bf16.gmra.mxu1 %v6442_v11  ;;  %v10803_v38 = vpop.f32.mrf.mxu1  ;;  %v7604_v11 = vsel %vm2973_vm7, %v7594_v40, %v7603_v5  ;;  %v7621_v40 = vor.u32 %v7620_v48, %v7617_v37 }
 0x312   : > { %11101 = vmatprep.mubr.bf16.mxu1 %v7208_v32  ;;  %v14391_v52 = vadd.f32 %v14275_v15, %v10803_v38  ;;  %v7211_v15 = vrot.slane %v14095_v28, 2  ;;  %v14407_v33 = vpop.f32.mrf.mxu0  ;;  %v7613_v28 = vsel %vm2973_vm7, %v7603_v5, %v7612_v25  ;;  %v7629_v32 = vrot.slane %v7627_v45, 3 }
 0x313   : > { %v5114_v16 = vpop.f32.mrf.mxu1  ;;  %v7636_v5 = vshll.u32 %v14116_v54, 16 }
 0x314   : > { %v14399_v39 = vadd.f32 %v14284_v14, %v5114_v16  ;;  %v11479_v14 = vld [vmem:[%s15253_s4 + $0x230] sm:$0xff]   ;;  %v7212_v29 = vsel %vm2220_vm4, %v7209_v27, %v7211_v15  ;;  %v14420_v38 = vpop.f32.mrf.mxu0  ;;  %v7633_v16 = vshrl.u32 %v14116_v54, 16  ;;  %v7642_v27 = vshrl.u32 %v14118_v46, 16 }
 0x315   : > { %v10804_v13 = vpop.f32.mrf.mxu1  ;;  %v7214_v43 = vsel %vm2220_vm4, %v7211_v15, %v7213_v4  ;;  %v7217_v15 = vrot.slane %v14102_v56, 2  ;;  %v7663_v56 = vshll.u32 %v14125_v59, 16 }
 0x316   : > { %v14405_v18 = vadd.f32 %v14297_v62, %v10804_v13  ;;  %11162 = vmatmul.mubr.bf16.gmra.mxu0 %v7604_v11  ;;  %v7626_v62 = vrot.slane %v7624_v35, 2  ;;  %v7215_v35 = vrot.slane %v14100_v0, 2  ;;  %v14431_v45 = vpop.f32.mrf.mxu0  ;;  %v7622_v13 = vsel %vm2973_vm7, %v7612_v25, %v7621_v40  ;;  %v11487_v11 = vld [vmem:[%s15253_s4 + $0x220] sm:$0xff]  }
 0x317   : > { %v5117_v8 = vpop.f32.mrf.mxu1  ;;  %11165 = vmatprep.mubr.bf16.mxu0 %v7613_v28  ;;  %v7644_v48 = vrot.slane %v7642_v27, 2 }
 0x318   : > { %v14415_v53 = vadd.f32 %v14303_v36, %v5117_v8  ;;  %v11483_v36 = vld [vmem:[%s15253_s4 + $0x228] sm:$0xff]   ;;  %v7630_v10 = vor.u32 %v7629_v32, %v7626_v62  ;;  %v7638_v8 = vrot.slane %v7636_v5, 3 }
 0x319   : > { %11102 = vmatmul.mubr.bf16.vlgmr.msra.gmra.mxu1 %v7210_v21  ;;  %v7635_v21 = vrot.slane %v7633_v16, 2 }
 0x31a   : > { %11190 = vmatpush3.bf16.msra.mxu1 %v14295_v7  ;;  %11105 = vmatprep.mubr.bf16.mxu1 %v7212_v29  ;;  %v7645_v7 = vshll.u32 %v14118_v46, 16  ;;  %v7631_v37 = vsel %vm2973_vm7, %v7621_v40, %v7630_v10  ;;  %v15394_v40 = vld [vmem:[#allocation5_spill] sm:$0xff] }
 0x31b   : > { %11191 = vmatprep.subr.bf16.mxu1 %v11479_v14  ;;  %v7639_v29 = vor.u32 %v7638_v8, %v7635_v21  ;;  %v7651_v16 = vshrl.u32 %v15394_v40, 16  ;;  %v7654_v5 = vshll.u32 %v15394_v40, 16  ;;  %v7219_v21 = vrot.slane %v14104_v12, 2 }
 0x31c   : > { %v7647_v28 = vrot.slane %v7645_v7, 3  ;;  %v7660_v7 = vshrl.u32 %v14125_v59, 16 }
 0x31e   : > { %11192 = vmatpush3.bf16.msra.mxu1 %v11479_v14  ;;  %11166 = vmatmul.mubr.bf16.gmra.mxu0 %v7622_v13  ;;  %v7216_v14 = vsel %vm2220_vm4, %v7213_v4, %v7215_v35  ;;  %v11490_v4 = vld [vmem:[%s15253_s4 + $0x218] sm:$0xff]   ;;  %v7648_v27 = vor.u32 %v7647_v28, %v7644_v48  ;;  %v7656_v48 = vrot.slane %v7654_v5, 3  ;;  %v11493_v28 = vld [vmem:[%s15253_s4 + $0x210] sm:$0xff]  }
 0x31f   : > { %11193 = vmatprep.subr.bf16.mxu1 %v11483_v36  ;;  %11169 = vmatprep.mubr.bf16.mxu0 %v7631_v37  ;;  %v7218_v37 = vsel %vm2220_vm4, %v7215_v35, %v7217_v15 }
 0x320   : > { %v7649_v12 = vsel %vm2973_vm7, %v7639_v29, %v7648_v27 }
 0x321   : > { %v10807_v0 = vpop.f32.mrf.mxu1  ;;  %11106 = vmatmul.mubr.bf16.gmra.mxu1 %v7214_v43  ;;  %v14443_v62 = vpop.f32.mrf.mxu0 }
 0x322   : > { %v14441_v25 = vadd.f32 %v14316_v30, %v10807_v0  ;;  %11109 = vmatprep.mubr.bf16.mxu1 %v7216_v14  ;;  %11194 = vmatpush3.bf16.msra.mxu1 %v11483_v36  ;;  %v7653_v0 = vrot.slane %v7651_v16, 2 }
 0x323   : > { %v5130_v32 = vpop.f32.mrf.mxu1  ;;  %11195 = vmatprep.subr.bf16.mxu1 %v11487_v11  ;;  %v14454_v36 = vpop.f32.mrf.mxu0 }
 0x324   : > { %v14452_v30 = vadd.f32 %v14323_v55, %v5130_v32  ;;  %v7640_v55 = vsel %vm2973_vm7, %v7630_v10, %v7639_v29  ;;  %v7665_v32 = vrot.slane %v7663_v56, 3  ;;  %v7220_v10 = vsel %vm2220_vm4, %v7217_v15, %v7219_v21 }
 0x325   : > { %v10808_v13 = vpop.f32.mrf.mxu1  ;;  %v7669_v29 = vshrl.u32 %v14130_v19, 16 }
 0x326   : > { %v14460_v8 = vadd.f32 %v14335_v9, %v10808_v13  ;;  %11196 = vmatpush3.bf16.msra.mxu1 %v11487_v11  ;;  %11170 = vmatmul.mubr.bf16.gmra.mxu0 %v7640_v55  ;;  %v14471_v9 = vpop.f32.mrf.mxu0  ;;  %v7662_v11 = vrot.slane %v7660_v7, 2  ;;  %v7657_v13 = vor.u32 %v7656_v48, %v7653_v0  ;;  %v11496_v7 = vld [vmem:[%s15253_s4 + $0x208] sm:$0xff]   ;;  %v7223_v0 = vrot.slane %v14111_v17, 2 }
 0x327   : > { %v5133_v43 = vpop.f32.mrf.mxu1  ;;  %11197 = vmatprep.subr.bf16.mxu1 %v11490_v4  ;;  %11173 = vmatprep.mubr.bf16.mxu0 %v7649_v12 }
 0x328   : > { %v14468_v14 = vadd.f32 %v14341_v49, %v5133_v43  ;;  %v7221_v49 = vrot.slane %v14109_v31, 2  ;;  %v7672_v43 = vshll.u32 %v14130_v19, 16  ;;  %v7666_v56 = vor.u32 %v7665_v32, %v7662_v11  ;;  %v11498_v11 = vld [vmem:[%s15253_s4 + $0x200] sm:$0xff]  }
 0x329   : > { %v10811_v35 = vpop.f32.mrf.mxu1  ;;  %11110 = vmatmul.mubr.bf16.gmra.mxu1 %v7218_v37 }
 0x32a   : > { %v14475_v16 = vadd.f32 %v14349_v3, %v10811_v35  ;;  %11113 = vmatprep.mubr.bf16.mxu1 %v7220_v10  ;;  %11198 = vmatpush3.bf16.msra.mxu1 %v11490_v4  ;;  %v14486_v3 = vpop.f32.mrf.mxu0  ;;  %v15395_v4 = vld [vmem:[#allocation15_spill] sm:$0xff]  ;;  %v7222_v35 = vsel %vm2220_vm4, %v7219_v21, %v7221_v49  ;;  %v7671_v10 = vrot.slane %v7669_v29, 2 }
 0x32b   : > { %v5146_v5 = vpop.f32.mrf.mxu1  ;;  %11199 = vmatprep.subr.bf16.mxu1 %v11493_v28  ;;  %v7678_v37 = vshrl.u32 %v15395_v4, 16  ;;  %v7681_v31 = vshll.u32 %v15395_v4, 16 }
 0x32c   : > { %v14484_v15 = vadd.f32 %v14361_v22, %v5146_v5  ;;  %v7658_v22 = vsel %vm2973_vm7, %v7648_v27, %v7657_v13  ;;  %v7674_v5 = vrot.slane %v7672_v43, 3  ;;  %v7224_v27 = vsel %vm2220_vm4, %v7221_v49, %v7223_v0 }
 0x32d   : > { %v10812_v55 = vpop.f32.mrf.mxu1  ;;  %v7225_v49 = vrot.slane %v14116_v54, 2 }
 0x32e   : > { %v14492_v48 = vadd.f32 %v14375_v51, %v10812_v55  ;;  %11200 = vmatpush3.bf16.msra.mxu1 %v11493_v28  ;;  %v14502_v17 = vpop.f32.mrf.mxu0  ;;  %11174 = vmatmul.mubr.bf16.gmra.mxu0 %v7658_v22  ;;  %v7667_v51 = vsel %vm2973_vm7, %v7657_v13, %v7666_v56  ;;  %v7680_v28 = vrot.slane %v7678_v37, 2  ;;  %v7683_v55 = vrot.slane %v7681_v31, 3 }
 0x32f   : > { %v5149_v12 = vpop.f32.mrf.mxu1  ;;  %11201 = vmatprep.subr.bf16.mxu1 %v11496_v7  ;;  %11177 = vmatprep.mubr.bf16.mxu0 %v7667_v51  ;;  %v7687_v13 = vshrl.u32 %v14138_v24, 16  ;;  %v7690_v37 = vshll.u32 %v14138_v24, 16  ;;  %v7227_v51 = vrot.slane %v14118_v46, 2  ;;  %v7226_v46 = vsel %vm2220_vm4, %v7223_v0, %v7225_v49 }
 0x330   : > { %v14500_v32 = vadd.f32 %v14382_v58, %v5149_v12  ;;  %v14509_v43 = vpop.f32.mrf.mxu0  ;;  %v7675_v12 = vor.u32 %v7674_v5, %v7671_v10  ;;  %v7699_v10 = vshll.u32 %v14151_v34, 16  ;;  %v11501_v5 = vld [vmem:[%s11607_s12 + $0x8] sm:$0xfe]  }
 0x331   : > { %v10815_v21 = vpop.f32.mrf.mxu1  ;;  %11114 = vmatmul.mubr.bf16.gmra.mxu1 %v7222_v35  ;;  %v7684_v35 = vor.u32 %v7683_v55, %v7680_v28  ;;  %v7692_v28 = vrot.slane %v7690_v37, 3  ;;  %v8507_v0 = vshll.u32 %v11501_v5, 16 }
 0x332   : > { %15396 = vst [vmem:[#allocation14_spill] sm:$0xff] %v14500_v32  ;;  %v14507_v29 = vadd.f32 %v14393_v44, %v10815_v21  ;;  %11117 = vmatprep.mubr.bf16.mxu1 %v7224_v27  ;;  %11202 = vmatpush3.bf16.msra.mxu1 %v11496_v7  ;;  %v14517_v44 = vpop.f32.mrf.mxu0  ;;  %v7696_v7 = vshrl.u32 %v14151_v34, 16  ;;  %v7676_v54 = vsel %vm2973_vm7, %v7666_v56, %v7675_v12  ;;  %v7701_v42 = vrot.slane %v7699_v10, 3 }
 0x333   : > { %v5162_v58 = vpop.f32.mrf.mxu1  ;;  %11203 = vmatprep.subr.bf16.mxu1 %v11498_v11  ;;  %v8504_v56 = vshrl.u32 %v11501_v5, 16  ;;  %v7231_v10 = vrot.slane %v14125_v59, 2 }
 0x334   : > { %15397 = vst [vmem:[#allocation3_spill] sm:$0xff] %v14507_v29  ;;  %v14514_v31 = vadd.f32 %v14407_v33, %v5162_v58  ;;  %v14526_v27 = vpop.f32.mrf.mxu0  ;;  %v11502_v33 = vld [vmem:[%s11607_s12 + $0x10] sm:$0xff]  }
 0x335   : > { %v10816_v22 = vpop.f32.mrf.mxu1  ;;  %v8512_v37 = vshrl.u32 %v11502_v33, 16  ;;  %v8506_v5 = vrot.slane %v8504_v56, 1 }
 0x336   : > { %15398 = vst [vmem:[#allocation11_spill] sm:$0xff] %v14514_v31  ;;  %v14524_v21 = vadd.f32 %v14420_v38, %v10816_v22  ;;  %11204 = vmatpush3.bf16.msra.mxu1 %v11498_v11  ;;  %v7689_v31 = vrot.slane %v7687_v13, 2  ;;  %v14534_v29 = vpop.f32.mrf.mxu0  ;;  %11178 = vmatmul.mubr.bf16.gmra.mxu0 %v7676_v54  ;;  %v7685_v38 = vsel %vm2973_vm7, %v7675_v12, %v7684_v35 }
 0x337   : > { %v5165_v58 = vpop.f32.mrf.mxu1  ;;  %v7228_v11 = vsel %vm2220_vm4, %v7225_v49, %v7227_v51  ;;  %11181 = vmatprep.mubr.bf16.mxu0 %v7685_v38  ;;  %v7708_v49 = vshll.u32 %v14153_v60, 16 }
 0x338   : > { %15399 = vst [vmem:[#allocation6_spill] sm:$0xff] %v14524_v21  ;;  %v14531_v55 = vadd.f32 %v14431_v45, %v5165_v58  ;;  %v7698_v21 = vrot.slane %v7696_v7, 2  ;;  %v14541_v45 = vpop.f32.mrf.mxu0  ;;  %v8515_v58 = vshll.u32 %v11502_v33, 16  ;;  %v7693_v54 = vor.u32 %v7692_v28, %v7689_v31  ;;  %v11504_v33 = vld [vmem:[%s11607_s12 + $0x20] sm:$0xff]  }
 0x339   : > { %v10819_v22 = vpop.f32.mrf.mxu1  ;;  %11118 = vmatmul.mubr.bf16.gmra.mxu1 %v7226_v46  ;;  %v7705_v46 = vshrl.u32 %v14153_v60, 16  ;;  %v8509_v60 = vrot.slane %v8507_v0, 2  ;;  %v7710_v59 = vrot.slane %v7708_v49, 3 }
 0x33a   : > { %15400 = vst [vmem:[#allocation13_spill] sm:$0xff] %v14531_v55  ;;  %v14539_v13 = vadd.f32 %v14443_v62, %v10819_v22  ;;  %11121 = vmatprep.mubr.bf16.mxu1 %v7228_v11  ;;  %v7229_v62 = vrot.slane %v15394_v40, 2  ;;  %v14550_v38 = vpop.f32.mrf.mxu0  ;;  %v7702_v11 = vor.u32 %v7701_v42, %v7698_v21  ;;  %v8514_v55 = vrot.slane %v8512_v37, 1 }
 0x33b   : > { %v5178_v12 = vpop.f32.mrf.mxu1  ;;  %v7694_v40 = vsel %vm2973_vm7, %v7684_v35, %v7693_v54  ;;  %v8510_v49 = vor.u32 %v8509_v60, %v8506_v5 }
 0x33c   : > { %15401 = vst [vmem:[#allocation5_spill] sm:$0xff] %v14539_v13  ;;  %v14546_v7 = vadd.f32 %v14454_v36, %v5178_v12  ;;  %v11503_v13 = vld [vmem:[%s11607_s12 + $0x18] sm:$0xff]   ;;  %v14557_v28 = vpop.f32.mrf.mxu0  ;;  %v8517_v36 = vrot.slane %v8515_v58, 2  ;;  %v7230_v42 = vsel %vm2220_vm4, %v7227_v51, %v7229_v62  ;;  %v7232_v21 = vsel %vm2220_vm4, %v7229_v62, %v7231_v10 }
 0x33d   : > { %v10820_v22 = vpop.f32.mrf.mxu1  ;;  %v8521_v37 = vshrl.u32 %v11503_v13, 16  ;;  %v8524_v35 = vshll.u32 %v11503_v13, 16  ;;  %v8530_v58 = vshrl.u32 %v11504_v33, 16  ;;  %v7235_v13 = vrot.slane %v15395_v4, 2 }
 0x33e   : > { %15402 = vst [vmem:[#allocation15_spill] sm:$0xff] %v14546_v7  ;;  %v14555_v31 = vadd.f32 %v14471_v9, %v10820_v22  ;;  %v7707_v7 = vrot.slane %v7705_v46, 2  ;;  %v14565_v56 = vpop.f32.mrf.mxu0  ;;  %11182 = vmatmul.mubr.bf16.gmra.mxu0 %v7694_v40  ;;  %v7703_v9 = vsel %vm2973_vm7, %v7693_v54, %v7702_v11  ;;  %v8533_v46 = vshll.u32 %v11504_v33, 16  ;;  %v11505_v33 = vld [vmem:[%s11607_s12 + $0x28] sm:$0xff]  }
 0x33f   : > { %v5181_v12 = vpop.f32.mrf.mxu1  ;;  %11185 = vmatprep.mubr.bf16.mxu0 %v7703_v9  ;;  %v8518_v62 = vor.u32 %v8517_v36, %v8514_v55  ;;  %v7233_v40 = vrot.slane %v14130_v19, 2  ;;  %v8523_v9 = vrot.slane %v8521_v37, 1  ;;  %v8539_v37 = vshrl.u32 %v11505_v33, 16 }
 0x340   : > { %v14561_v32 = vadd.f32 %v14486_v3, %v5181_v12  ;;  %v14571_v51 = vpop.f32.mrf.mxu0  ;;  %v7711_v12 = vor.u32 %v7710_v59, %v7707_v7  ;;  %v11506_v7 = vld [vmem:[%s11607_s12 + $0x30] sm:$0xff]  }
 0x341   : > { %v10823_v0 = vpop.f32.mrf.mxu1  ;;  %11122 = vmatmul.mubr.bf16.gmra.mxu1 %v7230_v42  ;;  %v7234_v36 = vsel %vm2220_vm4, %v7231_v10, %v7233_v40  ;;  %v8548_v10 = vshrl.u32 %v11506_v7, 16 }
 0x342   : > { %v14569_v3 = vadd.f32 %v14502_v17, %v10823_v0  ;;  %11125 = vmatprep.mubr.bf16.mxu1 %v7232_v21  ;;  %v14578_v42 = vpop.f32.mrf.mxu0  ;;  %v8526_v21 = vrot.slane %v8524_v35, 2  ;;  %v8532_v0 = vrot.slane %v8530_v58, 1  ;;  %v7712_v19 = vsel %vm2973_vm7, %v7702_v11, %v7711_v12 }
 0x343   : > { %v5194_v22 = vpop.f32.mrf.mxu1  ;;  %v8542_v35 = vshll.u32 %v11505_v33, 16  ;;  %v7236_v58 = vsel %vm2220_vm4, %v7233_v40, %v7235_v13  ;;  %v7237_v33 = vrot.slane %v14138_v24, 2  ;;  %v8541_v40 = vrot.slane %v8539_v37, 1  ;;  %v11507_v24 = vld [vmem:[%s11607_s12 + $0x38] sm:$0xff]  }
 0x344   : > { %15403 = vst [vmem:[#allocation29_spill] sm:$0xff] %v14569_v3  ;;  %v14574_v54 = vadd.f32 %v14509_v43, %v5194_v22  ;;  %v8535_v3 = vrot.slane %v8533_v46, 2  ;;  %v14584_v5 = vpop.f32.mrf.mxu0  ;;  %v8519_v43 = vsel %vm1773_vm5, %v8510_v49, %v8518_v62  ;;  %v8527_v46 = vor.u32 %v8526_v21, %v8523_v9 }
 0x345   : > { %v10824_v17 = vpop.f32.mrf.mxu1  ;;  %v8551_v22 = vshll.u32 %v11506_v7, 16  ;;  %v8550_v37 = vrot.slane %v8548_v10, 1 }
 0x346   : > { %v14582_v55 = vadd.f32 %v14517_v44, %v10824_v17  ;;  %v14593_v59 = vpop.f32.mrf.mxu0  ;;  %11186 = vmatmul.mubr.bf16.gmra.mxu0 %v7712_v19  ;;  %v8536_v49 = vor.u32 %v8535_v3, %v8532_v0  ;;  %v7239_v0 = vrot.slane %v14151_v34, 2  ;;  %v8528_v7 = vsel %vm1773_vm5, %v8518_v62, %v8527_v46 }
 0x347   : > { %v5197_v60 = vpop.f32.mrf.mxu1  ;;  %11243 = vmatprep.mubr.msk.bf16.mxu0 %vm562_vm2, %v8519_v43  ;;  %v8544_v43 = vrot.slane %v8542_v35, 2  ;;  %v8553_v35 = vrot.slane %v8551_v22, 2  ;;  %v8560_v22 = vshll.u32 %v11507_v24, 16 }
 0x348   : > { %v14590_v4 = vadd.f32 %v14526_v27, %v5197_v60  ;;  %v14598_v27 = vpop.f32.mrf.mxu0  ;;  %v8537_v19 = vsel %vm1773_vm5, %v8527_v46, %v8536_v49  ;;  %v7240_v62 = vsel %vm2220_vm4, %v7237_v33, %v7239_v0 }
 0x349   : > { %v10895_v44 = vpop.f32.mrf.mxu1  ;;  %11126 = vmatmul.mubr.bf16.gmra.mxu1 %v7234_v36  ;;  %v11508_v36 = vld [vmem:[%s11607_s12 + $0x40] sm:$0xff]   ;;  %v8545_v46 = vor.u32 %v8544_v43, %v8541_v40 }
 0x34a   : > { %v5755_v11 = vadd.f32 %v10895_v44, %v14273_v61  ;;  %11129 = vmatprep.mubr.bf16.mxu1 %v7236_v58  ;;  %v14602_v60 = vpop.f32.mrf.mxu0  ;;  %v15404_v61 = vld [vmem:[#allocation4_spill] sm:$0xff] }
 0x34b   : > { %v5610_v12 = vpop.f32.mrf.mxu1  ;;  %v5313_v9 = vadd.f32 %v15404_v61, %v14299_v47  ;;  %v7238_v47 = vsel %vm2220_vm4, %v7235_v13, %v7237_v33  ;;  %v8566_v13 = vshrl.u32 %v11508_v36, 16 }
 0x34c   : > { %v5753_v17 = vadd.f32 %v5610_v12, %v14282_v6  ;;  %v14605_v3 = vadd.f32 %v14534_v29, %v5755_v11  ;;  %v14615_v44 = vpop.f32.mrf.mxu0  ;;  %v11499_v11 = vld [vmem:[#allocation2 + $0xa0] ss:$0 sps:$4 sm:$0x33]  }
 0x34d   : > { %v10896_v21 = vpop.f32.mrf.mxu1  ;;  %v7241_v43 = vrot.slane %v11499_v11, 2 }
 0x34e   : > { %v5756_v6 = vadd.f32 %v10896_v21, %v14290_v23  ;;  %v14618_v29 = vadd.f32 %v14541_v45, %v5753_v17  ;;  %v14622_v12 = vpop.f32.mrf.mxu0  ;;  %11244 = vmatmul.mubr.msk.bf16.vlgmr.msra.gmra.mxu0 %vm562_vm2, %v8528_v7  ;;  %v8557_v45 = vshrl.u32 %v11507_v24, 16  ;;  %v8569_v17 = vshll.u32 %v11508_v36, 16  ;;  %v11509_v24 = vld [vmem:[%s11607_s12 + $0x48] sm:$0xff]  }
 0x34f   : > { %v5613_v58 = vpop.f32.mrf.mxu1  ;;  %11247 = vmatprep.mubr.msk.bf16.mxu0 %vm562_vm2, %v8537_v19  ;;  %v8546_v19 = vsel %vm1773_vm5, %v8536_v49, %v8545_v46 }
 0x350   : > { %v5754_v34 = vadd.f32 %v5613_v58, %v5313_v9  ;;  %v14626_v23 = vadd.f32 %v14550_v38, %v5756_v6  ;;  %v14630_v33 = vpop.f32.mrf.mxu0  ;;  %v8554_v9 = vor.u32 %v8553_v35, %v8550_v37  ;;  %v8559_v6 = vrot.slane %v8557_v45, 1 }
 0x351   : > { %v10899_v10 = vpop.f32.mrf.mxu1  ;;  %11130 = vmatmul.mubr.bf16.gmra.mxu1 %v7238_v47  ;;  %v8562_v58 = vrot.slane %v8560_v22, 2  ;;  %v8568_v37 = vrot.slane %v8566_v13, 1  ;;  %v8571_v35 = vrot.slane %v8569_v17, 2  ;;  %v8575_v45 = vshrl.u32 %v11509_v24, 16  ;;  %v15405_v17 = vld [vmem:[#allocation7_spill] sm:$0xff] }
 0x352   : > { %v5759_v61 = vadd.f32 %v10899_v10, %v14312_v20  ;;  %11133 = vmatprep.mubr.bf16.mxu1 %v7240_v62  ;;  %v14633_v40 = vadd.f32 %v14557_v28, %v5754_v34  ;;  %v14636_v7 = vpop.f32.mrf.mxu0  ;;  %v8555_v11 = vsel %vm1773_vm5, %v8545_v46, %v8554_v9  ;;  %v7242_v62 = vsel %vm2220_vm4, %v7239_v0, %v7241_v43 }
 0x353   : > { %v5626_v38 = vpop.f32.mrf.mxu1  ;;  %v8578_v22 = vshll.u32 %v11509_v24, 16  ;;  %v8572_v46 = vor.u32 %v8571_v35, %v8568_v37  ;;  %v8577_v24 = vrot.slane %v8575_v45, 1  ;;  %v11511_v35 = vld [vmem:[%s11607_s12 + $0x58] sm:$0xff]  }
 0x354   : > { %v5757_v21 = vadd.f32 %v5626_v38, %v14319_v63  ;;  %v14641_v36 = vadd.f32 %v14565_v56, %v5759_v61  ;;  %v14644_v47 = vpop.f32.mrf.mxu0  ;;  %v11510_v63 = vld [vmem:[%s11607_s12 + $0x50] sm:$0xff]  }
 0x355   : > { %v10900_v20 = vpop.f32.mrf.mxu1  ;;  %v8584_v61 = vshrl.u32 %v11510_v63, 16  ;;  %v8587_v38 = vshll.u32 %v11510_v63, 16 }
 0x356   : > { %v5760_v28 = vadd.f32 %v10900_v20, %v14327_v2  ;;  %v14649_v34 = vadd.f32 %v14571_v51, %v5757_v21  ;;  %v14653_v10 = vpop.f32.mrf.mxu0  ;;  %11248 = vmatmul.mubr.msk.bf16.gmra.mxu0 %vm562_vm2, %v8546_v19  ;;  %v8563_v51 = vor.u32 %v8562_v58, %v8559_v6  ;;  %v8580_v20 = vrot.slane %v8578_v22, 2 }
 0x357   : > { %v5629_v49 = vpop.f32.mrf.mxu1  ;;  %11251 = vmatprep.mubr.msk.bf16.mxu0 %vm562_vm2, %v8555_v11  ;;  %v8586_v63 = vrot.slane %v8584_v61, 1 }
 0x358   : > { %v5758_v56 = vadd.f32 %v5629_v49, %v14333_v26  ;;  %v14657_v2 = vadd.f32 %v14578_v42, %v5760_v28  ;;  %v14662_v26 = vpop.f32.mrf.mxu0  ;;  %v8564_v58 = vsel %vm1773_vm5, %v8554_v9, %v8563_v51  ;;  %v8573_v37 = vsel %vm1773_vm5, %v8563_v51, %v8572_v46  ;;  %v11512_v28 = vld [vmem:[%s11607_s12 + $0x60] sm:$0xff]  }
 0x359   : > { %v10903_v13 = vpop.f32.mrf.mxu1  ;;  %11134 = vmatmul.mubr.bf16.gmra.mxu1 %v7242_v62  ;;  %v8581_v9 = vor.u32 %v8580_v20, %v8577_v24  ;;  %v8602_v51 = vshrl.u32 %v11512_v28, 16 }
 0x35a   : > { %v5763_v0 = vadd.f32 %v10903_v13, %v14354_v1  ;;  %11205 = vmatprep.mubr.bf16.mxu1 %v15405_v17  ;;  %v14665_v43 = vadd.f32 %v14584_v5, %v5758_v56  ;;  %v14668_v19 = vpop.f32.mrf.mxu0  ;;  %v8593_v13 = vshrl.u32 %v11511_v35, 16  ;;  %v15407_v17 = vld [vmem:[#allocation9_spill] sm:$0xff] }
 0x35b   : > { %v5642_v42 = vpop.f32.mrf.mxu1  ;;  %v8582_v20 = vsel %vm1773_vm5, %v8572_v46, %v8581_v9 }
 0x35c   : > { %v5761_v21 = vadd.f32 %v5642_v42, %v14359_v57  ;;  %v14671_v6 = vadd.f32 %v14593_v59, %v5763_v0  ;;  %v14678_v11 = vpop.f32.mrf.mxu0  ;;  %v8589_v57 = vrot.slane %v8587_v38, 2  ;;  %v8605_v0 = vshll.u32 %v11512_v28, 16 }
 0x35d   : > { %v10904_v1 = vpop.f32.mrf.mxu1  ;;  %v8604_v28 = vrot.slane %v8602_v51, 1 }
 0x35e   : > { %v5764_v5 = vadd.f32 %v10904_v1, %v14368_v41  ;;  %v14681_v49 = vadd.f32 %v14598_v27, %v5761_v21  ;;  %v14684_v56 = vpop.f32.mrf.mxu0  ;;  %11252 = vmatmul.mubr.msk.bf16.gmra.mxu0 %vm562_vm2, %v8564_v58  ;;  %v15406_v41 = vld [vmem:[#allocation8_spill] sm:$0xff]  ;;  %v8596_v27 = vshll.u32 %v11511_v35, 16  ;;  %v8590_v38 = vor.u32 %v8589_v57, %v8586_v63  ;;  %v11513_v1 = vld [vmem:[%s11607_s12 + $0x68] sm:$0xff]  }
 0x35f   : > { %v5645_v62 = vpop.f32.mrf.mxu1  ;;  %11255 = vmatprep.mubr.msk.bf16.mxu0 %vm562_vm2, %v8573_v37  ;;  %v8595_v37 = vrot.slane %v8593_v13, 1 }
 0x360   : > { %v5762_v59 = vadd.f32 %v5645_v62, %v14373_v50  ;;  %v14688_v45 = vadd.f32 %v14602_v60, %v5764_v5  ;;  %v14694_v61 = vpop.f32.mrf.mxu0  ;;  %v8598_v35 = vrot.slane %v8596_v27, 2  ;;  %v8607_v5 = vrot.slane %v8605_v0, 2  ;;  %v15408_v27 = vld [vmem:[#allocation10_spill] sm:$0xff] }
 0x361   : > { %v10907_v22 = vpop.f32.mrf.mxu1  ;;  %11206 = vmatmul.mubr.bf16.vlgmr.msra.gmra.mxu1 %v15406_v41  ;;  %v8591_v57 = vsel %vm1773_vm5, %v8581_v9, %v8590_v38  ;;  %v8614_v41 = vshll.u32 %v11513_v1, 16 }
 0x362   : > { %v5767_v50 = vadd.f32 %v10907_v22, %v14391_v52  ;;  %11209 = vmatprep.mubr.bf16.mxu1 %v15407_v17  ;;  %v14697_v60 = vadd.f32 %v14615_v44, %v5762_v59  ;;  %v14700_v24 = vpop.f32.mrf.mxu0  ;;  %v8611_v22 = vshrl.u32 %v11513_v1, 16  ;;  %v8599_v9 = vor.u32 %v8598_v35, %v8595_v37 }
 0x363   : > { %v5658_v42 = vpop.f32.mrf.mxu1 }
 0x364   : > { %v5765_v21 = vadd.f32 %v5658_v42, %v14399_v39  ;;  %v14705_v58 = vadd.f32 %v14622_v12, %v5767_v50  ;;  %v14708_v44 = vpop.f32.mrf.mxu0  ;;  %v11514_v39 = vld [vmem:[%s11607_s12 + $0x70] sm:$0xff]   ;;  %v8613_v1 = vrot.slane %v8611_v22, 1  ;;  %v8600_v35 = vsel %vm1773_vm5, %v8590_v38, %v8599_v9 }
 0x365   : > { %v10908_v52 = vpop.f32.mrf.mxu1  ;;  %v8620_v50 = vshrl.u32 %v11514_v39, 16  ;;  %v8623_v17 = vshll.u32 %v11514_v39, 16 }
 0x366   : > { %v5768_v63 = vadd.f32 %v10908_v52, %v14405_v18  ;;  %v14713_v62 = vadd.f32 %v14630_v33, %v5765_v21  ;;  %v14716_v12 = vpop.f32.mrf.mxu0  ;;  %11256 = vmatmul.mubr.msk.bf16.gmra.mxu0 %vm562_vm2, %v8582_v20  ;;  %v8608_v33 = vor.u32 %v8607_v5, %v8604_v28  ;;  %v8616_v52 = vrot.slane %v8614_v41, 2  ;;  %v11515_v5 = vld [vmem:[%s11607_s12 + $0x78] sm:$0xff]  }
 0x367   : > { %v5661_v46 = vpop.f32.mrf.mxu1  ;;  %11259 = vmatprep.mubr.msk.bf16.mxu0 %vm562_vm2, %v8591_v57  ;;  %v8622_v39 = vrot.slane %v8620_v50, 1 }
 0x368   : > { %v5766_v59 = vadd.f32 %v5661_v46, %v14415_v53  ;;  %v14720_v13 = vadd.f32 %v14636_v7, %v5768_v63  ;;  %v15409_v53 = vld [vmem:[#allocation12_spill] sm:$0xff]  ;;  %v14726_v0 = vpop.f32.mrf.mxu0  ;;  %v8609_v28 = vsel %vm1773_vm5, %v8599_v9, %v8608_v33  ;;  %v11516_v63 = vld [vmem:[%s11607_s12 + $0x80] sm:$0xff]   ;;  %v8617_v38 = vor.u32 %v8616_v52, %v8613_v1 }
 0x369   : > { %v10911_v18 = vpop.f32.mrf.mxu1  ;;  %11210 = vmatmul.mubr.bf16.gmra.mxu1 %v15408_v27  ;;  %v8629_v27 = vshrl.u32 %v11515_v5, 16  ;;  %v8632_v9 = vshll.u32 %v11515_v5, 16 }
 0x36a   : > { %v5771_v51 = vadd.f32 %v10911_v18, %v14441_v25  ;;  %11213 = vmatprep.mubr.bf16.mxu1 %v15409_v53  ;;  %v14729_v7 = vadd.f32 %v14644_v47, %v5766_v59  ;;  %v14732_v20 = vpop.f32.mrf.mxu0  ;;  %v15411_v53 = vld [vmem:[#allocation17_spill] sm:$0xff]  ;;  %v8618_v52 = vsel %vm1773_vm5, %v8608_v33, %v8617_v38 }
 0x36b   : > { %v5674_v42 = vpop.f32.mrf.mxu1 }
 0x36c   : > { %v5769_v21 = vadd.f32 %v5674_v42, %v14452_v30  ;;  %v14735_v37 = vadd.f32 %v14653_v10, %v5771_v51  ;;  %v14742_v57 = vpop.f32.mrf.mxu0  ;;  %v8625_v30 = vrot.slane %v8623_v17, 2  ;;  %v8641_v51 = vshll.u32 %v11516_v63, 16 }
 0x36d   : > { %v10912_v25 = vpop.f32.mrf.mxu1 }
 0x36e   : > { %v5772_v47 = vadd.f32 %v10912_v25, %v14460_v8  ;;  %v14745_v46 = vadd.f32 %v14662_v26, %v5769_v21  ;;  %v14748_v22 = vpop.f32.mrf.mxu0  ;;  %11260 = vmatmul.mubr.msk.bf16.gmra.mxu0 %vm562_vm2, %v8600_v35  ;;  %v15410_v8 = vld [vmem:[#allocation16_spill] sm:$0xff]  ;;  %v8638_v26 = vshrl.u32 %v11516_v63, 16  ;;  %v8626_v17 = vor.u32 %v8625_v30, %v8622_v39 }
 0x36f   : > { %v5677_v59 = vpop.f32.mrf.mxu1  ;;  %11263 = vmatprep.mubr.msk.bf16.mxu0 %vm562_vm2, %v8609_v28  ;;  %v8631_v35 = vrot.slane %v8629_v27, 1  ;;  %v8634_v28 = vrot.slane %v8632_v9, 2  ;;  %v8643_v63 = vrot.slane %v8641_v51, 2  ;;  %v15414_v51 = vld [vmem:[#allocation3_spill] sm:$0xff] }
 0x370   : > { %v5770_v10 = vadd.f32 %v5677_v59, %v14468_v14  ;;  %v14752_v41 = vadd.f32 %v14668_v19, %v5772_v47  ;;  %v14758_v50 = vpop.f32.mrf.mxu0  ;;  %v8640_v5 = vrot.slane %v8638_v26, 1  ;;  %v11517_v47 = vld [vmem:[%s11607_s12 + $0x88] sm:$0xff]   ;;  %v8627_v30 = vsel %vm1773_vm5, %v8617_v38, %v8626_v17 }
 0x371   : > { %v10915_v18 = vpop.f32.mrf.mxu1  ;;  %11214 = vmatmul.mubr.bf16.gmra.mxu1 %v15410_v8  ;;  %v8635_v38 = vor.u32 %v8634_v28, %v8631_v35  ;;  %v8647_v26 = vshrl.u32 %v11517_v47, 16 }
 0x372   : > { %v5775_v14 = vadd.f32 %v10915_v18, %v14475_v16  ;;  %11217 = vmatprep.mubr.bf16.mxu1 %v15411_v53  ;;  %v14761_v19 = vadd.f32 %v14678_v11, %v5770_v10  ;;  %v14764_v1 = vpop.f32.mrf.mxu0  ;;  %v15412_v10 = vld [vmem:[#allocation14_spill] sm:$0xff]  ;;  %v8644_v9 = vor.u32 %v8643_v63, %v8640_v5 }
 0x373   : > { %v5690_v42 = vpop.f32.mrf.mxu1  ;;  %v15415_v53 = vld [vmem:[#allocation18_spill] sm:$0xff]  ;;  %v8636_v5 = vsel %vm1773_vm5, %v8626_v17, %v8635_v38 }
 0x374   : > { %v5773_v21 = vadd.f32 %v5690_v42, %v14484_v15  ;;  %v14768_v25 = vadd.f32 %v14684_v56, %v5775_v14  ;;  %v14772_v11 = vpop.f32.mrf.mxu0  ;;  %v11518_v15 = vld [vmem:[%s11607_s12 + $0x90] sm:$0xff]   ;;  %v8645_v63 = vsel %vm1773_vm5, %v8635_v38, %v8644_v9 }
 0x375   : > { %v10916_v16 = vpop.f32.mrf.mxu1 }
 0x376   : > { %v5776_v39 = vadd.f32 %v10916_v16, %v14492_v48  ;;  %v14777_v59 = vadd.f32 %v14694_v61, %v5773_v21  ;;  %v14780_v18 = vpop.f32.mrf.mxu0  ;;  %11264 = vmatmul.mubr.msk.bf16.gmra.mxu0 %vm562_vm2, %v8618_v52  ;;  %v15413_v48 = vld [vmem:[#allocation20_spill] sm:$0xff]  ;;  %v8650_v61 = vshll.u32 %v11517_v47, 16  ;;  %v8656_v21 = vshrl.u32 %v11518_v15, 16 }
 0x377   : > { %v5693_v33 = vpop.f32.mrf.mxu1  ;;  %11267 = vmatprep.mubr.msk.bf16.mxu0 %vm562_vm2, %v8627_v30  ;;  %v8659_v52 = vshll.u32 %v11518_v15, 16  ;;  %v8649_v47 = vrot.slane %v8647_v26, 1  ;;  %v15417_v15 = vld [vmem:[#allocation6_spill] sm:$0xff]  ;;  %v15420_v26 = vld [vmem:[#allocation19_spill] sm:$0xff] }
 0x378   : > { %v5774_v56 = vadd.f32 %v5693_v33, %v15412_v10  ;;  %v14784_v8 = vadd.f32 %v14700_v24, %v5776_v39  ;;  %v14790_v42 = vpop.f32.mrf.mxu0  ;;  %v15416_v39 = vld [vmem:[#allocation11_spill] sm:$0xff]  ;;  %v8652_v10 = vrot.slane %v8650_v61, 2 }
 0x379   : > { %v10919_v27 = vpop.f32.mrf.mxu1  ;;  %11218 = vmatmul.mubr.bf16.gmra.mxu1 %v15413_v48 }
 0x37a   : > { %v5779_v14 = vadd.f32 %v10919_v27, %v15414_v51  ;;  %11221 = vmatprep.mubr.bf16.mxu1 %v15415_v53  ;;  %v14793_v24 = vadd.f32 %v14708_v44, %v5774_v56  ;;  %v14796_v30 = vpop.f32.mrf.mxu0  ;;  %v11519_v27 = vld [vmem:[%s11607_s12 + $0x98] ss:$0 sps:$4 sm:$0x33]   ;;  %v8658_v56 = vrot.slane %v8656_v21, 1  ;;  %v8661_v51 = vrot.slane %v8659_v52, 2 }
 0x37b   : > { %v5706_v16 = vpop.f32.mrf.mxu1  ;;  %v8653_v61 = vor.u32 %v8652_v10, %v8649_v47  ;;  %v8665_v21 = vshrl.u32 %v11519_v27, 16  ;;  %v8668_v52 = vshll.u32 %v11519_v27, 16 }
 0x37c   : > { %v5777_v33 = vadd.f32 %v5706_v16, %v15416_v39  ;;  %v14799_v35 = vadd.f32 %v14716_v12, %v5779_v14  ;;  %v14805_v44 = vpop.f32.mrf.mxu0  ;;  %v15418_v12 = vld [vmem:[#allocation13_spill] sm:$0xff] }
 0x37d   : > { %v10920_v28 = vpop.f32.mrf.mxu1  ;;  %v8654_v47 = vsel %vm1773_vm5, %v8644_v9, %v8653_v61  ;;  %v8667_v10 = vrot.slane %v8665_v21, 1  ;;  %v8670_v27 = vrot.slane %v8668_v52, 2  ;;  %v15424_v21 = vld [vmem:[#allocation22_spill] sm:$0xff]  ;;  %v15425_v52 = vld [vmem:[#allocation29_spill] sm:$0xff] }
 0x37e   : > { %v5780_v48 = vadd.f32 %v10920_v28, %v15417_v15  ;;  %v14808_v53 = vadd.f32 %v14726_v0, %v5777_v33  ;;  %v11051_v39 = vpop.f32.mrf.mxu0  ;;  %11268 = vmatmul.mubr.msk.bf16.gmra.mxu0 %vm562_vm2, %v8636_v5  ;;  %v15421_v28 = vld [vmem:[#allocation5_spill] sm:$0xff] }
 0x37f   : > { %v5709_v16 = vpop.f32.mrf.mxu1  ;;  %11271 = vmatprep.mubr.msk.bf16.mxu0 %vm562_vm2, %v8645_v63  ;;  %v15422_v33 = vld [vmem:[#allocation21_spill] sm:$0xff] }
 0x380   : > { %v5778_v14 = vadd.f32 %v5709_v16, %v15418_v12  ;;  %v14813_v17 = vadd.f32 %v14732_v20, %v5780_v48  ;;  %v6880_v15 = vpop.f32.mrf.mxu0  ;;  %v8662_v16 = vor.u32 %v8661_v51, %v8658_v56  ;;  %v15423_v20 = vld [vmem:[#allocation15_spill] sm:$0xff] }
 0x381   : > { %v10923_v38 = vpop.f32.mrf.mxu1  ;;  %11222 = vmatmul.mubr.bf16.gmra.mxu1 %v15420_v26 }
 0x382   : > { %15419 = vst [vmem:[#allocation4_spill] sm:$0xff] %v14813_v17  ;;  %v5783_v0 = vadd.f32 %v10923_v38, %v15421_v28  ;;  %11225 = vmatprep.mubr.bf16.mxu1 %v15422_v33  ;;  %v14820_v12 = vadd.f32 %v14742_v57, %v5778_v14  ;;  %v11052_v17 = vpop.f32.mrf.mxu0  ;;  %v8663_v56 = vsel %vm1773_vm5, %v8653_v61, %v8662_v16 }
 0x383   : > { %v5722_v5 = vpop.f32.mrf.mxu1 }
 0x384   : > { %v5781_v48 = vadd.f32 %v5722_v5, %v15423_v20  ;;  %v14824_v26 = vadd.f32 %v14748_v22, %v5783_v0  ;;  %v6883_v28 = vpop.f32.mrf.mxu0  ;;  %v15426_v0 = vld [vmem:[#allocation23_spill] sm:$0xff] }
 0x385   : > { %v10924_v63 = vpop.f32.mrf.mxu1 }
 0x386   : > { %v5784_v38 = vadd.f32 %v10924_v63, %v14555_v31  ;;  %v14830_v57 = vadd.f32 %v14758_v50, %v5781_v48  ;;  %v11055_v33 = vpop.f32.mrf.mxu0  ;;  %11272 = vmatmul.mubr.msk.bf16.gmra.mxu0 %vm562_vm2, %v8654_v47  ;;  %v8671_v31 = vor.u32 %v8670_v27, %v8667_v10 }
 0x387   : > { %v5725_v51 = vpop.f32.mrf.mxu1  ;;  %11275 = vmatprep.mubr.msk.bf16.mxu0 %vm562_vm2, %v8663_v56 }
 0x388   : > { %v5782_v14 = vadd.f32 %v5725_v51, %v14561_v32  ;;  %v14835_v22 = vadd.f32 %v14764_v1, %v5784_v38  ;;  %v6896_v50 = vpop.f32.mrf.mxu0  ;;  %v8672_v47 = vsel %vm1773_vm5, %v8662_v16, %v8671_v31 }
 0x389   : > { %v10927_v9 = vpop.f32.mrf.mxu1  ;;  %11226 = vmatmul.mubr.bf16.gmra.mxu1 %v15424_v21 }
 0x38a   : > { %v5787_v61 = vadd.f32 %v10927_v9, %v15425_v52  ;;  %11229 = vmatprep.mubr.bf16.mxu1 %v15426_v0  ;;  %v14842_v5 = vadd.f32 %v14772_v11, %v5782_v14  ;;  %v11056_v48 = vpop.f32.mrf.mxu0  ;;  %v15427_v14 = vld [vmem:[#allocation24_spill] sm:$0xff]  ;;  %v15428_v9 = vld [vmem:[#allocation25_spill] sm:$0xff] }
 0x38b   : > { %v5738_v32 = vpop.f32.mrf.mxu1 }
 0x38c   : > { %v5785_v20 = vadd.f32 %v5738_v32, %v14574_v54  ;;  %v14846_v1 = vadd.f32 %v14780_v18, %v5787_v61  ;;  %v6899_v27 = vpop.f32.mrf.mxu0 }
 0x38d   : > { %v10928_v63 = vpop.f32.mrf.mxu1 }
 0x38e   : > { %v5788_v10 = vadd.f32 %v10928_v63, %v14582_v55  ;;  %v14851_v38 = vadd.f32 %v14790_v42, %v5785_v20  ;;  %v11059_v51 = vpop.f32.mrf.mxu0  ;;  %11276 = vmatmul.mubr.msk.bf16.gmra.mxu0 %vm562_vm2, %v8672_v47 }
 0x38f   : > { %v5741_v56 = vpop.f32.mrf.mxu1 }
 0x390   : > { %v5786_v11 = vadd.f32 %v5741_v56, %v14590_v4  ;;  %v14856_v54 = vadd.f32 %v14796_v30, %v5788_v10  ;;  %v6912_v55 = vpop.f32.mrf.mxu0  ;;  %v15429_v10 = vld [vmem:[#allocation26_spill] sm:$0xff]  ;;  %v15430_v56 = vld [vmem:[#allocation27_spill] sm:$0xff] }
 0x391   : > { %v10999_v18 = vpop.f32.mrf.mxu1  ;;  %11230 = vmatmul.mubr.bf16.gmra.mxu1 %v15427_v14 }
 0x392   : > { %v6688_v16 = vadd.f32 %v10999_v18, %v14605_v3  ;;  %11233 = vmatprep.mubr.bf16.mxu1 %v15428_v9  ;;  %v14862_v42 = vadd.f32 %v14805_v44, %v5786_v11  ;;  %v11060_v31 = vpop.f32.mrf.mxu0 }
 0x393   : > { %v6543_v21 = vpop.f32.mrf.mxu1 }
 0x394   : > { %v6686_v4 = vadd.f32 %v6543_v21, %v14618_v29  ;;  %v14865_v52 = vadd.f32 %v11051_v39, %v6688_v16  ;;  %v6915_v0 = vpop.f32.mrf.mxu0 }
 0x395   : > { %v11000_v61 = vpop.f32.mrf.mxu1 }
 0x396   : > { %v6689_v30 = vadd.f32 %v11000_v61, %v14626_v23  ;;  %v14868_v32 = vadd.f32 %v6880_v15, %v6686_v4  ;;  %v11063_v63 = vpop.f32.mrf.mxu0 }
 0x397   : > { %v6546_v20 = vpop.f32.mrf.mxu1 }
 0x398   : > { %v6687_v3 = vadd.f32 %v6546_v20, %v14633_v40  ;;  %v14871_v47 = vadd.f32 %v11052_v17, %v6689_v30  ;;  %v6928_v39 = vpop.f32.mrf.mxu0  ;;  %v15431_v30 = vld [vmem:[#allocation28_spill] sm:$0xff] }
 0x399   : > { %v11003_v44 = vpop.f32.mrf.mxu1  ;;  %11234 = vmatmul.mubr.bf16.gmra.mxu1 %v15429_v10 }
 0x39a   : > { %v6692_v29 = vadd.f32 %v11003_v44, %v14641_v36  ;;  %11237 = vmatprep.mubr.bf16.mxu1 %v15430_v56  ;;  %v14876_v11 = vadd.f32 %v6883_v28, %v6687_v3  ;;  %v11064_v18 = vpop.f32.mrf.mxu0 }
 0x39b   : > { %v6559_v23 = vpop.f32.mrf.mxu1 }
 0x39c   : > { %v6690_v15 = vadd.f32 %v6559_v23, %v14649_v34  ;;  %v14879_v14 = vadd.f32 %v11055_v33, %v6692_v29  ;;  %v6931_v16 = vpop.f32.mrf.mxu0 }
 0x39d   : > { %v11004_v40 = vpop.f32.mrf.mxu1 }
 0x39e   : > { %v6693_v17 = vadd.f32 %v11004_v40, %v14657_v2  ;;  %v14882_v9 = vadd.f32 %v6896_v50, %v6690_v15  ;;  %v11067_v4 = vpop.f32.mrf.mxu0 }
 0x39f   : > { %v6562_v21 = vpop.f32.mrf.mxu1 }
 0x3a0   : > { %v6691_v36 = vadd.f32 %v6562_v21, %v14665_v43  ;;  %v14885_v61 = vadd.f32 %v11056_v48, %v6693_v17  ;;  %v6944_v20 = vpop.f32.mrf.mxu0 }
 0x3a1   : > { %v11007_v28 = vpop.f32.mrf.mxu1  ;;  %11238 = vmatmul.mubr.bf16.gmra.mxu1 %v15431_v30 }
 0x3a2   : > { %v6696_v34 = vadd.f32 %v11007_v28, %v14671_v6  ;;  %v14889_v33 = vadd.f32 %v6899_v27, %v6691_v36  ;;  %v11068_v44 = vpop.f32.mrf.mxu0 }
 0x3a3   : > { %v6575_v3 = vpop.f32.mrf.mxu1 }
 0x3a4   : > { %v6694_v2 = vadd.f32 %v6575_v3, %v14681_v49  ;;  %v14892_v50 = vadd.f32 %v11059_v51, %v6696_v34  ;;  %v6947_v29 = vpop.f32.mrf.mxu0 }
 0x3a5   : > { %v11008_v10 = vpop.f32.mrf.mxu1 }
 0x3a6   : > { %v6697_v43 = vadd.f32 %v11008_v10, %v14688_v45  ;;  %v14895_v48 = vadd.f32 %v6912_v55, %v6694_v2  ;;  %v11071_v15 = vpop.f32.mrf.mxu0 }
 0x3a7   : > { %v6578_v56 = vpop.f32.mrf.mxu1 }
 0x3a8   : > { %v6695_v23 = vadd.f32 %v6578_v56, %v14697_v60  ;;  %v14898_v6 = vadd.f32 %v11060_v31, %v6697_v43  ;;  %v6960_v17 = vpop.f32.mrf.mxu0 }
 0x3a9   : > { %v11011_v27 = vpop.f32.mrf.mxu1 }
 0x3aa   : > { %v6700_v40 = vadd.f32 %v11011_v27, %v14705_v58  ;;  %v14901_v49 = vadd.f32 %v6915_v0, %v6695_v23  ;;  %v11072_v36 = vpop.f32.mrf.mxu0 }
 0x3ab   : > { %v6591_v51 = vpop.f32.mrf.mxu1 }
 0x3ac   : > { %v6698_v21 = vadd.f32 %v6591_v51, %v14713_v62  ;;  %v14904_v45 = vadd.f32 %v11063_v63, %v6700_v40  ;;  %v6963_v30 = vpop.f32.mrf.mxu0 }
 0x3ad   : > { %v11012_v55 = vpop.f32.mrf.mxu1 }
 0x3ae   : > { %v6701_v28 = vadd.f32 %v11012_v55, %v14720_v13  ;;  %v14907_v60 = vadd.f32 %v6928_v39, %v6698_v21  ;;  %v11075_v3 = vpop.f32.mrf.mxu0 }
 0x3af   : > { %v6594_v31 = vpop.f32.mrf.mxu1 }
 0x3b0   : > { %v6699_v34 = vadd.f32 %v6594_v31, %v14729_v7  ;;  %v14910_v58 = vadd.f32 %v11064_v18, %v6701_v28  ;;  %v6976_v10 = vpop.f32.mrf.mxu0 }
 0x3b1   : > { %v11015_v0 = vpop.f32.mrf.mxu1 }
 0x3b2   : > { %v6704_v2 = vadd.f32 %v11015_v0, %v14735_v37  ;;  %v14913_v62 = vadd.f32 %v6931_v16, %v6699_v34  ;;  %v11076_v56 = vpop.f32.mrf.mxu0 }
 0x3b3   : > { %v6607_v63 = vpop.f32.mrf.mxu1 }
 0x3b4   : > { %v6702_v43 = vadd.f32 %v6607_v63, %v14745_v46  ;;  %v14916_v13 = vadd.f32 %v11067_v4, %v6704_v2  ;;  %v6979_v27 = vpop.f32.mrf.mxu0 }
 0x3b5   : > { %v11016_v39 = vpop.f32.mrf.mxu1 }
 0x3b6   : > { %v6705_v23 = vadd.f32 %v11016_v39, %v14752_v41  ;;  %v14919_v7 = vadd.f32 %v6944_v20, %v6702_v43  ;;  %v11079_v51 = vpop.f32.mrf.mxu0 }
 0x3b7   : > { %v6610_v18 = vpop.f32.mrf.mxu1 }
 0x3b8   : > { %v6703_v40 = vadd.f32 %v6610_v18, %v14761_v19  ;;  %v14922_v37 = vadd.f32 %v11068_v44, %v6705_v23  ;;  %v6992_v55 = vpop.f32.mrf.mxu0 }
 0x3b9   : > { %v11019_v16 = vpop.f32.mrf.mxu1 }
 0x3ba   : > { %v6708_v21 = vadd.f32 %v11019_v16, %v14768_v25  ;;  %v14925_v46 = vadd.f32 %v6947_v29, %v6703_v40  ;;  %v11080_v31 = vpop.f32.mrf.mxu0  ;;  %v15432_v40 = vld [vmem:[#allocation4_spill] sm:$0xff] }
 0x3bb   : > { %v6623_v4 = vpop.f32.mrf.mxu1 }
 0x3bc   : > { %v6706_v28 = vadd.f32 %v6623_v4, %v14777_v59  ;;  %v14928_v41 = vadd.f32 %v11071_v15, %v6708_v21  ;;  %v6995_v0 = vpop.f32.mrf.mxu0 }
 0x3bd   : > { %v11020_v20 = vpop.f32.mrf.mxu1 }
 0x3be   : > { %v6709_v34 = vadd.f32 %v11020_v20, %v14784_v8  ;;  %v14931_v19 = vadd.f32 %v6960_v17, %v6706_v28  ;;  %v11083_v63 = vpop.f32.mrf.mxu0 }
 0x3bf   : > { %v6626_v44 = vpop.f32.mrf.mxu1 }
 0x3c0   : > { %v6707_v2 = vadd.f32 %v6626_v44, %v14793_v24  ;;  %v14934_v25 = vadd.f32 %v11072_v36, %v6709_v34  ;;  %v7008_v39 = vpop.f32.mrf.mxu0 }
 0x3c1   : > { %v11023_v29 = vpop.f32.mrf.mxu1 }
 0x3c2   : > { %v6712_v43 = vadd.f32 %v11023_v29, %v14799_v35  ;;  %v14937_v59 = vadd.f32 %v6963_v30, %v6707_v2  ;;  %v11084_v18 = vpop.f32.mrf.mxu0 }
 0x3c3   : > { %v6639_v15 = vpop.f32.mrf.mxu1 }
 0x3c4   : > { %v6710_v23 = vadd.f32 %v6639_v15, %v14808_v53  ;;  %v14940_v8 = vadd.f32 %v11075_v3, %v6712_v43  ;;  %v7011_v21 = vpop.f32.mrf.mxu0 }
 0x3c5   : > { %v11024_v17 = vpop.f32.mrf.mxu1 }
 0x3c6   : > { %v6713_v16 = vadd.f32 %v11024_v17, %v15432_v40  ;;  %v14943_v24 = vadd.f32 %v6976_v10, %v6710_v23  ;;  %v11155_v28 = vpop.f32.mrf.mxu0 }
 0x3c7   : > { %v6642_v36 = vpop.f32.mrf.mxu1 }
 0x3c8   : > { %v6711_v4 = vadd.f32 %v6642_v36, %v14820_v12  ;;  %v14946_v35 = vadd.f32 %v11076_v56, %v6713_v16  ;;  %v7813_v34 = vpop.f32.mrf.mxu0 }
 0x3c9   : > { %v11027_v30 = vpop.f32.mrf.mxu1 }
 0x3ca   : > { %v6716_v20 = vadd.f32 %v11027_v30, %v14824_v26  ;;  %v14949_v53 = vadd.f32 %v6979_v27, %v6711_v4  ;;  %v11156_v2 = vpop.f32.mrf.mxu0 }
 0x3cb   : > { %v6655_v3 = vpop.f32.mrf.mxu1 }
 0x3cc   : > { %v6714_v44 = vadd.f32 %v6655_v3, %v14830_v57  ;;  %v14952_v29 = vadd.f32 %v11079_v51, %v6716_v20  ;;  %v7816_v15 = vpop.f32.mrf.mxu0 }
 0x3cd   : > { %v11028_v10 = vpop.f32.mrf.mxu1 }
 0x3ce   : > { %v6717_v43 = vadd.f32 %v11028_v10, %v14835_v22  ;;  %v14955_v12 = vadd.f32 %v6992_v55, %v6714_v44  ;;  %v11159_v17 = vpop.f32.mrf.mxu0 }
 0x3cf   : > { %v6658_v56 = vpop.f32.mrf.mxu1 }
 0x3d0   : > { %v6715_v23 = vadd.f32 %v6658_v56, %v14842_v5  ;;  %v14958_v26 = vadd.f32 %v11080_v31, %v6717_v43  ;;  %v7829_v16 = vpop.f32.mrf.mxu0 }
 0x3d1   : > { %v11031_v27 = vpop.f32.mrf.mxu1 }
 0x3d2   : > { %v6720_v40 = vadd.f32 %v11031_v27, %v14846_v1  ;;  %v14961_v57 = vadd.f32 %v6995_v0, %v6715_v23  ;;  %v11160_v4 = vpop.f32.mrf.mxu0 }
 0x3d3   : > { %v6671_v51 = vpop.f32.mrf.mxu1 }
 0x3d4   : > { %v6718_v36 = vadd.f32 %v6671_v51, %v14851_v38  ;;  %v14964_v22 = vadd.f32 %v11083_v63, %v6720_v40  ;;  %v7832_v20 = vpop.f32.mrf.mxu0 }
 0x3d5   : > { %v11032_v55 = vpop.f32.mrf.mxu1 }
 0x3d6   : > { %v6721_v30 = vadd.f32 %v11032_v55, %v14856_v54  ;;  %v14967_v5 = vadd.f32 %v7008_v39, %v6718_v36  ;;  %v11163_v44 = vpop.f32.mrf.mxu0 }
 0x3d7   : > { %v6674_v31 = vpop.f32.mrf.mxu1 }
 0x3d8   : > { %v6719_v3 = vadd.f32 %v6674_v31, %v14862_v42  ;;  %v14970_v1 = vadd.f32 %v11084_v18, %v6721_v30  ;;  %v7845_v43 = vpop.f32.mrf.mxu0 }
 0x3d9   : > { %v11103_v0 = vpop.f32.mrf.mxu1 }
 0x3da   : > { %v7488_v10 = vadd.f32 %v11103_v0, %v14865_v52  ;;  %v14973_v38 = vadd.f32 %v7011_v21, %v6719_v3  ;;  %v11164_v23 = vpop.f32.mrf.mxu0 }
 0x3db   : > { %v7343_v63 = vpop.f32.mrf.mxu1 }
 0x3dc   : > { %v7486_v56 = vadd.f32 %v7343_v63, %v14868_v32  ;;  %v14976_v54 = vadd.f32 %v11155_v28, %v7488_v10  ;;  %v7848_v40 = vpop.f32.mrf.mxu0 }
 0x3dd   : > { %v11104_v39 = vpop.f32.mrf.mxu1 }
 0x3de   : > { %v7489_v27 = vadd.f32 %v11104_v39, %v14871_v47  ;;  %v14979_v42 = vadd.f32 %v7813_v34, %v7486_v56  ;;  %v11167_v36 = vpop.f32.mrf.mxu0 }
 0x3df   : > { %v7346_v18 = vpop.f32.mrf.mxu1 }
 0x3e0   : > { %v7487_v51 = vadd.f32 %v7346_v18, %v14876_v11  ;;  %v14982_v52 = vadd.f32 %v11156_v2, %v7489_v27  ;;  %v7861_v30 = vpop.f32.mrf.mxu0 }
 0x3e1   : > { %v11107_v21 = vpop.f32.mrf.mxu1 }
 0x3e2   : > { %v7492_v55 = vadd.f32 %v11107_v21, %v14879_v14  ;;  %v14985_v32 = vadd.f32 %v7816_v15, %v7487_v51  ;;  %v11168_v3 = vpop.f32.mrf.mxu0 }
 0x3e3   : > { %v7359_v28 = vpop.f32.mrf.mxu1 }
 0x3e4   : > { %v7490_v31 = vadd.f32 %v7359_v28, %v14882_v9  ;;  %v14988_v47 = vadd.f32 %v11159_v17, %v7492_v55  ;;  %v7864_v10 = vpop.f32.mrf.mxu0 }
 0x3e5   : > { %v11108_v34 = vpop.f32.mrf.mxu1 }
 0x3e6   : > { %v7493_v0 = vadd.f32 %v11108_v34, %v14885_v61  ;;  %v14991_v11 = vadd.f32 %v7829_v16, %v7490_v31  ;;  %v11171_v56 = vpop.f32.mrf.mxu0 }
 0x3e7   : > { %v7362_v2 = vpop.f32.mrf.mxu1 }
 0x3e8   : > { %v7491_v63 = vadd.f32 %v7362_v2, %v14889_v33  ;;  %v14994_v14 = vadd.f32 %v11160_v4, %v7493_v0  ;;  %v7877_v27 = vpop.f32.mrf.mxu0 }
 0x3e9   : > { %v11111_v15 = vpop.f32.mrf.mxu1 }
 0x3ea   : > { %v7496_v39 = vadd.f32 %v11111_v15, %v14892_v50  ;;  %v14997_v9 = vadd.f32 %v7832_v20, %v7491_v63  ;;  %v11172_v51 = vpop.f32.mrf.mxu0 }
 0x3eb   : > { %v7375_v17 = vpop.f32.mrf.mxu1 }
 0x3ec   : > { %v7494_v18 = vadd.f32 %v7375_v17, %v14895_v48  ;;  %v15000_v61 = vadd.f32 %v11163_v44, %v7496_v39  ;;  %v7880_v55 = vpop.f32.mrf.mxu0 }
 0x3ed   : > { %v11112_v16 = vpop.f32.mrf.mxu1 }
 0x3ee   : > { %v7497_v21 = vadd.f32 %v11112_v16, %v14898_v6  ;;  %v15003_v33 = vadd.f32 %v7845_v43, %v7494_v18  ;;  %v11175_v31 = vpop.f32.mrf.mxu0 }
 0x3ef   : > { %v7378_v4 = vpop.f32.mrf.mxu1 }
 0x3f0   : > { %v7495_v28 = vadd.f32 %v7378_v4, %v14901_v49  ;;  %v15006_v50 = vadd.f32 %v11164_v23, %v7497_v21  ;;  %v7893_v0 = vpop.f32.mrf.mxu0 }
 0x3f1   : > { %v11115_v20 = vpop.f32.mrf.mxu1 }
 0x3f2   : > { %v7500_v34 = vadd.f32 %v11115_v20, %v14904_v45  ;;  %v15009_v48 = vadd.f32 %v7848_v40, %v7495_v28  ;;  %v11176_v63 = vpop.f32.mrf.mxu0 }
 0x3f3   : > { %v7391_v44 = vpop.f32.mrf.mxu1 }
 0x3f4   : > { %v7498_v2 = vadd.f32 %v7391_v44, %v14907_v60  ;;  %v15012_v6 = vadd.f32 %v11167_v36, %v7500_v34  ;;  %v7896_v39 = vpop.f32.mrf.mxu0 }
 0x3f5   : > { %v11116_v43 = vpop.f32.mrf.mxu1 }
 0x3f6   : > { %v7501_v15 = vadd.f32 %v11116_v43, %v14910_v58  ;;  %v15015_v49 = vadd.f32 %v7861_v30, %v7498_v2  ;;  %v11179_v18 = vpop.f32.mrf.mxu0 }
 0x3f7   : > { %v7394_v23 = vpop.f32.mrf.mxu1 }
 0x3f8   : > { %v7499_v17 = vadd.f32 %v7394_v23, %v14913_v62  ;;  %v15018_v45 = vadd.f32 %v11168_v3, %v7501_v15  ;;  %v7909_v21 = vpop.f32.mrf.mxu0 }
 0x3f9   : > { %v11119_v40 = vpop.f32.mrf.mxu1 }
 0x3fa   : > { %v7504_v16 = vadd.f32 %v11119_v40, %v14916_v13  ;;  %v15021_v60 = vadd.f32 %v7864_v10, %v7499_v17  ;;  %v11180_v28 = vpop.f32.mrf.mxu0 }
 0x3fb   : > { %v7407_v36 = vpop.f32.mrf.mxu1 }
 0x3fc   : > { %v7502_v4 = vadd.f32 %v7407_v36, %v14919_v7  ;;  %v15024_v58 = vadd.f32 %v11171_v56, %v7504_v16  ;;  %v7912_v34 = vpop.f32.mrf.mxu0 }
 0x3fd   : > { %v11120_v30 = vpop.f32.mrf.mxu1 }
 0x3fe   : > { %v7505_v20 = vadd.f32 %v11120_v30, %v14922_v37  ;;  %v15027_v62 = vadd.f32 %v7877_v27, %v7502_v4  ;;  %v11183_v2 = vpop.f32.mrf.mxu0 }
 0x3ff   : > { %v7410_v3 = vpop.f32.mrf.mxu1 }
 0x400   : > { %v7503_v44 = vadd.f32 %v7410_v3, %v14925_v46  ;;  %v15030_v13 = vadd.f32 %v11172_v51, %v7505_v20  ;;  %v7925_v15 = vpop.f32.mrf.mxu0 }
 0x401   : > { %v11123_v10 = vpop.f32.mrf.mxu1 }
 0x402   : > { %v7508_v43 = vadd.f32 %v11123_v10, %v14928_v41  ;;  %v15033_v7 = vadd.f32 %v7880_v55, %v7503_v44  ;;  %v11184_v17 = vpop.f32.mrf.mxu0 }
 0x403   : > { %v7423_v56 = vpop.f32.mrf.mxu1 }
 0x404   : > { %v7506_v23 = vadd.f32 %v7423_v56, %v14931_v19  ;;  %v15036_v37 = vadd.f32 %v11175_v31, %v7508_v43  ;;  %v7928_v16 = vpop.f32.mrf.mxu0 }
 0x405   : > { %v11124_v27 = vpop.f32.mrf.mxu1 }
 0x406   : > { %v7509_v40 = vadd.f32 %v11124_v27, %v14934_v25  ;;  %v15039_v46 = vadd.f32 %v7893_v0, %v7506_v23  ;;  %v11187_v4 = vpop.f32.mrf.mxu0 }
 0x407   : > { %v7426_v51 = vpop.f32.mrf.mxu1 }
 0x408   : > { %v7507_v36 = vadd.f32 %v7426_v51, %v14937_v59  ;;  %v15042_v41 = vadd.f32 %v11176_v63, %v7509_v40  ;;  %v7941_v20 = vpop.f32.mrf.mxu0 }
 0x409   : > { %v11127_v55 = vpop.f32.mrf.mxu1 }
 0x40a   : > { %v7512_v30 = vadd.f32 %v11127_v55, %v14940_v8  ;;  %v15045_v19 = vadd.f32 %v7896_v39, %v7507_v36  ;;  %v11188_v44 = vpop.f32.mrf.mxu0 }
 0x40b   : > { %v7439_v31 = vpop.f32.mrf.mxu1 }
 0x40c   : > { %v7510_v3 = vadd.f32 %v7439_v31, %v14943_v24  ;;  %v15048_v25 = vadd.f32 %v11179_v18, %v7512_v30  ;;  %v7944_v43 = vpop.f32.mrf.mxu0 }
 0x40d   : > { %v11128_v0 = vpop.f32.mrf.mxu1 }
 0x40e   : > { %v7513_v10 = vadd.f32 %v11128_v0, %v14946_v35  ;;  %v15051_v59 = vadd.f32 %v7909_v21, %v7510_v3  ;;  %v11245_v23 = vpop.f32.mrf.mxu0 }
 0x40f   : > { %v7442_v63 = vpop.f32.mrf.mxu1 }
 0x410   : > { %v7511_v56 = vadd.f32 %v7442_v63, %v14949_v53  ;;  %v15054_v8 = vadd.f32 %v11180_v28, %v7513_v10  ;;  %v8764_v40 = vpop.f32.mrf.mxu0 }
 0x411   : > { %v11131_v39 = vpop.f32.mrf.mxu1 }
 0x412   : > { %v7516_v27 = vadd.f32 %v11131_v39, %v14952_v29  ;;  %v15057_v24 = vadd.f32 %v7912_v34, %v7511_v56  ;;  %v11246_v36 = vpop.f32.mrf.mxu0 }
 0x413   : > { %v7455_v18 = vpop.f32.mrf.mxu1 }
 0x414   : > { %v7514_v51 = vadd.f32 %v7455_v18, %v14955_v12  ;;  %v15060_v35 = vadd.f32 %v11183_v2, %v7516_v27  ;;  %v8767_v30 = vpop.f32.mrf.mxu0 }
 0x415   : > { %v11132_v21 = vpop.f32.mrf.mxu1 }
 0x416   : > { %v7517_v55 = vadd.f32 %v11132_v21, %v14958_v26  ;;  %v15063_v53 = vadd.f32 %v7925_v15, %v7514_v51  ;;  %v15066_v3 = vpop.f32.mrf.mxu0 }
 0x417   : > { %v7458_v28 = vpop.f32.mrf.mxu1 }
 0x418   : > { %v7515_v31 = vadd.f32 %v7458_v28, %v14961_v57  ;;  %v15068_v29 = vadd.f32 %v11184_v17, %v7517_v55  ;;  %v15071_v12 = vpop.f32.mrf.mxu0 }
 0x419   : > { %v11135_v34 = vpop.f32.mrf.mxu1 }
 0x41a   : > { %v7520_v0 = vadd.f32 %v11135_v34, %v14964_v22  ;;  %v15073_v2 = vadd.f32 %v7928_v16, %v7515_v31  ;;  %v15076_v63 = vpop.f32.mrf.mxu0 }
 0x41b   : > { %v7471_v10 = vpop.f32.mrf.mxu1 }
 0x41c   : > { %v7518_v26 = vadd.f32 %v7471_v10, %v14967_v5  ;;  %v15078_v15 = vadd.f32 %v11187_v4, %v7520_v0  ;;  %v8783_v39 = vpop.f32.mrf.mxu0  ;;  %v15091_v5 = vld [vmem:[%s15254_s5] ss:$0 sm:$0xff] }
 0x41d   : > { %v11136_v56 = vpop.f32.mrf.mxu1 }
 0x41e   : > { %v7521_v57 = vadd.f32 %v11136_v56, %v14970_v1  ;;  %v15081_v17 = vadd.f32 %v7941_v20, %v7518_v26  ;;  %v15084_v18 = vpop.f32.mrf.mxu0 }
 0x41f   : > { %v7474_v27 = vpop.f32.mrf.mxu1 }
 0x420   : > { %v7519_v22 = vadd.f32 %v7474_v27, %v14973_v38  ;;  %v15086_v16 = vadd.f32 %v11188_v44, %v7521_v57  ;;  %v15094_v1 = vpop.f32.mrf.mxu0 }
 0x421   : > { %v11207_v51 = vpop.f32.mrf.mxu1 }
 0x422   : > { %v8295_v4 = vadd.f32 %v11207_v51, %v14976_v54  ;;  %v15096_v20 = vadd.f32 %v7944_v43, %v7519_v22  ;;  %v15100_v44 = vpop.f32.mrf.mxu0 }
 0x423   : > { %v8150_v21 = vpop.f32.mrf.mxu1 }
 0x424   : > { %v8338_v38 = vadd.f32 %v15091_v5, %v8295_v4  ;;  %v8293_v55 = vadd.f32 %v8150_v21, %v14979_v42  ;;  %v15104_v0 = vpop.f32.mrf.mxu0 }
 0x425   : > { %v11208_v28 = vpop.f32.mrf.mxu1 }
 0x426   : > { %v8336_v31 = vadd.f32 %v15091_v5, %v8293_v55  ;;  %v8296_v34 = vadd.f32 %v11208_v28, %v14982_v52  ;;  %v8909_v10 = vadd.f32 %v11245_v23, %v8338_v38  ;;  %v15108_v56 = vpop.f32.mrf.mxu0 }
 0x427   : > { %v8153_v54 = vpop.f32.mrf.mxu1 }
 0x428   : > { %v8339_v26 = vadd.f32 %v15091_v5, %v8296_v34  ;;  %v8294_v43 = vadd.f32 %v8153_v54, %v14985_v32  ;;  %v8907_v42 = vadd.f32 %v8764_v40, %v8336_v31  ;;  %v15113_v4 = vpop.f32.mrf.mxu0  ;;  %v8945_v21 = vmax.f32 %v8909_v10, 0.0 }
 0x429   : > { %v11211_v57 = vpop.f32.mrf.mxu1 }
 0x42a   : > { %v8910_v27 = vadd.f32 %v11246_v36, %v8339_v26  ;;  %v8337_v22 = vadd.f32 %v15091_v5, %v8294_v43  ;;  %v8299_v51 = vadd.f32 %v11211_v57, %v14988_v47  ;;  %v15116_v28 = vpop.f32.mrf.mxu0  ;;  %v8943_v40 = vmax.f32 %v8907_v42, 0.0 }
 0x42b   : > { %v8166_v52 = vpop.f32.mrf.mxu1 }
 0x42c   : > { %v8946_v55 = vmax.f32 %v8910_v27, 0.0  ;;  %v8908_v23 = vadd.f32 %v8767_v30, %v8337_v22  ;;  %v8297_v38 = vadd.f32 %v8166_v52, %v14991_v11  ;;  %v8342_v32 = vadd.f32 %v15091_v5, %v8299_v51  ;;  %v15125_v30 = vpop.f32.mrf.mxu0 }
 0x42d   : > { %v11212_v47 = vpop.f32.mrf.mxu1 }
 0x42e   : > { %v9908_v36 = vpack.c.bf16 %v8946_v55, %v8945_v21  ;;  %v8944_v31 = vmax.f32 %v8908_v23, 0.0  ;;  %v8340_v34 = vadd.f32 %v15091_v5, %v8297_v38  ;;  %v8300_v11 = vadd.f32 %v11212_v47, %v14994_v14  ;;  %v15130_v43 = vpop.f32.mrf.mxu0 }
 0x42f   : > { %v8169_v54 = vpop.f32.mrf.mxu1  ;;  %v8913_v57 = vadd.f32 %v15066_v3, %v8342_v32 }
 0x430   : > { %9990 = vst [vmem:[%s15121_s25 + $0x8] sm:$0xff] %v9908_v36   ;;  %v9903_v10 = vpack.c.bf16 %v8944_v31, %v8943_v40  ;;  %v8298_v26 = vadd.f32 %v8169_v54, %v14997_v9  ;;  %v8343_v27 = vadd.f32 %v15091_v5, %v8300_v11  ;;  %v8911_v22 = vadd.f32 %v15071_v12, %v8340_v34  ;;  %v15138_v14 = vpop.f32.mrf.mxu0 }
 0x431   : > { %v11215_v42 = vpop.f32.mrf.mxu1  ;;  %v8949_v32 = vmax.f32 %v8913_v57, 0.0 }
 0x432   : > { %9904 = vst [vmem:[%s15121_s25] sm:$0xff] %v9903_v10   ;;  %v8341_v51 = vadd.f32 %v15091_v5, %v8298_v26  ;;  %v8303_v52 = vadd.f32 %v11215_v42, %v15000_v61  ;;  %v8914_v21 = vadd.f32 %v15076_v63, %v8343_v27  ;;  %v15143_v38 = vpop.f32.mrf.mxu0  ;;  %v8947_v40 = vmax.f32 %v8911_v22, 0.0 }
 0x433   : > { %v8182_v55 = vpop.f32.mrf.mxu1 }
 0x434   : > { %v8912_v9 = vadd.f32 %v8783_v39, %v8341_v51  ;;  %v8346_v23 = vadd.f32 %v15091_v5, %v8303_v52  ;;  %v8301_v3 = vadd.f32 %v8182_v55, %v15003_v33  ;;  %v8950_v47 = vmax.f32 %v8914_v21, 0.0  ;;  %v15146_v31 = vpop.f32.mrf.mxu0 }
 0x435   : > { %v11216_v12 = vpop.f32.mrf.mxu1 }
 0x436   : > { %v8948_v36 = vmax.f32 %v8912_v9, 0.0  ;;  %v8304_v61 = vadd.f32 %v11216_v12, %v15006_v50  ;;  %v9918_v63 = vpack.c.bf16 %v8950_v47, %v8949_v32  ;;  %v8344_v39 = vadd.f32 %v15091_v5, %v8301_v3  ;;  %v15151_v10 = vpop.f32.mrf.mxu0 }
 0x437   : > { %v8185_v34 = vpop.f32.mrf.mxu1  ;;  %v8917_v33 = vadd.f32 %v15084_v18, %v8346_v23 }
 0x438   : > { %v9913_v11 = vpack.c.bf16 %v8948_v36, %v8947_v40  ;;  %v8347_v54 = vadd.f32 %v15091_v5, %v8304_v61  ;;  %9992 = vst [vmem:[%s15121_s25 + $0x18] sm:$0xff] %v9918_v63   ;;  %v8302_v26 = vadd.f32 %v8185_v34, %v15009_v48  ;;  %v15158_v42 = vpop.f32.mrf.mxu0  ;;  %v8915_v22 = vadd.f32 %v15094_v1, %v8344_v39 }
 0x439   : > { %v11219_v57 = vpop.f32.mrf.mxu1  ;;  %v8953_v52 = vmax.f32 %v8917_v33, 0.0 }
 0x43a   : > { %9991 = vst [vmem:[%s15121_s25 + $0x10] sm:$0xff] %v9913_v11   ;;  %v8918_v50 = vadd.f32 %v15100_v44, %v8347_v54  ;;  %v8307_v27 = vadd.f32 %v11219_v57, %v15012_v6  ;;  %v8345_v51 = vadd.f32 %v15091_v5, %v8302_v26  ;;  %v15164_v9 = vpop.f32.mrf.mxu0  ;;  %v8951_v47 = vmax.f32 %v8915_v22, 0.0 }
 0x43b   : > { %v8198_v18 = vpop.f32.mrf.mxu1 }
 0x43c   : > { %v8954_v21 = vmax.f32 %v8918_v50, 0.0  ;;  %v8350_v55 = vadd.f32 %v15091_v5, %v8307_v27  ;;  %v8305_v48 = vadd.f32 %v8198_v18, %v15015_v49  ;;  %v8916_v44 = vadd.f32 %v15104_v0, %v8345_v51  ;;  %v15169_v32 = vpop.f32.mrf.mxu0 }
 0x43d   : > { %v11220_v23 = vpop.f32.mrf.mxu1 }
 0x43e   : > { %v9928_v6 = vpack.c.bf16 %v8954_v21, %v8953_v52  ;;  %v8348_v3 = vadd.f32 %v15091_v5, %v8305_v48  ;;  %v8308_v1 = vadd.f32 %v11220_v23, %v15018_v45  ;;  %v8952_v12 = vmax.f32 %v8916_v44, 0.0  ;;  %v15175_v0 = vpop.f32.mrf.mxu0 }
 0x43f   : > { %v8201_v40 = vpop.f32.mrf.mxu1  ;;  %v8921_v36 = vadd.f32 %v15108_v56, %v8350_v55 }
 0x440   : > { %9994 = vst [vmem:[%s15121_s25 + $0x28] sm:$0xff] %v9928_v6   ;;  %v8351_v49 = vadd.f32 %v15091_v5, %v8308_v1  ;;  %v8306_v61 = vadd.f32 %v8201_v40, %v15021_v60  ;;  %v9923_v63 = vpack.c.bf16 %v8952_v12, %v8951_v47  ;;  %v8919_v34 = vadd.f32 %v15113_v4, %v8348_v3  ;;  %v15184_v50 = vpop.f32.mrf.mxu0 }
 0x441   : > { %v11223_v39 = vpop.f32.mrf.mxu1  ;;  %v8957_v56 = vmax.f32 %v8921_v36, 0.0 }
 0x442   : > { %v8922_v45 = vadd.f32 %v15116_v28, %v8351_v49  ;;  %v8349_v11 = vadd.f32 %v15091_v5, %v8306_v61  ;;  %v8311_v33 = vadd.f32 %v11223_v39, %v15024_v58  ;;  %9993 = vst [vmem:[%s15121_s25 + $0x20] sm:$0xff] %v9923_v63   ;;  %v8955_v28 = vmax.f32 %v8919_v34, 0.0  ;;  %v11270_v55 = vpop.f32.mrf.mxu0 }
 0x443   : > { %v8214_v54 = vpop.f32.mrf.mxu1 }
 0x444   : > { %v8958_v26 = vmax.f32 %v8922_v45, 0.0  ;;  %v8920_v57 = vadd.f32 %v15125_v30, %v8349_v11  ;;  %v8309_v60 = vadd.f32 %v8214_v54, %v15027_v62  ;;  %v8354_v4 = vadd.f32 %v15091_v5, %v8311_v33  ;;  %v8863_v12 = vpop.f32.mrf.mxu0 }
 0x445   : > { %v11224_v27 = vpop.f32.mrf.mxu1 }
 0x446   : > { %v9938_v22 = vpack.c.bf16 %v8958_v26, %v8957_v56  ;;  %v8956_v51 = vmax.f32 %v8920_v57, 0.0  ;;  %v8352_v58 = vadd.f32 %v15091_v5, %v8309_v60  ;;  %v8312_v18 = vadd.f32 %v11224_v27, %v15030_v13  ;;  %v11273_v11 = vpop.f32.mrf.mxu0 }
 0x447   : > { %v8217_v52 = vpop.f32.mrf.mxu1  ;;  %v8925_v62 = vadd.f32 %v15130_v43, %v8354_v4 }
 0x448   : > { %9996 = vst [vmem:[%s15121_s25 + $0x38] sm:$0xff] %v9938_v22   ;;  %v9933_v21 = vpack.c.bf16 %v8956_v51, %v8955_v28  ;;  %v8310_v30 = vadd.f32 %v8217_v52, %v15033_v7  ;;  %v8355_v48 = vadd.f32 %v15091_v5, %v8312_v18  ;;  %v8923_v23 = vadd.f32 %v15138_v14, %v8352_v58  ;;  %v8876_v28 = vpop.f32.mrf.mxu0 }
 0x449   : > { %v11227_v44 = vpop.f32.mrf.mxu1  ;;  %v8961_v40 = vmax.f32 %v8925_v62, 0.0 }
 0x44a   : > { %9995 = vst [vmem:[%s15121_s25 + $0x30] sm:$0xff] %v9933_v21   ;;  %v8353_v6 = vadd.f32 %v15091_v5, %v8310_v30  ;;  %v8315_v3 = vadd.f32 %v11227_v44, %v15036_v37  ;;  %v8926_v13 = vadd.f32 %v15143_v38, %v8355_v48  ;;  %v8959_v14 = vmax.f32 %v8923_v23, 0.0  ;;  %v11274_v30 = vpop.f32.mrf.mxu0 }
 0x44b   : > { %v8230_v1 = vpop.f32.mrf.mxu1 }
 0x44c   : > { %v8924_v47 = vadd.f32 %v15146_v31, %v8353_v6  ;;  %v8358_v7 = vadd.f32 %v15091_v5, %v8315_v3  ;;  %v8313_v43 = vadd.f32 %v8230_v1, %v15039_v46  ;;  %v8962_v36 = vmax.f32 %v8926_v13, 0.0 }
 0x44d   : > { %v11228_v49 = vpop.f32.mrf.mxu1 }
 0x44e   : > { %v8960_v61 = vmax.f32 %v8924_v47, 0.0  ;;  %v8316_v63 = vadd.f32 %v11228_v49, %v15042_v41  ;;  %v9948_v37 = vpack.c.bf16 %v8962_v36, %v8961_v40  ;;  %v8356_v38 = vadd.f32 %v15091_v5, %v8313_v43  ;;  %v8879_v47 = vpop.f32.mrf.mxu0 }
 0x44f   : > { %v8233_v39 = vpop.f32.mrf.mxu1  ;;  %v8929_v31 = vadd.f32 %v15151_v10, %v8358_v7 }
 0x450   : > { %v9943_v34 = vpack.c.bf16 %v8960_v61, %v8959_v14  ;;  %v8359_v45 = vadd.f32 %v15091_v5, %v8316_v63  ;;  %9998 = vst [vmem:[%s15121_s25 + $0x48] sm:$0xff] %v9948_v37   ;;  %v8314_v46 = vadd.f32 %v8233_v39, %v15045_v19  ;;  %v8927_v41 = vadd.f32 %v15158_v42, %v8356_v38 }
 0x451   : > { %v11231_v33 = vpop.f32.mrf.mxu1  ;;  %v8965_v60 = vmax.f32 %v8929_v31, 0.0 }
 0x452   : > { %9997 = vst [vmem:[%s15121_s25 + $0x40] sm:$0xff] %v9943_v34   ;;  %v8930_v54 = vadd.f32 %v15164_v9, %v8359_v45  ;;  %v8319_v56 = vadd.f32 %v11231_v33, %v15048_v25  ;;  %v8357_v26 = vadd.f32 %v15091_v5, %v8314_v46  ;;  %v8963_v42 = vmax.f32 %v8927_v41, 0.0 }
 0x453   : > { %v8246_v57 = vpop.f32.mrf.mxu1 }
 0x454   : > { %v8966_v10 = vmax.f32 %v8930_v54, 0.0  ;;  %v8362_v4 = vadd.f32 %v15091_v5, %v8319_v56  ;;  %v8317_v27 = vadd.f32 %v8246_v57, %v15051_v59  ;;  %v8928_v19 = vadd.f32 %v15169_v32, %v8357_v26 }
 0x455   : > { %v11232_v22 = vpop.f32.mrf.mxu1 }
 0x456   : > { %v9958_v51 = vpack.c.bf16 %v8966_v10, %v8965_v60  ;;  %v8360_v9 = vadd.f32 %v15091_v5, %v8317_v27  ;;  %v8320_v25 = vadd.f32 %v11232_v22, %v15054_v8  ;;  %v8964_v58 = vmax.f32 %v8928_v19, 0.0 }
 0x457   : > { %v8249_v18 = vpop.f32.mrf.mxu1  ;;  %v8933_v52 = vadd.f32 %v15175_v0, %v8362_v4 }
 0x458   : > { %10000 = vst [vmem:[%s15121_s25 + $0x58] sm:$0xff] %v9958_v51   ;;  %v8363_v21 = vadd.f32 %v15091_v5, %v8320_v25  ;;  %v8318_v59 = vadd.f32 %v8249_v18, %v15057_v24  ;;  %v9953_v62 = vpack.c.bf16 %v8964_v58, %v8963_v42  ;;  %v8931_v48 = vadd.f32 %v15184_v50, %v8360_v9 }
 0x459   : > { %v11235_v32 = vpop.f32.mrf.mxu1  ;;  %v8969_v3 = vmax.f32 %v8933_v52, 0.0 }
 0x45a   : > { %v8934_v44 = vadd.f32 %v11270_v55, %v8363_v21  ;;  %v8361_v23 = vadd.f32 %v15091_v5, %v8318_v59  ;;  %v8323_v8 = vadd.f32 %v11235_v32, %v15060_v35  ;;  %9999 = vst [vmem:[%s15121_s25 + $0x50] sm:$0xff] %v9953_v62   ;;  %v8967_v43 = vmax.f32 %v8931_v48, 0.0 }
 0x45b   : > { %v8262_v6 = vpop.f32.mrf.mxu1 }
 0x45c   : > { %v8970_v13 = vmax.f32 %v8934_v44, 0.0  ;;  %v8932_v0 = vadd.f32 %v8863_v12, %v8361_v23  ;;  %v8321_v1 = vadd.f32 %v8262_v6, %v15063_v53  ;;  %v8366_v24 = vadd.f32 %v15091_v5, %v8323_v8  ;;  %v11277_v12 = vpop.f32.mrf.mxu0 }
 0x45d   : > { %v11236_v7 = vpop.f32.mrf.mxu1 }
 0x45e   : > { %v9968_v50 = vpack.c.bf16 %v8970_v13, %v8969_v3  ;;  %v8968_v55 = vmax.f32 %v8932_v0, 0.0  ;;  %v8364_v40 = vadd.f32 %v15091_v5, %v8321_v1  ;;  %v8324_v35 = vadd.f32 %v11236_v7, %v15068_v29  ;;  %v8892_v46 = vpop.f32.mrf.mxu0 }
 0x45f   : > { %v8265_v36 = vpop.f32.mrf.mxu1  ;;  %v8937_v61 = vadd.f32 %v11273_v11, %v8366_v24 }
 0x460   : > { %10002 = vst [vmem:[%s15121_s25 + $0x68] sm:$0xff] %v9968_v50   ;;  %v9963_v49 = vpack.c.bf16 %v8968_v55, %v8967_v43  ;;  %v8322_v14 = vadd.f32 %v8265_v36, %v15073_v2  ;;  %v8367_v53 = vadd.f32 %v15091_v5, %v8324_v35  ;;  %v8935_v37 = vadd.f32 %v8876_v28, %v8364_v40  ;;  %v11278_v27 = vpop.f32.mrf.mxu0 }
 0x461   : > { %v11239_v63 = vpop.f32.mrf.mxu1  ;;  %v8973_v11 = vmax.f32 %v8937_v61, 0.0 }
 0x462   : > { %10001 = vst [vmem:[%s15121_s25 + $0x60] sm:$0xff] %v9963_v49   ;;  %v8365_v38 = vadd.f32 %v15091_v5, %v8322_v14  ;;  %v8327_v39 = vadd.f32 %v11239_v63, %v15078_v15  ;;  %v8938_v34 = vadd.f32 %v11274_v30, %v8367_v53  ;;  %v8971_v56 = vmax.f32 %v8935_v37, 0.0  ;;  %v8895_v25 = vpop.f32.mrf.mxu0 }
 0x463   : > { %v8278_v31 = vpop.f32.mrf.mxu1 }
 0x464   : > { %v8936_v45 = vadd.f32 %v8879_v47, %v8365_v38  ;;  %v8370_v29 = vadd.f32 %v15091_v5, %v8327_v39  ;;  %v8325_v2 = vadd.f32 %v8278_v31, %v15081_v17  ;;  %v8974_v33 = vmax.f32 %v8938_v34, 0.0 }
 0x465   : > { %v11240_v54 = vpop.f32.mrf.mxu1 }
 0x466   : > { %v8972_v41 = vmax.f32 %v8936_v45, 0.0  ;;  %v8328_v26 = vadd.f32 %v11240_v54, %v15086_v16  ;;  %v9978_v57 = vpack.c.bf16 %v8974_v33, %v8973_v11  ;;  %v8368_v15 = vadd.f32 %v15091_v5, %v8325_v2 }
 0x467   : > { %v8281_v60 = vpop.f32.mrf.mxu1  ;;  %v8941_v4 = vadd.f32 %v11277_v12, %v8370_v29 }
 0x468   : > { %v9973_v10 = vpack.c.bf16 %v8972_v41, %v8971_v56  ;;  %v8371_v28 = vadd.f32 %v15091_v5, %v8328_v26  ;;  %10004 = vst [vmem:[%s15121_s25 + $0x78] sm:$0xff] %v9978_v57   ;;  %v8326_v17 = vadd.f32 %v8281_v60, %v15096_v20  ;;  %v8939_v22 = vadd.f32 %v8892_v46, %v8368_v15 }
 0x469   : > { %v8977_v16 = vmax.f32 %v8941_v4, 0.0 }
 0x46a   : > { %10003 = vst [vmem:[%s15121_s25 + $0x70] sm:$0xff] %v9973_v10   ;;  %v8942_v19 = vadd.f32 %v11278_v27, %v8371_v28  ;;  %v8369_v51 = vadd.f32 %v15091_v5, %v8326_v17  ;;  %v8975_v18 = vmax.f32 %v8939_v22, 0.0 }
 0x46c   : > { %v8978_v9 = vmax.f32 %v8942_v19, 0.0  ;;  %v8940_v42 = vadd.f32 %v8895_v25, %v8369_v51 }
 0x46e   : > { %v9988_v58 = vpack.c.bf16 %v8978_v9, %v8977_v16  ;;  %v8976_v52 = vmax.f32 %v8940_v42, 0.0 }
 0x470   : > { %10006 = vst [vmem:[%s15121_s25 + $0x88] sm:$0xff] %v9988_v58   ;;  %v9983_v21 = vpack.c.bf16 %v8976_v52, %v8975_v18 }
 0x472   : > { %10005 = vst [vmem:[%s15121_s25 + $0x80] sm:$0xff] %v9983_v21  }
 0x473 PF: > { %s17_s24 = sadd.s32 1, %s11536_s24  }
 0x474   : > { %p14_p4 = scmp.ge.s32.totalorder %s17_s24, 4  }
 0x476   :  { %16 = sbr.rel (!%p14_p4) target bundleno = 1 (0x1), region = 94 }

</bundles_post_ra>
